<compile_context>
chip_gen: v7x
topology: tpu7x:2x2x1
jax: 0.10.0
libtpu: 0.0.40
codegen_flags: <defaults>
</compile_context>

<pallas_src>
import math

import numpy as np
import jax
import jax.numpy as jnp
from jax import lax
from jax.experimental import pallas as pl
from jax.experimental.pallas import tpu as pltpu

EPS = 1e-5
N_CONST_PER_STAGE = 6  # Wb, Bc, bias_row, gba, cummask_norm, expand


# ---------------------------------------------------------------------------
# Fused kernel: all decoder stages for one batch element.
# ---------------------------------------------------------------------------
def make_fused_kernel(cfgs, T, eps=EPS):
    n = len(cfgs)
    NC = N_CONST_PER_STAGE

    def kernel(*refs):
        x_ref = refs[0]
        en_refs = refs[1:1 + n]
        base = 1 + n
        stage_refs = [refs[base + NC * i: base + NC * (i + 1)] for i in range(n)]
        w1_ref = refs[base + NC * n]
        b1_ref = refs[base + NC * n + 1]
        o_ref = refs[base + NC * n + 2]

        a = x_ref[0]                                          # (F0, T*Cin0) f32
        for i, cfg in enumerate(cfgs):
            Wb_ref, Bc_ref, bias_ref, gba_ref, cm_ref, ex_ref = stage_refs[i]
            Cout, kf = cfg["Cout"], cfg["kf"]
            TC = T * Cout

            a = a + en_refs[i][0]                             # inter_connect='add'

            # --- Gated ConvTranspose2d (stride (1,2)) + causal Chomp_T ------
            # 1) channel/time mixing against block-banded bf16 weights (MXU).
            A = jnp.dot(a.astype(jnp.bfloat16), Wb_ref[...],
                        preferred_element_type=jnp.float32)   # (F_in, kf*2*TC)
            # 2) stride-2 frequency scatter: kf per-tap 0/1 matmuls on
            #    256-lane-aligned slices of A (no sublane concatenate).
            conv = jnp.dot(Bc_ref[0], A[:, :2 * TC],
                           preferred_element_type=jnp.float32)  # (F_out, 2*TC)
            for d in range(1, kf):
                conv = conv + jnp.dot(
                    Bc_ref[d], A[:, d * 2 * TC:(d + 1) * 2 * TC],
                    preferred_element_type=jnp.float32)

            z = conv + bias_ref[...]                          # (F_out, 2*TC)
            # gate: exp on EUP, approx reciprocal also on EUP (free slot).
            u = z[:, :TC] * pl.reciprocal(1.0 + jnp.exp(-z[:, TC:]), approx=True)

            # --- CumulativeLayerNorm2d via tiny matmuls ---------------------
            # columns are (t, c) blocks of width Cout; stats over (C, F),
            # cumulative over T, 1/cnt folded into the cum-mask constant.
            col_sum = jnp.sum(u, axis=0, keepdims=True)       # (1, TC)
            col_sq = jnp.sum(u * u, axis=0, keepdims=True)    # (1, TC)
            m = jnp.dot(col_sum, cm_ref[...],
                        preferred_element_type=jnp.float32)   # (1, T)  mean
            q = jnp.dot(col_sq, cm_ref[...],
                        preferred_element_type=jnp.float32)   # (1, T)  E[x^2]
            inv = lax.rsqrt(q - m * m + eps)                  # (1, T)  1/std
            mean_row = jnp.dot(m, ex_ref[...],
                               preferred_element_type=jnp.float32)   # (1, TC)
            inv_row = jnp.dot(inv, ex_ref[...],
                              preferred_element_type=jnp.float32)    # (1, TC)

            gba = gba_ref[...]                                # (3, TC)
            y = (u - mean_row) * inv_row * gba[0:1, :] + gba[1:2, :]
            a = jnp.where(y > 0, y, gba[2:3, :] * y)          # PReLU

        # --- final 1x1 conv (16 -> 1) + sigmoid, lane-dense (T, F_last) store.
        # Contract over the TC axis of both operands (rhs-transposed dot),
        # so the MXU op has N=F_last lanes and no explicit transpose is needed.
        logit_T = lax.dot_general(
            w1_ref[...], a, (((1,), (1,)), ((), ())),
            preferred_element_type=jnp.float32) + b1_ref[...]   # (T, F_last)
        o_ref[0] = 1.0 / (1.0 + jnp.exp(-logit_T))

    return kernel


# ---------------------------------------------------------------------------
# Host-side constant assembly (pure layout plumbing of the module weights).
# ---------------------------------------------------------------------------
def build_kernel_constants(params, T, F0):
    cfgs, consts = [], []
    F_in = F0
    for p in params:
        Cin, Cout, kt, kf = p["Cin"], p["Cout"], p["kt"], p["kf"]
        F_out = 2 * F_in + kf - 2
        TC = T * Cout

        W = np.asarray(p["W"], np.float32)                 # (Cin, 2*Cout, kt, kf)
        # Block-banded channel/time-mixing matrix: row (t, ci) ->
        # col (dkf, half, t', co); Chomp_T causality folded in.
        Wb = np.zeros((T * Cin, kf * 2 * TC), np.float32)
        for dkf in range(kf):
            for half in range(2):
                for dkt in range(kt):
                    for t in range(T - dkt):
                        tp = t + dkt
                        c0 = dkf * 2 * TC + half * TC + tp * Cout
                        for ci in range(Cin):
                            Wb[t * Cin + ci, c0:c0 + Cout] = \
                                W[ci, half * Cout:(half + 1) * Cout, dkt, dkf]

        # Per-tap 0/1 frequency scatter blocks: output f' = 2*f + dkf.
        Bc = np.zeros((kf, F_out, F_in), np.float32)
        for dkf in range(kf):
            for f in range(F_in):
                Bc[dkf, 2 * f + dkf, f] = 1.0

        b = np.asarray(p["b"], np.float32)
        bias_row = np.concatenate([np.tile(b[:Cout], T),
                                   np.tile(b[Cout:], T)])[None, :]   # (1, 2*TC)

        gba = np.stack([np.tile(np.asarray(p["gain"], np.float32), T),
                        np.tile(np.asarray(p["beta"], np.float32), T),
                        np.tile(np.asarray(p["alpha"], np.float32), T)], axis=0)

        # Cumulative mask with 1/cnt folded in: (TC, T).
        cm = np.zeros((TC, T), np.float32)
        for tau in range(T):
            cm[:(tau + 1) * Cout, tau] = 1.0 / float((tau + 1) * Cout * F_out)

        # Per-timestep block expand: (T, TC).
        ex = np.zeros((T, TC), np.float32)
        for t in range(T):
            ex[t, t * Cout:(t + 1) * Cout] = 1.0

        consts += [jnp.asarray(Wb, jnp.bfloat16),
                   jnp.asarray(Bc, jnp.float32),
                   jnp.asarray(bias_row, jnp.float32),
                   jnp.asarray(gba, jnp.float32),
                   jnp.asarray(cm, jnp.float32),
                   jnp.asarray(ex, jnp.float32)]
        cfgs.append(dict(Cin=Cin, Cout=Cout, kt=kt, kf=kf, F_in=F_in, F_out=F_out))
        F_in = F_out

    p_last = params[-1]
    Cout = p_last["Cout"]
    w1 = np.asarray(p_last["w1"], np.float32)              # (Cout, 1)
    W1r = np.zeros((T, T * Cout), np.float32)              # (T, TC): row t holds w1
    for t in range(T):
        W1r[t, t * Cout:(t + 1) * Cout] = w1[:, 0]
    b1 = np.asarray(p_last["b1"], np.float32).reshape(1, 1)
    consts += [jnp.asarray(W1r, jnp.float32), jnp.asarray(b1, jnp.float32)]
    return cfgs, consts


def to_freq_major(x_cl):
    # channels-last (B, T, F, C) -> frequency-major (B, F, T*C)
    B, T, F, C = x_cl.shape
    return jnp.transpose(x_cl, (0, 2, 1, 3)).reshape(B, F, T * C)


def unet_decoder_pallas(x_cl, en_cl_list, params):
    B, T, F0 = x_cl.shape[0], x_cl.shape[1], x_cl.shape[2]
    cfgs, consts = build_kernel_constants(params, T, F0)

    x_fm = to_freq_major(x_cl)
    en_fm = [to_freq_major(en_cl_list[-(i + 1)]) for i in range(len(params))]
    F_last = cfgs[-1]["F_out"]

    def batch_spec(a):
        return pl.BlockSpec((1,) + a.shape[1:], lambda b: (b, 0, 0))

    def const_spec(c):
        zeros = (0,) * c.ndim
        return pl.BlockSpec(c.shape, lambda b, z=zeros: z)

    args = [x_fm] + en_fm + consts
    in_specs = ([batch_spec(x_fm)]
                + [batch_spec(e) for e in en_fm]
                + [const_spec(c) for c in consts])

    out = pl.pallas_call(
        make_fused_kernel(cfgs, T),
        grid=(B,),
        in_specs=in_specs,
        out_specs=pl.BlockSpec((1, T, F_last), lambda b: (b, 0, 0)),
        out_shape=jax.ShapeDtypeStruct((B, T, F_last), jnp.float32),
        compiler_params=pltpu.CompilerParams(dimension_semantics=("parallel",)),
    )(*args)
    return out                                            # (B, T, F_last), lane-dense


# ---------------------------------------------------------------------------
# Parameter init (deterministic, PyTorch shapes)
# ---------------------------------------------------------------------------
def init_params(key, c=16):
    cfgs = [
        dict(Cin=64, Cout=c, kt=2, kf=3, final=False),
        dict(Cin=c, Cout=c, kt=2, kf=3, final=False),
        dict(Cin=c, Cout=c, kt=2, kf=3, final=False),
        dict(Cin=c, Cout=c, kt=2, kf=3, final=False),
        dict(Cin=c, Cout=16, kt=1, kf=5, final=True),
    ]
    params = []
    for cfg in cfgs:
        key, k1, k2 = jax.random.split(key, 3)
        Cin, Cout, kt, kf = cfg["Cin"], cfg["Cout"], cfg["kt"], cfg["kf"]
        fan = Cin * kt * kf
        W = jax.random.normal(k1, (Cin, 2 * Cout, kt, kf), jnp.float32) / math.sqrt(fan)
        b = jax.random.normal(k2, (2 * Cout,), jnp.float32) * 0.05
        p = dict(cfg)
        p["W"], p["b"] = W, b
        p["gain"] = jnp.ones((Cout,), jnp.float32)
        p["beta"] = jnp.zeros((Cout,), jnp.float32)
        p["alpha"] = jnp.full((Cout,), 0.25, jnp.float32)
        if cfg["final"]:
            key, k3, k4 = jax.random.split(key, 3)
            p["w1"] = jax.random.normal(k3, (Cout, 1), jnp.float32) / math.sqrt(Cout)
            p["b1"] = jax.random.normal(k4, (1, 1), jnp.float32) * 0.05
        params.append(p)
    return params


# ---------------------------------------------------------------------------
# Pure-JAX reference (channels-last, high precision) for validation
# ---------------------------------------------------------------------------
def ref_gate_convT(x, W, b, kt, kf):
    B, T, F, Cin = x.shape
    Cout2 = W.shape[1]
    F_out = (F - 1) * 2 + kf
    full = jnp.zeros((B, T + kt - 1, F_out, Cout2), jnp.float32) + b
    for dkt in range(kt):
        for dkf in range(kf):
            contrib = jnp.einsum("btfc,cd->btfd", x, W[:, :, dkt, dkf],
                                 precision=lax.Precision.HIGHEST)
            full = full.at[:, dkt:dkt + T, dkf:dkf + 2 * F - 1:2, :].add(contrib)
    full = full[:, :T]                                      # Chomp_T
    Cout = Cout2 // 2
    return full[..., :Cout] * jax.nn.sigmoid(full[..., Cout:])


def ref_cln(u, gain, beta, eps=EPS):
    B, T, F, C = u.shape
    step_sum = jnp.sum(u, axis=(2, 3), keepdims=True)
    step_pow = jnp.sum(u * u, axis=(2, 3), keepdims=True)
    cum_sum = jnp.cumsum(step_sum, axis=1)
    cum_pow = jnp.cumsum(step_pow, axis=1)
    cnt = (jnp.arange(1, T + 1, dtype=jnp.float32) * (C * F)).reshape(1, T, 1, 1)
    mean = cum_sum / cnt
    var = (cum_pow - 2 * mean * cum_sum) / cnt + mean ** 2
    std = jnp.sqrt(var + eps)
    return (u - mean) / std * gain.reshape(1, 1, 1, C) + beta.reshape(1, 1, 1, C)


def unet_decoder_ref(x, en_list, params):
    for i, p in enumerate(params):
        tmp = x + en_list[-(i + 1)]
        u = ref_gate_convT(tmp, p["W"], p["b"], p["kt"], p["kf"])
        y = ref_cln(u, p["gain"], p["beta"])
        a = p["alpha"].reshape(1, 1, 1, -1)
        y = jnp.where(y > 0, y, a * y)
        if p["final"]:
            logit = jnp.einsum("btfc,co->btfo", y, p["w1"],
                               precision=lax.Precision.HIGHEST)
            logit = logit + p["b1"].reshape(1, 1, 1, 1)
            x = jax.nn.sigmoid(logit)[..., 0]
        else:
            x = y
    return x


# ---------------------------------------------------------------------------
if __name__ == "__main__":
    key = jax.random.PRNGKey(0)
    kp, kx, k0, k1, k2, k3, k4 = jax.random.split(key, 7)

    B, T, F0, c = 2, 8, 3, 16
    params = init_params(kp, c=c)

    # PyTorch-side NCHW inputs, converted to channels-last (B, T, F, C)
    x_nchw = jax.random.normal(kx, (B, 64, T, F0), jnp.float32)
    x = jnp.transpose(x_nchw, (0, 2, 3, 1))

    # encoder skip list (inter_connect='add' -> shapes match stage inputs)
    en_nchw_shapes = [(B, c, T, 63), (B, c, T, 31), (B, c, T, 15),
                      (B, c, T, 7), (B, 64, T, F0)]
    en_keys = [k0, k1, k2, k3, k4]
    en_list = [jnp.transpose(jax.random.normal(kk, s, jnp.float32), (0, 2, 3, 1))
               for kk, s in zip(en_keys, en_nchw_shapes)]

    out = unet_decoder_pallas(x, en_list, params)
    out = jax.block_until_ready(out)

    assert out.shape == (B, T, 129), out.shape
    ref = unet_decoder_ref(x, en_list, params)
    err = float(jnp.max(jnp.abs(out - ref)))
    # Kernel conv matmuls run at bf16 MXU precision and the gate sigmoid uses
    # the EUP approximate reciprocal (per perf review); the reference runs at
    # HIGHEST precision everywhere, hence the 4e-2 budget.
    if err < 4e-2:
        print("KERNEL_OK")
    else:
        raise SystemExit(f"mismatch vs reference: max abs err = {err}")
</pallas_src>

<mosaic_0001>
module attributes {stable_mosaic.version = 11 : i64} {
  func.func @kernel(%arg0: i32, %arg1: memref<1x3x512xf32, #tpu.memory_space<vmem>>, %arg2: memref<1x3x512xf32, #tpu.memory_space<vmem>>, %arg3: memref<1x7x128xf32, #tpu.memory_space<vmem>>, %arg4: memref<1x15x128xf32, #tpu.memory_space<vmem>>, %arg5: memref<1x31x128xf32, #tpu.memory_space<vmem>>, %arg6: memref<1x63x128xf32, #tpu.memory_space<vmem>>, %arg7: memref<512x768xbf16, #tpu.memory_space<vmem>>, %arg8: memref<3x7x3xf32, #tpu.memory_space<vmem>>, %arg9: memref<1x256xf32, #tpu.memory_space<vmem>>, %arg10: memref<3x128xf32, #tpu.memory_space<vmem>>, %arg11: memref<128x8xf32, #tpu.memory_space<vmem>>, %arg12: memref<8x128xf32, #tpu.memory_space<vmem>>, %arg13: memref<128x768xbf16, #tpu.memory_space<vmem>>, %arg14: memref<3x15x7xf32, #tpu.memory_space<vmem>>, %arg15: memref<1x256xf32, #tpu.memory_space<vmem>>, %arg16: memref<3x128xf32, #tpu.memory_space<vmem>>, %arg17: memref<128x8xf32, #tpu.memory_space<vmem>>, %arg18: memref<8x128xf32, #tpu.memory_space<vmem>>, %arg19: memref<128x768xbf16, #tpu.memory_space<vmem>>, %arg20: memref<3x31x15xf32, #tpu.memory_space<vmem>>, %arg21: memref<1x256xf32, #tpu.memory_space<vmem>>, %arg22: memref<3x128xf32, #tpu.memory_space<vmem>>, %arg23: memref<128x8xf32, #tpu.memory_space<vmem>>, %arg24: memref<8x128xf32, #tpu.memory_space<vmem>>, %arg25: memref<128x768xbf16, #tpu.memory_space<vmem>>, %arg26: memref<3x63x31xf32, #tpu.memory_space<vmem>>, %arg27: memref<1x256xf32, #tpu.memory_space<vmem>>, %arg28: memref<3x128xf32, #tpu.memory_space<vmem>>, %arg29: memref<128x8xf32, #tpu.memory_space<vmem>>, %arg30: memref<8x128xf32, #tpu.memory_space<vmem>>, %arg31: memref<128x1280xbf16, #tpu.memory_space<vmem>>, %arg32: memref<5x129x63xf32, #tpu.memory_space<vmem>>, %arg33: memref<1x256xf32, #tpu.memory_space<vmem>>, %arg34: memref<3x128xf32, #tpu.memory_space<vmem>>, %arg35: memref<128x8xf32, #tpu.memory_space<vmem>>, %arg36: memref<8x128xf32, #tpu.memory_space<vmem>>, %arg37: memref<8x128xf32, #tpu.memory_space<vmem>>, %arg38: memref<1x1xf32, #tpu.memory_space<vmem>>, %arg39: memref<1x8x129xf32, #tpu.memory_space<vmem>>) attributes {dimension_semantics = [#tpu.dimension_semantics<parallel>], iteration_bounds = array<i64: 2>, scalar_prefetch = 0 : i64, scratch_operands = 0 : i64, tpu.core_type = #tpu.core_type<tc>, window_params = [{transform_indices = @transform_0, window_bounds = array<i64: 1, 3, 512>}, {transform_indices = @transform_1, window_bounds = array<i64: 1, 3, 512>}, {transform_indices = @transform_2, window_bounds = array<i64: 1, 7, 128>}, {transform_indices = @transform_3, window_bounds = array<i64: 1, 15, 128>}, {transform_indices = @transform_4, window_bounds = array<i64: 1, 31, 128>}, {transform_indices = @transform_5, window_bounds = array<i64: 1, 63, 128>}, {pipeline_mode = #tpu.pipeline_mode<synchronous>, transform_indices = @transform_6, window_bounds = array<i64: 512, 768>}, {pipeline_mode = #tpu.pipeline_mode<synchronous>, transform_indices = @transform_7, window_bounds = array<i64: 3, 7, 3>}, {pipeline_mode = #tpu.pipeline_mode<synchronous>, transform_indices = @transform_8, window_bounds = array<i64: 1, 256>}, {pipeline_mode = #tpu.pipeline_mode<synchronous>, transform_indices = @transform_9, window_bounds = array<i64: 3, 128>}, {pipeline_mode = #tpu.pipeline_mode<synchronous>, transform_indices = @transform_10, window_bounds = array<i64: 128, 8>}, {pipeline_mode = #tpu.pipeline_mode<synchronous>, transform_indices = @transform_11, window_bounds = array<i64: 8, 128>}, {pipeline_mode = #tpu.pipeline_mode<synchronous>, transform_indices = @transform_12, window_bounds = array<i64: 128, 768>}, {pipeline_mode = #tpu.pipeline_mode<synchronous>, transform_indices = @transform_13, window_bounds = array<i64: 3, 15, 7>}, {pipeline_mode = #tpu.pipeline_mode<synchronous>, transform_indices = @transform_14, window_bounds = array<i64: 1, 256>}, {pipeline_mode = #tpu.pipeline_mode<synchronous>, transform_indices = @transform_15, window_bounds = array<i64: 3, 128>}, {pipeline_mode = #tpu.pipeline_mode<synchronous>, transform_indices = @transform_16, window_bounds = array<i64: 128, 8>}, {pipeline_mode = #tpu.pipeline_mode<synchronous>, transform_indices = @transform_17, window_bounds = array<i64: 8, 128>}, {pipeline_mode = #tpu.pipeline_mode<synchronous>, transform_indices = @transform_18, window_bounds = array<i64: 128, 768>}, {pipeline_mode = #tpu.pipeline_mode<synchronous>, transform_indices = @transform_19, window_bounds = array<i64: 3, 31, 15>}, {pipeline_mode = #tpu.pipeline_mode<synchronous>, transform_indices = @transform_20, window_bounds = array<i64: 1, 256>}, {pipeline_mode = #tpu.pipeline_mode<synchronous>, transform_indices = @transform_21, window_bounds = array<i64: 3, 128>}, {pipeline_mode = #tpu.pipeline_mode<synchronous>, transform_indices = @transform_22, window_bounds = array<i64: 128, 8>}, {pipeline_mode = #tpu.pipeline_mode<synchronous>, transform_indices = @transform_23, window_bounds = array<i64: 8, 128>}, {pipeline_mode = #tpu.pipeline_mode<synchronous>, transform_indices = @transform_24, window_bounds = array<i64: 128, 768>}, {pipeline_mode = #tpu.pipeline_mode<synchronous>, transform_indices = @transform_25, window_bounds = array<i64: 3, 63, 31>}, {pipeline_mode = #tpu.pipeline_mode<synchronous>, transform_indices = @transform_26, window_bounds = array<i64: 1, 256>}, {pipeline_mode = #tpu.pipeline_mode<synchronous>, transform_indices = @transform_27, window_bounds = array<i64: 3, 128>}, {pipeline_mode = #tpu.pipeline_mode<synchronous>, transform_indices = @transform_28, window_bounds = array<i64: 128, 8>}, {pipeline_mode = #tpu.pipeline_mode<synchronous>, transform_indices = @transform_29, window_bounds = array<i64: 8, 128>}, {pipeline_mode = #tpu.pipeline_mode<synchronous>, transform_indices = @transform_30, window_bounds = array<i64: 128, 1280>}, {pipeline_mode = #tpu.pipeline_mode<synchronous>, transform_indices = @transform_31, window_bounds = array<i64: 5, 129, 63>}, {pipeline_mode = #tpu.pipeline_mode<synchronous>, transform_indices = @transform_32, window_bounds = array<i64: 1, 256>}, {pipeline_mode = #tpu.pipeline_mode<synchronous>, transform_indices = @transform_33, window_bounds = array<i64: 3, 128>}, {pipeline_mode = #tpu.pipeline_mode<synchronous>, transform_indices = @transform_34, window_bounds = array<i64: 128, 8>}, {pipeline_mode = #tpu.pipeline_mode<synchronous>, transform_indices = @transform_35, window_bounds = array<i64: 8, 128>}, {pipeline_mode = #tpu.pipeline_mode<synchronous>, transform_indices = @transform_36, window_bounds = array<i64: 8, 128>}, {pipeline_mode = #tpu.pipeline_mode<synchronous>, transform_indices = @transform_37, window_bounds = array<i64: 1, 1>}, {transform_indices = @transform_38, window_bounds = array<i64: 1, 8, 129>}]} {
    %c0 = arith.constant 0 : index
    %c0_0 = arith.constant 0 : index
    %c0_1 = arith.constant 0 : index
    %0 = vector.load %arg1[%c0, %c0_0, %c0_1] : memref<1x3x512xf32, #tpu.memory_space<vmem>>, vector<1x3x512xf32>
    %1 = vector.shape_cast %0 : vector<1x3x512xf32> to vector<3x512xf32>
    %c0_2 = arith.constant 0 : index
    %c0_3 = arith.constant 0 : index
    %c0_4 = arith.constant 0 : index
    %2 = vector.load %arg2[%c0_2, %c0_3, %c0_4] : memref<1x3x512xf32, #tpu.memory_space<vmem>>, vector<1x3x512xf32>
    %3 = vector.shape_cast %2 : vector<1x3x512xf32> to vector<3x512xf32>
    %4 = arith.addf %1, %3 : vector<3x512xf32>
    %5 = arith.truncf %4 : vector<3x512xf32> to vector<3x512xbf16>
    %c0_5 = arith.constant 0 : index
    %c0_6 = arith.constant 0 : index
    %6 = vector.load %arg7[%c0_5, %c0_6] : memref<512x768xbf16, #tpu.memory_space<vmem>>, vector<512x768xbf16>
    %cst = arith.constant dense<0.000000e+00> : vector<3x768xf32>
    %7 = tpu.matmul %5, %6, %cst {dimension_numbers = #tpu.dot_dimension_numbers<[1], [0], [0], [1], [0, 0, 1, 1], [], []>} : vector<3x512xbf16>, vector<512x768xbf16>, vector<3x768xf32> -> vector<3x768xf32>
    %c0_7 = arith.constant 0 : index
    %c0_8 = arith.constant 0 : index
    %c0_9 = arith.constant 0 : index
    %8 = vector.load %arg8[%c0_7, %c0_8, %c0_9] : memref<3x7x3xf32, #tpu.memory_space<vmem>>, vector<1x7x3xf32>
    %9 = vector.shape_cast %8 : vector<1x7x3xf32> to vector<7x3xf32>
    %10 = vector.extract_strided_slice %7 {offsets = [0, 0], sizes = [3, 256], strides = [1, 1]} : vector<3x768xf32> to vector<3x256xf32>
    %cst_10 = arith.constant dense<0.000000e+00> : vector<7x256xf32>
    %11 = tpu.matmul %9, %10, %cst_10 {dimension_numbers = #tpu.dot_dimension_numbers<[1], [0], [0], [1], [0, 0, 1, 1], [], []>} : vector<7x3xf32>, vector<3x256xf32>, vector<7x256xf32> -> vector<7x256xf32>
    %c1 = arith.constant 1 : index
    %c0_11 = arith.constant 0 : index
    %c0_12 = arith.constant 0 : index
    %12 = vector.load %arg8[%c1, %c0_11, %c0_12] : memref<3x7x3xf32, #tpu.memory_space<vmem>>, vector<1x7x3xf32>
    %13 = vector.shape_cast %12 : vector<1x7x3xf32> to vector<7x3xf32>
    %14 = vector.extract_strided_slice %7 {offsets = [0, 256], sizes = [3, 256], strides = [1, 1]} : vector<3x768xf32> to vector<3x256xf32>
    %cst_13 = arith.constant dense<0.000000e+00> : vector<7x256xf32>
    %15 = tpu.matmul %13, %14, %cst_13 {dimension_numbers = #tpu.dot_dimension_numbers<[1], [0], [0], [1], [0, 0, 1, 1], [], []>} : vector<7x3xf32>, vector<3x256xf32>, vector<7x256xf32> -> vector<7x256xf32>
    %16 = arith.addf %11, %15 : vector<7x256xf32>
    %c2 = arith.constant 2 : index
    %c0_14 = arith.constant 0 : index
    %c0_15 = arith.constant 0 : index
    %17 = vector.load %arg8[%c2, %c0_14, %c0_15] : memref<3x7x3xf32, #tpu.memory_space<vmem>>, vector<1x7x3xf32>
    %18 = vector.shape_cast %17 : vector<1x7x3xf32> to vector<7x3xf32>
    %19 = vector.extract_strided_slice %7 {offsets = [0, 512], sizes = [3, 256], strides = [1, 1]} : vector<3x768xf32> to vector<3x256xf32>
    %cst_16 = arith.constant dense<0.000000e+00> : vector<7x256xf32>
    %20 = tpu.matmul %18, %19, %cst_16 {dimension_numbers = #tpu.dot_dimension_numbers<[1], [0], [0], [1], [0, 0, 1, 1], [], []>} : vector<7x3xf32>, vector<3x256xf32>, vector<7x256xf32> -> vector<7x256xf32>
    %21 = arith.addf %16, %20 : vector<7x256xf32>
    %c0_17 = arith.constant 0 : index
    %c0_18 = arith.constant 0 : index
    %22 = vector.load %arg9[%c0_17, %c0_18] : memref<1x256xf32, #tpu.memory_space<vmem>>, vector<1x256xf32>
    %23 = vector.broadcast %22 : vector<1x256xf32> to vector<7x256xf32>
    %24 = arith.addf %21, %23 : vector<7x256xf32>
    %25 = vector.extract_strided_slice %24 {offsets = [0, 0], sizes = [7, 128], strides = [1, 1]} : vector<7x256xf32> to vector<7x128xf32>
    %26 = vector.extract_strided_slice %24 {offsets = [0, 128], sizes = [7, 128], strides = [1, 1]} : vector<7x256xf32> to vector<7x128xf32>
    %cst_19 = arith.constant 0.000000e+00 : f32
    %27 = vector.broadcast %cst_19 : f32 to vector<7x128xf32>
    %28 = arith.subf %27, %26 : vector<7x128xf32>
    %29 = math.exp %28 : vector<7x128xf32>
    %cst_20 = arith.constant 1.000000e+00 : f32
    %30 = vector.broadcast %cst_20 : f32 to vector<7x128xf32>
    %31 = arith.addf %30, %29 : vector<7x128xf32>
    %32 = tpu.reciprocal %31 {approx = true} : vector<7x128xf32> -> vector<7x128xf32>
    %33 = arith.mulf %25, %32 : vector<7x128xf32>
    %cst_21 = arith.constant dense<0.000000e+00> : vector<128xf32>
    %34 = vector.multi_reduction <add>, %33, %cst_21 [0] : vector<7x128xf32> to vector<128xf32>
    %35 = vector.shape_cast %34 : vector<128xf32> to vector<1x128xf32>
    %36 = arith.mulf %33, %33 : vector<7x128xf32>
    %cst_22 = arith.constant dense<0.000000e+00> : vector<128xf32>
    %37 = vector.multi_reduction <add>, %36, %cst_22 [0] : vector<7x128xf32> to vector<128xf32>
    %38 = vector.shape_cast %37 : vector<128xf32> to vector<1x128xf32>
    %c0_23 = arith.constant 0 : index
    %c0_24 = arith.constant 0 : index
    %39 = vector.load %arg11[%c0_23, %c0_24] : memref<128x8xf32, #tpu.memory_space<vmem>>, vector<128x8xf32>
    %cst_25 = arith.constant dense<0.000000e+00> : vector<1x8xf32>
    %40 = tpu.matmul %35, %39, %cst_25 {dimension_numbers = #tpu.dot_dimension_numbers<[1], [0], [0], [1], [0, 0, 1, 1], [], []>} : vector<1x128xf32>, vector<128x8xf32>, vector<1x8xf32> -> vector<1x8xf32>
    %c0_26 = arith.constant 0 : index
    %c0_27 = arith.constant 0 : index
    %41 = vector.load %arg11[%c0_26, %c0_27] : memref<128x8xf32, #tpu.memory_space<vmem>>, vector<128x8xf32>
    %cst_28 = arith.constant dense<0.000000e+00> : vector<1x8xf32>
    %42 = tpu.matmul %38, %41, %cst_28 {dimension_numbers = #tpu.dot_dimension_numbers<[1], [0], [0], [1], [0, 0, 1, 1], [], []>} : vector<1x128xf32>, vector<128x8xf32>, vector<1x8xf32> -> vector<1x8xf32>
    %43 = arith.mulf %40, %40 : vector<1x8xf32>
    %44 = arith.subf %42, %43 : vector<1x8xf32>
    %cst_29 = arith.constant 9.99999974E-6 : f32
    %45 = vector.broadcast %cst_29 : f32 to vector<1x8xf32>
    %46 = arith.addf %44, %45 : vector<1x8xf32>
    %47 = math.rsqrt %46 : vector<1x8xf32>
    %c0_30 = arith.constant 0 : index
    %c0_31 = arith.constant 0 : index
    %48 = vector.load %arg12[%c0_30, %c0_31] : memref<8x128xf32, #tpu.memory_space<vmem>>, vector<8x128xf32>
    %cst_32 = arith.constant dense<0.000000e+00> : vector<1x128xf32>
    %49 = tpu.matmul %40, %48, %cst_32 {dimension_numbers = #tpu.dot_dimension_numbers<[1], [0], [0], [1], [0, 0, 1, 1], [], []>} : vector<1x8xf32>, vector<8x128xf32>, vector<1x128xf32> -> vector<1x128xf32>
    %c0_33 = arith.constant 0 : index
    %c0_34 = arith.constant 0 : index
    %50 = vector.load %arg12[%c0_33, %c0_34] : memref<8x128xf32, #tpu.memory_space<vmem>>, vector<8x128xf32>
    %cst_35 = arith.constant dense<0.000000e+00> : vector<1x128xf32>
    %51 = tpu.matmul %47, %50, %cst_35 {dimension_numbers = #tpu.dot_dimension_numbers<[1], [0], [0], [1], [0, 0, 1, 1], [], []>} : vector<1x8xf32>, vector<8x128xf32>, vector<1x128xf32> -> vector<1x128xf32>
    %c0_36 = arith.constant 0 : index
    %c0_37 = arith.constant 0 : index
    %52 = vector.load %arg10[%c0_36, %c0_37] : memref<3x128xf32, #tpu.memory_space<vmem>>, vector<3x128xf32>
    %53 = vector.broadcast %49 : vector<1x128xf32> to vector<7x128xf32>
    %54 = arith.subf %33, %53 : vector<7x128xf32>
    %55 = vector.broadcast %51 : vector<1x128xf32> to vector<7x128xf32>
    %56 = arith.mulf %54, %55 : vector<7x128xf32>
    %57 = vector.extract_strided_slice %52 {offsets = [0, 0], sizes = [1, 128], strides = [1, 1]} : vector<3x128xf32> to vector<1x128xf32>
    %58 = vector.broadcast %57 : vector<1x128xf32> to vector<7x128xf32>
    %59 = arith.mulf %56, %58 : vector<7x128xf32>
    %60 = vector.extract_strided_slice %52 {offsets = [1, 0], sizes = [1, 128], strides = [1, 1]} : vector<3x128xf32> to vector<1x128xf32>
    %61 = vector.broadcast %60 : vector<1x128xf32> to vector<7x128xf32>
    %62 = arith.addf %59, %61 : vector<7x128xf32>
    %cst_38 = arith.constant 0.000000e+00 : f32
    %63 = vector.broadcast %cst_38 : f32 to vector<7x128xf32>
    %64 = arith.cmpf ogt, %62, %63 : vector<7x128xf32>
    %65 = vector.extract_strided_slice %52 {offsets = [2, 0], sizes = [1, 128], strides = [1, 1]} : vector<3x128xf32> to vector<1x128xf32>
    %66 = vector.broadcast %65 : vector<1x128xf32> to vector<7x128xf32>
    %67 = arith.mulf %66, %62 : vector<7x128xf32>
    %68 = arith.select %64, %62, %67 : vector<7x128xi1>, vector<7x128xf32>
    %c0_39 = arith.constant 0 : index
    %c0_40 = arith.constant 0 : index
    %c0_41 = arith.constant 0 : index
    %69 = vector.load %arg3[%c0_39, %c0_40, %c0_41] : memref<1x7x128xf32, #tpu.memory_space<vmem>>, vector<1x7x128xf32>
    %70 = vector.shape_cast %69 : vector<1x7x128xf32> to vector<7x128xf32>
    %71 = arith.addf %68, %70 : vector<7x128xf32>
    %72 = arith.truncf %71 : vector<7x128xf32> to vector<7x128xbf16>
    %c0_42 = arith.constant 0 : index
    %c0_43 = arith.constant 0 : index
    %73 = vector.load %arg13[%c0_42, %c0_43] : memref<128x768xbf16, #tpu.memory_space<vmem>>, vector<128x768xbf16>
    %cst_44 = arith.constant dense<0.000000e+00> : vector<7x768xf32>
    %74 = tpu.matmul %72, %73, %cst_44 {dimension_numbers = #tpu.dot_dimension_numbers<[1], [0], [0], [1], [0, 0, 1, 1], [], []>} : vector<7x128xbf16>, vector<128x768xbf16>, vector<7x768xf32> -> vector<7x768xf32>
    %c0_45 = arith.constant 0 : index
    %c0_46 = arith.constant 0 : index
    %c0_47 = arith.constant 0 : index
    %75 = vector.load %arg14[%c0_45, %c0_46, %c0_47] : memref<3x15x7xf32, #tpu.memory_space<vmem>>, vector<1x15x7xf32>
    %76 = vector.shape_cast %75 : vector<1x15x7xf32> to vector<15x7xf32>
    %77 = vector.extract_strided_slice %74 {offsets = [0, 0], sizes = [7, 256], strides = [1, 1]} : vector<7x768xf32> to vector<7x256xf32>
    %cst_48 = arith.constant dense<0.000000e+00> : vector<15x256xf32>
    %78 = tpu.matmul %76, %77, %cst_48 {dimension_numbers = #tpu.dot_dimension_numbers<[1], [0], [0], [1], [0, 0, 1, 1], [], []>} : vector<15x7xf32>, vector<7x256xf32>, vector<15x256xf32> -> vector<15x256xf32>
    %c1_49 = arith.constant 1 : index
    %c0_50 = arith.constant 0 : index
    %c0_51 = arith.constant 0 : index
    %79 = vector.load %arg14[%c1_49, %c0_50, %c0_51] : memref<3x15x7xf32, #tpu.memory_space<vmem>>, vector<1x15x7xf32>
    %80 = vector.shape_cast %79 : vector<1x15x7xf32> to vector<15x7xf32>
    %81 = vector.extract_strided_slice %74 {offsets = [0, 256], sizes = [7, 256], strides = [1, 1]} : vector<7x768xf32> to vector<7x256xf32>
    %cst_52 = arith.constant dense<0.000000e+00> : vector<15x256xf32>
    %82 = tpu.matmul %80, %81, %cst_52 {dimension_numbers = #tpu.dot_dimension_numbers<[1], [0], [0], [1], [0, 0, 1, 1], [], []>} : vector<15x7xf32>, vector<7x256xf32>, vector<15x256xf32> -> vector<15x256xf32>
    %83 = arith.addf %78, %82 : vector<15x256xf32>
    %c2_53 = arith.constant 2 : index
    %c0_54 = arith.constant 0 : index
    %c0_55 = arith.constant 0 : index
    %84 = vector.load %arg14[%c2_53, %c0_54, %c0_55] : memref<3x15x7xf32, #tpu.memory_space<vmem>>, vector<1x15x7xf32>
    %85 = vector.shape_cast %84 : vector<1x15x7xf32> to vector<15x7xf32>
    %86 = vector.extract_strided_slice %74 {offsets = [0, 512], sizes = [7, 256], strides = [1, 1]} : vector<7x768xf32> to vector<7x256xf32>
    %cst_56 = arith.constant dense<0.000000e+00> : vector<15x256xf32>
    %87 = tpu.matmul %85, %86, %cst_56 {dimension_numbers = #tpu.dot_dimension_numbers<[1], [0], [0], [1], [0, 0, 1, 1], [], []>} : vector<15x7xf32>, vector<7x256xf32>, vector<15x256xf32> -> vector<15x256xf32>
    %88 = arith.addf %83, %87 : vector<15x256xf32>
    %c0_57 = arith.constant 0 : index
    %c0_58 = arith.constant 0 : index
    %89 = vector.load %arg15[%c0_57, %c0_58] : memref<1x256xf32, #tpu.memory_space<vmem>>, vector<1x256xf32>
    %90 = vector.broadcast %89 : vector<1x256xf32> to vector<15x256xf32>
    %91 = arith.addf %88, %90 : vector<15x256xf32>
    %92 = vector.extract_strided_slice %91 {offsets = [0, 0], sizes = [15, 128], strides = [1, 1]} : vector<15x256xf32> to vector<15x128xf32>
    %93 = vector.extract_strided_slice %91 {offsets = [0, 128], sizes = [15, 128], strides = [1, 1]} : vector<15x256xf32> to vector<15x128xf32>
    %cst_59 = arith.constant 0.000000e+00 : f32
    %94 = vector.broadcast %cst_59 : f32 to vector<15x128xf32>
    %95 = arith.subf %94, %93 : vector<15x128xf32>
    %96 = math.exp %95 : vector<15x128xf32>
    %cst_60 = arith.constant 1.000000e+00 : f32
    %97 = vector.broadcast %cst_60 : f32 to vector<15x128xf32>
    %98 = arith.addf %97, %96 : vector<15x128xf32>
    %99 = tpu.reciprocal %98 {approx = true} : vector<15x128xf32> -> vector<15x128xf32>
    %100 = arith.mulf %92, %99 : vector<15x128xf32>
    %cst_61 = arith.constant dense<0.000000e+00> : vector<128xf32>
    %101 = vector.multi_reduction <add>, %100, %cst_61 [0] : vector<15x128xf32> to vector<128xf32>
    %102 = vector.shape_cast %101 : vector<128xf32> to vector<1x128xf32>
    %103 = arith.mulf %100, %100 : vector<15x128xf32>
    %cst_62 = arith.constant dense<0.000000e+00> : vector<128xf32>
    %104 = vector.multi_reduction <add>, %103, %cst_62 [0] : vector<15x128xf32> to vector<128xf32>
    %105 = vector.shape_cast %104 : vector<128xf32> to vector<1x128xf32>
    %c0_63 = arith.constant 0 : index
    %c0_64 = arith.constant 0 : index
    %106 = vector.load %arg17[%c0_63, %c0_64] : memref<128x8xf32, #tpu.memory_space<vmem>>, vector<128x8xf32>
    %cst_65 = arith.constant dense<0.000000e+00> : vector<1x8xf32>
    %107 = tpu.matmul %102, %106, %cst_65 {dimension_numbers = #tpu.dot_dimension_numbers<[1], [0], [0], [1], [0, 0, 1, 1], [], []>} : vector<1x128xf32>, vector<128x8xf32>, vector<1x8xf32> -> vector<1x8xf32>
    %c0_66 = arith.constant 0 : index
    %c0_67 = arith.constant 0 : index
    %108 = vector.load %arg17[%c0_66, %c0_67] : memref<128x8xf32, #tpu.memory_space<vmem>>, vector<128x8xf32>
    %cst_68 = arith.constant dense<0.000000e+00> : vector<1x8xf32>
    %109 = tpu.matmul %105, %108, %cst_68 {dimension_numbers = #tpu.dot_dimension_numbers<[1], [0], [0], [1], [0, 0, 1, 1], [], []>} : vector<1x128xf32>, vector<128x8xf32>, vector<1x8xf32> -> vector<1x8xf32>
    %110 = arith.mulf %107, %107 : vector<1x8xf32>
    %111 = arith.subf %109, %110 : vector<1x8xf32>
    %cst_69 = arith.constant 9.99999974E-6 : f32
    %112 = vector.broadcast %cst_69 : f32 to vector<1x8xf32>
    %113 = arith.addf %111, %112 : vector<1x8xf32>
    %114 = math.rsqrt %113 : vector<1x8xf32>
    %c0_70 = arith.constant 0 : index
    %c0_71 = arith.constant 0 : index
    %115 = vector.load %arg18[%c0_70, %c0_71] : memref<8x128xf32, #tpu.memory_space<vmem>>, vector<8x128xf32>
    %cst_72 = arith.constant dense<0.000000e+00> : vector<1x128xf32>
    %116 = tpu.matmul %107, %115, %cst_72 {dimension_numbers = #tpu.dot_dimension_numbers<[1], [0], [0], [1], [0, 0, 1, 1], [], []>} : vector<1x8xf32>, vector<8x128xf32>, vector<1x128xf32> -> vector<1x128xf32>
    %c0_73 = arith.constant 0 : index
    %c0_74 = arith.constant 0 : index
    %117 = vector.load %arg18[%c0_73, %c0_74] : memref<8x128xf32, #tpu.memory_space<vmem>>, vector<8x128xf32>
    %cst_75 = arith.constant dense<0.000000e+00> : vector<1x128xf32>
    %118 = tpu.matmul %114, %117, %cst_75 {dimension_numbers = #tpu.dot_dimension_numbers<[1], [0], [0], [1], [0, 0, 1, 1], [], []>} : vector<1x8xf32>, vector<8x128xf32>, vector<1x128xf32> -> vector<1x128xf32>
    %c0_76 = arith.constant 0 : index
    %c0_77 = arith.constant 0 : index
    %119 = vector.load %arg16[%c0_76, %c0_77] : memref<3x128xf32, #tpu.memory_space<vmem>>, vector<3x128xf32>
    %120 = vector.broadcast %116 : vector<1x128xf32> to vector<15x128xf32>
    %121 = arith.subf %100, %120 : vector<15x128xf32>
    %122 = vector.broadcast %118 : vector<1x128xf32> to vector<15x128xf32>
    %123 = arith.mulf %121, %122 : vector<15x128xf32>
    %124 = vector.extract_strided_slice %119 {offsets = [0, 0], sizes = [1, 128], strides = [1, 1]} : vector<3x128xf32> to vector<1x128xf32>
    %125 = vector.broadcast %124 : vector<1x128xf32> to vector<15x128xf32>
    %126 = arith.mulf %123, %125 : vector<15x128xf32>
    %127 = vector.extract_strided_slice %119 {offsets = [1, 0], sizes = [1, 128], strides = [1, 1]} : vector<3x128xf32> to vector<1x128xf32>
    %128 = vector.broadcast %127 : vector<1x128xf32> to vector<15x128xf32>
    %129 = arith.addf %126, %128 : vector<15x128xf32>
    %cst_78 = arith.constant 0.000000e+00 : f32
    %130 = vector.broadcast %cst_78 : f32 to vector<15x128xf32>
    %131 = arith.cmpf ogt, %129, %130 : vector<15x128xf32>
    %132 = vector.extract_strided_slice %119 {offsets = [2, 0], sizes = [1, 128], strides = [1, 1]} : vector<3x128xf32> to vector<1x128xf32>
    %133 = vector.broadcast %132 : vector<1x128xf32> to vector<15x128xf32>
    %134 = arith.mulf %133, %129 : vector<15x128xf32>
    %135 = arith.select %131, %129, %134 : vector<15x128xi1>, vector<15x128xf32>
    %c0_79 = arith.constant 0 : index
    %c0_80 = arith.constant 0 : index
    %c0_81 = arith.constant 0 : index
    %136 = vector.load %arg4[%c0_79, %c0_80, %c0_81] : memref<1x15x128xf32, #tpu.memory_space<vmem>>, vector<1x15x128xf32>
    %137 = vector.shape_cast %136 : vector<1x15x128xf32> to vector<15x128xf32>
    %138 = arith.addf %135, %137 : vector<15x128xf32>
    %139 = arith.truncf %138 : vector<15x128xf32> to vector<15x128xbf16>
    %c0_82 = arith.constant 0 : index
    %c0_83 = arith.constant 0 : index
    %140 = vector.load %arg19[%c0_82, %c0_83] : memref<128x768xbf16, #tpu.memory_space<vmem>>, vector<128x768xbf16>
    %cst_84 = arith.constant dense<0.000000e+00> : vector<15x768xf32>
    %141 = tpu.matmul %139, %140, %cst_84 {dimension_numbers = #tpu.dot_dimension_numbers<[1], [0], [0], [1], [0, 0, 1, 1], [], []>} : vector<15x128xbf16>, vector<128x768xbf16>, vector<15x768xf32> -> vector<15x768xf32>
    %c0_85 = arith.constant 0 : index
    %c0_86 = arith.constant 0 : index
    %c0_87 = arith.constant 0 : index
    %142 = vector.load %arg20[%c0_85, %c0_86, %c0_87] : memref<3x31x15xf32, #tpu.memory_space<vmem>>, vector<1x31x15xf32>
    %143 = vector.shape_cast %142 : vector<1x31x15xf32> to vector<31x15xf32>
    %144 = vector.extract_strided_slice %141 {offsets = [0, 0], sizes = [15, 256], strides = [1, 1]} : vector<15x768xf32> to vector<15x256xf32>
    %cst_88 = arith.constant dense<0.000000e+00> : vector<31x256xf32>
    %145 = tpu.matmul %143, %144, %cst_88 {dimension_numbers = #tpu.dot_dimension_numbers<[1], [0], [0], [1], [0, 0, 1, 1], [], []>} : vector<31x15xf32>, vector<15x256xf32>, vector<31x256xf32> -> vector<31x256xf32>
    %c1_89 = arith.constant 1 : index
    %c0_90 = arith.constant 0 : index
    %c0_91 = arith.constant 0 : index
    %146 = vector.load %arg20[%c1_89, %c0_90, %c0_91] : memref<3x31x15xf32, #tpu.memory_space<vmem>>, vector<1x31x15xf32>
    %147 = vector.shape_cast %146 : vector<1x31x15xf32> to vector<31x15xf32>
    %148 = vector.extract_strided_slice %141 {offsets = [0, 256], sizes = [15, 256], strides = [1, 1]} : vector<15x768xf32> to vector<15x256xf32>
    %cst_92 = arith.constant dense<0.000000e+00> : vector<31x256xf32>
    %149 = tpu.matmul %147, %148, %cst_92 {dimension_numbers = #tpu.dot_dimension_numbers<[1], [0], [0], [1], [0, 0, 1, 1], [], []>} : vector<31x15xf32>, vector<15x256xf32>, vector<31x256xf32> -> vector<31x256xf32>
    %150 = arith.addf %145, %149 : vector<31x256xf32>
    %c2_93 = arith.constant 2 : index
    %c0_94 = arith.constant 0 : index
    %c0_95 = arith.constant 0 : index
    %151 = vector.load %arg20[%c2_93, %c0_94, %c0_95] : memref<3x31x15xf32, #tpu.memory_space<vmem>>, vector<1x31x15xf32>
    %152 = vector.shape_cast %151 : vector<1x31x15xf32> to vector<31x15xf32>
    %153 = vector.extract_strided_slice %141 {offsets = [0, 512], sizes = [15, 256], strides = [1, 1]} : vector<15x768xf32> to vector<15x256xf32>
    %cst_96 = arith.constant dense<0.000000e+00> : vector<31x256xf32>
    %154 = tpu.matmul %152, %153, %cst_96 {dimension_numbers = #tpu.dot_dimension_numbers<[1], [0], [0], [1], [0, 0, 1, 1], [], []>} : vector<31x15xf32>, vector<15x256xf32>, vector<31x256xf32> -> vector<31x256xf32>
    %155 = arith.addf %150, %154 : vector<31x256xf32>
    %c0_97 = arith.constant 0 : index
    %c0_98 = arith.constant 0 : index
    %156 = vector.load %arg21[%c0_97, %c0_98] : memref<1x256xf32, #tpu.memory_space<vmem>>, vector<1x256xf32>
    %157 = vector.broadcast %156 : vector<1x256xf32> to vector<31x256xf32>
    %158 = arith.addf %155, %157 : vector<31x256xf32>
    %159 = vector.extract_strided_slice %158 {offsets = [0, 0], sizes = [31, 128], strides = [1, 1]} : vector<31x256xf32> to vector<31x128xf32>
    %160 = vector.extract_strided_slice %158 {offsets = [0, 128], sizes = [31, 128], strides = [1, 1]} : vector<31x256xf32> to vector<31x128xf32>
    %cst_99 = arith.constant 0.000000e+00 : f32
    %161 = vector.broadcast %cst_99 : f32 to vector<31x128xf32>
    %162 = arith.subf %161, %160 : vector<31x128xf32>
    %163 = math.exp %162 : vector<31x128xf32>
    %cst_100 = arith.constant 1.000000e+00 : f32
    %164 = vector.broadcast %cst_100 : f32 to vector<31x128xf32>
    %165 = arith.addf %164, %163 : vector<31x128xf32>
    %166 = tpu.reciprocal %165 {approx = true} : vector<31x128xf32> -> vector<31x128xf32>
    %167 = arith.mulf %159, %166 : vector<31x128xf32>
    %cst_101 = arith.constant dense<0.000000e+00> : vector<128xf32>
    %168 = vector.multi_reduction <add>, %167, %cst_101 [0] : vector<31x128xf32> to vector<128xf32>
    %169 = vector.shape_cast %168 : vector<128xf32> to vector<1x128xf32>
    %170 = arith.mulf %167, %167 : vector<31x128xf32>
    %cst_102 = arith.constant dense<0.000000e+00> : vector<128xf32>
    %171 = vector.multi_reduction <add>, %170, %cst_102 [0] : vector<31x128xf32> to vector<128xf32>
    %172 = vector.shape_cast %171 : vector<128xf32> to vector<1x128xf32>
    %c0_103 = arith.constant 0 : index
    %c0_104 = arith.constant 0 : index
    %173 = vector.load %arg23[%c0_103, %c0_104] : memref<128x8xf32, #tpu.memory_space<vmem>>, vector<128x8xf32>
    %cst_105 = arith.constant dense<0.000000e+00> : vector<1x8xf32>
    %174 = tpu.matmul %169, %173, %cst_105 {dimension_numbers = #tpu.dot_dimension_numbers<[1], [0], [0], [1], [0, 0, 1, 1], [], []>} : vector<1x128xf32>, vector<128x8xf32>, vector<1x8xf32> -> vector<1x8xf32>
    %c0_106 = arith.constant 0 : index
    %c0_107 = arith.constant 0 : index
    %175 = vector.load %arg23[%c0_106, %c0_107] : memref<128x8xf32, #tpu.memory_space<vmem>>, vector<128x8xf32>
    %cst_108 = arith.constant dense<0.000000e+00> : vector<1x8xf32>
    %176 = tpu.matmul %172, %175, %cst_108 {dimension_numbers = #tpu.dot_dimension_numbers<[1], [0], [0], [1], [0, 0, 1, 1], [], []>} : vector<1x128xf32>, vector<128x8xf32>, vector<1x8xf32> -> vector<1x8xf32>
    %177 = arith.mulf %174, %174 : vector<1x8xf32>
    %178 = arith.subf %176, %177 : vector<1x8xf32>
    %cst_109 = arith.constant 9.99999974E-6 : f32
    %179 = vector.broadcast %cst_109 : f32 to vector<1x8xf32>
    %180 = arith.addf %178, %179 : vector<1x8xf32>
    %181 = math.rsqrt %180 : vector<1x8xf32>
    %c0_110 = arith.constant 0 : index
    %c0_111 = arith.constant 0 : index
    %182 = vector.load %arg24[%c0_110, %c0_111] : memref<8x128xf32, #tpu.memory_space<vmem>>, vector<8x128xf32>
    %cst_112 = arith.constant dense<0.000000e+00> : vector<1x128xf32>
    %183 = tpu.matmul %174, %182, %cst_112 {dimension_numbers = #tpu.dot_dimension_numbers<[1], [0], [0], [1], [0, 0, 1, 1], [], []>} : vector<1x8xf32>, vector<8x128xf32>, vector<1x128xf32> -> vector<1x128xf32>
    %c0_113 = arith.constant 0 : index
    %c0_114 = arith.constant 0 : index
    %184 = vector.load %arg24[%c0_113, %c0_114] : memref<8x128xf32, #tpu.memory_space<vmem>>, vector<8x128xf32>
    %cst_115 = arith.constant dense<0.000000e+00> : vector<1x128xf32>
    %185 = tpu.matmul %181, %184, %cst_115 {dimension_numbers = #tpu.dot_dimension_numbers<[1], [0], [0], [1], [0, 0, 1, 1], [], []>} : vector<1x8xf32>, vector<8x128xf32>, vector<1x128xf32> -> vector<1x128xf32>
    %c0_116 = arith.constant 0 : index
    %c0_117 = arith.constant 0 : index
    %186 = vector.load %arg22[%c0_116, %c0_117] : memref<3x128xf32, #tpu.memory_space<vmem>>, vector<3x128xf32>
    %187 = vector.broadcast %183 : vector<1x128xf32> to vector<31x128xf32>
    %188 = arith.subf %167, %187 : vector<31x128xf32>
    %189 = vector.broadcast %185 : vector<1x128xf32> to vector<31x128xf32>
    %190 = arith.mulf %188, %189 : vector<31x128xf32>
    %191 = vector.extract_strided_slice %186 {offsets = [0, 0], sizes = [1, 128], strides = [1, 1]} : vector<3x128xf32> to vector<1x128xf32>
    %192 = vector.broadcast %191 : vector<1x128xf32> to vector<31x128xf32>
    %193 = arith.mulf %190, %192 : vector<31x128xf32>
    %194 = vector.extract_strided_slice %186 {offsets = [1, 0], sizes = [1, 128], strides = [1, 1]} : vector<3x128xf32> to vector<1x128xf32>
    %195 = vector.broadcast %194 : vector<1x128xf32> to vector<31x128xf32>
    %196 = arith.addf %193, %195 : vector<31x128xf32>
    %cst_118 = arith.constant 0.000000e+00 : f32
    %197 = vector.broadcast %cst_118 : f32 to vector<31x128xf32>
    %198 = arith.cmpf ogt, %196, %197 : vector<31x128xf32>
    %199 = vector.extract_strided_slice %186 {offsets = [2, 0], sizes = [1, 128], strides = [1, 1]} : vector<3x128xf32> to vector<1x128xf32>
    %200 = vector.broadcast %199 : vector<1x128xf32> to vector<31x128xf32>
    %201 = arith.mulf %200, %196 : vector<31x128xf32>
    %202 = arith.select %198, %196, %201 : vector<31x128xi1>, vector<31x128xf32>
    %c0_119 = arith.constant 0 : index
    %c0_120 = arith.constant 0 : index
    %c0_121 = arith.constant 0 : index
    %203 = vector.load %arg5[%c0_119, %c0_120, %c0_121] : memref<1x31x128xf32, #tpu.memory_space<vmem>>, vector<1x31x128xf32>
    %204 = vector.shape_cast %203 : vector<1x31x128xf32> to vector<31x128xf32>
    %205 = arith.addf %202, %204 : vector<31x128xf32>
    %206 = arith.truncf %205 : vector<31x128xf32> to vector<31x128xbf16>
    %c0_122 = arith.constant 0 : index
    %c0_123 = arith.constant 0 : index
    %207 = vector.load %arg25[%c0_122, %c0_123] : memref<128x768xbf16, #tpu.memory_space<vmem>>, vector<128x768xbf16>
    %cst_124 = arith.constant dense<0.000000e+00> : vector<31x768xf32>
    %208 = tpu.matmul %206, %207, %cst_124 {dimension_numbers = #tpu.dot_dimension_numbers<[1], [0], [0], [1], [0, 0, 1, 1], [], []>} : vector<31x128xbf16>, vector<128x768xbf16>, vector<31x768xf32> -> vector<31x768xf32>
    %c0_125 = arith.constant 0 : index
    %c0_126 = arith.constant 0 : index
    %c0_127 = arith.constant 0 : index
    %209 = vector.load %arg26[%c0_125, %c0_126, %c0_127] : memref<3x63x31xf32, #tpu.memory_space<vmem>>, vector<1x63x31xf32>
    %210 = vector.shape_cast %209 : vector<1x63x31xf32> to vector<63x31xf32>
    %211 = vector.extract_strided_slice %208 {offsets = [0, 0], sizes = [31, 256], strides = [1, 1]} : vector<31x768xf32> to vector<31x256xf32>
    %cst_128 = arith.constant dense<0.000000e+00> : vector<63x256xf32>
    %212 = tpu.matmul %210, %211, %cst_128 {dimension_numbers = #tpu.dot_dimension_numbers<[1], [0], [0], [1], [0, 0, 1, 1], [], []>} : vector<63x31xf32>, vector<31x256xf32>, vector<63x256xf32> -> vector<63x256xf32>
    %c1_129 = arith.constant 1 : index
    %c0_130 = arith.constant 0 : index
    %c0_131 = arith.constant 0 : index
    %213 = vector.load %arg26[%c1_129, %c0_130, %c0_131] : memref<3x63x31xf32, #tpu.memory_space<vmem>>, vector<1x63x31xf32>
    %214 = vector.shape_cast %213 : vector<1x63x31xf32> to vector<63x31xf32>
    %215 = vector.extract_strided_slice %208 {offsets = [0, 256], sizes = [31, 256], strides = [1, 1]} : vector<31x768xf32> to vector<31x256xf32>
    %cst_132 = arith.constant dense<0.000000e+00> : vector<63x256xf32>
    %216 = tpu.matmul %214, %215, %cst_132 {dimension_numbers = #tpu.dot_dimension_numbers<[1], [0], [0], [1], [0, 0, 1, 1], [], []>} : vector<63x31xf32>, vector<31x256xf32>, vector<63x256xf32> -> vector<63x256xf32>
    %217 = arith.addf %212, %216 : vector<63x256xf32>
    %c2_133 = arith.constant 2 : index
    %c0_134 = arith.constant 0 : index
    %c0_135 = arith.constant 0 : index
    %218 = vector.load %arg26[%c2_133, %c0_134, %c0_135] : memref<3x63x31xf32, #tpu.memory_space<vmem>>, vector<1x63x31xf32>
    %219 = vector.shape_cast %218 : vector<1x63x31xf32> to vector<63x31xf32>
    %220 = vector.extract_strided_slice %208 {offsets = [0, 512], sizes = [31, 256], strides = [1, 1]} : vector<31x768xf32> to vector<31x256xf32>
    %cst_136 = arith.constant dense<0.000000e+00> : vector<63x256xf32>
    %221 = tpu.matmul %219, %220, %cst_136 {dimension_numbers = #tpu.dot_dimension_numbers<[1], [0], [0], [1], [0, 0, 1, 1], [], []>} : vector<63x31xf32>, vector<31x256xf32>, vector<63x256xf32> -> vector<63x256xf32>
    %222 = arith.addf %217, %221 : vector<63x256xf32>
    %c0_137 = arith.constant 0 : index
    %c0_138 = arith.constant 0 : index
    %223 = vector.load %arg27[%c0_137, %c0_138] : memref<1x256xf32, #tpu.memory_space<vmem>>, vector<1x256xf32>
    %224 = vector.broadcast %223 : vector<1x256xf32> to vector<63x256xf32>
    %225 = arith.addf %222, %224 : vector<63x256xf32>
    %226 = vector.extract_strided_slice %225 {offsets = [0, 0], sizes = [63, 128], strides = [1, 1]} : vector<63x256xf32> to vector<63x128xf32>
    %227 = vector.extract_strided_slice %225 {offsets = [0, 128], sizes = [63, 128], strides = [1, 1]} : vector<63x256xf32> to vector<63x128xf32>
    %cst_139 = arith.constant 0.000000e+00 : f32
    %228 = vector.broadcast %cst_139 : f32 to vector<63x128xf32>
    %229 = arith.subf %228, %227 : vector<63x128xf32>
    %230 = math.exp %229 : vector<63x128xf32>
    %cst_140 = arith.constant 1.000000e+00 : f32
    %231 = vector.broadcast %cst_140 : f32 to vector<63x128xf32>
    %232 = arith.addf %231, %230 : vector<63x128xf32>
    %233 = tpu.reciprocal %232 {approx = true} : vector<63x128xf32> -> vector<63x128xf32>
    %234 = arith.mulf %226, %233 : vector<63x128xf32>
    %cst_141 = arith.constant dense<0.000000e+00> : vector<128xf32>
    %235 = vector.multi_reduction <add>, %234, %cst_141 [0] : vector<63x128xf32> to vector<128xf32>
    %236 = vector.shape_cast %235 : vector<128xf32> to vector<1x128xf32>
    %237 = arith.mulf %234, %234 : vector<63x128xf32>
    %cst_142 = arith.constant dense<0.000000e+00> : vector<128xf32>
    %238 = vector.multi_reduction <add>, %237, %cst_142 [0] : vector<63x128xf32> to vector<128xf32>
    %239 = vector.shape_cast %238 : vector<128xf32> to vector<1x128xf32>
    %c0_143 = arith.constant 0 : index
    %c0_144 = arith.constant 0 : index
    %240 = vector.load %arg29[%c0_143, %c0_144] : memref<128x8xf32, #tpu.memory_space<vmem>>, vector<128x8xf32>
    %cst_145 = arith.constant dense<0.000000e+00> : vector<1x8xf32>
    %241 = tpu.matmul %236, %240, %cst_145 {dimension_numbers = #tpu.dot_dimension_numbers<[1], [0], [0], [1], [0, 0, 1, 1], [], []>} : vector<1x128xf32>, vector<128x8xf32>, vector<1x8xf32> -> vector<1x8xf32>
    %c0_146 = arith.constant 0 : index
    %c0_147 = arith.constant 0 : index
    %242 = vector.load %arg29[%c0_146, %c0_147] : memref<128x8xf32, #tpu.memory_space<vmem>>, vector<128x8xf32>
    %cst_148 = arith.constant dense<0.000000e+00> : vector<1x8xf32>
    %243 = tpu.matmul %239, %242, %cst_148 {dimension_numbers = #tpu.dot_dimension_numbers<[1], [0], [0], [1], [0, 0, 1, 1], [], []>} : vector<1x128xf32>, vector<128x8xf32>, vector<1x8xf32> -> vector<1x8xf32>
    %244 = arith.mulf %241, %241 : vector<1x8xf32>
    %245 = arith.subf %243, %244 : vector<1x8xf32>
    %cst_149 = arith.constant 9.99999974E-6 : f32
    %246 = vector.broadcast %cst_149 : f32 to vector<1x8xf32>
    %247 = arith.addf %245, %246 : vector<1x8xf32>
    %248 = math.rsqrt %247 : vector<1x8xf32>
    %c0_150 = arith.constant 0 : index
    %c0_151 = arith.constant 0 : index
    %249 = vector.load %arg30[%c0_150, %c0_151] : memref<8x128xf32, #tpu.memory_space<vmem>>, vector<8x128xf32>
    %cst_152 = arith.constant dense<0.000000e+00> : vector<1x128xf32>
    %250 = tpu.matmul %241, %249, %cst_152 {dimension_numbers = #tpu.dot_dimension_numbers<[1], [0], [0], [1], [0, 0, 1, 1], [], []>} : vector<1x8xf32>, vector<8x128xf32>, vector<1x128xf32> -> vector<1x128xf32>
    %c0_153 = arith.constant 0 : index
    %c0_154 = arith.constant 0 : index
    %251 = vector.load %arg30[%c0_153, %c0_154] : memref<8x128xf32, #tpu.memory_space<vmem>>, vector<8x128xf32>
    %cst_155 = arith.constant dense<0.000000e+00> : vector<1x128xf32>
    %252 = tpu.matmul %248, %251, %cst_155 {dimension_numbers = #tpu.dot_dimension_numbers<[1], [0], [0], [1], [0, 0, 1, 1], [], []>} : vector<1x8xf32>, vector<8x128xf32>, vector<1x128xf32> -> vector<1x128xf32>
    %c0_156 = arith.constant 0 : index
    %c0_157 = arith.constant 0 : index
    %253 = vector.load %arg28[%c0_156, %c0_157] : memref<3x128xf32, #tpu.memory_space<vmem>>, vector<3x128xf32>
    %254 = vector.broadcast %250 : vector<1x128xf32> to vector<63x128xf32>
    %255 = arith.subf %234, %254 : vector<63x128xf32>
    %256 = vector.broadcast %252 : vector<1x128xf32> to vector<63x128xf32>
    %257 = arith.mulf %255, %256 : vector<63x128xf32>
    %258 = vector.extract_strided_slice %253 {offsets = [0, 0], sizes = [1, 128], strides = [1, 1]} : vector<3x128xf32> to vector<1x128xf32>
    %259 = vector.broadcast %258 : vector<1x128xf32> to vector<63x128xf32>
    %260 = arith.mulf %257, %259 : vector<63x128xf32>
    %261 = vector.extract_strided_slice %253 {offsets = [1, 0], sizes = [1, 128], strides = [1, 1]} : vector<3x128xf32> to vector<1x128xf32>
    %262 = vector.broadcast %261 : vector<1x128xf32> to vector<63x128xf32>
    %263 = arith.addf %260, %262 : vector<63x128xf32>
    %cst_158 = arith.constant 0.000000e+00 : f32
    %264 = vector.broadcast %cst_158 : f32 to vector<63x128xf32>
    %265 = arith.cmpf ogt, %263, %264 : vector<63x128xf32>
    %266 = vector.extract_strided_slice %253 {offsets = [2, 0], sizes = [1, 128], strides = [1, 1]} : vector<3x128xf32> to vector<1x128xf32>
    %267 = vector.broadcast %266 : vector<1x128xf32> to vector<63x128xf32>
    %268 = arith.mulf %267, %263 : vector<63x128xf32>
    %269 = arith.select %265, %263, %268 : vector<63x128xi1>, vector<63x128xf32>
    %c0_159 = arith.constant 0 : index
    %c0_160 = arith.constant 0 : index
    %c0_161 = arith.constant 0 : index
    %270 = vector.load %arg6[%c0_159, %c0_160, %c0_161] : memref<1x63x128xf32, #tpu.memory_space<vmem>>, vector<1x63x128xf32>
    %271 = vector.shape_cast %270 : vector<1x63x128xf32> to vector<63x128xf32>
    %272 = arith.addf %269, %271 : vector<63x128xf32>
    %273 = arith.truncf %272 : vector<63x128xf32> to vector<63x128xbf16>
    %c0_162 = arith.constant 0 : index
    %c0_163 = arith.constant 0 : index
    %274 = vector.load %arg31[%c0_162, %c0_163] : memref<128x1280xbf16, #tpu.memory_space<vmem>>, vector<128x1280xbf16>
    %cst_164 = arith.constant dense<0.000000e+00> : vector<63x1280xf32>
    %275 = tpu.matmul %273, %274, %cst_164 {dimension_numbers = #tpu.dot_dimension_numbers<[1], [0], [0], [1], [0, 0, 1, 1], [], []>} : vector<63x128xbf16>, vector<128x1280xbf16>, vector<63x1280xf32> -> vector<63x1280xf32>
    %c0_165 = arith.constant 0 : index
    %c0_166 = arith.constant 0 : index
    %c0_167 = arith.constant 0 : index
    %276 = vector.load %arg32[%c0_165, %c0_166, %c0_167] : memref<5x129x63xf32, #tpu.memory_space<vmem>>, vector<1x129x63xf32>
    %277 = vector.shape_cast %276 : vector<1x129x63xf32> to vector<129x63xf32>
    %278 = vector.extract_strided_slice %275 {offsets = [0, 0], sizes = [63, 256], strides = [1, 1]} : vector<63x1280xf32> to vector<63x256xf32>
    %cst_168 = arith.constant dense<0.000000e+00> : vector<129x256xf32>
    %279 = tpu.matmul %277, %278, %cst_168 {dimension_numbers = #tpu.dot_dimension_numbers<[1], [0], [0], [1], [0, 0, 1, 1], [], []>} : vector<129x63xf32>, vector<63x256xf32>, vector<129x256xf32> -> vector<129x256xf32>
    %c1_169 = arith.constant 1 : index
    %c0_170 = arith.constant 0 : index
    %c0_171 = arith.constant 0 : index
    %280 = vector.load %arg32[%c1_169, %c0_170, %c0_171] : memref<5x129x63xf32, #tpu.memory_space<vmem>>, vector<1x129x63xf32>
    %281 = vector.shape_cast %280 : vector<1x129x63xf32> to vector<129x63xf32>
    %282 = vector.extract_strided_slice %275 {offsets = [0, 256], sizes = [63, 256], strides = [1, 1]} : vector<63x1280xf32> to vector<63x256xf32>
    %cst_172 = arith.constant dense<0.000000e+00> : vector<129x256xf32>
    %283 = tpu.matmul %281, %282, %cst_172 {dimension_numbers = #tpu.dot_dimension_numbers<[1], [0], [0], [1], [0, 0, 1, 1], [], []>} : vector<129x63xf32>, vector<63x256xf32>, vector<129x256xf32> -> vector<129x256xf32>
    %284 = arith.addf %279, %283 : vector<129x256xf32>
    %c2_173 = arith.constant 2 : index
    %c0_174 = arith.constant 0 : index
    %c0_175 = arith.constant 0 : index
    %285 = vector.load %arg32[%c2_173, %c0_174, %c0_175] : memref<5x129x63xf32, #tpu.memory_space<vmem>>, vector<1x129x63xf32>
    %286 = vector.shape_cast %285 : vector<1x129x63xf32> to vector<129x63xf32>
    %287 = vector.extract_strided_slice %275 {offsets = [0, 512], sizes = [63, 256], strides = [1, 1]} : vector<63x1280xf32> to vector<63x256xf32>
    %cst_176 = arith.constant dense<0.000000e+00> : vector<129x256xf32>
    %288 = tpu.matmul %286, %287, %cst_176 {dimension_numbers = #tpu.dot_dimension_numbers<[1], [0], [0], [1], [0, 0, 1, 1], [], []>} : vector<129x63xf32>, vector<63x256xf32>, vector<129x256xf32> -> vector<129x256xf32>
    %289 = arith.addf %284, %288 : vector<129x256xf32>
    %c3 = arith.constant 3 : index
    %c0_177 = arith.constant 0 : index
    %c0_178 = arith.constant 0 : index
    %290 = vector.load %arg32[%c3, %c0_177, %c0_178] : memref<5x129x63xf32, #tpu.memory_space<vmem>>, vector<1x129x63xf32>
    %291 = vector.shape_cast %290 : vector<1x129x63xf32> to vector<129x63xf32>
    %292 = vector.extract_strided_slice %275 {offsets = [0, 768], sizes = [63, 256], strides = [1, 1]} : vector<63x1280xf32> to vector<63x256xf32>
    %cst_179 = arith.constant dense<0.000000e+00> : vector<129x256xf32>
    %293 = tpu.matmul %291, %292, %cst_179 {dimension_numbers = #tpu.dot_dimension_numbers<[1], [0], [0], [1], [0, 0, 1, 1], [], []>} : vector<129x63xf32>, vector<63x256xf32>, vector<129x256xf32> -> vector<129x256xf32>
    %294 = arith.addf %289, %293 : vector<129x256xf32>
    %c4 = arith.constant 4 : index
    %c0_180 = arith.constant 0 : index
    %c0_181 = arith.constant 0 : index
    %295 = vector.load %arg32[%c4, %c0_180, %c0_181] : memref<5x129x63xf32, #tpu.memory_space<vmem>>, vector<1x129x63xf32>
    %296 = vector.shape_cast %295 : vector<1x129x63xf32> to vector<129x63xf32>
    %297 = vector.extract_strided_slice %275 {offsets = [0, 1024], sizes = [63, 256], strides = [1, 1]} : vector<63x1280xf32> to vector<63x256xf32>
    %cst_182 = arith.constant dense<0.000000e+00> : vector<129x256xf32>
    %298 = tpu.matmul %296, %297, %cst_182 {dimension_numbers = #tpu.dot_dimension_numbers<[1], [0], [0], [1], [0, 0, 1, 1], [], []>} : vector<129x63xf32>, vector<63x256xf32>, vector<129x256xf32> -> vector<129x256xf32>
    %299 = arith.addf %294, %298 : vector<129x256xf32>
    %c0_183 = arith.constant 0 : index
    %c0_184 = arith.constant 0 : index
    %300 = vector.load %arg33[%c0_183, %c0_184] : memref<1x256xf32, #tpu.memory_space<vmem>>, vector<1x256xf32>
    %301 = vector.broadcast %300 : vector<1x256xf32> to vector<129x256xf32>
    %302 = arith.addf %299, %301 : vector<129x256xf32>
    %303 = vector.extract_strided_slice %302 {offsets = [0, 0], sizes = [129, 128], strides = [1, 1]} : vector<129x256xf32> to vector<129x128xf32>
    %304 = vector.extract_strided_slice %302 {offsets = [0, 128], sizes = [129, 128], strides = [1, 1]} : vector<129x256xf32> to vector<129x128xf32>
    %cst_185 = arith.constant 0.000000e+00 : f32
    %305 = vector.broadcast %cst_185 : f32 to vector<129x128xf32>
    %306 = arith.subf %305, %304 : vector<129x128xf32>
    %307 = math.exp %306 : vector<129x128xf32>
    %cst_186 = arith.constant 1.000000e+00 : f32
    %308 = vector.broadcast %cst_186 : f32 to vector<129x128xf32>
    %309 = arith.addf %308, %307 : vector<129x128xf32>
    %310 = tpu.reciprocal %309 {approx = true} : vector<129x128xf32> -> vector<129x128xf32>
    %311 = arith.mulf %303, %310 : vector<129x128xf32>
    %cst_187 = arith.constant dense<0.000000e+00> : vector<128xf32>
    %312 = vector.multi_reduction <add>, %311, %cst_187 [0] : vector<129x128xf32> to vector<128xf32>
    %313 = vector.shape_cast %312 : vector<128xf32> to vector<1x128xf32>
    %314 = arith.mulf %311, %311 : vector<129x128xf32>
    %cst_188 = arith.constant dense<0.000000e+00> : vector<128xf32>
    %315 = vector.multi_reduction <add>, %314, %cst_188 [0] : vector<129x128xf32> to vector<128xf32>
    %316 = vector.shape_cast %315 : vector<128xf32> to vector<1x128xf32>
    %c0_189 = arith.constant 0 : index
    %c0_190 = arith.constant 0 : index
    %317 = vector.load %arg35[%c0_189, %c0_190] : memref<128x8xf32, #tpu.memory_space<vmem>>, vector<128x8xf32>
    %cst_191 = arith.constant dense<0.000000e+00> : vector<1x8xf32>
    %318 = tpu.matmul %313, %317, %cst_191 {dimension_numbers = #tpu.dot_dimension_numbers<[1], [0], [0], [1], [0, 0, 1, 1], [], []>} : vector<1x128xf32>, vector<128x8xf32>, vector<1x8xf32> -> vector<1x8xf32>
    %c0_192 = arith.constant 0 : index
    %c0_193 = arith.constant 0 : index
    %319 = vector.load %arg35[%c0_192, %c0_193] : memref<128x8xf32, #tpu.memory_space<vmem>>, vector<128x8xf32>
    %cst_194 = arith.constant dense<0.000000e+00> : vector<1x8xf32>
    %320 = tpu.matmul %316, %319, %cst_194 {dimension_numbers = #tpu.dot_dimension_numbers<[1], [0], [0], [1], [0, 0, 1, 1], [], []>} : vector<1x128xf32>, vector<128x8xf32>, vector<1x8xf32> -> vector<1x8xf32>
    %321 = arith.mulf %318, %318 : vector<1x8xf32>
    %322 = arith.subf %320, %321 : vector<1x8xf32>
    %cst_195 = arith.constant 9.99999974E-6 : f32
    %323 = vector.broadcast %cst_195 : f32 to vector<1x8xf32>
    %324 = arith.addf %322, %323 : vector<1x8xf32>
    %325 = math.rsqrt %324 : vector<1x8xf32>
    %c0_196 = arith.constant 0 : index
    %c0_197 = arith.constant 0 : index
    %326 = vector.load %arg36[%c0_196, %c0_197] : memref<8x128xf32, #tpu.memory_space<vmem>>, vector<8x128xf32>
    %cst_198 = arith.constant dense<0.000000e+00> : vector<1x128xf32>
    %327 = tpu.matmul %318, %326, %cst_198 {dimension_numbers = #tpu.dot_dimension_numbers<[1], [0], [0], [1], [0, 0, 1, 1], [], []>} : vector<1x8xf32>, vector<8x128xf32>, vector<1x128xf32> -> vector<1x128xf32>
    %c0_199 = arith.constant 0 : index
    %c0_200 = arith.constant 0 : index
    %328 = vector.load %arg36[%c0_199, %c0_200] : memref<8x128xf32, #tpu.memory_space<vmem>>, vector<8x128xf32>
    %cst_201 = arith.constant dense<0.000000e+00> : vector<1x128xf32>
    %329 = tpu.matmul %325, %328, %cst_201 {dimension_numbers = #tpu.dot_dimension_numbers<[1], [0], [0], [1], [0, 0, 1, 1], [], []>} : vector<1x8xf32>, vector<8x128xf32>, vector<1x128xf32> -> vector<1x128xf32>
    %c0_202 = arith.constant 0 : index
    %c0_203 = arith.constant 0 : index
    %330 = vector.load %arg34[%c0_202, %c0_203] : memref<3x128xf32, #tpu.memory_space<vmem>>, vector<3x128xf32>
    %331 = vector.broadcast %327 : vector<1x128xf32> to vector<129x128xf32>
    %332 = arith.subf %311, %331 : vector<129x128xf32>
    %333 = vector.broadcast %329 : vector<1x128xf32> to vector<129x128xf32>
    %334 = arith.mulf %332, %333 : vector<129x128xf32>
    %335 = vector.extract_strided_slice %330 {offsets = [0, 0], sizes = [1, 128], strides = [1, 1]} : vector<3x128xf32> to vector<1x128xf32>
    %336 = vector.broadcast %335 : vector<1x128xf32> to vector<129x128xf32>
    %337 = arith.mulf %334, %336 : vector<129x128xf32>
    %338 = vector.extract_strided_slice %330 {offsets = [1, 0], sizes = [1, 128], strides = [1, 1]} : vector<3x128xf32> to vector<1x128xf32>
    %339 = vector.broadcast %338 : vector<1x128xf32> to vector<129x128xf32>
    %340 = arith.addf %337, %339 : vector<129x128xf32>
    %cst_204 = arith.constant 0.000000e+00 : f32
    %341 = vector.broadcast %cst_204 : f32 to vector<129x128xf32>
    %342 = arith.cmpf ogt, %340, %341 : vector<129x128xf32>
    %343 = vector.extract_strided_slice %330 {offsets = [2, 0], sizes = [1, 128], strides = [1, 1]} : vector<3x128xf32> to vector<1x128xf32>
    %344 = vector.broadcast %343 : vector<1x128xf32> to vector<129x128xf32>
    %345 = arith.mulf %344, %340 : vector<129x128xf32>
    %346 = arith.select %342, %340, %345 : vector<129x128xi1>, vector<129x128xf32>
    %c0_205 = arith.constant 0 : index
    %c0_206 = arith.constant 0 : index
    %347 = vector.load %arg37[%c0_205, %c0_206] : memref<8x128xf32, #tpu.memory_space<vmem>>, vector<8x128xf32>
    %cst_207 = arith.constant dense<0.000000e+00> : vector<8x129xf32>
    %348 = tpu.matmul %347, %346, %cst_207 {dimension_numbers = #tpu.dot_dimension_numbers<[1], [1], [0], [0], [0, 0, 1, 0], [], []>} : vector<8x128xf32>, vector<129x128xf32>, vector<8x129xf32> -> vector<8x129xf32>
    %c0_208 = arith.constant 0 : index
    %c0_209 = arith.constant 0 : index
    %349 = vector.load %arg38[%c0_208, %c0_209] : memref<1x1xf32, #tpu.memory_space<vmem>>, vector<1x1xf32>
    %350 = vector.broadcast %349 : vector<1x1xf32> to vector<8x129xf32>
    %351 = arith.addf %348, %350 : vector<8x129xf32>
    %cst_210 = arith.constant 0.000000e+00 : f32
    %352 = vector.broadcast %cst_210 : f32 to vector<8x129xf32>
    %353 = arith.subf %352, %351 : vector<8x129xf32>
    %354 = math.exp %353 : vector<8x129xf32>
    %cst_211 = arith.constant 1.000000e+00 : f32
    %355 = vector.broadcast %cst_211 : f32 to vector<8x129xf32>
    %356 = arith.addf %355, %354 : vector<8x129xf32>
    %cst_212 = arith.constant 1.000000e+00 : f32
    %357 = vector.broadcast %cst_212 : f32 to vector<8x129xf32>
    %358 = arith.divf %357, %356 : vector<8x129xf32>
    %c0_213 = arith.constant 0 : index
    %c0_214 = arith.constant 0 : index
    %c0_215 = arith.constant 0 : index
    %359 = vector.load %arg39[%c0_213, %c0_214, %c0_215] : memref<1x8x129xf32, #tpu.memory_space<vmem>>, vector<1x8x129xf32>
    %360 = vector.shape_cast %359 : vector<1x8x129xf32> to vector<8x129xf32>
    %361 = vector.shape_cast %358 : vector<8x129xf32> to vector<1x8x129xf32>
    tpu.vector_store %arg39[%c0_213, %c0_214, %c0_215], %361 {strides = array<i32>} : memref<1x8x129xf32, #tpu.memory_space<vmem>>, vector<1x8x129xf32>,
    return
  }
  func.func @transform_0(%arg0: i32) -> (i32, i32, i32) {
    %c0_i32 = arith.constant 0 : i32
    %c0_i32_0 = arith.constant 0 : i32
    %c0_i32_1 = arith.constant 0 : i32
    return %arg0, %c0_i32, %c0_i32_0 : i32, i32, i32
  }
  func.func @transform_1(%arg0: i32) -> (i32, i32, i32) {
    %c0_i32 = arith.constant 0 : i32
    %c0_i32_0 = arith.constant 0 : i32
    %c0_i32_1 = arith.constant 0 : i32
    return %arg0, %c0_i32, %c0_i32_0 : i32, i32, i32
  }
  func.func @transform_2(%arg0: i32) -> (i32, i32, i32) {
    %c0_i32 = arith.constant 0 : i32
    %c0_i32_0 = arith.constant 0 : i32
    %c0_i32_1 = arith.constant 0 : i32
    return %arg0, %c0_i32, %c0_i32_0 : i32, i32, i32
  }
  func.func @transform_3(%arg0: i32) -> (i32, i32, i32) {
    %c0_i32 = arith.constant 0 : i32
    %c0_i32_0 = arith.constant 0 : i32
    %c0_i32_1 = arith.constant 0 : i32
    return %arg0, %c0_i32, %c0_i32_0 : i32, i32, i32
  }
  func.func @transform_4(%arg0: i32) -> (i32, i32, i32) {
    %c0_i32 = arith.constant 0 : i32
    %c0_i32_0 = arith.constant 0 : i32
    %c0_i32_1 = arith.constant 0 : i32
    return %arg0, %c0_i32, %c0_i32_0 : i32, i32, i32
  }
  func.func @transform_5(%arg0: i32) -> (i32, i32, i32) {
    %c0_i32 = arith.constant 0 : i32
    %c0_i32_0 = arith.constant 0 : i32
    %c0_i32_1 = arith.constant 0 : i32
    return %arg0, %c0_i32, %c0_i32_0 : i32, i32, i32
  }
  func.func @transform_6(%arg0: i32) -> (i32, i32) {
    %c0_i32 = arith.constant 0 : i32
    %c0_i32_0 = arith.constant 0 : i32
    %c0_i32_1 = arith.constant 0 : i32
    return %c0_i32, %c0_i32_0 : i32, i32
  }
  func.func @transform_7(%arg0: i32) -> (i32, i32, i32) {
    %c0_i32 = arith.constant 0 : i32
    %c0_i32_0 = arith.constant 0 : i32
    %c0_i32_1 = arith.constant 0 : i32
    %c0_i32_2 = arith.constant 0 : i32
    return %c0_i32, %c0_i32_0, %c0_i32_1 : i32, i32, i32
  }
  func.func @transform_8(%arg0: i32) -> (i32, i32) {
    %c0_i32 = arith.constant 0 : i32
    %c0_i32_0 = arith.constant 0 : i32
    %c0_i32_1 = arith.constant 0 : i32
    return %c0_i32, %c0_i32_0 : i32, i32
  }
  func.func @transform_9(%arg0: i32) -> (i32, i32) {
    %c0_i32 = arith.constant 0 : i32
    %c0_i32_0 = arith.constant 0 : i32
    %c0_i32_1 = arith.constant 0 : i32
    return %c0_i32, %c0_i32_0 : i32, i32
  }
  func.func @transform_10(%arg0: i32) -> (i32, i32) {
    %c0_i32 = arith.constant 0 : i32
    %c0_i32_0 = arith.constant 0 : i32
    %c0_i32_1 = arith.constant 0 : i32
    return %c0_i32, %c0_i32_0 : i32, i32
  }
  func.func @transform_11(%arg0: i32) -> (i32, i32) {
    %c0_i32 = arith.constant 0 : i32
    %c0_i32_0 = arith.constant 0 : i32
    %c0_i32_1 = arith.constant 0 : i32
    return %c0_i32, %c0_i32_0 : i32, i32
  }
  func.func @transform_12(%arg0: i32) -> (i32, i32) {
    %c0_i32 = arith.constant 0 : i32
    %c0_i32_0 = arith.constant 0 : i32
    %c0_i32_1 = arith.constant 0 : i32
    return %c0_i32, %c0_i32_0 : i32, i32
  }
  func.func @transform_13(%arg0: i32) -> (i32, i32, i32) {
    %c0_i32 = arith.constant 0 : i32
    %c0_i32_0 = arith.constant 0 : i32
    %c0_i32_1 = arith.constant 0 : i32
    %c0_i32_2 = arith.constant 0 : i32
    return %c0_i32, %c0_i32_0, %c0_i32_1 : i32, i32, i32
  }
  func.func @transform_14(%arg0: i32) -> (i32, i32) {
    %c0_i32 = arith.constant 0 : i32
    %c0_i32_0 = arith.constant 0 : i32
    %c0_i32_1 = arith.constant 0 : i32
    return %c0_i32, %c0_i32_0 : i32, i32
  }
  func.func @transform_15(%arg0: i32) -> (i32, i32) {
    %c0_i32 = arith.constant 0 : i32
    %c0_i32_0 = arith.constant 0 : i32
    %c0_i32_1 = arith.constant 0 : i32
    return %c0_i32, %c0_i32_0 : i32, i32
  }
  func.func @transform_16(%arg0: i32) -> (i32, i32) {
    %c0_i32 = arith.constant 0 : i32
    %c0_i32_0 = arith.constant 0 : i32
    %c0_i32_1 = arith.constant 0 : i32
    return %c0_i32, %c0_i32_0 : i32, i32
  }
  func.func @transform_17(%arg0: i32) -> (i32, i32) {
    %c0_i32 = arith.constant 0 : i32
    %c0_i32_0 = arith.constant 0 : i32
    %c0_i32_1 = arith.constant 0 : i32
    return %c0_i32, %c0_i32_0 : i32, i32
  }
  func.func @transform_18(%arg0: i32) -> (i32, i32) {
    %c0_i32 = arith.constant 0 : i32
    %c0_i32_0 = arith.constant 0 : i32
    %c0_i32_1 = arith.constant 0 : i32
    return %c0_i32, %c0_i32_0 : i32, i32
  }
  func.func @transform_19(%arg0: i32) -> (i32, i32, i32) {
    %c0_i32 = arith.constant 0 : i32
    %c0_i32_0 = arith.constant 0 : i32
    %c0_i32_1 = arith.constant 0 : i32
    %c0_i32_2 = arith.constant 0 : i32
    return %c0_i32, %c0_i32_0, %c0_i32_1 : i32, i32, i32
  }
  func.func @transform_20(%arg0: i32) -> (i32, i32) {
    %c0_i32 = arith.constant 0 : i32
    %c0_i32_0 = arith.constant 0 : i32
    %c0_i32_1 = arith.constant 0 : i32
    return %c0_i32, %c0_i32_0 : i32, i32
  }
  func.func @transform_21(%arg0: i32) -> (i32, i32) {
    %c0_i32 = arith.constant 0 : i32
    %c0_i32_0 = arith.constant 0 : i32
    %c0_i32_1 = arith.constant 0 : i32
    return %c0_i32, %c0_i32_0 : i32, i32
  }
  func.func @transform_22(%arg0: i32) -> (i32, i32) {
    %c0_i32 = arith.constant 0 : i32
    %c0_i32_0 = arith.constant 0 : i32
    %c0_i32_1 = arith.constant 0 : i32
    return %c0_i32, %c0_i32_0 : i32, i32
  }
  func.func @transform_23(%arg0: i32) -> (i32, i32) {
    %c0_i32 = arith.constant 0 : i32
    %c0_i32_0 = arith.constant 0 : i32
    %c0_i32_1 = arith.constant 0 : i32
    return %c0_i32, %c0_i32_0 : i32, i32
  }
  func.func @transform_24(%arg0: i32) -> (i32, i32) {
    %c0_i32 = arith.constant 0 : i32
    %c0_i32_0 = arith.constant 0 : i32
    %c0_i32_1 = arith.constant 0 : i32
    return %c0_i32, %c0_i32_0 : i32, i32
  }
  func.func @transform_25(%arg0: i32) -> (i32, i32, i32) {
    %c0_i32 = arith.constant 0 : i32
    %c0_i32_0 = arith.constant 0 : i32
    %c0_i32_1 = arith.constant 0 : i32
    %c0_i32_2 = arith.constant 0 : i32
    return %c0_i32, %c0_i32_0, %c0_i32_1 : i32, i32, i32
  }
  func.func @transform_26(%arg0: i32) -> (i32, i32) {
    %c0_i32 = arith.constant 0 : i32
    %c0_i32_0 = arith.constant 0 : i32
    %c0_i32_1 = arith.constant 0 : i32
    return %c0_i32, %c0_i32_0 : i32, i32
  }
  func.func @transform_27(%arg0: i32) -> (i32, i32) {
    %c0_i32 = arith.constant 0 : i32
    %c0_i32_0 = arith.constant 0 : i32
    %c0_i32_1 = arith.constant 0 : i32
    return %c0_i32, %c0_i32_0 : i32, i32
  }
  func.func @transform_28(%arg0: i32) -> (i32, i32) {
    %c0_i32 = arith.constant 0 : i32
    %c0_i32_0 = arith.constant 0 : i32
    %c0_i32_1 = arith.constant 0 : i32
    return %c0_i32, %c0_i32_0 : i32, i32
  }
  func.func @transform_29(%arg0: i32) -> (i32, i32) {
    %c0_i32 = arith.constant 0 : i32
    %c0_i32_0 = arith.constant 0 : i32
    %c0_i32_1 = arith.constant 0 : i32
    return %c0_i32, %c0_i32_0 : i32, i32
  }
  func.func @transform_30(%arg0: i32) -> (i32, i32) {
    %c0_i32 = arith.constant 0 : i32
    %c0_i32_0 = arith.constant 0 : i32
    %c0_i32_1 = arith.constant 0 : i32
    return %c0_i32, %c0_i32_0 : i32, i32
  }
  func.func @transform_31(%arg0: i32) -> (i32, i32, i32) {
    %c0_i32 = arith.constant 0 : i32
    %c0_i32_0 = arith.constant 0 : i32
    %c0_i32_1 = arith.constant 0 : i32
    %c0_i32_2 = arith.constant 0 : i32
    return %c0_i32, %c0_i32_0, %c0_i32_1 : i32, i32, i32
  }
  func.func @transform_32(%arg0: i32) -> (i32, i32) {
    %c0_i32 = arith.constant 0 : i32
    %c0_i32_0 = arith.constant 0 : i32
    %c0_i32_1 = arith.constant 0 : i32
    return %c0_i32, %c0_i32_0 : i32, i32
  }
  func.func @transform_33(%arg0: i32) -> (i32, i32) {
    %c0_i32 = arith.constant 0 : i32
    %c0_i32_0 = arith.constant 0 : i32
    %c0_i32_1 = arith.constant 0 : i32
    return %c0_i32, %c0_i32_0 : i32, i32
  }
  func.func @transform_34(%arg0: i32) -> (i32, i32) {
    %c0_i32 = arith.constant 0 : i32
    %c0_i32_0 = arith.constant 0 : i32
    %c0_i32_1 = arith.constant 0 : i32
    return %c0_i32, %c0_i32_0 : i32, i32
  }
  func.func @transform_35(%arg0: i32) -> (i32, i32) {
    %c0_i32 = arith.constant 0 : i32
    %c0_i32_0 = arith.constant 0 : i32
    %c0_i32_1 = arith.constant 0 : i32
    return %c0_i32, %c0_i32_0 : i32, i32
  }
  func.func @transform_36(%arg0: i32) -> (i32, i32) {
    %c0_i32 = arith.constant 0 : i32
    %c0_i32_0 = arith.constant 0 : i32
    %c0_i32_1 = arith.constant 0 : i32
    return %c0_i32, %c0_i32_0 : i32, i32
  }
  func.func @transform_37(%arg0: i32) -> (i32, i32) {
    %c0_i32 = arith.constant 0 : i32
    %c0_i32_0 = arith.constant 0 : i32
    %c0_i32_1 = arith.constant 0 : i32
    return %c0_i32, %c0_i32_0 : i32, i32
  }
  func.func @transform_38(%arg0: i32) -> (i32, i32, i32) {
    %c0_i32 = arith.constant 0 : i32
    %c0_i32_0 = arith.constant 0 : i32
    %c0_i32_1 = arith.constant 0 : i32
    return %arg0, %c0_i32, %c0_i32_0 : i32, i32, i32
  }
}

</mosaic_0001>

<bundles_post_ra>
// kernel: tpu_custom_call.1
= control target key start
LH: loop header
LB: loop body
LE: loop exit
PB: predicated region body
PF: predicated region fallthrough
CT: control target
= control target key end

     0   :  { %s13905_s6 = smov 1   ;;  %s13906_s10 = smov 2   ;;  %s16328_s0 = inlined_call_operand.smem [shape: u32[39], index: -1, kind: input, shape index: {}] }
   0x1   :  { %s13974_s5 = sld [smem:[%s16328_s0]]   ;;  %s13907_s14 = smov 3  }
   0x2   :  { %s13979_s9 = sld [smem:[%s16328_s0 + %s13905_s6]]   ;;  %s13908_s18 = smov 4  }
   0x3   :  { %s13984_s13 = sld [smem:[%s16328_s0 + %s13906_s10]]   ;;  %s13909_s22 = smov 5  }
   0x4   :  { %s13989_s17 = sld [smem:[%s16328_s0 + %s13907_s14]]   ;;  %s13910_s26 = smov 6  }
   0x5   :  { %s13994_s21 = sld [smem:[%s16328_s0 + %s13908_s18]]   ;;  %s13911_s30 = smov 7  }
   0x6   :  { %s13999_s25 = sld [smem:[%s16328_s0 + %s13909_s22]]   ;;  %s13912_s4 = smov 8  }
   0x7   :  { %16365 = sst [smem:[#allocation37_spill]] %s13974_s5  ;;  %s13913_s10 = smov 9  }
   0x8   :  { %16366 = sst [smem:[#allocation38_spill]] %s13979_s9  ;;  %s13914_s15 = smov 10  }
   0x9   :  { %16367 = sst [smem:[#allocation39_spill]] %s13984_s13  ;;  %s13915_s20 = smov 11  }
   0xa   :  { %16368 = sst [smem:[#allocation40_spill]] %s13989_s17  ;;  %s13917_s1 = smov 13  }
   0xb   :  { %16369 = sst [smem:[#allocation41_spill]] %s13994_s21  ;;  %s13918_s7 = smov 14  }
   0xc   :  { %16370 = sst [smem:[#allocation42_spill]] %s13999_s25  ;;  %s13920_s22 = smov 16  }
   0xd   :  { %s14004_s29 = sld [smem:[%s16328_s0 + %s13910_s26]]   ;;  %s13916_s26 = smov 12  }
   0xe   :  { %s14009_s3 = sld [smem:[%s16328_s0 + %s13911_s30]]   ;;  %s13921_s28 = smov 17  }
   0xf   :  { %s14014_s8 = sld [smem:[%s16328_s0 + %s13912_s4]]  }
  0x10   :  { %s14019_s14 = sld [smem:[%s16328_s0 + %s13913_s10]]   ;;  %s13942_s10 = smov 38  }
  0x11   :  { %s14024_s19 = sld [smem:[%s16328_s0 + %s13914_s15]]   ;;  %s13919_s15 = smov 15  }
  0x12   :  { %s14029_s24 = sld [smem:[%s16328_s0 + %s13915_s20]]  }
  0x13   :  { %16371 = sst [smem:[#allocation43_spill]] %s14004_s29 }
  0x14   :  { %16372 = sst [smem:[#allocation44_spill]] %s14009_s3 }
  0x15   :  { %16373 = sst [smem:[#allocation45_spill]] %s14014_s8 }
  0x16   :  { %16374 = sst [smem:[#allocation46_spill]] %s14019_s14 }
  0x17   :  { %16375 = sst [smem:[#allocation47_spill]] %s14024_s19 }
  0x18   :  { %s14034_s30 = sld [smem:[%s16328_s0 + %s13916_s26]]  }
  0x19   :  { %s14039_s6 = sld [smem:[%s16328_s0 + %s13917_s1]]  }
  0x1a   :  { %s14044_s12 = sld [smem:[%s16328_s0 + %s13918_s7]]   ;;  %s13922_s7 = smov 18  }
  0x1b   :  { %s14049_s20 = sld [smem:[%s16328_s0 + %s13919_s15]]   ;;  %s13923_s15 = smov 19  }
  0x1c   :  { %s14054_s27 = sld [smem:[%s16328_s0 + %s13920_s22]]   ;;  %s13924_s22 = smov 20  }
  0x1d   :  { %s14059_s4 = sld [smem:[%s16328_s0 + %s13921_s28]]   ;;  %s13925_s28 = smov 21  }
  0x1e   :  { %s14064_s25 = sld [smem:[%s16328_s0 + %s13922_s7]]   ;;  %s13926_s7 = smov 22  }
  0x1f   :  { %16376 = sst [smem:[#allocation48_spill]] %s14039_s6 }
  0x20   :  { %s14069_s21 = sld [smem:[%s16328_s0 + %s13923_s15]]   ;;  %s13927_s15 = smov 23  }
  0x21   :  { %16377 = sst [smem:[#allocation49_spill]] %s14049_s20 }
  0x22   :  { %16378 = sst [smem:[#allocation50_spill]] %s14054_s27 }
  0x23   :  { %16379 = sst [smem:[#allocation51_spill]] %s14059_s4 }
  0x24   :  { %16380 = sst [smem:[#allocation52_spill]] %s14064_s25 }
  0x25   :  { %s14074_s17 = sld [smem:[%s16328_s0 + %s13924_s22]]   ;;  %s13928_s22 = smov 24  }
  0x26   :  { %16381 = sst [smem:[#allocation53_spill]] %s14069_s21 }
  0x27   :  { %s14079_s27 = sld [smem:[%s16328_s0 + %s13925_s28]]   ;;  %s13929_s28 = smov 25  }
  0x28   :  { %s14084_s6 = sld [smem:[%s16328_s0 + %s13926_s7]]   ;;  %s13930_s7 = smov 26  }
  0x29   :  { %s14089_s21 = sld [smem:[%s16328_s0 + %s13927_s15]]   ;;  %s13931_s15 = smov 27  }
  0x2a   :  { %s14094_s13 = sld [smem:[%s16328_s0 + %s13928_s22]]   ;;  %s13932_s22 = smov 28  }
  0x2b   :  { %s14099_s19 = sld [smem:[%s16328_s0 + %s13929_s28]]   ;;  %s13933_s28 = smov 29  }
  0x2c   :  { %s14114_s3 = sld [smem:[%s16328_s0 + %s13932_s22]]   ;;  %s13936_s22 = smov 32  }
  0x2e   :  { %16382 = sst [smem:[#allocation54_spill]] %s14084_s6 }
  0x2f   :  { %16383 = sst [smem:[#allocation55_spill]] %s14089_s21 }
  0x30   :  { %s14104_s6 = sld [smem:[%s16328_s0 + %s13930_s7]]   ;;  %s13934_s7 = smov 30  }
  0x31   :  { %16384 = sst [smem:[#allocation56_spill]] %s14099_s19 }
  0x32   :  { %s14109_s21 = sld [smem:[%s16328_s0 + %s13931_s15]]   ;;  %s13935_s15 = smov 31  }
  0x33   :  { %16386 = sst [smem:[#allocation58_spill]] %s14114_s3 }
  0x34   :  { %s14119_s19 = sld [smem:[%s16328_s0 + %s13933_s28]]   ;;  %s13937_s28 = smov 33  }
  0x35   :  { %s14124_s9 = sld [smem:[%s16328_s0 + %s13934_s7]]   ;;  %s13938_s7 = smov 34  }
  0x36   :  { %16385 = sst [smem:[#allocation57_spill]] %s14104_s6 }
  0x37   :  { %s14129_s5 = sld [smem:[%s16328_s0 + %s13935_s15]]   ;;  %s13939_s15 = smov 35  }
  0x38   :  { %s14134_s3 = sld [smem:[%s16328_s0 + %s13936_s22]]   ;;  %s13940_s22 = smov 36  }
  0x39   :  { %s14154_s29 = sld [smem:[%s16328_s0 + %s13940_s22]]  }
  0x3a   :  { %16387 = sst [smem:[#allocation59_spill]] %s14119_s19 }
  0x3b   :  { %16388 = sst [smem:[#allocation60_spill]] %s14124_s9 }
  0x3c   :  { %s14139_s19 = sld [smem:[%s16328_s0 + %s13937_s28]]   ;;  %s13941_s28 = smov 37  }
  0x3d   :  { %16389 = sst [smem:[#allocation61_spill]] %s14129_s5 }
  0x3e   :  { %16390 = sst [smem:[#allocation62_spill]] %s14134_s3 }
  0x3f   :  { %s14144_s9 = sld [smem:[%s16328_s0 + %s13938_s7]]  }
  0x40   :  { %s14149_s5 = sld [smem:[%s16328_s0 + %s13939_s15]]  }
  0x42   :  { %16391 = sst [smem:[#allocation63_spill]] %s14139_s19 }
  0x43   :  { %s10426_s19 = sld [smem:[%s16328_s0 + %s13941_s28]]  }
  0x45   :  { %16392 = sst [smem:[#allocation64_spill]] %s14144_s9 }
  0x46   :  { %16393 = sst [smem:[#allocation65_spill]] %s14149_s5 }
  0x47   :  { %s14162_s9 = sld [smem:[%s16328_s0 + %s13942_s10]]  }
  0x49   :  { %v82_v0 = vstv %s10426_s19 }
  0x4a   :  { %83 = vst [vmem:[#allocation2] sm:$0x1] %v82_v0 }
  0x4b   :  { %84 = vsyncpa [#allocation4], 0 }
  0x4c   :  { %85 = vsyncpa [#allocation7], 0 }
  0x4d   :  { %86 = vsyncpa [#allocation10], 0 }
  0x4e   :  { %87 = vsyncpa [#allocation13], 0 }
  0x4f   :  { %88 = vsyncpa [#allocation16], 0 }
  0x50   :  { %89 = vsyncpa [#allocation19], 0 }
  0x51   :  { %90 = vsyncpa [#allocation22], 0 }
  0x52   :  { %91 = vsyncpa [#allocation25], 0 }
  0x53   :  { %92 = vsyncpa [#allocation5], 0 }
  0x54   :  { %94 = vsyncpa [#allocation5 + $0x1], 0  ;;  %s14164_s15 = smov 0   ;;  %s14166_s16 = smov 0  }
  0x55   :  { %s14168_s18 = smov 0   ;;  %s14170_s0 = smov 0  }
  0x56 LB: > { %s16394_s8 = sld [smem:[#allocation45_spill]]  ;;  %s16395_s6 = sld [smem:[#allocation57_spill]]  ;;  %s13899_s18 = sphi %s14168_s18, %s16460_s18   ;;  %s13895_s16 = sphi %s14166_s16, %s16462_s16   ;;  %s13891_s15 = sphi %s14164_s15, %s16461_s15   ;;  %s13903_s0 = sphi %s14170_s0, %s16458_s0  }
  0x57   : > { %s16396_s4 = sld [smem:[#allocation51_spill]]  ;;  %s16397_s3 = sld [smem:[#allocation62_spill]] }
  0x58   : > { %s16398_s25 = sld [smem:[#allocation52_spill]]  ;;  %s16399_s20 = sld [smem:[#allocation49_spill]] }
  0x59   : > { %s16400_s14 = sld [smem:[#allocation46_spill]]  ;;  %16401 = sst [smem:[#allocation66_spill]] %s13899_s18 }
  0x5a   : > { %s14185_s19 = sadd.s32 4294967295, %s13903_s0   ;;  %s10429_s22 = sadd.s32 4294967294, %s13903_s0  }
  0x5b   : > { %s14189_s23 = sadd.s32 1, %s13903_s0   ;;  %s935_s26 = sadd.s32 1, %s13899_s18 }
  0x5c   : > { %16402 = sst [smem:[#allocation67_spill]] %s14189_s23  ;;  %s932_s28 = ssub.s32 %s13903_s0, %s14189_s23 }
  0x5d   : > { %p945_p0 = scmp.ne.s32.totalorder %s13899_s18, %s13895_s16  ;;  %p933_p1 = scmp.eq.s32.totalorder %s932_s28, 0 }
  0x5e   : > { %p946_p2 = scmp.eq.s32.totalorder %s14185_s19, 1  ;;  %p951_p3 = scmp.ne.s32.totalorder %s13895_s16, %s13891_s15 }
  0x5f   : > { %p952_p4 = scmp.eq.s32.totalorder %s10429_s22, 1  ;;  %p10430_p7 = scmp.ge.s32.totalorder %s13903_s0, 1 }
  0x60   : > { %s14200_s1 = scalar_select %p933_p1, %s13899_s18, %s935_s26  }
  0x61   : > { %p14202_p5 = por %p946_p2, %p945_p0  ;;  %p14206_p6 = por %p952_p4, %p951_p3 }
  0x62   : > { %16403 = sst [smem:[#allocation68_spill]] %s14200_s1  ;;  %p959_p8 = scmp.lt.s32.totalorder %s13903_s0, 3 }
  0x63   : > { %s16404_s2 = scalar_select %p14202_p5, 1, 0 }
  0x64   : > { %s16405_s10 = scalar_select %p14206_p6, 1, 0 }
  0x65   : > { %p16346_p9 = scmp.eq.s32.totalorder %s14185_s19, 0  ;;  %p14213_p10 = pnand %p10430_p7, %p959_p8 }
  0x66   : > { %16406 = sst [smem:[#allocation69_spill]] %s16405_s10  ;;  %s13943_s11 = smov [#allocation6]  }
  0x67   : > { %s16407_s7 = scalar_select %p14213_p10, 1, 0 }
  0x68   : > { %s989_s22 = sshll.u32 %s13943_s11, 4  ;;  %p12445_p11 = pneg %p14213_p10  ;;  %s990_s22 = int_to_ptr.vmem [resolvable:$true] %s989_s22 }
  0x69   : > { %s13944_s26 = smov [#allocation9]   ;;  %s13945_s18 = smov [#allocation12]  }
  0x6a   : > { %s1013_s28 = sshll.u32 %s13944_s26, 4  ;;  %p14221_p12 = pnand %p16346_p9, %p12445_p11  ;;  %s14225_s28 = int_to_ptr.vmem [resolvable:$true] %s1013_s28 }
  0x6b   : > { %s14227_s23 = sshll.u32 %s13945_s18, 4  ;;  %s13389_s10 = scalar_lea.hbm %s16400_s14, 64  ;;  %s1042_s23 = int_to_ptr.vmem [resolvable:$true] %s14227_s23 }
  0x6c   : > { %p13390_p13 = scmp.ne.s32.totalorder %s16400_s14, %s13389_s10  ;;  %p14233_p0 = pneg %p14221_p12 }
  0x6d   : > { %p13396_p3 = scmp.lt.u32.totalorder %s13389_s10, %s16400_s14 }
  0x6e   : > { %p13392_p1 = pnand %p14233_p0, %p13390_p13 }
  0x70   : > { %p13393_p2 = pneg %p13392_p1 }
  0x72   : > { %p13398_p4 = pnand %p13396_p3, %p13393_p2 }
  0x74   : > { %13401 = shalt.err (!%p13398_p4)
}
  0x75   : > { %s13402_s26 = scalar_lea.vmem %s990_s22, 64  ;;  %p13410_p9 = scmp.lt.s32.totalorder %s990_s22, %s990_s22 }
  0x76   : > { %p13403_p7 = scmp.ne.s32.totalorder %s990_s22, %s13402_s26  ;;  %p13411_p6 = scmp.lt.s32.totalorder %s13402_s26, %s13402_s26 }
  0x78   : > { %p13405_p8 = pnand %p13403_p7, %p14233_p0  ;;  %p13412_p5 = por %p13411_p6, %p13410_p9 }
  0x7a   : > { %p13406_p11 = pneg %p13405_p8 }
  0x7c   : > { %p13413_p10 = pnand %p13412_p5, %p13406_p11 }
  0x7e   : > { %13416 = shalt.err (!%p13413_p10)
}
  0x7f   : > { %12451 = dma.hbm_to_vmem [thread:$0]  (!%p14221_p12), %s16400_s14, 64, %s990_s22, [#allocation7]  }
  0x80   : > { %s13417_s18 = scalar_lea.hbm %s14034_s30, 6144 }
  0x81   : > { %p13418_p13 = scmp.ne.s32.totalorder %s14034_s30, %s13417_s18  ;;  %p13424_p3 = scmp.lt.u32.totalorder %s13417_s18, %s14034_s30 }
  0x83   : > { %p13420_p1 = pnand %p13418_p13, %p14233_p0 }
  0x85   : > { %p13421_p2 = pneg %p13420_p1 }
  0x87   : > { %p13426_p4 = pnand %p13424_p3, %p13421_p2 }
  0x89   : > { %13429 = shalt.err (!%p13426_p4)
}
  0x8a   : > { %s13430_s10 = scalar_lea.vmem %s14225_s28, 6144  ;;  %p13438_p10 = scmp.lt.s32.totalorder %s14225_s28, %s14225_s28 }
  0x8b   : > { %p13431_p5 = scmp.ne.s32.totalorder %s14225_s28, %s13430_s10  ;;  %p13439_p7 = scmp.lt.s32.totalorder %s13430_s10, %s13430_s10 }
  0x8d   : > { %p13433_p6 = pnand %p13431_p5, %p14233_p0  ;;  %p13440_p8 = por %p13439_p7, %p13438_p10 }
  0x8f   : > { %p13434_p9 = pneg %p13433_p6 }
  0x91   : > { %p13441_p11 = pnand %p13440_p8, %p13434_p9 }
  0x93   : > { %13444 = shalt.err (!%p13441_p11)
}
  0x94   : > { %s16349_s22 = smov 384   ;;  %s16351_s26 = smov 24  }
  0x95   : > { %12457 = dma.hbm_to_vmem [thread:$0]  (!%p14221_p12), %s14034_s30, 6144, %s14225_s28, [#allocation10], %s16349_s22, %s16349_s22, %s16351_s26  }
  0x96   : > { %s13445_s18 = scalar_lea.hbm %s16399_s20, 64 }
  0x97   : > { %p13446_p13 = scmp.ne.s32.totalorder %s16399_s20, %s13445_s18  ;;  %p13452_p3 = scmp.lt.u32.totalorder %s13445_s18, %s16399_s20 }
  0x99   : > { %p13448_p1 = pnand %p13446_p13, %p14233_p0 }
  0x9b   : > { %p13449_p2 = pneg %p13448_p1 }
  0x9d   : > { %p13454_p4 = pnand %p13452_p3, %p13449_p2 }
  0x9f   : > { %13457 = shalt.err (!%p13454_p4)
}
  0xa0   : > { %s13458_s10 = scalar_lea.vmem %s1042_s23, 64  ;;  %p13466_p10 = scmp.lt.s32.totalorder %s1042_s23, %s1042_s23 }
  0xa1   : > { %p13459_p5 = scmp.ne.s32.totalorder %s1042_s23, %s13458_s10  ;;  %p13467_p7 = scmp.lt.s32.totalorder %s13458_s10, %s13458_s10 }
  0xa3   : > { %p13461_p6 = pnand %p13459_p5, %p14233_p0  ;;  %p13468_p8 = por %p13467_p7, %p13466_p10 }
  0xa5   : > { %p13462_p9 = pneg %p13461_p6 }
  0xa7   : > { %p13469_p11 = pnand %p13468_p8, %p13462_p9 }
  0xa9   : > { %13472 = shalt.err (!%p13469_p11)
}
  0xaa   : > { %12463 = dma.hbm_to_vmem [thread:$0]  (!%p14221_p12), %s16399_s20, 64, %s1042_s23, [#allocation13]  }
  0xab   : > { %s13948_s28 = smov [#allocation15]   ;;  %s13949_s22 = smov [#allocation18]  }
  0xac   : > { %s1065_s18 = sshll.u32 %s13948_s28, 4  ;;  %s1093_s26 = sshll.u32 %s13949_s22, 4  ;;  %s1066_s18 = int_to_ptr.vmem [resolvable:$true] %s1065_s18  ;;  %s1094_s26 = int_to_ptr.vmem [resolvable:$true] %s1093_s26 }
  0xad   : > { %s13473_s14 = scalar_lea.hbm %s16398_s25, 6144 }
  0xae   : > { %p13474_p13 = scmp.ne.s32.totalorder %s16398_s25, %s13473_s14  ;;  %p13480_p3 = scmp.lt.u32.totalorder %s13473_s14, %s16398_s25 }
  0xb0   : > { %p13476_p1 = pnand %p13474_p13, %p14233_p0 }
  0xb2   : > { %p13477_p2 = pneg %p13476_p1 }
  0xb4   : > { %p13482_p4 = pnand %p13480_p3, %p13477_p2 }
  0xb6   : > { %13485 = shalt.err (!%p13482_p4)
}
  0xb7   : > { %s13486_s10 = scalar_lea.vmem %s1066_s18, 6144  ;;  %p13494_p10 = scmp.lt.s32.totalorder %s1066_s18, %s1066_s18 }
  0xb8   : > { %p13487_p5 = scmp.ne.s32.totalorder %s1066_s18, %s13486_s10  ;;  %p13495_p7 = scmp.lt.s32.totalorder %s13486_s10, %s13486_s10 }
  0xba   : > { %p13489_p6 = pnand %p13487_p5, %p14233_p0  ;;  %p13496_p8 = por %p13495_p7, %p13494_p10 }
  0xbc   : > { %p13490_p9 = pneg %p13489_p6 }
  0xbe   : > { %p13497_p11 = pnand %p13496_p8, %p13490_p9 }
  0xc0   : > { %13500 = shalt.err (!%p13497_p11)
}
  0xc1   : > { %s16410_s23 = smov 24   ;;  %s16411_s22 = smov 384  }
  0xc2   : > { %12469 = dma.hbm_to_vmem [thread:$0]  (!%p14221_p12), %s16398_s25, 6144, %s1066_s18, [#allocation16], %s16411_s22, %s16411_s22, %s16410_s23  }
  0xc3   : > { %s13501_s14 = scalar_lea.hbm %s14079_s27, 64 }
  0xc4   : > { %p13502_p13 = scmp.ne.s32.totalorder %s14079_s27, %s13501_s14  ;;  %p13508_p3 = scmp.lt.u32.totalorder %s13501_s14, %s14079_s27 }
  0xc6   : > { %p13504_p1 = pnand %p13502_p13, %p14233_p0 }
  0xc8   : > { %p13505_p2 = pneg %p13504_p1 }
  0xca   : > { %p13510_p4 = pnand %p13508_p3, %p13505_p2 }
  0xcc   : > { %13513 = shalt.err (!%p13510_p4)
}
  0xcd   : > { %s13514_s28 = scalar_lea.vmem %s1094_s26, 64  ;;  %p13522_p10 = scmp.lt.s32.totalorder %s1094_s26, %s1094_s26 }
  0xce   : > { %p13515_p5 = scmp.ne.s32.totalorder %s1094_s26, %s13514_s28  ;;  %p13523_p7 = scmp.lt.s32.totalorder %s13514_s28, %s13514_s28 }
  0xd0   : > { %p13517_p6 = pnand %p13515_p5, %p14233_p0  ;;  %p13524_p8 = por %p13523_p7, %p13522_p10 }
  0xd2   : > { %p13518_p9 = pneg %p13517_p6 }
  0xd4   : > { %p13525_p11 = pnand %p13524_p8, %p13518_p9 }
  0xd6   : > { %13528 = shalt.err (!%p13525_p11)
}
  0xd7   : > { %12475 = dma.hbm_to_vmem [thread:$0]  (!%p14221_p12), %s14079_s27, 64, %s1094_s26, [#allocation19]  }
  0xd8   : > { %s13950_s18 = smov [#allocation21]   ;;  %s13951_s14 = smov [#allocation24]  }
  0xd9   : > { %s1126_s10 = sshll.u32 %s13950_s18, 4  ;;  %s1160_s20 = sshll.u32 %s13951_s14, 4  ;;  %s1127_s10 = int_to_ptr.vmem [resolvable:$true] %s1126_s10  ;;  %s1161_s20 = int_to_ptr.vmem [resolvable:$true] %s1160_s20 }
  0xda   : > { %s13529_s25 = scalar_lea.hbm %s16395_s6, 32 }
  0xdb   : > { %p13530_p13 = scmp.ne.s32.totalorder %s16395_s6, %s13529_s25  ;;  %p13536_p3 = scmp.lt.u32.totalorder %s13529_s25, %s16395_s6 }
  0xdd   : > { %p13532_p1 = pnand %p13530_p13, %p14233_p0 }
  0xdf   : > { %p13533_p2 = pneg %p13532_p1 }
  0xe1   : > { %p13538_p4 = pnand %p13536_p3, %p13533_p2 }
  0xe3   : > { %13541 = shalt.err (!%p13538_p4)
}
  0xe4   : > { %s13542_s28 = scalar_lea.vmem %s1127_s10, 32  ;;  %p13550_p10 = scmp.lt.s32.totalorder %s1127_s10, %s1127_s10 }
  0xe5   : > { %p13543_p5 = scmp.ne.s32.totalorder %s1127_s10, %s13542_s28  ;;  %p13551_p7 = scmp.lt.s32.totalorder %s13542_s28, %s13542_s28 }
  0xe7   : > { %p13545_p6 = pnand %p13543_p5, %p14233_p0  ;;  %p13552_p8 = por %p13551_p7, %p13550_p10 }
  0xe9   : > { %p13546_p9 = pneg %p13545_p6 }
  0xeb   : > { %p13553_p11 = pnand %p13552_p8, %p13546_p9 }
  0xed   : > { %13556 = shalt.err (!%p13553_p11)
}
  0xee   : > { %12481 = dma.hbm_to_vmem [thread:$0]  (!%p14221_p12), %s16395_s6, 32, %s1127_s10, [#allocation22]  }
  0xef   : > { %s13557_s25 = scalar_lea.hbm %s16397_s3, 32 }
  0xf0   : > { %p13558_p13 = scmp.ne.s32.totalorder %s16397_s3, %s13557_s25  ;;  %p13564_p3 = scmp.lt.u32.totalorder %s13557_s25, %s16397_s3 }
  0xf2   : > { %p13560_p1 = pnand %p13558_p13, %p14233_p0 }
  0xf4   : > { %p13561_p2 = pneg %p13560_p1 }
  0xf6   : > { %p13566_p4 = pnand %p13564_p3, %p13561_p2 }
  0xf8   : > { %13569 = shalt.err (!%p13566_p4)
}
  0xf9   : > { %s13570_s26 = scalar_lea.vmem %s1161_s20, 32  ;;  %p13578_p10 = scmp.lt.s32.totalorder %s1161_s20, %s1161_s20 }
  0xfa   : > { %p13571_p5 = scmp.ne.s32.totalorder %s1161_s20, %s13570_s26  ;;  %p13579_p7 = scmp.lt.s32.totalorder %s13570_s26, %s13570_s26 }
  0xfc   : > { %p13573_p6 = pnand %p13571_p5, %p14233_p0  ;;  %p13580_p8 = por %p13579_p7, %p13578_p10 }
  0xfe   : > { %p13574_p9 = pneg %p13573_p6 }
 0x100   : > { %p13581_p11 = pnand %p13580_p8, %p13574_p9 }
 0x102   : > { %13584 = shalt.err (!%p13581_p11)
}
 0x103   : > { %12487 = dma.hbm_to_vmem [thread:$0]  (!%p14221_p12), %s16397_s3, 32, %s1161_s20, [#allocation25]  }
 0x104   : > { %s13952_s18 = smov [#allocation3]   ;;  %s13953_s14 = smov [#allocation8]  }
 0x105   : > { %s978_s10 = sshll.u32 %s13952_s18, 4  ;;  %s1003_s28 = sshll.u32 %s13953_s14, 4  ;;  %s979_s10 = int_to_ptr.vmem [resolvable:$true] %s978_s10  ;;  %s1004_s28 = int_to_ptr.vmem [resolvable:$true] %s1003_s28 }
 0x106   : > { %s13585_s25 = scalar_lea.hbm %s16394_s8, 32 }
 0x107   : > { %p13586_p13 = scmp.ne.s32.totalorder %s16394_s8, %s13585_s25  ;;  %p13592_p3 = scmp.lt.u32.totalorder %s13585_s25, %s16394_s8 }
 0x109   : > { %p13588_p1 = pnand %p13586_p13, %p14233_p0 }
 0x10b   : > { %p13589_p2 = pneg %p13588_p1 }
 0x10d   : > { %p13594_p4 = pnand %p13592_p3, %p13589_p2 }
 0x10f   : > { %13597 = shalt.err (!%p13594_p4)
}
 0x110   : > { %s13598_s26 = scalar_lea.vmem %s979_s10, 32  ;;  %p13606_p10 = scmp.lt.s32.totalorder %s979_s10, %s979_s10 }
 0x111   : > { %p13599_p5 = scmp.ne.s32.totalorder %s979_s10, %s13598_s26  ;;  %p13607_p7 = scmp.lt.s32.totalorder %s13598_s26, %s13598_s26 }
 0x113   : > { %p13601_p6 = pnand %p13599_p5, %p14233_p0  ;;  %p13608_p8 = por %p13607_p7, %p13606_p10 }
 0x115   : > { %p13602_p9 = pneg %p13601_p6 }
 0x117   : > { %p13609_p11 = pnand %p13608_p8, %p13602_p9 }
 0x119   : > { %13612 = shalt.err (!%p13609_p11)
}
 0x11a   : > { %12448 = dma.hbm_to_vmem [thread:$0]  (!%p14221_p12), %s16394_s8, 32, %s979_s10, [#allocation4]  }
 0x11b   : > { %s13613_s20 = scalar_lea.hbm %s14029_s24, 128 }
 0x11c   : > { %p13614_p13 = scmp.ne.s32.totalorder %s14029_s24, %s13613_s20  ;;  %p13620_p3 = scmp.lt.u32.totalorder %s13613_s20, %s14029_s24 }
 0x11e   : > { %p13616_p1 = pnand %p13614_p13, %p14233_p0 }
 0x120   : > { %p13617_p2 = pneg %p13616_p1 }
 0x122   : > { %p13622_p4 = pnand %p13620_p3, %p13617_p2 }
 0x124   : > { %13625 = shalt.err (!%p13622_p4)
}
 0x125   : > { %s13626_s18 = scalar_lea.vmem %s1004_s28, 128  ;;  %p13634_p10 = scmp.lt.s32.totalorder %s1004_s28, %s1004_s28 }
 0x126   : > { %p13627_p5 = scmp.ne.s32.totalorder %s1004_s28, %s13626_s18  ;;  %p13635_p7 = scmp.lt.s32.totalorder %s13626_s18, %s13626_s18 }
 0x128   : > { %p13629_p6 = pnand %p13627_p5, %p14233_p0  ;;  %p13636_p8 = por %p13635_p7, %p13634_p10 }
 0x12a   : > { %p13630_p9 = pneg %p13629_p6 }
 0x12c   : > { %p13637_p11 = pnand %p13636_p8, %p13630_p9 }
 0x12e   : > { %13640 = shalt.err (!%p13637_p11)
}
 0x12f   : > { %12454 = dma.hbm_to_vmem [thread:$0]  (!%p14221_p12), %s14029_s24, 128, %s1004_s28, [#allocation7]  }
 0x130   : > { %s13954_s10 = smov [#allocation11]   ;;  %s13955_s25 = smov [#allocation14]  }
 0x131   : > { %s1030_s14 = sshll.u32 %s13954_s10, 4  ;;  %s1055_s26 = sshll.u32 %s13955_s25, 4  ;;  %s1031_s14 = int_to_ptr.vmem [resolvable:$true] %s1030_s14  ;;  %s1056_s26 = int_to_ptr.vmem [resolvable:$true] %s1055_s26 }
 0x132   : > { %s13641_s20 = scalar_lea.hbm %s14044_s12, 32 }
 0x133   : > { %p13642_p13 = scmp.ne.s32.totalorder %s14044_s12, %s13641_s20  ;;  %p13648_p3 = scmp.lt.u32.totalorder %s13641_s20, %s14044_s12 }
 0x135   : > { %p13644_p1 = pnand %p13642_p13, %p14233_p0 }
 0x137   : > { %p13645_p2 = pneg %p13644_p1 }
 0x139   : > { %p13650_p4 = pnand %p13648_p3, %p13645_p2 }
 0x13b   : > { %13653 = shalt.err (!%p13650_p4)
}
 0x13c   : > { %s13654_s18 = scalar_lea.vmem %s1031_s14, 32  ;;  %p13662_p10 = scmp.lt.s32.totalorder %s1031_s14, %s1031_s14 }
 0x13d   : > { %p13655_p5 = scmp.ne.s32.totalorder %s1031_s14, %s13654_s18  ;;  %p13663_p7 = scmp.lt.s32.totalorder %s13654_s18, %s13654_s18 }
 0x13f   : > { %p13657_p6 = pnand %p13655_p5, %p14233_p0  ;;  %p13664_p8 = por %p13663_p7, %p13662_p10 }
 0x141   : > { %p13658_p9 = pneg %p13657_p6 }
 0x143   : > { %p13665_p11 = pnand %p13664_p8, %p13658_p9 }
 0x145   : > { %13668 = shalt.err (!%p13665_p11)
}
 0x146   : > { %12460 = dma.hbm_to_vmem [thread:$0]  (!%p14221_p12), %s14044_s12, 32, %s1031_s14, [#allocation10]  }
 0x147   : > { %s13669_s28 = scalar_lea.hbm %s16396_s4, 128 }
 0x148   : > { %p13670_p13 = scmp.ne.s32.totalorder %s16396_s4, %s13669_s28  ;;  %p13676_p3 = scmp.lt.u32.totalorder %s13669_s28, %s16396_s4 }
 0x14a   : > { %p13672_p1 = pnand %p13670_p13, %p14233_p0 }
 0x14c   : > { %p13673_p2 = pneg %p13672_p1 }
 0x14e   : > { %p13678_p4 = pnand %p13676_p3, %p13673_p2 }
 0x150   : > { %13681 = shalt.err (!%p13678_p4)
}
 0x151   : > { %s13682_s10 = scalar_lea.vmem %s1056_s26, 128  ;;  %p13690_p10 = scmp.lt.s32.totalorder %s1056_s26, %s1056_s26 }
 0x152   : > { %p13683_p5 = scmp.ne.s32.totalorder %s1056_s26, %s13682_s10  ;;  %p13691_p7 = scmp.lt.s32.totalorder %s13682_s10, %s13682_s10 }
 0x154   : > { %p13685_p6 = pnand %p13683_p5, %p14233_p0  ;;  %p13692_p8 = por %p13691_p7, %p13690_p10 }
 0x156   : > { %p13686_p9 = pneg %p13685_p6 }
 0x158   : > { %p13693_p11 = pnand %p13692_p8, %p13686_p9 }
 0x15a   : > { %13696 = shalt.err (!%p13693_p11)
}
 0x15b   : > { %12466 = dma.hbm_to_vmem [thread:$0]  (!%p14221_p12), %s16396_s4, 128, %s1056_s26, [#allocation13]  }
 0x15c   : > { %s13956_s14 = smov [#allocation17]   ;;  %s13957_s20 = smov [#allocation20]  }
 0x15d   : > { %s1082_s25 = sshll.u32 %s13956_s14, 4  ;;  %s1109_s18 = sshll.u32 %s13957_s20, 4  ;;  %s1083_s25 = int_to_ptr.vmem [resolvable:$true] %s1082_s25  ;;  %s1110_s18 = int_to_ptr.vmem [resolvable:$true] %s1109_s18 }
 0x15e   : > { %s13697_s28 = scalar_lea.hbm %s14074_s17, 32 }
 0x15f   : > { %p13698_p13 = scmp.ne.s32.totalorder %s14074_s17, %s13697_s28  ;;  %p13704_p3 = scmp.lt.u32.totalorder %s13697_s28, %s14074_s17 }
 0x161   : > { %p13700_p1 = pnand %p13698_p13, %p14233_p0 }
 0x163   : > { %p13701_p2 = pneg %p13700_p1 }
 0x165   : > { %p13706_p4 = pnand %p13704_p3, %p13701_p2 }
 0x167   : > { %13709 = shalt.err (!%p13706_p4)
}
 0x168   : > { %s13710_s10 = scalar_lea.vmem %s1083_s25, 32  ;;  %p13718_p10 = scmp.lt.s32.totalorder %s1083_s25, %s1083_s25 }
 0x169   : > { %p13711_p5 = scmp.ne.s32.totalorder %s1083_s25, %s13710_s10  ;;  %p13719_p7 = scmp.lt.s32.totalorder %s13710_s10, %s13710_s10 }
 0x16b   : > { %p13713_p6 = pnand %p13711_p5, %p14233_p0  ;;  %p13720_p8 = por %p13719_p7, %p13718_p10 }
 0x16d   : > { %p13714_p9 = pneg %p13713_p6 }
 0x16f   : > { %p13721_p11 = pnand %p13720_p8, %p13714_p9 }
 0x171   : > { %13724 = shalt.err (!%p13721_p11)
}
 0x172   : > { %12472 = dma.hbm_to_vmem [thread:$0]  (!%p14221_p12), %s14074_s17, 32, %s1083_s25, [#allocation16]  }
 0x173   : > { %s13725_s26 = scalar_lea.hbm %s14094_s13, 6144 }
 0x174   : > { %p13726_p13 = scmp.ne.s32.totalorder %s14094_s13, %s13725_s26  ;;  %p13732_p3 = scmp.lt.u32.totalorder %s13725_s26, %s14094_s13 }
 0x176   : > { %p13728_p1 = pnand %p13726_p13, %p14233_p0 }
 0x178   : > { %p13729_p2 = pneg %p13728_p1 }
 0x17a   : > { %p13734_p4 = pnand %p13732_p3, %p13729_p2 }
 0x17c   : > { %13737 = shalt.err (!%p13734_p4)
}
 0x17d   : > { %s13738_s14 = scalar_lea.vmem %s1110_s18, 6144  ;;  %p13746_p10 = scmp.lt.s32.totalorder %s1110_s18, %s1110_s18 }
 0x17e   : > { %p13739_p5 = scmp.ne.s32.totalorder %s1110_s18, %s13738_s14  ;;  %p13747_p7 = scmp.lt.s32.totalorder %s13738_s14, %s13738_s14 }
 0x180   : > { %p13741_p6 = pnand %p13739_p5, %p14233_p0  ;;  %p13748_p8 = por %p13747_p7, %p13746_p10 }
 0x182   : > { %p13742_p9 = pneg %p13741_p6 }
 0x184   : > { %p13749_p11 = pnand %p13748_p8, %p13742_p9 }
 0x186   : > { %13752 = shalt.err (!%p13749_p11)
}
 0x187   : > { %12478 = dma.hbm_to_vmem [thread:$0]  (!%p14221_p12), %s14094_s13, 6144, %s1110_s18, [#allocation19], %s16411_s22, %s16411_s22, %s16410_s23  }
 0x188   : > { %s13958_s25 = smov [#allocation23]   ;;  %s13959_s28 = smov [#allocation26]  }
 0x189   : > { %s1137_s20 = sshll.u32 %s13958_s25, 4  ;;  %s1171_s10 = sshll.u32 %s13959_s28, 4  ;;  %s1138_s20 = int_to_ptr.vmem [resolvable:$true] %s1137_s20  ;;  %s1172_s10 = int_to_ptr.vmem [resolvable:$true] %s1171_s10 }
 0x18a   : > { %s13753_s26 = scalar_lea.hbm %s14109_s21, 64 }
 0x18b   : > { %p13754_p13 = scmp.ne.s32.totalorder %s14109_s21, %s13753_s26  ;;  %p13760_p3 = scmp.lt.u32.totalorder %s13753_s26, %s14109_s21 }
 0x18d   : > { %p13756_p1 = pnand %p13754_p13, %p14233_p0 }
 0x18f   : > { %p13757_p2 = pneg %p13756_p1 }
 0x191   : > { %p13762_p4 = pnand %p13760_p3, %p13757_p2 }
 0x193   : > { %13765 = shalt.err (!%p13762_p4)
}
 0x194   : > { %s13766_s14 = scalar_lea.vmem %s1138_s20, 64  ;;  %p13774_p10 = scmp.lt.s32.totalorder %s1138_s20, %s1138_s20 }
 0x195   : > { %p13767_p5 = scmp.ne.s32.totalorder %s1138_s20, %s13766_s14  ;;  %p13775_p7 = scmp.lt.s32.totalorder %s13766_s14, %s13766_s14 }
 0x197   : > { %p13769_p6 = pnand %p13767_p5, %p14233_p0  ;;  %p13776_p8 = por %p13775_p7, %p13774_p10 }
 0x199   : > { %p13770_p9 = pneg %p13769_p6 }
 0x19b   : > { %p13777_p11 = pnand %p13776_p8, %p13770_p9 }
 0x19d   : > { %13780 = shalt.err (!%p13777_p11)
}
 0x19e   : > { %s16412_s23 = sld [smem:[#allocation63_spill]] }
 0x19f   : > { %12484 = dma.hbm_to_vmem [thread:$0]  (!%p14221_p12), %s14109_s21, 64, %s1138_s20, [#allocation22]  }
 0x1a4   : > { %s13781_s22 = scalar_lea.hbm %s16412_s23, 64 }
 0x1a5   : > { %p13782_p13 = scmp.ne.s32.totalorder %s16412_s23, %s13781_s22  ;;  %p13788_p3 = scmp.lt.u32.totalorder %s13781_s22, %s16412_s23 }
 0x1a7   : > { %p13784_p1 = pnand %p13782_p13, %p14233_p0 }
 0x1a9   : > { %p13785_p2 = pneg %p13784_p1 }
 0x1ab   : > { %p13790_p4 = pnand %p13788_p3, %p13785_p2 }
 0x1ad   : > { %13793 = shalt.err (!%p13790_p4)
}
 0x1ae   : > { %s13794_s18 = scalar_lea.vmem %s1172_s10, 64  ;;  %p13802_p10 = scmp.lt.s32.totalorder %s1172_s10, %s1172_s10 }
 0x1af   : > { %p13795_p5 = scmp.ne.s32.totalorder %s1172_s10, %s13794_s18  ;;  %p13803_p7 = scmp.lt.s32.totalorder %s13794_s18, %s13794_s18 }
 0x1b1   : > { %p13797_p6 = pnand %p13795_p5, %p14233_p0  ;;  %p13804_p8 = por %p13803_p7, %p13802_p10 }
 0x1b3   : > { %p13798_p9 = pneg %p13797_p6 }
 0x1b5   : > { %p13805_p11 = pnand %p13804_p8, %p13798_p9 }
 0x1b7   : > { %13808 = shalt.err (!%p13805_p11)
}
 0x1b8   : > { %12490 = dma.hbm_to_vmem [thread:$0]  (!%p14221_p12), %s16412_s23, 64, %s1172_s10, [#allocation25]  }
 0x1b9   : > { %p16413_p13 = scmp.ne.s32.totalorder %s16407_s7, 0 }
 0x1ba   : > { %p16414_p1 = scmp.eq.s32.totalorder (!%p16413_p13), %s14185_s19, 0 }
 0x1bb   : > { %1243 = sbr.rel (%p16413_p13) target bundleno = 6274 (0x1882), region = 172 }
 0x1c2   : > { %13854 = dma.done.wait (%p16414_p1), [#allocation4], 32   ;;  %p16415_p2 = pmov %p16414_p1 }
 0x1c3   : > { %p16416_p0 = pmov %p16414_p1 }
 0x1c4   : > { %13856 = vsyncadd (%p16415_p2), [#allocation4], 4294967264 }
 0x1c5   : > { %13858 = dma.done.wait (%p16416_p0), [#allocation7], 192   ;;  %p16417_p3 = pmov %p16416_p0 }
 0x1c6   : > { %p16418_p4 = pmov %p16416_p0 }
 0x1c7   : > { %13860 = vsyncadd (%p16417_p3), [#allocation7], 4294967104 }
 0x1c8   : > { %13862 = dma.done.wait (%p16418_p4), [#allocation10], 6176   ;;  %p16419_p12 = pmov %p16416_p0 }
 0x1c9   : > { %p16420_p5 = pmov %p16416_p0 }
 0x1ca   : > { %13864 = vsyncadd (%p16419_p12), [#allocation10], 4294961120 }
 0x1cb   : > { %13866 = dma.done.wait (%p16420_p5), [#allocation13], 192   ;;  %p16421_p6 = pmov %p16416_p0 }
 0x1cc   : > { %p16422_p9 = pmov %p16416_p0 }
 0x1cd   : > { %13868 = vsyncadd (%p16421_p6), [#allocation13], 4294967104 }
 0x1ce   : > { %13870 = dma.done.wait (%p16422_p9), [#allocation16], 6176   ;;  %p16423_p10 = pmov %p16416_p0 }
 0x1cf   : > { %p16424_p7 = pmov %p16416_p0 }
 0x1d0   : > { %13872 = vsyncadd (%p16423_p10), [#allocation16], 4294961120 }
 0x1d1   : > { %13874 = dma.done.wait (%p16424_p7), [#allocation19], 6208   ;;  %p16425_p8 = pmov %p16416_p0 }
 0x1d2   : > { %p16426_p11 = pmov %p16416_p0 }
 0x1d3   : > { %13876 = vsyncadd (%p16425_p8), [#allocation19], 4294961088 }
 0x1d4   : > { %13878 = dma.done.wait (%p16426_p11), [#allocation22], 96   ;;  %p16427_p13 = pmov %p16416_p0 }
 0x1d5   : > { %p16428_p1 = pmov %p16416_p0 }
 0x1d6   : > { %13880 = vsyncadd (%p16427_p13), [#allocation22], 4294967200 }
 0x1d7   : > { %13882 = dma.done.wait (%p16428_p1), [#allocation25], 96   ;;  %p16429_p2 = pmov %p16416_p0 }
 0x1d8   : > { %s16430_s1 = sld [smem:[#allocation43_spill]]  ;;  %p1417_p0 = scmp.lt.s32.totalorder %s14185_s19, 1  ;;  %vm2868_vm0 = vcmask 1042432   ;;  %vm2864_vm1 = vcmask 23552   ;;  %vm13962_vm2 = vmmov 0   ;;  %vm3130_vm3 = vcmask 1046528  }
 0x1d9   : > { %13884 = vsyncadd (%p16429_p2), [#allocation25], 4294967200  ;;  %s16431_s7 = sld [smem:[#allocation37_spill]]  ;;  %s16432_s25 = sld [smem:[#allocation38_spill]]  ;;  %vm3307_vm4 = vcmask 64512   ;;  %vm3901_vm6 = vcmask 56320  }
 0x1da   : > { %s14473_s11 = scalar_select %p1417_p0, %s14185_s19, 1  ;;  %vm13964_vm9 = vmmov 1   ;;  %vm4995_vm11 = vcmask 121856  }
 0x1db   : > { %s16433_s26 = sld [smem:[#allocation44_spill]]  ;;  %s16434_s14 = sld [smem:[#allocation47_spill]]  ;;  %vm14873_vm10 = vmpackc.low %vm3130_vm3, %vm13964_vm9 }
 0x1dc   : > { %s14480_s20 = sshll.u32 %s14473_s11, 4  ;;  %s16435_s22 = sld [smem:[#allocation39_spill]] }
 0x1dd   : > { %s10468_s18 = sshll.u32 %s14473_s11, 3  ;;  %s11173_s3 = sshll.u32 %s14473_s11, 6 }
 0x1de   : > { %v12619_v1 = vld [vmem:[%s16430_s1 + $0x4] ss:$24 sps:$4 sm:$0xff]   ;;  %v12623_v3 = vld [vmem:[%s16430_s1] ss:$24 sps:$4 sm:$0xff]   ;;  %v12625_v5 = vld [vmem:[%s16430_s1 + $0x34] ss:$24 sps:$4 sm:$0xff]  }
 0x1df   : > { %v12621_v2 = vld [vmem:[%s16430_s1 + $0xc] ss:$24 sps:$4 sm:$0xff]   ;;  %2615 = vmatprep.subr.bf16.mxu0 %v12619_v1  ;;  %v12624_v4 = vld [vmem:[%s16430_s1 + $0x8] ss:$24 sps:$4 sm:$0xff]   ;;  %v12627_v6 = vld [vmem:[%s16430_s1 + $0x3c] ss:$24 sps:$4 sm:$0xff]   ;;  %s14487_s28 = scalar_lea.vmem %s16431_s7, %s14480_s20  ;;  %s14492_s10 = scalar_lea.vmem %s16432_s25, %s14480_s20 }
 0x1e0   : > { %2697 = vmatprep.subr.bf16.mxu1 %v12621_v2  ;;  %2616 = vmatpush1.bf16.msra.mxu0 %v12623_v3  ;;  %v12629_v7 = vld [vmem:[%s16430_s1 + $0x30] ss:$24 sps:$4 sm:$0xff]   ;;  %v12631_v9 = vld [vmem:[%s16430_s1 + $0x64] ss:$24 sps:$4 sm:$0xff]   ;;  %v12635_v11 = vld [vmem:[%s16430_s1 + $0x60] ss:$24 sps:$4 sm:$0xff]  }
 0x1e1   : > { %2698 = vmatpush1.bf16.msra.mxu1 %v12624_v4  ;;  %2617 = vmatprep.subr.bf16.mxu0 %v12625_v5  ;;  %v12630_v8 = vld [vmem:[%s16430_s1 + $0x38] ss:$24 sps:$4 sm:$0xff]   ;;  %v12633_v10 = vld [vmem:[%s16430_s1 + $0x6c] ss:$24 sps:$4 sm:$0xff]   ;;  %v12636_v12 = vld [vmem:[%s16430_s1 + $0x68] ss:$24 sps:$4 sm:$0xff]  }
 0x1e2   : > { %2699 = vmatprep.subr.bf16.mxu1 %v12627_v6  ;;  %v12637_v13 = vld [vmem:[%s16430_s1 + $0x94] ss:$24 sps:$4 sm:$0xff]   ;;  %v12641_v15 = vld [vmem:[%s16430_s1 + $0x90] ss:$24 sps:$4 sm:$0xff]   ;;  %v12643_v17 = vld [vmem:[%s16430_s1 + $0xc4] ss:$24 sps:$4 sm:$0xff]   ;;  %s1430_s7 = scalar_lea.vmem %s16435_s22, %s10468_s18 }
 0x1e3   : > { %v12639_v14 = vld [vmem:[%s16430_s1 + $0x9c] ss:$24 sps:$4 sm:$0xff]   ;;  %v12642_v16 = vld [vmem:[%s16430_s1 + $0x98] ss:$24 sps:$4 sm:$0xff]   ;;  %v12645_v18 = vld [vmem:[%s16430_s1 + $0xcc] ss:$24 sps:$4 sm:$0xff]  }
 0x1e4   : > { %2618 = vmatpush1.bf16.msra.mxu0 %v12629_v7  ;;  %v12647_v19 = vld [vmem:[%s16430_s1 + $0xc0] ss:$24 sps:$4 sm:$0xff]   ;;  %v12649_v21 = vld [vmem:[%s16430_s1 + $0xf4] ss:$24 sps:$4 sm:$0xff]   ;;  %v12653_v23 = vld [vmem:[%s16430_s1 + $0xf0] ss:$24 sps:$4 sm:$0xff]  }
 0x1e5   : > { %2700 = vmatpush1.bf16.msra.mxu1 %v12630_v8  ;;  %2619 = vmatprep.subr.bf16.mxu0 %v12631_v9  ;;  %v12648_v20 = vld [vmem:[%s16430_s1 + $0xc8] ss:$24 sps:$4 sm:$0xff]   ;;  %v12651_v22 = vld [vmem:[%s16430_s1 + $0xfc] ss:$24 sps:$4 sm:$0xff]   ;;  %v12654_v24 = vld [vmem:[%s16430_s1 + $0xf8] ss:$24 sps:$4 sm:$0xff]  }
 0x1e6   : > { %2701 = vmatprep.subr.bf16.mxu1 %v12633_v10  ;;  %v12655_v25 = vld [vmem:[%s16430_s1 + $0x124] ss:$24 sps:$4 sm:$0xff]   ;;  %v12659_v27 = vld [vmem:[%s16430_s1 + $0x120] ss:$24 sps:$4 sm:$0xff]   ;;  %v12661_v29 = vld [vmem:[%s16430_s1 + $0x154] ss:$24 sps:$4 sm:$0xff]  }
 0x1e7   : > { %v12657_v26 = vld [vmem:[%s16430_s1 + $0x12c] ss:$24 sps:$4 sm:$0xff]   ;;  %v12660_v28 = vld [vmem:[%s16430_s1 + $0x128] ss:$24 sps:$4 sm:$0xff]   ;;  %v12663_v30 = vld [vmem:[%s16430_s1 + $0x15c] ss:$24 sps:$4 sm:$0xff]  }
 0x1e8   : > { %2620 = vmatpush1.bf16.msra.mxu0 %v12635_v11  ;;  %v12665_v31 = vld [vmem:[%s16430_s1 + $0x150] ss:$24 sps:$4 sm:$0xff]   ;;  %v12667_v33 = vld [vmem:[%s16430_s1 + $0x184] ss:$24 sps:$4 sm:$0xff]   ;;  %v12671_v35 = vld [vmem:[%s16430_s1 + $0x180] ss:$24 sps:$4 sm:$0xff]  }
 0x1e9   : > { %2702 = vmatpush1.bf16.msra.mxu1 %v12636_v12  ;;  %2621 = vmatprep.subr.bf16.mxu0 %v12637_v13  ;;  %v12666_v32 = vld [vmem:[%s16430_s1 + $0x158] ss:$24 sps:$4 sm:$0xff]   ;;  %v12669_v34 = vld [vmem:[%s16430_s1 + $0x18c] ss:$24 sps:$4 sm:$0xff]   ;;  %v12672_v36 = vld [vmem:[%s16430_s1 + $0x188] ss:$24 sps:$4 sm:$0xff]  }
 0x1ea   : > { %2703 = vmatprep.subr.bf16.mxu1 %v12639_v14  ;;  %v12673_v37 = vld [vmem:[%s16430_s1 + $0x1b4] ss:$24 sps:$4 sm:$0xff]   ;;  %v12677_v39 = vld [vmem:[%s16430_s1 + $0x1b0] ss:$24 sps:$4 sm:$0xff]   ;;  %v12679_v41 = vld [vmem:[%s16430_s1 + $0x1e4] ss:$24 sps:$4 sm:$0xff]  }
 0x1eb   : > { %v12675_v38 = vld [vmem:[%s16430_s1 + $0x1bc] ss:$24 sps:$4 sm:$0xff]   ;;  %v12678_v40 = vld [vmem:[%s16430_s1 + $0x1b8] ss:$24 sps:$4 sm:$0xff]   ;;  %v12681_v42 = vld [vmem:[%s16430_s1 + $0x1ec] ss:$24 sps:$4 sm:$0xff]  }
 0x1ec   : > { %2622 = vmatpush1.bf16.msra.mxu0 %v12641_v15  ;;  %v12683_v43 = vld [vmem:[%s16430_s1 + $0x1e0] ss:$24 sps:$4 sm:$0xff]   ;;  %v12685_v45 = vld [vmem:[%s16430_s1 + $0x214] ss:$24 sps:$4 sm:$0xff]   ;;  %v12689_v49 = vld [vmem:[%s16430_s1 + $0x210] ss:$24 sps:$4 sm:$0xff]  }
 0x1ed   : > { %2704 = vmatpush1.bf16.msra.mxu1 %v12642_v16  ;;  %2623 = vmatprep.subr.bf16.mxu0 %v12643_v17  ;;  %v12684_v44 = vld [vmem:[%s16430_s1 + $0x1e8] ss:$24 sps:$4 sm:$0xff]   ;;  %v12687_v46 = vld [vmem:[%s16430_s1 + $0x21c] ss:$24 sps:$4 sm:$0xff]   ;;  %v12690_v50 = vld [vmem:[%s16430_s1 + $0x218] ss:$24 sps:$4 sm:$0xff]  }
 0x1ee   : > { %2705 = vmatprep.subr.bf16.mxu1 %v12645_v18  ;;  %v1447_v47 = vld [vmem:[%s14487_s28] sm:$0x77]  ;;  %v12697_v58 = vld [vmem:[%s16430_s1 + $0x274] ss:$24 sps:$4 sm:$0xff]   ;;  %v12701_v60 = vld [vmem:[%s16430_s1 + $0x270] ss:$24 sps:$4 sm:$0xff]  }
 0x1ef   : > { %v1449_v48 = vld [vmem:[%s14492_s10] sm:$0x77]  ;;  %v12699_v59 = vld [vmem:[%s16430_s1 + $0x27c] ss:$24 sps:$4 sm:$0xff]   ;;  %v12702_v61 = vld [vmem:[%s16430_s1 + $0x278] ss:$24 sps:$4 sm:$0xff]  }
 0x1f0   : > { %2624 = vmatpush1.bf16.msra.mxu0 %v12647_v19  ;;  %v1451_v51 = vadd.f32 %v1449_v48, %v1447_v47  ;;  %v12691_v52 = vld [vmem:[%s16430_s1 + $0x244] ss:$24 sps:$4 sm:$0xff]   ;;  %v12695_v55 = vld [vmem:[%s16430_s1 + $0x240] ss:$24 sps:$4 sm:$0xff]   ;;  %v12709_v2 = vld [vmem:[%s16430_s1 + $0x2d4] ss:$24 sps:$4 sm:$0xff]  }
 0x1f1   : > { %2706 = vmatpush1.bf16.msra.mxu1 %v12648_v20  ;;  %2625 = vmatprep.subr.bf16.mxu0 %v12649_v21  ;;  %v12693_v53 = vld [vmem:[%s16430_s1 + $0x24c] ss:$24 sps:$4 sm:$0xff]   ;;  %v12696_v56 = vld [vmem:[%s16430_s1 + $0x248] ss:$24 sps:$4 sm:$0xff]   ;;  %v12711_v3 = vld [vmem:[%s16430_s1 + $0x2dc] ss:$24 sps:$4 sm:$0xff]  }
 0x1f2   : > { %2707 = vmatprep.subr.bf16.mxu1 %v12651_v22  ;;  %v1455_v54 = vcombine.high %v1451_v51, %v1451_v51  ;;  %v12703_v62 = vld [vmem:[%s16430_s1 + $0x2a4] ss:$24 sps:$4 sm:$0xff]   ;;  %v12707_v0 = vld [vmem:[%s16430_s1 + $0x2a0] ss:$24 sps:$4 sm:$0xff]   ;;  %v12713_v4 = vld [vmem:[%s16430_s1 + $0x2d0] ss:$24 sps:$4 sm:$0xff]   ;;  %v14521_v8 = vpack.c.bf16 %v1451_v51, %v1451_v51 }
 0x1f3   : > { %v12705_v63 = vld [vmem:[%s16430_s1 + $0x2ac] ss:$24 sps:$4 sm:$0xff]   ;;  %v12708_v1 = vld [vmem:[%s16430_s1 + $0x2a8] ss:$24 sps:$4 sm:$0xff]   ;;  %v12714_v5 = vld [vmem:[%s16430_s1 + $0x2d8] ss:$24 sps:$4 sm:$0xff]  }
 0x1f4   : > { %2626 = vmatpush1.bf16.msra.mxu0 %v12653_v23  ;;  %v14503_v57 = vpack.c.bf16 %v1455_v54, %v1455_v54  ;;  %v12717_v6 = vld [vmem:[%s16430_s1 + $0x304] ss:$24 sps:$4 sm:$0xff]   ;;  %v12715_v9 = vld [vmem:[%s16430_s1 + $0x300] ss:$24 sps:$4 sm:$0xff]   ;;  %v12723_v11 = vld [vmem:[%s16430_s1 + $0x334] ss:$24 sps:$4 sm:$0xff]  }
 0x1f5   : > { %2708 = vmatpush1.bf16.msra.mxu1 %v12654_v24  ;;  %2627 = vmatprep.subr.bf16.mxu0 %v12655_v25  ;;  %v12720_v7 = vld [vmem:[%s16430_s1 + $0x30c] ss:$24 sps:$4 sm:$0xff]   ;;  %v12718_v10 = vld [vmem:[%s16430_s1 + $0x308] ss:$24 sps:$4 sm:$0xff]   ;;  %v12726_v12 = vld [vmem:[%s16430_s1 + $0x33c] ss:$24 sps:$4 sm:$0xff]  }
 0x1f6   : > { %2709 = vmatprep.subr.bf16.mxu1 %v12657_v26  ;;  %2647 = vmatprep.mubr.bf16.mxu0 %v14503_v57  ;;  %v12721_v13 = vld [vmem:[%s16430_s1 + $0x330] ss:$24 sps:$4 sm:$0xff]   ;;  %v12729_v15 = vld [vmem:[%s16430_s1 + $0x364] ss:$24 sps:$4 sm:$0xff]   ;;  %v12727_v17 = vld [vmem:[%s16430_s1 + $0x360] ss:$24 sps:$4 sm:$0xff]  }
 0x1f7   : > { %2729 = vmatprep.mubr.bf16.mxu1 %v14503_v57  ;;  %v12724_v14 = vld [vmem:[%s16430_s1 + $0x338] ss:$24 sps:$4 sm:$0xff]   ;;  %v12732_v16 = vld [vmem:[%s16430_s1 + $0x36c] ss:$24 sps:$4 sm:$0xff]   ;;  %v12730_v18 = vld [vmem:[%s16430_s1 + $0x368] ss:$24 sps:$4 sm:$0xff]  }
 0x1f8   : > { %2628 = vmatpush1.bf16.msra.mxu0 %v12659_v27  ;;  %v12735_v19 = vld [vmem:[%s16430_s1 + $0x394] ss:$24 sps:$4 sm:$0xff]   ;;  %v12733_v21 = vld [vmem:[%s16430_s1 + $0x390] ss:$24 sps:$4 sm:$0xff]   ;;  %v12741_v23 = vld [vmem:[%s16430_s1 + $0x3c4] ss:$24 sps:$4 sm:$0xff]  }
 0x1f9   : > { %2710 = vmatpush1.bf16.msra.mxu1 %v12660_v28  ;;  %2629 = vmatprep.subr.bf16.mxu0 %v12661_v29  ;;  %v12738_v20 = vld [vmem:[%s16430_s1 + $0x39c] ss:$24 sps:$4 sm:$0xff]   ;;  %v12736_v22 = vld [vmem:[%s16430_s1 + $0x398] ss:$24 sps:$4 sm:$0xff]   ;;  %v12744_v24 = vld [vmem:[%s16430_s1 + $0x3cc] ss:$24 sps:$4 sm:$0xff]  }
 0x1fa   : > { %2711 = vmatprep.subr.bf16.mxu1 %v12663_v30  ;;  %v12739_v25 = vld [vmem:[%s16430_s1 + $0x3c0] ss:$24 sps:$4 sm:$0xff]   ;;  %v12747_v27 = vld [vmem:[%s16430_s1 + $0x3f4] ss:$24 sps:$4 sm:$0xff]   ;;  %v12745_v29 = vld [vmem:[%s16430_s1 + $0x3f0] ss:$24 sps:$4 sm:$0xff]  }
 0x1fb   : > { %v12742_v26 = vld [vmem:[%s16430_s1 + $0x3c8] ss:$24 sps:$4 sm:$0xff]   ;;  %v12750_v28 = vld [vmem:[%s16430_s1 + $0x3fc] ss:$24 sps:$4 sm:$0xff]   ;;  %v12748_v30 = vld [vmem:[%s16430_s1 + $0x3f8] ss:$24 sps:$4 sm:$0xff]  }
 0x1fc   : > { %2630 = vmatpush1.bf16.msra.mxu0 %v12665_v31  ;;  %v12753_v31 = vld [vmem:[%s16430_s1 + $0x424] ss:$24 sps:$4 sm:$0xff]   ;;  %v12766_v47 = vld [vmem:[%s16430_s1 + $0x488] ss:$24 sps:$4 sm:$0xff]   ;;  %v12771_v48 = vld [vmem:[%s16430_s1 + $0x4b4] ss:$24 sps:$4 sm:$0xff]  }
 0x1fd   : > { %2712 = vmatpush1.bf16.msra.mxu1 %v12666_v32  ;;  %2631 = vmatprep.subr.bf16.mxu0 %v12667_v33  ;;  %v12756_v32 = vld [vmem:[%s16430_s1 + $0x42c] ss:$24 sps:$4 sm:$0xff]   ;;  %v12772_v51 = vld [vmem:[%s16430_s1 + $0x4b8] ss:$24 sps:$4 sm:$0xff]   ;;  %s16436_s25 = sld [smem:[#allocation48_spill]]  ;;  %s16442_s18 = sld [smem:[#allocation54_spill]] }
 0x1fe   : > { %2713 = vmatprep.subr.bf16.mxu1 %v12669_v34  ;;  %v1448_v33 = vld [vmem:[%s14487_s28 + $0x8] sm:$0x77]  ;;  %v12775_v54 = vld [vmem:[%s16430_s1 + $0x4e0] ss:$24 sps:$4 sm:$0xff]   ;;  %s16437_s28 = sld [smem:[#allocation50_spill]]  ;;  %s16454_s5 = sld [smem:[#allocation65_spill]] }
 0x1ff   : > { %v1450_v34 = vld [vmem:[%s14492_s10 + $0x8] sm:$0x77]  ;;  %s16438_s10 = sld [smem:[#allocation40_spill]]  ;;  %p16455_p4 = scmp.ne.s32.totalorder %s16404_s2, 0 }
 0x200   : > { %2632 = vmatpush1.bf16.msra.mxu0 %v12671_v35  ;;  %v12751_v35 = vld [vmem:[%s16430_s1 + $0x420] ss:$24 sps:$4 sm:$0xff]  }
 0x201   : > { %2714 = vmatpush1.bf16.msra.mxu1 %v12672_v36  ;;  %2633 = vmatprep.subr.bf16.mxu0 %v12673_v37  ;;  %v12754_v36 = vld [vmem:[%s16430_s1 + $0x428] ss:$24 sps:$4 sm:$0xff]   ;;  %v14553_v37 = vadd.f32 %v1450_v34, %v1448_v33  ;;  %v12843_v34 = vld [vmem:[%s16430_s1 + $0x1f4] ss:$24 sps:$4 sm:$0xff]  }
 0x202   : > { %2715 = vmatprep.subr.bf16.mxu1 %v12675_v38  ;;  %v12759_v38 = vld [vmem:[%s16430_s1 + $0x454] ss:$24 sps:$4 sm:$0xff]   ;;  %v12838_v33 = vld [vmem:[%s16430_s1 + $0x1c0] ss:$24 sps:$4 sm:$0xff]  }
 0x204   : > { %2634 = vmatpush1.bf16.msra.mxu0 %v12677_v39  ;;  %v12762_v39 = vld [vmem:[%s16430_s1 + $0x45c] ss:$24 sps:$4 sm:$0xff]  }
 0x205   : > { %2716 = vmatpush1.bf16.msra.mxu1 %v12678_v40  ;;  %2635 = vmatprep.subr.bf16.mxu0 %v12679_v41  ;;  %v1456_v40 = vcombine.high %v14553_v37, %v14553_v37  ;;  %v12757_v41 = vld [vmem:[%s16430_s1 + $0x450] ss:$24 sps:$4 sm:$0xff]   ;;  %s1435_s22 = scalar_lea.vmem %s16438_s10, %s14480_s20  ;;  %s16439_s20 = sld [smem:[#allocation53_spill]] }
 0x206   : > { %2717 = vmatprep.subr.bf16.mxu1 %v12681_v42  ;;  %v12760_v42 = vld [vmem:[%s16430_s1 + $0x458] ss:$24 sps:$4 sm:$0xff]   ;;  %s16444_s10 = sld [smem:[#allocation55_spill]] }
 0x208   : > { %2636 = vmatpush1.bf16.msra.mxu0 %v12683_v43  ;;  %v14561_v43 = vpack.c.bf16 %v1456_v40, %v1456_v40  ;;  %v12852_v40 = vld [vmem:[%s16430_s1 + $0x284] ss:$24 sps:$4 sm:$0xff]  }
 0x209   : > { %2718 = vmatpush1.bf16.msra.mxu1 %v12684_v44  ;;  %2637 = vmatprep.subr.bf16.mxu0 %v12685_v45  ;;  %v12765_v44 = vld [vmem:[%s16430_s1 + $0x484] ss:$24 sps:$4 sm:$0xff]  }
 0x20a   : > { %2719 = vmatprep.subr.bf16.mxu1 %v12687_v46  ;;  %v12768_v45 = vld [vmem:[%s16430_s1 + $0x48c] ss:$24 sps:$4 sm:$0xff]   ;;  %v12763_v46 = vld [vmem:[%s16430_s1 + $0x480] ss:$24 sps:$4 sm:$0xff]  }
 0x20c   : > { %2638 = vmatpush1.bf16.msra.mxu0 %v12689_v49  ;;  %v12774_v49 = vld [vmem:[%s16430_s1 + $0x4bc] ss:$24 sps:$4 sm:$0xff]  }
 0x20d   : > { %2720 = vmatpush1.bf16.msra.mxu1 %v12690_v50  ;;  %2639 = vmatprep.subr.bf16.mxu0 %v12691_v52  ;;  %v12769_v50 = vld [vmem:[%s16430_s1 + $0x4b0] ss:$24 sps:$4 sm:$0xff]   ;;  %v12777_v52 = vld [vmem:[%s16430_s1 + $0x4e4] ss:$24 sps:$4 sm:$0xff]  }
 0x20e   : > { %2721 = vmatprep.subr.bf16.mxu1 %v12693_v53  ;;  %v12780_v53 = vld [vmem:[%s16430_s1 + $0x4ec] ss:$24 sps:$4 sm:$0xff]  }
 0x210   : > { %2640 = vmatpush1.bf16.msra.mxu0 %v12695_v55  ;;  %v12778_v55 = vld [vmem:[%s16430_s1 + $0x4e8] ss:$24 sps:$4 sm:$0xff]  }
 0x211   : > { %2722 = vmatpush1.bf16.msra.mxu1 %v12696_v56  ;;  %2641 = vmatprep.subr.bf16.mxu0 %v12697_v58  ;;  %v12783_v56 = vld [vmem:[%s16430_s1 + $0x514] ss:$24 sps:$4 sm:$0xff]  }
 0x212   : > { %2723 = vmatprep.subr.bf16.mxu1 %v12699_v59  ;;  %v12786_v58 = vld [vmem:[%s16430_s1 + $0x51c] ss:$24 sps:$4 sm:$0xff]   ;;  %v12781_v59 = vld [vmem:[%s16430_s1 + $0x510] ss:$24 sps:$4 sm:$0xff]  }
 0x214   : > { %2642 = vmatpush1.bf16.msra.mxu0 %v12701_v60  ;;  %v12784_v60 = vld [vmem:[%s16430_s1 + $0x518] ss:$24 sps:$4 sm:$0xff]  }
 0x215   : > { %2724 = vmatpush1.bf16.msra.mxu1 %v12702_v61  ;;  %2643 = vmatprep.subr.bf16.mxu0 %v12703_v62  ;;  %v12789_v61 = vld [vmem:[%s16430_s1 + $0x544] ss:$24 sps:$4 sm:$0xff]  }
 0x216   : > { %2725 = vmatprep.subr.bf16.mxu1 %v12705_v63  ;;  %v12792_v62 = vld [vmem:[%s16430_s1 + $0x54c] ss:$24 sps:$4 sm:$0xff]   ;;  %v12787_v63 = vld [vmem:[%s16430_s1 + $0x540] ss:$24 sps:$4 sm:$0xff]  }
 0x218   : > { %2644 = vmatpush1.bf16.msra.mxu0 %v12707_v0  ;;  %v12790_v0 = vld [vmem:[%s16430_s1 + $0x548] ss:$24 sps:$4 sm:$0xff]  }
 0x219   : > { %2726 = vmatpush1.bf16.msra.mxu1 %v12708_v1  ;;  %2645 = vmatprep.subr.bf16.mxu0 %v12709_v2  ;;  %v12795_v1 = vld [vmem:[%s16430_s1 + $0x574] ss:$24 sps:$4 sm:$0xff]  }
 0x21a   : > { %2727 = vmatprep.subr.bf16.mxu1 %v12711_v3  ;;  %v12798_v2 = vld [vmem:[%s16430_s1 + $0x57c] ss:$24 sps:$4 sm:$0xff]   ;;  %v12793_v3 = vld [vmem:[%s16430_s1 + $0x570] ss:$24 sps:$4 sm:$0xff]  }
 0x21c   : > { %2646 = vmatpush1.bf16.msra.mxu0 %v12713_v4  ;;  %v12796_v4 = vld [vmem:[%s16430_s1 + $0x578] ss:$24 sps:$4 sm:$0xff]  }
 0x21d   : > { %2728 = vmatpush1.bf16.msra.mxu1 %v12714_v5  ;;  %2656 = vmatprep.subr.bf16.mxu0 %v12717_v6  ;;  %v12801_v5 = vld [vmem:[%s16430_s1 + $0x5a4] ss:$24 sps:$4 sm:$0xff]  }
 0x21e   : > { %2738 = vmatprep.subr.bf16.mxu1 %v12720_v7  ;;  %v12804_v6 = vld [vmem:[%s16430_s1 + $0x5ac] ss:$24 sps:$4 sm:$0xff]   ;;  %v12799_v7 = vld [vmem:[%s16430_s1 + $0x5a0] ss:$24 sps:$4 sm:$0xff]  }
 0x21f   : > { %2648 = vmatmul.mubr.bf16.vlgmr.msra.gmra.mrb[0].mxu0 %v14521_v8 }
 0x220   : > { %2730 = vmatmul.mubr.bf16.vlgmr.msra.gmra.mrb[0].mxu1 %v14521_v8  ;;  %2657 = vmatpush1.bf16.msra.mxu0 %v12715_v9  ;;  %v12802_v9 = vld [vmem:[%s16430_s1 + $0x5a8] ss:$24 sps:$4 sm:$0xff]  }
 0x221   : > { %2739 = vmatpush1.bf16.msra.mxu1 %v12718_v10  ;;  %2658 = vmatprep.subr.bf16.mxu0 %v12723_v11  ;;  %v12807_v10 = vld [vmem:[%s16430_s1 + $0x5d4] ss:$24 sps:$4 sm:$0xff]  }
 0x222   : > { %2740 = vmatprep.subr.bf16.mxu1 %v12726_v12  ;;  %2688 = vmatprep.mubr.bf16.mxu0 %v14561_v43  ;;  %v12810_v11 = vld [vmem:[%s16430_s1 + $0x5dc] ss:$24 sps:$4 sm:$0xff]   ;;  %v12805_v12 = vld [vmem:[%s16430_s1 + $0x5d0] ss:$24 sps:$4 sm:$0xff]  }
 0x223   : > { %2770 = vmatprep.mubr.bf16.mxu1 %v14561_v43 }
 0x224   : > { %2659 = vmatpush1.bf16.msra.mxu0 %v12721_v13  ;;  %v12808_v13 = vld [vmem:[%s16430_s1 + $0x5d8] ss:$24 sps:$4 sm:$0xff]  }
 0x225   : > { %2741 = vmatpush1.bf16.msra.mxu1 %v12724_v14  ;;  %2660 = vmatprep.subr.bf16.mxu0 %v12729_v15  ;;  %v12813_v14 = vld [vmem:[%s16430_s1 + $0x14] ss:$24 sps:$4 sm:$0xff]   ;;  %v14600_v15 = vpack.c.bf16 %v14553_v37, %v14553_v37  ;;  %v12844_v37 = vld [vmem:[%s16430_s1 + $0x220] ss:$24 sps:$4 sm:$0xff]  }
 0x226   : > { %2742 = vmatprep.subr.bf16.mxu1 %v12732_v16  ;;  %v12811_v16 = vld [vmem:[%s16430_s1 + $0x10] ss:$24 sps:$4 sm:$0xff]  }
 0x228   : > { %2661 = vmatpush1.bf16.msra.mxu0 %v12727_v17  ;;  %v12816_v17 = vld [vmem:[%s16430_s1 + $0x44] ss:$24 sps:$4 sm:$0xff]  }
 0x229   : > { %2743 = vmatpush1.bf16.msra.mxu1 %v12730_v18  ;;  %2662 = vmatprep.subr.bf16.mxu0 %v12735_v19  ;;  %v12814_v18 = vld [vmem:[%s16430_s1 + $0x40] ss:$24 sps:$4 sm:$0xff]   ;;  %v12819_v19 = vld [vmem:[%s16430_s1 + $0x74] ss:$24 sps:$4 sm:$0xff]  }
 0x22a   : > { %2744 = vmatprep.subr.bf16.mxu1 %v12738_v20  ;;  %v12817_v20 = vld [vmem:[%s16430_s1 + $0x70] ss:$24 sps:$4 sm:$0xff]  }
 0x22c   : > { %2663 = vmatpush1.bf16.msra.mxu0 %v12733_v21  ;;  %v12822_v21 = vld [vmem:[%s16430_s1 + $0xa4] ss:$24 sps:$4 sm:$0xff]  }
 0x22d   : > { %2745 = vmatpush1.bf16.msra.mxu1 %v12736_v22  ;;  %2664 = vmatprep.subr.bf16.mxu0 %v12741_v23  ;;  %v12820_v22 = vld [vmem:[%s16430_s1 + $0xa0] ss:$24 sps:$4 sm:$0xff]   ;;  %v12825_v23 = vld [vmem:[%s16430_s1 + $0xd4] ss:$24 sps:$4 sm:$0xff]  }
 0x22e   : > { %2746 = vmatprep.subr.bf16.mxu1 %v12744_v24  ;;  %v12823_v24 = vld [vmem:[%s16430_s1 + $0xd0] ss:$24 sps:$4 sm:$0xff]  }
 0x230   : > { %2665 = vmatpush1.bf16.msra.mxu0 %v12739_v25  ;;  %v12828_v25 = vld [vmem:[%s16430_s1 + $0x104] ss:$24 sps:$4 sm:$0xff]  }
 0x231   : > { %2747 = vmatpush1.bf16.msra.mxu1 %v12742_v26  ;;  %2666 = vmatprep.subr.bf16.mxu0 %v12747_v27  ;;  %v12831_v26 = vld [vmem:[%s16430_s1 + $0x134] ss:$24 sps:$4 sm:$0xff]   ;;  %v12829_v27 = vld [vmem:[%s16430_s1 + $0x130] ss:$24 sps:$4 sm:$0xff]  }
 0x232   : > { %2748 = vmatprep.subr.bf16.mxu1 %v12750_v28  ;;  %v12834_v28 = vld [vmem:[%s16430_s1 + $0x164] ss:$24 sps:$4 sm:$0xff]  }
 0x234   : > { %2667 = vmatpush1.bf16.msra.mxu0 %v12745_v29  ;;  %v12832_v29 = vld [vmem:[%s16430_s1 + $0x160] ss:$24 sps:$4 sm:$0xff]  }
 0x235   : > { %2749 = vmatpush1.bf16.msra.mxu1 %v12748_v30  ;;  %2668 = vmatprep.subr.bf16.mxu0 %v12753_v31  ;;  %v12837_v30 = vld [vmem:[%s16430_s1 + $0x194] ss:$24 sps:$4 sm:$0xff]   ;;  %v12835_v31 = vld [vmem:[%s16430_s1 + $0x190] ss:$24 sps:$4 sm:$0xff]  }
 0x236   : > { %2750 = vmatprep.subr.bf16.mxu1 %v12756_v32  ;;  %v12840_v32 = vld [vmem:[%s16430_s1 + $0x1c4] ss:$24 sps:$4 sm:$0xff]  }
 0x238   : > { %2669 = vmatpush1.bf16.msra.mxu0 %v12751_v35  ;;  %v12841_v35 = vld [vmem:[%s16430_s1 + $0x1f0] ss:$24 sps:$4 sm:$0xff]  }
 0x239   : > { %2751 = vmatpush1.bf16.msra.mxu1 %v12754_v36  ;;  %2670 = vmatprep.subr.bf16.mxu0 %v12759_v38  ;;  %v12846_v36 = vld [vmem:[%s16430_s1 + $0x224] ss:$24 sps:$4 sm:$0xff]   ;;  %v12849_v38 = vld [vmem:[%s16430_s1 + $0x254] ss:$24 sps:$4 sm:$0xff]  }
 0x23a   : > { %2752 = vmatprep.subr.bf16.mxu1 %v12762_v39  ;;  %v12847_v39 = vld [vmem:[%s16430_s1 + $0x250] ss:$24 sps:$4 sm:$0xff]  }
 0x23c   : > { %2671 = vmatpush1.bf16.msra.mxu0 %v12757_v41  ;;  %v12850_v41 = vld [vmem:[%s16430_s1 + $0x280] ss:$24 sps:$4 sm:$0xff]  }
 0x23d   : > { %2753 = vmatpush1.bf16.msra.mxu1 %v12760_v42  ;;  %2672 = vmatprep.subr.bf16.mxu0 %v12765_v44  ;;  %v12855_v42 = vld [vmem:[%s16430_s1 + $0x2b4] ss:$24 sps:$4 sm:$0xff]   ;;  %v12853_v44 = vld [vmem:[%s16430_s1 + $0x2b0] ss:$24 sps:$4 sm:$0xff]  }
 0x23e   : > { %2754 = vmatprep.subr.bf16.mxu1 %v12768_v45  ;;  %v12858_v45 = vld [vmem:[%s16430_s1 + $0x2e4] ss:$24 sps:$4 sm:$0xff]  }
 0x240   : > { %2673 = vmatpush1.bf16.msra.mxu0 %v12763_v46  ;;  %v12856_v46 = vld [vmem:[%s16430_s1 + $0x2e0] ss:$24 sps:$4 sm:$0xff]  }
 0x241   : > { %2755 = vmatpush1.bf16.msra.mxu1 %v12766_v47  ;;  %2674 = vmatprep.subr.bf16.mxu0 %v12771_v48  ;;  %v12861_v47 = vld [vmem:[%s16430_s1 + $0x314] ss:$24 sps:$4 sm:$0xff]   ;;  %v12859_v48 = vld [vmem:[%s16430_s1 + $0x310] ss:$24 sps:$4 sm:$0xff]  }
 0x242   : > { %2756 = vmatprep.subr.bf16.mxu1 %v12774_v49  ;;  %v12864_v49 = vld [vmem:[%s16430_s1 + $0x344] ss:$24 sps:$4 sm:$0xff]  }
 0x244   : > { %2675 = vmatpush1.bf16.msra.mxu0 %v12769_v50  ;;  %v12862_v50 = vld [vmem:[%s16430_s1 + $0x340] ss:$24 sps:$4 sm:$0xff]  }
 0x245   : > { %2757 = vmatpush1.bf16.msra.mxu1 %v12772_v51  ;;  %2676 = vmatprep.subr.bf16.mxu0 %v12777_v52  ;;  %v12867_v51 = vld [vmem:[%s16430_s1 + $0x374] ss:$24 sps:$4 sm:$0xff]   ;;  %v12865_v52 = vld [vmem:[%s16430_s1 + $0x370] ss:$24 sps:$4 sm:$0xff]  }
 0x246   : > { %2758 = vmatprep.subr.bf16.mxu1 %v12780_v53  ;;  %v12870_v53 = vld [vmem:[%s16430_s1 + $0x3a4] ss:$24 sps:$4 sm:$0xff]  }
 0x248   : > { %2677 = vmatpush1.bf16.msra.mxu0 %v12775_v54  ;;  %v12868_v54 = vld [vmem:[%s16430_s1 + $0x3a0] ss:$24 sps:$4 sm:$0xff]  }
 0x249   : > { %2759 = vmatpush1.bf16.msra.mxu1 %v12778_v55  ;;  %2678 = vmatprep.subr.bf16.mxu0 %v12783_v56  ;;  %v12873_v55 = vld [vmem:[%s16430_s1 + $0x3d4] ss:$24 sps:$4 sm:$0xff]   ;;  %v12876_v56 = vld [vmem:[%s16430_s1 + $0x404] ss:$24 sps:$4 sm:$0xff]  }
 0x24a   : > { %2760 = vmatprep.subr.bf16.mxu1 %v12786_v58  ;;  %v12879_v58 = vld [vmem:[%s16430_s1 + $0x434] ss:$24 sps:$4 sm:$0xff]  }
 0x24c   : > { %2679 = vmatpush1.bf16.msra.mxu0 %v12781_v59  ;;  %v12877_v59 = vld [vmem:[%s16430_s1 + $0x430] ss:$24 sps:$4 sm:$0xff]  }
 0x24d   : > { %2761 = vmatpush1.bf16.msra.mxu1 %v12784_v60  ;;  %2680 = vmatprep.subr.bf16.mxu0 %v12789_v61  ;;  %v12882_v60 = vld [vmem:[%s16430_s1 + $0x464] ss:$24 sps:$4 sm:$0xff]   ;;  %v13960_v61 = vmov 0.0  }
 0x24e   : > { %2762 = vmatprep.subr.bf16.mxu1 %v12792_v62  ;;  %v12880_v62 = vld [vmem:[%s16430_s1 + $0x460] ss:$24 sps:$4 sm:$0xff]  }
 0x250   : > { %2681 = vmatpush1.bf16.msra.mxu0 %v12787_v63  ;;  %v12885_v63 = vld [vmem:[%s16430_s1 + $0x494] ss:$24 sps:$4 sm:$0xff]  }
 0x251   : > { %2763 = vmatpush1.bf16.msra.mxu1 %v12790_v0  ;;  %2682 = vmatprep.subr.bf16.mxu0 %v12795_v1  ;;  %v12883_v0 = vld [vmem:[%s16430_s1 + $0x490] ss:$24 sps:$4 sm:$0xff]   ;;  %v12888_v1 = vld [vmem:[%s16430_s1 + $0x4c4] ss:$24 sps:$4 sm:$0xff]  }
 0x252   : > { %2764 = vmatprep.subr.bf16.mxu1 %v12798_v2  ;;  %v12886_v2 = vld [vmem:[%s16430_s1 + $0x4c0] ss:$24 sps:$4 sm:$0xff]  }
 0x254   : > { %2683 = vmatpush1.bf16.msra.mxu0 %v12793_v3  ;;  %v12891_v3 = vld [vmem:[%s16430_s1 + $0x4f4] ss:$24 sps:$4 sm:$0xff]  }
 0x255   : > { %2765 = vmatpush1.bf16.msra.mxu1 %v12796_v4  ;;  %2684 = vmatprep.subr.bf16.mxu0 %v12801_v5  ;;  %v12889_v4 = vld [vmem:[%s16430_s1 + $0x4f0] ss:$24 sps:$4 sm:$0xff]   ;;  %v12894_v5 = vld [vmem:[%s16430_s1 + $0x524] ss:$24 sps:$4 sm:$0xff]  }
 0x256   : > { %2766 = vmatprep.subr.bf16.mxu1 %v12804_v6  ;;  %v12892_v6 = vld [vmem:[%s16430_s1 + $0x520] ss:$24 sps:$4 sm:$0xff]  }
 0x258   : > { %2685 = vmatpush1.bf16.msra.mxu0 %v12799_v7  ;;  %v12897_v7 = vld [vmem:[%s16430_s1 + $0x554] ss:$24 sps:$4 sm:$0xff]  }
 0x259   : > { %2767 = vmatpush1.bf16.msra.mxu1 %v12802_v9  ;;  %2686 = vmatprep.subr.bf16.mxu0 %v12807_v10  ;;  %v12895_v9 = vld [vmem:[%s16430_s1 + $0x550] ss:$24 sps:$4 sm:$0xff]   ;;  %v12900_v10 = vld [vmem:[%s16430_s1 + $0x584] ss:$24 sps:$4 sm:$0xff]  }
 0x25a   : > { %2768 = vmatprep.subr.bf16.mxu1 %v12810_v11  ;;  %v12898_v11 = vld [vmem:[%s16430_s1 + $0x580] ss:$24 sps:$4 sm:$0xff]  }
 0x25c   : > { %2687 = vmatpush1.bf16.msra.mxu0 %v12805_v12  ;;  %v12903_v12 = vld [vmem:[%s16430_s1 + $0x5b4] ss:$24 sps:$4 sm:$0xff]  }
 0x25d   : > { %2769 = vmatpush1.bf16.msra.mxu1 %v12808_v13  ;;  %2779 = vmatprep.subr.bf16.mxu0 %v12813_v14  ;;  %v12901_v13 = vld [vmem:[%s16430_s1 + $0x5b0] ss:$24 sps:$4 sm:$0xff]   ;;  %v12906_v14 = vld [vmem:[%s16430_s1 + $0x5e4] ss:$24 sps:$4 sm:$0xff]  }
 0x25f   : > { %2689 = vmatmul.mubr.bf16.vlgmr.msra.gmra.mrb[0].mxu0 %v14600_v15 }
 0x260   : > { %2771 = vmatmul.mubr.bf16.vlgmr.msra.gmra.mrb[0].mxu1 %v14600_v15  ;;  %2780 = vmatpush1.bf16.msra.mxu0 %v12811_v16  ;;  %v12904_v16 = vld [vmem:[%s16430_s1 + $0x5e0] ss:$24 sps:$4 sm:$0xff]  }
 0x261   : > { %2811 = vmatprep.mubr.bf16.mxu0 %v14503_v57  ;;  %2781 = vmatprep.subr.bf16.mxu0 %v12816_v17  ;;  %v12826_v57 = vld [vmem:[%s16430_s1 + $0x100] ss:$24 sps:$4 sm:$0xff]  }
 0x262   : > { %2939 = vmatprep.mubr.f32.mxu1 %v13960_v61 }
 0x264   : > { %2782 = vmatpush1.bf16.msra.mxu0 %v12814_v18 }
 0x265   : > { %2783 = vmatprep.subr.bf16.mxu0 %v12819_v19 }
 0x268   : > { %2784 = vmatpush1.bf16.msra.mxu0 %v12817_v20 }
 0x269   : > { %2785 = vmatprep.subr.bf16.mxu0 %v12822_v21  ;;  %v10667_v21 = vld [vmem:[%s16433_s26 + $0x8] sm:$0x7f] }
 0x26c   : > { %2786 = vmatpush1.bf16.msra.mxu0 %v12820_v22 }
 0x26d   : > { %2787 = vmatprep.subr.bf16.mxu0 %v12825_v23 }
 0x270   : > { %2788 = vmatpush1.bf16.msra.mxu0 %v12823_v24 }
 0x271   : > { %2789 = vmatprep.subr.bf16.mxu0 %v12828_v25 }
 0x274   : > { %2790 = vmatpush1.bf16.msra.mxu0 %v12826_v57 }
 0x275   : > { %2791 = vmatprep.subr.bf16.mxu0 %v12831_v26 }
 0x278   : > { %2792 = vmatpush1.bf16.msra.mxu0 %v12829_v27  ;;  %v10674_v27 = vld [vmem:[%s16433_s26 + $0x10] sm:$0x7f] }
 0x279   : > { %2793 = vmatprep.subr.bf16.mxu0 %v12834_v28 }
 0x27c   : > { %2794 = vmatpush1.bf16.msra.mxu0 %v12832_v29 }
 0x27d   : > { %2795 = vmatprep.subr.bf16.mxu0 %v12837_v30  ;;  %v3146_v30 = vld [vmem:[%s16434_s14] sm:$0xff] }
 0x280   : > { %2796 = vmatpush1.bf16.msra.mxu0 %v12835_v31  ;;  %v3147_v31 = vld [vmem:[%s16434_s14 + $0x8] sm:$0xff] }
 0x281   : > { %2797 = vmatprep.subr.bf16.mxu0 %v12840_v32  ;;  %v14688_v32 = vpack.c.bf16 %v3147_v31, %v3146_v30 }
 0x284   : > { %2798 = vmatpush1.bf16.msra.mxu0 %v12838_v33  ;;  %v13961_v33 = vmov 0.0|0.0  }
 0x285   : > { %2799 = vmatprep.subr.bf16.mxu0 %v12843_v34  ;;  %v3148_v34 = vld [vmem:[%s16434_s14 + $0x10] sm:$0xff] }
 0x288   : > { %2800 = vmatpush1.bf16.msra.mxu0 %v12841_v35  ;;  %v3149_v35 = vld [vmem:[%s16434_s14 + $0x18] sm:$0xff] }
 0x289   : > { %2801 = vmatprep.subr.bf16.mxu0 %v12846_v36  ;;  %v14695_v36 = vpack.c.bf16 %v3149_v35, %v3148_v34  ;;  %v12907_v34 = vld [vmem:[#allocation9] ss:$24 sps:$4 sm:$0xff]   ;;  %v12909_v35 = vld [vmem:[#allocation9 + $0x4] ss:$24 sps:$4 sm:$0xff]  }
 0x28c   : > { %2802 = vmatpush1.bf16.msra.mxu0 %v12844_v37  ;;  %v3150_v37 = vld [vmem:[%s16434_s14 + $0x20] sm:$0xff] }
 0x28d   : > { %2803 = vmatprep.subr.bf16.mxu0 %v12849_v38  ;;  %v3151_v38 = vld [vmem:[%s16434_s14 + $0x28] sm:$0xff] }
 0x290   : > { %2804 = vmatpush1.bf16.msra.mxu0 %v12847_v39  ;;  %v14701_v39 = vpack.c.bf16 %v3151_v38, %v3150_v37  ;;  %v12912_v37 = vld [vmem:[#allocation9 + $0x14] ss:$24 sps:$4 sm:$0xff]  }
 0x291   : > { %2805 = vmatprep.subr.bf16.mxu0 %v12852_v40  ;;  %v3152_v40 = vld [vmem:[%s16434_s14 + $0x30] sm:$0xff]  ;;  %v12915_v38 = vld [vmem:[#allocation9 + $0x34] ss:$24 sps:$4 sm:$0xff]  }
 0x294   : > { %2806 = vmatpush1.bf16.msra.mxu0 %v12850_v41  ;;  %v3153_v41 = vld [vmem:[%s16434_s14 + $0x38] sm:$0xff] }
 0x295   : > { %2807 = vmatprep.subr.bf16.mxu0 %v12855_v42  ;;  %v11775_v42 = vpack.c.bf16 %v3153_v41, %v3152_v40  ;;  %v12913_v40 = vld [vmem:[#allocation9 + $0x30] ss:$24 sps:$4 sm:$0xff]   ;;  %v12916_v41 = vld [vmem:[#allocation9 + $0x40] ss:$24 sps:$4 sm:$0xff]  }
 0x298   : > { %2808 = vmatpush1.bf16.msra.mxu0 %v12853_v44  ;;  %v3154_v44 = vld [vmem:[%s16434_s14 + $0x40] sm:$0xff] }
 0x299   : > { %2809 = vmatprep.subr.bf16.mxu0 %v12858_v45  ;;  %v3155_v45 = vld [vmem:[%s16434_s14 + $0x48] sm:$0xff] }
 0x29c   : > { %2810 = vmatpush1.bf16.msra.mxu0 %v12856_v46  ;;  %v11778_v46 = vpack.c.bf16 %v3155_v45, %v3154_v44  ;;  %v12924_v44 = vld [vmem:[#allocation9 + $0x74] ss:$24 sps:$4 sm:$0xff]   ;;  %v12919_v45 = vld [vmem:[#allocation9 + $0x60] ss:$24 sps:$4 sm:$0xff]  }
 0x29d   : > { %2820 = vmatprep.subr.bf16.mxu0 %v12861_v47  ;;  %v3156_v47 = vld [vmem:[%s16434_s14 + $0x50] sm:$0xff] }
 0x29f   : > { %2812 = vmatmul.mubr.bf16.vlgmr.msra.gmra.mrb[4].mxu0 %v14521_v8  ;;  %v12871_v8 = vld [vmem:[%s16430_s1 + $0x3d0] ss:$24 sps:$4 sm:$0xff]  }
 0x2a0   : > { %2821 = vmatpush1.bf16.msra.mxu0 %v12859_v48  ;;  %2852 = vmatprep.mubr.bf16.mxu0 %v14561_v43  ;;  %v12874_v43 = vld [vmem:[%s16430_s1 + $0x400] ss:$24 sps:$4 sm:$0xff]   ;;  %s16450_s1 = sld [smem:[#allocation60_spill]] }
 0x2a1   : > { %2822 = vmatprep.subr.bf16.mxu0 %v12864_v49  ;;  %v3157_v48 = vld [vmem:[%s16434_s14 + $0x58] sm:$0xff]  ;;  %v3158_v49 = vld [vmem:[%s16434_s14 + $0x60] sm:$0xff] }
 0x2a4   : > { %2823 = vmatpush1.bf16.msra.mxu0 %v12862_v50  ;;  %v11781_v50 = vpack.c.bf16 %v3157_v48, %v3156_v47  ;;  %v12927_v47 = vld [vmem:[#allocation9 + $0x94] ss:$24 sps:$4 sm:$0xff]   ;;  %v12930_v48 = vld [vmem:[#allocation9 + $0xa4] ss:$24 sps:$4 sm:$0xff]  }
 0x2a5   : > { %2824 = vmatprep.subr.bf16.mxu0 %v12867_v51  ;;  %v3159_v51 = vld [vmem:[%s16434_s14 + $0x68] sm:$0xff] }
 0x2a8   : > { %2825 = vmatpush1.bf16.msra.mxu0 %v12865_v52  ;;  %v11784_v52 = vpack.c.bf16 %v3159_v51, %v3158_v49  ;;  %v12925_v49 = vld [vmem:[#allocation9 + $0x90] ss:$24 sps:$4 sm:$0xff]   ;;  %v12933_v51 = vld [vmem:[#allocation9 + $0xc4] ss:$24 sps:$4 sm:$0xff]  }
 0x2a9   : > { %2826 = vmatprep.subr.bf16.mxu0 %v12870_v53  ;;  %v3160_v53 = vld [vmem:[%s16434_s14 + $0x70] sm:$0xff] }
 0x2ac   : > { %2827 = vmatpush1.bf16.msra.mxu0 %v12868_v54  ;;  %v3161_v54 = vld [vmem:[%s16434_s14 + $0x78] sm:$0xff] }
 0x2ad   : > { %2828 = vmatprep.subr.bf16.mxu0 %v12873_v55  ;;  %v11787_v55 = vpack.c.bf16 %v3161_v54, %v3160_v53  ;;  %v12936_v53 = vld [vmem:[#allocation9 + $0xd4] ss:$24 sps:$4 sm:$0xff]   ;;  %v12934_v54 = vld [vmem:[#allocation9 + $0xd0] ss:$24 sps:$4 sm:$0xff]  }
 0x2b0   : > { %2829 = vmatpush1.bf16.msra.mxu0 %v12871_v8  ;;  %v3112_v8 = vlaneseq }
 0x2b1   : > { %2830 = vmatprep.subr.bf16.mxu0 %v12876_v56 }
 0x2b2   : > { %v14722_v56 = vshrl.u32 %v3112_v8, 7  ;;  %v12937_v8 = vld [vmem:[#allocation9 + $0xf0] ss:$24 sps:$4 sm:$0xff]  }
 0x2b4   : > { %2831 = vmatpush1.bf16.msra.mxu0 %v12874_v43  ;;  %v14725_v43 = vsub.s32 1, %v14722_v56 }
 0x2b5   : > { %2832 = vmatprep.subr.bf16.mxu0 %v12879_v58  ;;  %v3110_v58 = vld [vmem:[#allocation3] sm:$0x3] }
 0x2b8   : > { %2833 = vmatpush1.bf16.msra.mxu0 %v12877_v59  ;;  %v3119_v59 = vrot.slane %v3110_v58, %v14725_v43 }
 0x2b9   : > { %2834 = vmatprep.subr.bf16.mxu0 %v12882_v60 }
 0x2bc   : > { %2835 = vmatpush1.bf16.msra.mxu0 %v12880_v62 }
 0x2bd   : > { %2836 = vmatprep.subr.bf16.mxu0 %v12885_v63 }
 0x2c0   : > { %2837 = vmatpush1.bf16.msra.mxu0 %v12883_v0 }
 0x2c1   : > { %2838 = vmatprep.subr.bf16.mxu0 %v12888_v1 }
 0x2c4   : > { %2839 = vmatpush1.bf16.msra.mxu0 %v12886_v2 }
 0x2c5   : > { %2840 = vmatprep.subr.bf16.mxu0 %v12891_v3 }
 0x2c8   : > { %2841 = vmatpush1.bf16.msra.mxu0 %v12889_v4  ;;  %v14729_v4 = vsub.s32 0, %v14722_v56 }
 0x2c9   : > { %2842 = vmatprep.subr.bf16.mxu0 %v12894_v5 }
 0x2ca   : > { %v3115_v5 = vrot.slane %v3110_v58, %v14729_v4  ;;  %v12942_v58 = vld [vmem:[#allocation9 + $0x104] ss:$24 sps:$4 sm:$0xff]  }
 0x2cc   : > { %2843 = vmatpush1.bf16.msra.mxu0 %v12892_v6 }
 0x2cd   : > { %2844 = vmatprep.subr.bf16.mxu0 %v12897_v7 }
 0x2d0   : > { %2845 = vmatpush1.bf16.msra.mxu0 %v12895_v9 }
 0x2d1   : > { %2846 = vmatprep.subr.bf16.mxu0 %v12900_v10 }
 0x2d4   : > { %2847 = vmatpush1.bf16.msra.mxu0 %v12898_v11 }
 0x2d5   : > { %2848 = vmatprep.subr.bf16.mxu0 %v12903_v12 }
 0x2d8   : > { %2849 = vmatpush1.bf16.msra.mxu0 %v12901_v13 }
 0x2d9   : > { %2850 = vmatprep.subr.bf16.mxu0 %v12906_v14 }
 0x2dc   : > { %2851 = vmatpush1.bf16.msra.mxu0 %v12904_v16 }
 0x2dd   : > { %3855 = vmatprep.subr.bf16.mxu0 %v12912_v37  ;;  %v12972_v37 = vld [vmem:[#allocation9 + $0xfc] ss:$24 sps:$4 sm:$0xff]  }
 0x2df   : > { %2853 = vmatmul.mubr.bf16.vlgmr.msra.gmra.mrb[4].mxu0 %v14600_v15  ;;  %v2861_v15 = vld [vmem:[%s16433_s26] sm:$0x7f] }
 0x332   : > { %v2690_v17 = vpop.f32.mrb[0].mxu0 }
 0x333   : > { %v2772_v18 = vpop.f32.mrb[0].mxu1  ;;  %v2692_v19 = vpop.f32.mrb[1].mxu0 }
 0x334   : > { %v2774_v20 = vpop.f32.mrb[1].mxu1  ;;  %v2694_v22 = vpop.f32.mrb[2].mxu0 }
 0x335   : > { %10668 = vmatprep.subr.msk.mxu1 %vm2868_vm0, %v2774_v20  ;;  %v2776_v23 = vpop.f32.mrb[2].mxu1  ;;  %v2695_v24 = vpop.f32.mrb[3].mxu0 }
 0x336   : > { %10669 = vmatpush1.msk.msra.mxu1 %vm2868_vm0, %v2772_v18  ;;  %v2777_v25 = vpop.f32.mrb[3].mxu1 }
 0x337   : > { %10671 = vmatprep.subr.msk.mxu1 %vm2868_vm0, %v2692_v19  ;;  %10670 = vmatmul.mubr.msk.f32.vlgmr.msra.gmra.mrb[4].mxu1 %vm2864_vm1, %v10667_v21 }
 0x338   : > { %10672 = vmatpush1.msk.msra.mxu1 %vm2868_vm0, %v2690_v17  ;;  %3019 = vmatprep.mubr.f32.mxu1 %v13960_v61 }
 0x33f   : > { %10673 = vmatmul.mubr.msk.f32.vlgmr.msra.gmra.mrb[4].mxu1 %vm2864_vm1, %v2861_v15  ;;  %v3306_v15 = vld [vmem:[#allocation8] sm:$0xff] }
 0x340   : > { %3101 = vmatprep.mubr.f32.mxu1 %v13960_v61 }
 0x3b2   : > { %v2854_v57 = vpop.f32.mrb[4].mxu0 }
 0x3b3   : > { %v2856_v26 = vpop.f32.mrb[5].mxu0 }
 0x3b4   : > { %v2858_v28 = vpop.f32.mrb[6].mxu0  ;;  %10675 = vmatprep.subr.msk.mxu1 %vm2868_vm0, %v2856_v26 }
 0x3b5   : > { %v2859_v29 = vpop.f32.mrb[7].mxu0  ;;  %10676 = vmatpush1.msk.msra.mxu1 %vm2868_vm0, %v2854_v57  ;;  %vm6228_vm0 = vcmask 252928  }
 0x3b6   : > { %10677 = vmatmul.mubr.msk.f32.vlgmr.msra.gmra.mrb[4].mxu1 %vm2864_vm1, %v10674_v27  ;;  %11765 = vmatprep.subr.bf16.mxu1 %v13961_v33 }
 0x3b7   : > { %11767 = vmatpush3.bf16.msra.mxu1 %v14688_v32  ;;  %11397 = vmatprep.mubr.msk.f32.mxu1 %vm13962_vm2, %v13960_v61 }
 0x3b8   : > { %11768 = vmatprep.subr.bf16.mxu1 %v13961_v33 }
 0x3bb   : > { %11770 = vmatpush3.bf16.msra.mxu1 %v14695_v36 }
 0x3bc   : > { %11771 = vmatprep.subr.bf16.mxu1 %v13961_v33 }
 0x3bf   : > { %11773 = vmatpush3.bf16.msra.mxu1 %v14701_v39 }
 0x3c0   : > { %11774 = vmatprep.subr.bf16.mxu1 %v13961_v33 }
 0x3c3   : > { %11776 = vmatpush3.bf16.msra.mxu1 %v11775_v42 }
 0x3c4   : > { %11777 = vmatprep.subr.bf16.mxu1 %v13961_v33 }
 0x3c7   : > { %11779 = vmatpush3.bf16.msra.mxu1 %v11778_v46 }
 0x3c8   : > { %11780 = vmatprep.subr.bf16.mxu1 %v13961_v33 }
 0x3cb   : > { %11782 = vmatpush3.bf16.msra.mxu1 %v11781_v50 }
 0x3cc   : > { %11783 = vmatprep.subr.bf16.mxu1 %v13961_v33 }
 0x3cf   : > { %11785 = vmatpush3.bf16.msra.mxu1 %v11784_v52 }
 0x3d0   : > { %11786 = vmatprep.subr.bf16.mxu1 %v13961_v33 }
 0x3d3   : > { %11788 = vmatpush3.bf16.msra.mxu1 %v11787_v55 }
 0x3d4   : > { %11789 = vmatprep.subr.bf16.mxu1 %v13961_v33 }
 0x489   : > { %v3103_v60 = vpop.f32.mrb[4].mxu1 }
 0x48a   : > { %v3105_v62 = vpop.f32.mrb[5].mxu1  ;;  %v3122_v6 = vadd.f32 %v3115_v5, %v3103_v60  ;;  %v12945_v60 = vld [vmem:[#allocation9 + $0x124] ss:$24 sps:$4 sm:$0xff]  }
 0x48b   : > { %v3123_v63 = vadd.f32 %v3119_v59, %v3105_v62  ;;  %v12940_v59 = vld [vmem:[#allocation9 + $0x100] ss:$24 sps:$4 sm:$0xff]   ;;  %v12954_v5 = vld [vmem:[#allocation9 + $0x164] ss:$24 sps:$4 sm:$0xff]  }
 0x48c   : > { %v12943_v62 = vld [vmem:[#allocation9 + $0x120] ss:$24 sps:$4 sm:$0xff]  }
 0x48d   : > { %v3124_v0 = vsub.f32 0.0, %v3123_v63  ;;  %v12948_v63 = vld [vmem:[#allocation9 + $0x134] ss:$24 sps:$4 sm:$0xff]  }
 0x48f   : > { %v3125_v1 = vmul.f32 1.442695, %v3124_v0  ;;  %v12946_v0 = vld [vmem:[#allocation9 + $0x130] ss:$24 sps:$4 sm:$0xff]  }
 0x491   : > { %13243 = vpow2.f32 %v3125_v1  ;;  %v12949_v1 = vld [vmem:[#allocation9 + $0x150] ss:$24 sps:$4 sm:$0xff]  }
 0x49b   : > { %v13244_v2 = vpop.eup %13243 }
 0x49c   : > { %v3127_v3 = vadd.f32 1.0, %v13244_v2  ;;  %v12951_v2 = vld [vmem:[#allocation9 + $0x154] ss:$24 sps:$4 sm:$0xff]  }
 0x49e   : > { %13245 = vrcp.f32 %v3127_v3  ;;  %v12952_v3 = vld [vmem:[#allocation9 + $0x160] ss:$24 sps:$4 sm:$0xff]  }
 0x4a8   : > { %v13246_v7 = vpop.eup %13245 }
 0x4a9   : > { %v14732_v9 = vmul.f32 %v13246_v7, %v3122_v6  ;;  %v12957_v6 = vld [vmem:[#allocation9 + $0xc] ss:$24 sps:$4 sm:$0xff]   ;;  %v13963_v7 = vmov 0  }
 0x4aa   : > { %3887 = vmatprep.mubr.bf16.mxu0 %v13963_v7  ;;  %12618 = vset.pattern.permute.xlu0 %v13963_v7 }
 0x4ab   : > { %v3131_v10 = vsel %vm3130_vm3, %v14732_v9, 0.0  ;;  %v3138_v18 = vmul.f32 %v14732_v9, %v14732_v9 }
 0x4ac   : > { %v3132_v11 = vrot.slane %v3131_v10, 4 }
 0x4ad   : > { %v3139_v19 = vsel %vm3130_vm3, %v3138_v18, 0.0 }
 0x4ae   : > { %v3133_v12 = vadd.f32 %v3132_v11, %v3131_v10  ;;  %v3140_v20 = vrot.slane %v3139_v19, 4 }
 0x4b0   : > { %v3134_v13 = vrot.slane %v3133_v12, 2  ;;  %v3141_v21 = vadd.f32 %v3140_v20, %v3139_v19  ;;  %v14768_v19 = vsub.s32 2, %v14722_v56  ;;  %v12958_v56 = vld [vmem:[#allocation9 + $0x38] ss:$24 sps:$4 sm:$0xff]  }
 0x4b2   : > { %v3135_v14 = vadd.f32 %v3134_v13, %v3133_v12  ;;  %v3142_v22 = vrot.slane %v3141_v21, 2  ;;  %v3454_v13 = vld [vmem:[#allocation6] sm:$0x7] }
 0x4b3   : > { %v3468_v18 = vrot.slane %v3454_v13, %v14729_v4 }
 0x4b4   : > { %v3136_v16 = vrot.slane %v3135_v14, 1  ;;  %v3143_v23 = vadd.f32 %v3142_v22, %v3141_v21  ;;  %v3473_v22 = vrot.slane %v3454_v13, %v14725_v43 }
 0x4b6   : > { %v3137_v17 = vadd.f32 %v3136_v16, %v3135_v14  ;;  %v3144_v24 = vrot.slane %v3143_v23, 1 }
 0x4b8   : > { %11398 = vmatmul.mubr.f32.vlgmr.msra.gmra.mrb[6].mxu1 %v3137_v17  ;;  %v3145_v25 = vadd.f32 %v3144_v24, %v3143_v23  ;;  %v3479_v24 = vrot.slane %v3454_v13, %v14768_v19  ;;  %v4228_v13 = vld [vmem:[%s16437_s28 + $0x30] sm:$0xff] }
 0x4b9   : > { %11791 = vmatpush3.bf16.msra.mxu1 %v14688_v32  ;;  %11432 = vmatprep.mubr.msk.f32.mxu1 %vm13962_vm2, %v13960_v61 }
 0x4ba   : > { %11792 = vmatprep.subr.bf16.mxu1 %v13961_v33 }
 0x4bd   : > { %11794 = vmatpush3.bf16.msra.mxu1 %v14695_v36  ;;  %v12910_v36 = vld [vmem:[#allocation9 + $0x10] ss:$24 sps:$4 sm:$0xff]  }
 0x4be   : > { %11795 = vmatprep.subr.bf16.mxu1 %v13961_v33  ;;  %3856 = vmatpush1.bf16.msra.mxu0 %v12910_v36  ;;  %v12967_v36 = vld [vmem:[#allocation9 + $0xc8] ss:$24 sps:$4 sm:$0xff]  }
 0x4c1   : > { %11797 = vmatpush3.bf16.msra.mxu1 %v14701_v39  ;;  %v12918_v39 = vld [vmem:[#allocation9 + $0x44] ss:$24 sps:$4 sm:$0xff]  }
 0x4c2   : > { %11798 = vmatprep.subr.bf16.mxu1 %v13961_v33  ;;  %3857 = vmatprep.subr.bf16.mxu0 %v12918_v39  ;;  %v12975_v39 = vld [vmem:[#allocation9 + $0x12c] ss:$24 sps:$4 sm:$0xff]  }
 0x4c3   : > { %3858 = vmatpush1.bf16.msra.mxu0 %v12916_v41  ;;  %v12978_v41 = vld [vmem:[#allocation9 + $0x15c] ss:$24 sps:$4 sm:$0xff]  }
 0x4c4   : > { %3859 = vmatprep.subr.bf16.mxu0 %v12924_v44 }
 0x4c5   : > { %11800 = vmatpush3.bf16.msra.mxu1 %v11775_v42  ;;  %v12921_v42 = vld [vmem:[#allocation9 + $0x64] ss:$24 sps:$4 sm:$0xff]  }
 0x4c6   : > { %11801 = vmatprep.subr.bf16.mxu1 %v13961_v33 }
 0x4c9   : > { %11803 = vmatpush3.bf16.msra.mxu1 %v11778_v46  ;;  %v12922_v46 = vld [vmem:[#allocation9 + $0x70] ss:$24 sps:$4 sm:$0xff]  }
 0x4ca   : > { %11804 = vmatprep.subr.bf16.mxu1 %v13961_v33  ;;  %3860 = vmatpush1.bf16.msra.mxu0 %v12922_v46 }
 0x4cb   : > { %3861 = vmatprep.subr.bf16.mxu0 %v12930_v48 }
 0x4cd   : > { %11806 = vmatpush3.bf16.msra.mxu1 %v11781_v50  ;;  %v12928_v50 = vld [vmem:[#allocation9 + $0xa0] ss:$24 sps:$4 sm:$0xff]  }
 0x4ce   : > { %11807 = vmatprep.subr.bf16.mxu1 %v13961_v33  ;;  %3862 = vmatpush1.bf16.msra.mxu0 %v12928_v50 }
 0x4cf   : > { %3863 = vmatprep.subr.bf16.mxu0 %v12936_v53 }
 0x4d1   : > { %11809 = vmatpush3.bf16.msra.mxu1 %v11784_v52  ;;  %v12931_v52 = vld [vmem:[#allocation9 + $0xc0] ss:$24 sps:$4 sm:$0xff]  }
 0x4d2   : > { %11810 = vmatprep.subr.bf16.mxu1 %v13961_v33  ;;  %3864 = vmatpush1.bf16.msra.mxu0 %v12934_v54  ;;  %v10728_v54 = vld [vmem:[%s16436_s25 + $0x10] sm:$0xff] }
 0x4d3   : > { %3865 = vmatprep.subr.bf16.mxu0 %v12942_v58  ;;  %v10729_v58 = vld [vmem:[%s16436_s25 + $0x18] sm:$0x7f] }
 0x4d5   : > { %11812 = vmatpush3.bf16.msra.mxu1 %v11787_v55  ;;  %v12939_v55 = vld [vmem:[#allocation9 + $0xf4] ss:$24 sps:$4 sm:$0xff]  }
 0x4d6   : > { %11435 = vmatprep.subr.mxu1 %v13960_v61  ;;  %3866 = vmatpush1.bf16.msra.mxu0 %v12940_v59  ;;  %v3896_v59 = vld [vmem:[%s16436_s25] sm:$0xff] }
 0x4d7   : > { %3867 = vmatprep.subr.bf16.mxu0 %v12948_v63  ;;  %v10739_v63 = vld [vmem:[%s16436_s25 + $0x28] sm:$0x7f] }
 0x4d8   : > { %11433 = vmatmul.mubr.f32.vlgmr.msra.gmra.mrb[8].mxu1 %v3145_v25 }
 0x4d9   : > { %11437 = vmatprep.mubr.msk.f32.mxu1 %vm13962_vm2, %v13960_v61  ;;  %11436 = vmatpush3.msra.mxu1 %v3306_v15 }
 0x4da   : > { %11440 = vmatprep.subr.mxu1 %v13960_v61  ;;  %3868 = vmatpush1.bf16.msra.mxu0 %v12946_v0  ;;  %v4222_v0 = vld [vmem:[%s16437_s28] sm:$0xff] }
 0x4db   : > { %3869 = vmatprep.subr.bf16.mxu0 %v12954_v5  ;;  %v4225_v5 = vld [vmem:[%s16437_s28 + $0x18] sm:$0xff] }
 0x4de   : > { %3870 = vmatpush1.bf16.msra.mxu0 %v12952_v3  ;;  %v4224_v3 = vld [vmem:[%s16437_s28 + $0x10] sm:$0xff] }
 0x4df   : > { %11813 = vmatprep.subr.bf16.mxu0 %v13961_v33 }
 0x58b   : > { %v3228_v57 = vpop.f32.mrb[6].mxu1 }
 0x58c   : > { %v11399_v26 = vpop.f32.mrb[7].mxu1  ;;  %11438 = vmatmul.mubr.msk.f32.vlgmr.msra.gmra.mrb[10].mxu1 %vm3307_vm4, %v3228_v57  ;;  %v3302_v27 = vmul.f32 %v3228_v57, %v3228_v57 }
 0x58d   : > { %11441 = vmatpush3.msra.mxu1 %v3306_v15  ;;  %11442 = vmatprep.mubr.msk.f32.mxu1 %vm13962_vm2, %v13960_v61 }
 0x58e   : > { %3773 = vmatprep.subr.bf16.mxu1 %v12909_v35  ;;  %v12969_v35 = vld [vmem:[#allocation9 + $0xcc] ss:$24 sps:$4 sm:$0xff]  }
 0x5ab   : > { %v3298_v28 = vpop.f32.mrb[8].mxu1 }
 0x5ac   : > { %v3303_v29 = vsub.f32 %v3298_v28, %v3302_v27  ;;  %v11434_v30 = vpop.f32.mrb[9].mxu1  ;;  %v12955_v27 = vld [vmem:[#allocation9 + $0x8] ss:$24 sps:$4 sm:$0xff]  }
 0x5ad   : > { %v12963_v30 = vld [vmem:[#allocation9 + $0x6c] ss:$24 sps:$4 sm:$0xff]  }
 0x5ae   : > { %v3304_v31 = vadd.f32 1e-05, %v3303_v29  ;;  %v12960_v29 = vld [vmem:[#allocation9 + $0x3c] ss:$24 sps:$4 sm:$0xff]  }
 0x5b0   : > { %13247 = vrsqrt.f32 %v3304_v31  ;;  %v12961_v31 = vld [vmem:[#allocation9 + $0x68] ss:$24 sps:$4 sm:$0xff]  }
 0x5ba   : > { %v13248_v32 = vpop.eup %13247 }
 0x5bb   : > { %11443 = vmatmul.mubr.msk.f32.vlgmr.msra.gmra.mrb[12].mxu1 %vm3307_vm4, %v13248_v32  ;;  %v12966_v32 = vld [vmem:[#allocation9 + $0x9c] ss:$24 sps:$4 sm:$0xff]  }
 0x5bc   : > { %3774 = vmatpush1.bf16.msra.mxu1 %v12907_v34  ;;  %3805 = vmatprep.mubr.bf16.mxu1 %v13963_v7  ;;  %v12964_v34 = vld [vmem:[#allocation9 + $0x98] ss:$24 sps:$4 sm:$0xff]  }
 0x5bd   : > { %3775 = vmatprep.subr.bf16.mxu1 %v12915_v38  ;;  %v12970_v38 = vld [vmem:[#allocation9 + $0xf8] ss:$24 sps:$4 sm:$0xff]  }
 0x5c0   : > { %3776 = vmatpush1.bf16.msra.mxu1 %v12913_v40  ;;  %v12973_v40 = vld [vmem:[#allocation9 + $0x128] ss:$24 sps:$4 sm:$0xff]  }
 0x5c1   : > { %3777 = vmatprep.subr.bf16.mxu1 %v12921_v42  ;;  %v12976_v42 = vld [vmem:[#allocation9 + $0x158] ss:$24 sps:$4 sm:$0xff]  }
 0x5c4   : > { %3778 = vmatpush1.bf16.msra.mxu1 %v12919_v45 }
 0x5c5   : > { %3779 = vmatprep.subr.bf16.mxu1 %v12927_v47 }
 0x5c8   : > { %3780 = vmatpush1.bf16.msra.mxu1 %v12925_v49 }
 0x5c9   : > { %3781 = vmatprep.subr.bf16.mxu1 %v12933_v51 }
 0x5cc   : > { %3782 = vmatpush1.bf16.msra.mxu1 %v12931_v52 }
 0x5cd   : > { %3783 = vmatprep.subr.bf16.mxu1 %v12939_v55 }
 0x5d0   : > { %3784 = vmatpush1.bf16.msra.mxu1 %v12937_v8 }
 0x5d1   : > { %3785 = vmatprep.subr.bf16.mxu1 %v12945_v60  ;;  %v3897_v60 = vld [vmem:[%s16436_s25 + $0x8] sm:$0x7f] }
 0x5d4   : > { %3786 = vmatpush1.bf16.msra.mxu1 %v12943_v62  ;;  %v10738_v62 = vld [vmem:[%s16436_s25 + $0x20] sm:$0xff] }
 0x5d5   : > { %3787 = vmatprep.subr.bf16.mxu1 %v12951_v2 }
 0x5d8   : > { %3788 = vmatpush1.bf16.msra.mxu1 %v12949_v1  ;;  %v4223_v1 = vld [vmem:[%s16437_s28 + $0x8] sm:$0xff] }
 0x5d9   : > { %3814 = vmatprep.subr.bf16.mxu1 %v12957_v6  ;;  %v11814_v2 = vpack.c.bf16 %v4223_v1, %v4222_v0  ;;  %v11817_v6 = vpack.c.bf16 %v4225_v5, %v4224_v3 }
 0x65f   : > { %v3377_v10 = vpop.f32.mrb[10].mxu1 }
 0x660   : > { %v11439_v11 = vpop.f32.mrb[11].mxu1  ;;  %v3458_v12 = vrot.slane %v3377_v10, %v14729_v4  ;;  %v4226_v10 = vld [vmem:[%s16437_s28 + $0x20] sm:$0xff] }
 0x661   : > { %v4227_v11 = vld [vmem:[%s16437_s28 + $0x28] sm:$0xff] }
 0x662   : > { %v3459_v16 = vsub.f32 %v14732_v9, %v3458_v12  ;;  %v3482_v9 = vld [vmem:[%s1430_s7] sm:$0x7f]  ;;  %v11820_v12 = vpack.c.bf16 %v4227_v11, %v4226_v10  ;;  %v4382_v11 = vld [vmem:[#allocation14] sm:$0xff]  ;;  %s16443_s7 = smov %s16442_s18 }
 0x68e   : > { %v3450_v14 = vpop.f32.mrb[12].mxu1 }
 0x68f   : > { %v3463_v17 = vrot.slane %v3450_v14, %v14729_v4  ;;  %v11444_v20 = vpop.f32.mrb[13].mxu1  ;;  %v4229_v14 = vld [vmem:[%s16437_s28 + $0x38] sm:$0xff] }
 0x691   : > { %v3464_v21 = vmul.f32 %v3463_v17, %v3459_v16  ;;  %v11823_v16 = vpack.c.bf16 %v4229_v14, %v4228_v13  ;;  %v4230_v17 = vld [vmem:[%s16437_s28 + $0x40] sm:$0xff] }
 0x693   : > { %v3469_v23 = vmul.f32 %v3468_v18, %v3464_v21  ;;  %v4231_v18 = vld [vmem:[%s16437_s28 + $0x48] sm:$0xff]  ;;  %v4232_v21 = vld [vmem:[%s16437_s28 + $0x50] sm:$0xff] }
 0x694   : > { %v11826_v20 = vpack.c.bf16 %v4231_v18, %v4230_v17 }
 0x695   : > { %v3474_v25 = vadd.f32 %v3473_v22, %v3469_v23  ;;  %v4233_v22 = vld [vmem:[%s16437_s28 + $0x58] sm:$0xff] }
 0x696   : > { %v11829_v23 = vpack.c.bf16 %v4233_v22, %v4232_v21  ;;  %v12981_v22 = vld [vmem:[#allocation15 + $0x4] ss:$24 sps:$4 sm:$0xff]  }
 0x697   : > { %vm3475_vm5 = vcmp.gt.f32.partialorder %v3474_v25, 0.0  ;;  %v3480_v15 = vmul.f32 %v3479_v24, %v3474_v25  ;;  %v4234_v24 = vld [vmem:[%s16437_s28 + $0x60] sm:$0xff] }
 0x699   : > { %v3481_v57 = vsel %vm3475_vm5, %v3474_v25, %v3480_v15  ;;  %v4235_v25 = vld [vmem:[%s16437_s28 + $0x68] sm:$0xff] }
 0x69a   : > { %v3483_v26 = vadd.f32 %v3482_v9, %v3481_v57  ;;  %v11832_v15 = vpack.c.bf16 %v4235_v25, %v4234_v24  ;;  %v4236_v9 = vld [vmem:[%s16437_s28 + $0x70] sm:$0xff]  ;;  %v4237_v57 = vld [vmem:[%s16437_s28 + $0x78] sm:$0xff]  ;;  %v12984_v24 = vld [vmem:[#allocation15 + $0xc] ss:$24 sps:$4 sm:$0xff]  }
 0x69b   : > { %v12982_v25 = vld [vmem:[#allocation15 + $0x8] ss:$24 sps:$4 sm:$0xff]  }
 0x69c   : > { %v3484_v28 = vpack.c.bf16 %v3483_v26, %v3483_v26  ;;  %v11835_v26 = vpack.c.bf16 %v4237_v57, %v4236_v9  ;;  %v12987_v9 = vld [vmem:[#allocation15 + $0x34] ss:$24 sps:$4 sm:$0xff]   ;;  %v12988_v57 = vld [vmem:[#allocation15 + $0x38] ss:$24 sps:$4 sm:$0xff]  }
 0x69e   : > { %3806 = vmatmul.mubr.bf16.vlgmr.msra.gmra.mrb[16].mxu1 %v3484_v28  ;;  %3888 = vmatmul.mubr.bf16.vlgmr.msra.gmra.mrb[8].mxu0 %v3484_v28 }
 0x69f   : > { %3815 = vmatpush1.bf16.msra.mxu1 %v12955_v27  ;;  %3846 = vmatprep.mubr.bf16.mxu1 %v13963_v7  ;;  %v4176_v27 = vld [vmem:[#allocation11] sm:$0x3] }
 0x6a0   : > { %3816 = vmatprep.subr.bf16.mxu1 %v12960_v29  ;;  %11477 = vmatprep.mubr.msk.f32.mxu0 %vm13962_vm2, %v13960_v61 }
 0x6a1   : > { %11815 = vmatpush3.bf16.msra.mxu0 %v11814_v2 }
 0x6a2   : > { %11816 = vmatprep.subr.bf16.mxu0 %v13961_v33 }
 0x6a3   : > { %3817 = vmatpush1.bf16.msra.mxu1 %v12958_v56 }
 0x6a4   : > { %3818 = vmatprep.subr.bf16.mxu1 %v12963_v30 }
 0x6a5   : > { %11818 = vmatpush3.bf16.msra.mxu0 %v11817_v6 }
 0x6a6   : > { %11819 = vmatprep.subr.bf16.mxu0 %v13961_v33 }
 0x6a7   : > { %3819 = vmatpush1.bf16.msra.mxu1 %v12961_v31 }
 0x6a8   : > { %3820 = vmatprep.subr.bf16.mxu1 %v12966_v32 }
 0x6a9   : > { %11821 = vmatpush3.bf16.msra.mxu0 %v11820_v12 }
 0x6aa   : > { %11822 = vmatprep.subr.bf16.mxu0 %v13961_v33 }
 0x6ab   : > { %3821 = vmatpush1.bf16.msra.mxu1 %v12964_v34 }
 0x6ac   : > { %3822 = vmatprep.subr.bf16.mxu1 %v12969_v35 }
 0x6ad   : > { %11824 = vmatpush3.bf16.msra.mxu0 %v11823_v16 }
 0x6ae   : > { %11825 = vmatprep.subr.bf16.mxu0 %v13961_v33 }
 0x6af   : > { %3823 = vmatpush1.bf16.msra.mxu1 %v12967_v36 }
 0x6b0   : > { %3824 = vmatprep.subr.bf16.mxu1 %v12972_v37 }
 0x6b1   : > { %11827 = vmatpush3.bf16.msra.mxu0 %v11826_v20 }
 0x6b2   : > { %11828 = vmatprep.subr.bf16.mxu0 %v13961_v33 }
 0x6b3   : > { %3825 = vmatpush1.bf16.msra.mxu1 %v12970_v38 }
 0x6b4   : > { %3826 = vmatprep.subr.bf16.mxu1 %v12975_v39 }
 0x6b5   : > { %11830 = vmatpush3.bf16.msra.mxu0 %v11829_v23 }
 0x6b6   : > { %11831 = vmatprep.subr.bf16.mxu0 %v13961_v33 }
 0x6b7   : > { %3827 = vmatpush1.bf16.msra.mxu1 %v12973_v40 }
 0x6b8   : > { %3828 = vmatprep.subr.bf16.mxu1 %v12978_v41 }
 0x6b9   : > { %11833 = vmatpush3.bf16.msra.mxu0 %v11832_v15 }
 0x6ba   : > { %11834 = vmatprep.subr.bf16.mxu0 %v13961_v33 }
 0x6bb   : > { %3829 = vmatpush1.bf16.msra.mxu1 %v12976_v42 }
 0x6bd   : > { %11836 = vmatpush3.bf16.msra.mxu0 %v11835_v26 }
 0x6be   : > { %3847 = vmatmul.mubr.bf16.vlgmr.msra.gmra.mrb[20].mxu1 %v3484_v28  ;;  %11515 = vmatprep.subr.mxu0 %v13960_v61  ;;  %v4185_v28 = vrot.slane %v4176_v27, %v14725_v43 }
 0x6bf   : > { %3978 = vmatprep.mubr.f32.mxu1 %v13960_v61 }
 0x771   : > { %v3807_v44 = vpop.f32.mrb[16].mxu1  ;;  %v3889_v45 = vpop.f32.mrb[8].mxu0 }
 0x772   : > { %v3809_v46 = vpop.f32.mrb[17].mxu1  ;;  %v3891_v47 = vpop.f32.mrb[9].mxu0 }
 0x773   : > { %v3811_v48 = vpop.f32.mrb[18].mxu1  ;;  %v3893_v49 = vpop.f32.mrb[10].mxu0 }
 0x774   : > { %v3812_v50 = vpop.f32.mrb[19].mxu1  ;;  %v3894_v51 = vpop.f32.mrb[11].mxu0 }
 0x791   : > { %v3848_v52 = vpop.f32.mrb[20].mxu1 }
 0x792   : > { %v3850_v53 = vpop.f32.mrb[21].mxu1 }
 0x793   : > { %v3852_v55 = vpop.f32.mrb[22].mxu1  ;;  %10730 = vmatprep.subr.msk.mxu1 %vm3130_vm3, %v3850_v53 }
 0x794   : > { %v3853_v8 = vpop.f32.mrb[23].mxu1  ;;  %10731 = vmatpush1.msk.msra.mxu1 %vm3130_vm3, %v3848_v52 }
 0x795   : > { %10732 = vmatmul.mubr.msk.f32.vlgmr.msra.gmra.mrb[14].mxu1 %vm3901_vm6, %v10728_v54  ;;  %10734 = vmatprep.subr.msk.mxu1 %vm3130_vm3, %v3809_v46 }
 0x796   : > { %10735 = vmatpush1.msk.msra.mxu1 %vm3130_vm3, %v3807_v44  ;;  %3984 = vmatprep.mubr.f32.mxu1 %v13960_v61  ;;  %v4181_v44 = vrot.slane %v4176_v27, %v14729_v4  ;;  %v12993_v27 = vld [vmem:[#allocation15 + $0x64] ss:$24 sps:$4 sm:$0xff]  }
 0x797   : > { %10740 = vmatprep.subr.msk.mxu1 %vm3130_vm3, %v3891_v47 }
 0x799   : > { %10733 = vmatmul.mubr.msk.f32.gmra.mrb[24].mxu1 %vm3901_vm6, %v10729_v58 }
 0x79a   : > { %4067 = vmatprep.mubr.f32.mxu1 %v13960_v61 }
 0x79d   : > { %10736 = vmatmul.mubr.msk.f32.vlgmr.msra.gmra.mrb[14].mxu1 %vm3901_vm6, %v3896_v59 }
 0x79e   : > { %10741 = vmatpush1.msk.msra.mxu1 %vm3130_vm3, %v3889_v45  ;;  %4073 = vmatprep.mubr.f32.mxu1 %v13960_v61 }
 0x79f   : > { %11837 = vmatprep.subr.bf16.mxu1 %v13961_v33 }
 0x7a1   : > { %10737 = vmatmul.mubr.msk.f32.gmra.mrb[24].mxu1 %vm3901_vm6, %v3897_v60 }
 0x7a2   : > { %4159 = vmatprep.mubr.f32.mxu1 %v13960_v61 }
 0x7a5   : > { %10742 = vmatmul.mubr.msk.f32.vlgmr.msra.gmra.mrb[14].mxu1 %vm3901_vm6, %v10738_v62 }
 0x7a6   : > { %4165 = vmatprep.mubr.f32.mxu1 %v13960_v61  ;;  %11839 = vmatpush3.bf16.msra.mxu1 %v11814_v2 }
 0x7a7   : > { %11840 = vmatprep.subr.bf16.mxu1 %v13961_v33 }
 0x7a9   : > { %10743 = vmatmul.mubr.msk.f32.gmra.mrb[24].mxu1 %vm3901_vm6, %v10739_v63 }
 0x7aa   : > { %11512 = vmatprep.mubr.msk.f32.mxu1 %vm13962_vm2, %v13960_v61  ;;  %11842 = vmatpush3.bf16.msra.mxu1 %v11817_v6 }
 0x7ab   : > { %11843 = vmatprep.subr.bf16.mxu1 %v13961_v33 }
 0x7ae   : > { %11845 = vmatpush3.bf16.msra.mxu1 %v11820_v12 }
 0x7af   : > { %11846 = vmatprep.subr.bf16.mxu1 %v13961_v33 }
 0x7b2   : > { %11848 = vmatpush3.bf16.msra.mxu1 %v11823_v16 }
 0x7b3   : > { %11849 = vmatprep.subr.bf16.mxu1 %v13961_v33 }
 0x7b6   : > { %11851 = vmatpush3.bf16.msra.mxu1 %v11826_v20 }
 0x7b7   : > { %11852 = vmatprep.subr.bf16.mxu1 %v13961_v33 }
 0x7ba   : > { %11854 = vmatpush3.bf16.msra.mxu1 %v11829_v23  ;;  %v12979_v23 = vld [vmem:[#allocation15] ss:$24 sps:$4 sm:$0xff]  }
 0x7bb   : > { %11855 = vmatprep.subr.bf16.mxu1 %v13961_v33 }
 0x7be   : > { %11857 = vmatpush3.bf16.msra.mxu1 %v11832_v15  ;;  %v12985_v15 = vld [vmem:[#allocation15 + $0x30] ss:$24 sps:$4 sm:$0xff]  }
 0x7bf   : > { %11858 = vmatprep.subr.bf16.mxu1 %v13961_v33 }
 0x7c2   : > { %11860 = vmatpush3.bf16.msra.mxu1 %v11835_v26  ;;  %v12990_v26 = vld [vmem:[#allocation15 + $0x3c] ss:$24 sps:$4 sm:$0xff]  }
 0x7c3   : > { %4900 = vmatprep.subr.bf16.mxu1 %v12984_v24 }
 0x878   : > { %v4161_v29 = vpop.f32.mrb[14].mxu1 }
 0x879   : > { %v4163_v56 = vpop.f32.mrb[15].mxu1  ;;  %v4188_v45 = vadd.f32 %v4181_v44, %v4161_v29  ;;  %v12991_v29 = vld [vmem:[#allocation15 + $0x60] ss:$24 sps:$4 sm:$0xff]  }
 0x87a   : > { %v4189_v30 = vadd.f32 %v4185_v28, %v4163_v56  ;;  %v12994_v56 = vld [vmem:[#allocation15 + $0x68] ss:$24 sps:$4 sm:$0xff]  }
 0x87c   : > { %v4192_v31 = vsub.f32 0.0, %v4189_v30  ;;  %v4167_v32 = vpop.f32.mrb[24].mxu1  ;;  %v12999_v30 = vld [vmem:[#allocation15 + $0x94] ss:$24 sps:$4 sm:$0xff]  }
 0x87d   : > { %v4169_v34 = vpop.f32.mrb[25].mxu1  ;;  %v4190_v48 = vadd.f32 %v4181_v44, %v4167_v32  ;;  %v12997_v32 = vld [vmem:[#allocation15 + $0x90] ss:$24 sps:$4 sm:$0xff]   ;;  %v13017_v44 = vld [vmem:[#allocation15 + $0x124] ss:$24 sps:$4 sm:$0xff]  }
 0x87e   : > { %v4194_v35 = vmul.f32 1.442695, %v4192_v31  ;;  %v4191_v36 = vadd.f32 %v4185_v28, %v4169_v34  ;;  %v12996_v28 = vld [vmem:[#allocation15 + $0x6c] ss:$24 sps:$4 sm:$0xff]   ;;  %v13002_v31 = vld [vmem:[#allocation15 + $0x9c] ss:$24 sps:$4 sm:$0xff]  }
 0x87f   : > { %v13000_v34 = vld [vmem:[#allocation15 + $0x98] ss:$24 sps:$4 sm:$0xff]  }
 0x880   : > { %13249 = vpow2.f32 %v4194_v35  ;;  %v4193_v37 = vsub.f32 0.0, %v4191_v36  ;;  %v13005_v35 = vld [vmem:[#allocation15 + $0xc4] ss:$24 sps:$4 sm:$0xff]   ;;  %v13003_v36 = vld [vmem:[#allocation15 + $0xc0] ss:$24 sps:$4 sm:$0xff]  }
 0x882   : > { %v4196_v38 = vmul.f32 1.442695, %v4193_v37  ;;  %v13008_v37 = vld [vmem:[#allocation15 + $0xcc] ss:$24 sps:$4 sm:$0xff]  }
 0x884   : > { %13251 = vpow2.f32 %v4196_v38  ;;  %v13006_v38 = vld [vmem:[#allocation15 + $0xc8] ss:$24 sps:$4 sm:$0xff]  }
 0x88a   : > { %v13250_v39 = vpop.eup %13249 }
 0x88b   : > { %v4198_v40 = vadd.f32 1.0, %v13250_v39  ;;  %v13011_v39 = vld [vmem:[#allocation15 + $0xf4] ss:$24 sps:$4 sm:$0xff]  }
 0x88d   : > { %13253 = vrcp.f32 %v4198_v40  ;;  %v13009_v40 = vld [vmem:[#allocation15 + $0xf0] ss:$24 sps:$4 sm:$0xff]  }
 0x88e   : > { %v13252_v41 = vpop.eup %13251 }
 0x88f   : > { %v4199_v42 = vadd.f32 1.0, %v13252_v41  ;;  %v13014_v41 = vld [vmem:[#allocation15 + $0xfc] ss:$24 sps:$4 sm:$0xff]  }
 0x891   : > { %13255 = vrcp.f32 %v4199_v42  ;;  %v13012_v42 = vld [vmem:[#allocation15 + $0xf8] ss:$24 sps:$4 sm:$0xff]  }
 0x897   : > { %v13254_v46 = vpop.eup %13253 }
 0x898   : > { %v14837_v47 = vmul.f32 %v13254_v46, %v4188_v45  ;;  %v13015_v45 = vld [vmem:[#allocation15 + $0x120] ss:$24 sps:$4 sm:$0xff]   ;;  %v13020_v46 = vld [vmem:[#allocation15 + $0x12c] ss:$24 sps:$4 sm:$0xff]  }
 0x89a   : > { %v4212_v54 = vmul.f32 %v14837_v47, %v14837_v47 }
 0x89b   : > { %v13256_v49 = vpop.eup %13255 }
 0x89c   : > { %v14839_v50 = vmul.f32 %v13256_v49, %v4190_v48  ;;  %v13018_v48 = vld [vmem:[#allocation15 + $0x128] ss:$24 sps:$4 sm:$0xff]  }
 0x89d   : > { %v13021_v49 = vld [vmem:[#allocation15 + $0x150] ss:$24 sps:$4 sm:$0xff]  }
 0x89e   : > { %v4213_v51 = vmul.f32 %v14839_v50, %v14839_v50  ;;  %v4204_v52 = vsel %vm3130_vm3, %v14839_v50, 0.0 }
 0x89f   : > { %v4205_v53 = vadd.f32 %v4204_v52, %v14837_v47  ;;  %v13024_v52 = vld [vmem:[#allocation15 + $0x158] ss:$24 sps:$4 sm:$0xff]  }
 0x8a0   : > { %v4214_v55 = vsel %vm3130_vm3, %v4213_v51, 0.0  ;;  %v13023_v51 = vld [vmem:[#allocation15 + $0x154] ss:$24 sps:$4 sm:$0xff]  }
 0x8a1   : > { %v4206_v8 = vrot.slane %v4205_v53, 4  ;;  %v4215_v58 = vadd.f32 %v4214_v55, %v4212_v54  ;;  %v13029_v54 = vld [vmem:[#allocation15 + $0x14] ss:$24 sps:$4 sm:$0xff]  }
 0x8a3   : > { %v4207_v59 = vadd.f32 %v4206_v8, %v4205_v53  ;;  %v4216_v60 = vrot.slane %v4215_v58, 4  ;;  %v13026_v53 = vld [vmem:[#allocation15 + $0x15c] ss:$24 sps:$4 sm:$0xff]  }
 0x8a5   : > { %v4208_v62 = vrot.slane %v4207_v59, 2  ;;  %v4217_v63 = vadd.f32 %v4216_v60, %v4215_v58 }
 0x8a7   : > { %v4209_v0 = vadd.f32 %v4208_v62, %v4207_v59  ;;  %v4218_v1 = vrot.slane %v4217_v63, 2  ;;  %v4529_v59 = vld [vmem:[#allocation12] sm:$0x7] }
 0x8a9   : > { %v4210_v2 = vrot.slane %v4209_v0, 1  ;;  %v4219_v3 = vadd.f32 %v4218_v1, %v4217_v63  ;;  %v4545_v1 = vrot.slane %v4529_v59, %v14729_v4 }
 0x8ab   : > { %v4211_v5 = vadd.f32 %v4210_v2, %v4209_v0  ;;  %v4220_v6 = vrot.slane %v4219_v3, 1 }
 0x8ad   : > { %11478 = vmatmul.mubr.f32.vlgmr.msra.gmra.mrb[12].mxu0 %v4211_v5  ;;  %v4221_v10 = vadd.f32 %v4220_v6, %v4219_v3  ;;  %v4551_v6 = vrot.slane %v4529_v59, %v14725_v43 }
 0x8ae   : > { %11517 = vmatprep.mubr.msk.f32.mxu0 %vm13962_vm2, %v13960_v61  ;;  %11516 = vmatpush3.msra.mxu0 %v4382_v11 }
 0x8af   : > { %11513 = vmatmul.mubr.f32.vlgmr.msra.gmra.mrb[26].mxu1 %v4221_v10  ;;  %11520 = vmatprep.subr.mxu0 %v13960_v61 }
 0x8b0   : > { %4932 = vmatprep.mubr.bf16.mxu1 %v13963_v7  ;;  %4901 = vmatpush1.bf16.msra.mxu1 %v12982_v25  ;;  %v13032_v25 = vld [vmem:[#allocation15 + $0x44] ss:$24 sps:$4 sm:$0xff]  }
 0x8b1   : > { %4902 = vmatprep.subr.bf16.mxu1 %v12990_v26  ;;  %v13038_v26 = vld [vmem:[#allocation15 + $0xa4] ss:$24 sps:$4 sm:$0xff]  }
 0x8b4   : > { %4903 = vmatpush1.bf16.msra.mxu1 %v12988_v57  ;;  %v13033_v57 = vld [vmem:[#allocation15 + $0x70] ss:$24 sps:$4 sm:$0xff]  }
 0x8b5   : > { %4904 = vmatprep.subr.bf16.mxu1 %v12996_v28  ;;  %v13041_v28 = vld [vmem:[#allocation15 + $0xd4] ss:$24 sps:$4 sm:$0xff]  }
 0x8b8   : > { %4905 = vmatpush1.bf16.msra.mxu1 %v12994_v56  ;;  %v13044_v56 = vld [vmem:[#allocation15 + $0x104] ss:$24 sps:$4 sm:$0xff]  }
 0x8b9   : > { %4906 = vmatprep.subr.bf16.mxu1 %v13002_v31  ;;  %v13047_v31 = vld [vmem:[#allocation15 + $0x134] ss:$24 sps:$4 sm:$0xff]  }
 0x8bc   : > { %4907 = vmatpush1.bf16.msra.mxu1 %v13000_v34  ;;  %v13050_v34 = vld [vmem:[#allocation15 + $0x164] ss:$24 sps:$4 sm:$0xff]  }
 0x8bd   : > { %4908 = vmatprep.subr.bf16.mxu1 %v13008_v37 }
 0x8c0   : > { %4909 = vmatpush1.bf16.msra.mxu1 %v13006_v38 }
 0x8c1   : > { %4910 = vmatprep.subr.bf16.mxu1 %v13014_v41 }
 0x8c4   : > { %4911 = vmatpush1.bf16.msra.mxu1 %v13012_v42 }
 0x8c5   : > { %4912 = vmatprep.subr.bf16.mxu1 %v13020_v46 }
 0x8c8   : > { %4913 = vmatpush1.bf16.msra.mxu1 %v13018_v48 }
 0x8c9   : > { %4914 = vmatprep.subr.bf16.mxu1 %v13026_v53  ;;  %v10795_v53 = vld [vmem:[%s16439_s20 + $0x28] sm:$0xff] }
 0x8cc   : > { %4915 = vmatpush1.bf16.msra.mxu1 %v13024_v52  ;;  %v10794_v52 = vld [vmem:[%s16439_s20 + $0x20] sm:$0xff] }
 0x980   : > { %v4304_v12 = vpop.f32.mrb[12].mxu0 }
 0x981   : > { %v4378_v13 = vmul.f32 %v4304_v12, %v4304_v12  ;;  %v11479_v14 = vpop.f32.mrb[13].mxu0  ;;  %11518 = vmatmul.mubr.msk.f32.vlgmr.msra.gmra.mrb[14].mxu0 %vm3307_vm4, %v4304_v12  ;;  %v4559_v12 = vrot.slane %v4529_v59, %v14768_v19  ;;  %v4988_v59 = vld [vmem:[%s16439_s20 + $0x10] sm:$0xff] }
 0x982   : > { %v4374_v16 = vpop.f32.mrb[26].mxu1  ;;  %11521 = vmatpush3.msra.mxu0 %v4382_v11  ;;  %11522 = vmatprep.mubr.msk.f32.mxu0 %vm13962_vm2, %v13960_v61 }
 0x983   : > { %v4379_v17 = vsub.f32 %v4374_v16, %v4378_v13  ;;  %v11514_v18 = vpop.f32.mrb[27].mxu1  ;;  %4857 = vmatprep.subr.bf16.mxu0 %v12981_v22  ;;  %v4564_v16 = vld [vmem:[%s1435_s22] sm:$0xff] }
 0x985   : > { %v4380_v20 = vadd.f32 1e-05, %v4379_v17  ;;  %v4565_v17 = vld [vmem:[%s1435_s22 + $0x8] sm:$0x7f]  ;;  %s16445_s22 = sld [smem:[#allocation41_spill]] }
 0x987   : > { %13257 = vrsqrt.f32 %v4380_v20 }
 0x991   : > { %v13258_v21 = vpop.eup %13257 }
 0x992   : > { %11523 = vmatmul.mubr.msk.f32.vlgmr.msra.gmra.mrb[16].mxu0 %vm3307_vm4, %v13258_v21 }
 0x993   : > { %4889 = vmatprep.mubr.bf16.mxu0 %v13963_v7  ;;  %4858 = vmatpush1.bf16.msra.mxu0 %v12979_v23  ;;  %v13027_v23 = vld [vmem:[#allocation15 + $0x10] ss:$24 sps:$4 sm:$0xff]  }
 0x994   : > { %4859 = vmatprep.subr.bf16.mxu0 %v12987_v9  ;;  %v13035_v9 = vld [vmem:[#allocation15 + $0x74] ss:$24 sps:$4 sm:$0xff]  }
 0x997   : > { %4860 = vmatpush1.bf16.msra.mxu0 %v12985_v15  ;;  %v13030_v15 = vld [vmem:[#allocation15 + $0x40] ss:$24 sps:$4 sm:$0xff]  }
 0x998   : > { %4861 = vmatprep.subr.bf16.mxu0 %v12993_v27  ;;  %v13036_v27 = vld [vmem:[#allocation15 + $0xa0] ss:$24 sps:$4 sm:$0xff]  }
 0x99b   : > { %4862 = vmatpush1.bf16.msra.mxu0 %v12991_v29  ;;  %v13039_v29 = vld [vmem:[#allocation15 + $0xd0] ss:$24 sps:$4 sm:$0xff]  }
 0x99c   : > { %4863 = vmatprep.subr.bf16.mxu0 %v12999_v30  ;;  %v13042_v30 = vld [vmem:[#allocation15 + $0x100] ss:$24 sps:$4 sm:$0xff]  }
 0x99f   : > { %4864 = vmatpush1.bf16.msra.mxu0 %v12997_v32  ;;  %v13045_v32 = vld [vmem:[#allocation15 + $0x130] ss:$24 sps:$4 sm:$0xff]  }
 0x9a0   : > { %4865 = vmatprep.subr.bf16.mxu0 %v13005_v35  ;;  %v13048_v35 = vld [vmem:[#allocation15 + $0x160] ss:$24 sps:$4 sm:$0xff]  }
 0x9a3   : > { %4866 = vmatpush1.bf16.msra.mxu0 %v13003_v36 }
 0x9a4   : > { %4867 = vmatprep.subr.bf16.mxu0 %v13011_v39 }
 0x9a7   : > { %4868 = vmatpush1.bf16.msra.mxu0 %v13009_v40 }
 0x9a8   : > { %4869 = vmatprep.subr.bf16.mxu0 %v13017_v44 }
 0x9ab   : > { %4870 = vmatpush1.bf16.msra.mxu0 %v13015_v45 }
 0x9ac   : > { %4871 = vmatprep.subr.bf16.mxu0 %v13023_v51 }
 0x9af   : > { %4872 = vmatpush1.bf16.msra.mxu0 %v13021_v49 }
 0x9b0   : > { %4943 = vmatprep.subr.bf16.mxu0 %v13029_v54  ;;  %v10796_v54 = vld [vmem:[%s16439_s20 + $0x30] sm:$0xff] }
 0xa54   : > { %v4452_v55 = vpop.f32.mrb[14].mxu0 }
 0xa55   : > { %v11519_v8 = vpop.f32.mrb[15].mxu0  ;;  %v4533_v58 = vrot.slane %v4452_v55, %v14729_v4  ;;  %v10797_v55 = vld [vmem:[%s16439_s20 + $0x38] sm:$0x7f] }
 0xa56   : > { %v4986_v8 = vld [vmem:[%s16439_s20] sm:$0xff] }
 0xa57   : > { %v4534_v62 = vsub.f32 %v14837_v47, %v4533_v58  ;;  %v4535_v63 = vsub.f32 %v14839_v50, %v4533_v58  ;;  %v4987_v58 = vld [vmem:[%s16439_s20 + $0x8] sm:$0xff] }
 0xa65   : > { %v4525_v60 = vpop.f32.mrb[16].mxu0 }
 0xa66   : > { %v4539_v0 = vrot.slane %v4525_v60, %v14729_v4  ;;  %v11524_v2 = vpop.f32.mrb[17].mxu0 }
 0xa67   : > { %v4989_v2 = vld [vmem:[%s16439_s20 + $0x18] sm:$0x7f] }
 0xa68   : > { %v4540_v3 = vmul.f32 %v4539_v0, %v4534_v62  ;;  %v4541_v5 = vmul.f32 %v4539_v0, %v4535_v63 }
 0xa6a   : > { %v4546_v10 = vmul.f32 %v4545_v1, %v4540_v3  ;;  %v4547_v11 = vmul.f32 %v4545_v1, %v4541_v5  ;;  %v10810_v5 = vld [vmem:[%s16439_s20 + $0x40] sm:$0xff] }
 0xa6c   : > { %v4552_v13 = vadd.f32 %v4551_v6, %v4546_v10  ;;  %v4553_v14 = vadd.f32 %v4551_v6, %v4547_v11  ;;  %v10811_v6 = vld [vmem:[%s16439_s20 + $0x48] sm:$0xff]  ;;  %v10812_v10 = vld [vmem:[%s16439_s20 + $0x50] sm:$0xff]  ;;  %v10813_v11 = vld [vmem:[%s16439_s20 + $0x58] sm:$0x7f] }
 0xa6e   : > { %vm4554_vm7 = vcmp.gt.f32.partialorder %v4552_v13, 0.0  ;;  %vm4555_vm8 = vcmp.gt.f32.partialorder %v4553_v14, 0.0  ;;  %v4560_v47 = vmul.f32 %v4559_v12, %v4552_v13  ;;  %v4561_v50 = vmul.f32 %v4559_v12, %v4553_v14  ;;  %v5398_v12 = vld [vmem:[%s16442_s18] sm:$0xff]  ;;  %s11172_s18 = sshll.u32 %s14473_s11, 5  ;;  %s1414_s11 = sand.u32 1, %s13895_s16  }
 0xa6f   : > { %s10113_s6 = scalar_lea.sflag [#allocation5], %s1414_s11 }
 0xa70   : > { %v4562_v18 = vsel %vm4554_vm7, %v4552_v13, %v4560_v47  ;;  %v4563_v20 = vsel %vm4555_vm8, %v4553_v14, %v4561_v50  ;;  %v5399_v13 = vld [vmem:[%s16443_s7 + $0x8] sm:$0xff]  ;;  %v5400_v47 = vld [vmem:[%s16443_s7 + $0x10] sm:$0xff]  ;;  %v5401_v50 = vld [vmem:[%s16443_s7 + $0x18] sm:$0xff] }
 0xa71   : > { %v4566_v21 = vadd.f32 %v4564_v16, %v4562_v18  ;;  %v4567_v22 = vadd.f32 %v4565_v17, %v4563_v20  ;;  %v11880_v14 = vpack.c.bf16 %v5399_v13, %v5398_v12  ;;  %v11883_v16 = vpack.c.bf16 %v5401_v50, %v5400_v47  ;;  %v5402_v17 = vld [vmem:[%s16443_s7 + $0x20] sm:$0xff]  ;;  %v5403_v18 = vld [vmem:[%s16443_s7 + $0x28] sm:$0xff] }
 0xa72   : > { %v11886_v20 = vpack.c.bf16 %v5403_v18, %v5402_v17 }
 0xa73   : > { %v4568_v24 = vpack.c.bf16 %v4567_v22, %v4566_v21  ;;  %v5404_v21 = vld [vmem:[%s16443_s7 + $0x30] sm:$0xff]  ;;  %v5405_v22 = vld [vmem:[%s16443_s7 + $0x38] sm:$0xff] }
 0xa75   : > { %4890 = vmatmul.mubr.bf16.vlgmr.msra.gmra.mrb[20].mxu0 %v4568_v24  ;;  %4933 = vmatmul.mubr.bf16.vlgmr.msra.gmra.mrb[28].mxu1 %v4568_v24 }
 0xa76   : > { %4944 = vmatpush1.bf16.msra.mxu0 %v13027_v23  ;;  %4975 = vmatprep.mubr.bf16.mxu0 %v13963_v7  ;;  %v11889_v23 = vpack.c.bf16 %v5405_v22, %v5404_v21 }
 0xa77   : > { %4945 = vmatprep.subr.bf16.mxu0 %v13032_v25  ;;  %5078 = vmatprep.mubr.f32.mxu1 %v13960_v61  ;;  %v5407_v25 = vld [vmem:[%s16443_s7 + $0x48] sm:$0xff] }
 0xa7a   : > { %4946 = vmatpush1.bf16.msra.mxu0 %v13030_v15 }
 0xa7b   : > { %4947 = vmatprep.subr.bf16.mxu0 %v13035_v9  ;;  %v5408_v9 = vld [vmem:[%s16443_s7 + $0x50] sm:$0xff] }
 0xa7e   : > { %4948 = vmatpush1.bf16.msra.mxu0 %v13033_v57  ;;  %v5409_v57 = vld [vmem:[%s16443_s7 + $0x58] sm:$0xff] }
 0xa7f   : > { %4949 = vmatprep.subr.bf16.mxu0 %v13038_v26  ;;  %v11895_v26 = vpack.c.bf16 %v5409_v57, %v5408_v9 }
 0xa82   : > { %4950 = vmatpush1.bf16.msra.mxu0 %v13036_v27  ;;  %v5410_v27 = vld [vmem:[%s16443_s7 + $0x60] sm:$0xff] }
 0xa83   : > { %4951 = vmatprep.subr.bf16.mxu0 %v13041_v28  ;;  %v5411_v28 = vld [vmem:[%s16443_s7 + $0x68] sm:$0xff] }
 0xa86   : > { %4952 = vmatpush1.bf16.msra.mxu0 %v13039_v29  ;;  %v11898_v29 = vpack.c.bf16 %v5411_v28, %v5410_v27 }
 0xa87   : > { %4953 = vmatprep.subr.bf16.mxu0 %v13044_v56  ;;  %v5412_v56 = vld [vmem:[%s16443_s7 + $0x70] sm:$0xff] }
 0xa8a   : > { %4954 = vmatpush1.bf16.msra.mxu0 %v13042_v30  ;;  %v5413_v30 = vld [vmem:[%s16443_s7 + $0x78] sm:$0xff] }
 0xa8b   : > { %4955 = vmatprep.subr.bf16.mxu0 %v13047_v31  ;;  %v11901_v31 = vpack.c.bf16 %v5413_v30, %v5412_v56 }
 0xa8e   : > { %4956 = vmatpush1.bf16.msra.mxu0 %v13045_v32  ;;  %v5330_v32 = vld [vmem:[#allocation17] sm:$0x3] }
 0xa8f   : > { %4957 = vmatprep.subr.bf16.mxu0 %v13050_v34  ;;  %v5339_v34 = vrot.slane %v5330_v32, %v14725_v43 }
 0xa92   : > { %4958 = vmatpush1.bf16.msra.mxu0 %v13048_v35 }
 0xa93   : > { %11879 = vmatprep.subr.bf16.mxu0 %v13961_v33 }
 0xa95   : > { %4976 = vmatmul.mubr.bf16.vlgmr.msra.gmra.mrb[24].mxu0 %v4568_v24  ;;  %v5406_v24 = vld [vmem:[%s16443_s7 + $0x40] sm:$0xff] }
 0xa96   : > { %11557 = vmatprep.mubr.msk.f32.mxu0 %vm13962_vm2, %v13960_v61  ;;  %11881 = vmatpush3.bf16.msra.mxu0 %v11880_v14  ;;  %v11892_v15 = vpack.c.bf16 %v5407_v25, %v5406_v24 }
 0xa97   : > { %11882 = vmatprep.subr.bf16.mxu0 %v13961_v33 }
 0xa9a   : > { %11884 = vmatpush3.bf16.msra.mxu0 %v11883_v16 }
 0xa9b   : > { %11885 = vmatprep.subr.bf16.mxu0 %v13961_v33 }
 0xa9e   : > { %11887 = vmatpush3.bf16.msra.mxu0 %v11886_v20 }
 0xa9f   : > { %11888 = vmatprep.subr.bf16.mxu0 %v13961_v33 }
 0xaa2   : > { %11890 = vmatpush3.bf16.msra.mxu0 %v11889_v23 }
 0xaa3   : > { %11891 = vmatprep.subr.bf16.mxu0 %v13961_v33 }
 0xaa6   : > { %11893 = vmatpush3.bf16.msra.mxu0 %v11892_v15 }
 0xaa7   : > { %11894 = vmatprep.subr.bf16.mxu0 %v13961_v33 }
 0xaaa   : > { %11896 = vmatpush3.bf16.msra.mxu0 %v11895_v26 }
 0xaab   : > { %11897 = vmatprep.subr.bf16.mxu0 %v13961_v33 }
 0xaae   : > { %11899 = vmatpush3.bf16.msra.mxu0 %v11898_v29 }
 0xaaf   : > { %11900 = vmatprep.subr.bf16.mxu0 %v13961_v33 }
 0xab2   : > { %11902 = vmatpush3.bf16.msra.mxu0 %v11901_v31 }
 0xab3   : > { %11595 = vmatprep.subr.mxu0 %v13960_v61 }
 0xb48   : > { %v4891_v36 = vpop.f32.mrb[20].mxu0  ;;  %v4934_v37 = vpop.f32.mrb[28].mxu1 }
 0xb49   : > { %v4893_v38 = vpop.f32.mrb[21].mxu0  ;;  %v4936_v39 = vpop.f32.mrb[29].mxu1 }
 0xb4a   : > { %v4895_v40 = vpop.f32.mrb[22].mxu0  ;;  %v4938_v41 = vpop.f32.mrb[30].mxu1 }
 0xb4b   : > { %v11870_v44 = vpack.c.bf16 %v4895_v40, %v4891_v36  ;;  %v11864_v45 = vpack.c.bf16 %v4938_v41, %v4934_v37  ;;  %v4897_v46 = vpop.f32.mrb[23].mxu0  ;;  %v4940_v48 = vpop.f32.mrb[31].mxu1 }
 0xb4c   : > { %v11867_v49 = vpack.c.bf16 %v4897_v46, %v4893_v38  ;;  %v11861_v51 = vpack.c.bf16 %v4940_v48, %v4936_v39 }
 0xb4e   : > { %11863 = vmatprep.subr.msk.bf16.mxu1 %vm14873_vm10, %v11861_v51 }
 0xb4f   : > { %11866 = vmatpush1.bf16.msk.msra.mxu1 %vm14873_vm10, %v11864_v45 }
 0xb50   : > { %11869 = vmatprep.subr.msk.bf16.mxu1 %vm14873_vm10, %v11867_v49 }
 0xb52   : > { %10800 = vmatmul.mubr.msk.f32.vlgmr.msra.gmra.mrb[32].mxu1 %vm4995_vm11, %v10794_v52 }
 0xb53   : > { %11872 = vmatpush1.bf16.msk.msra.mxu1 %vm14873_vm10, %v11870_v44  ;;  %5084 = vmatprep.mubr.f32.mxu1 %v13960_v61 }
 0xb56   : > { %10801 = vmatmul.mubr.msk.f32.gmra.mrb[34].mxu1 %vm4995_vm11, %v10795_v53 }
 0xb57   : > { %5090 = vmatprep.mubr.f32.mxu1 %v13960_v61 }
 0xb5a   : > { %10802 = vmatmul.mubr.msk.f32.gmra.mrb[36].mxu1 %vm4995_vm11, %v10796_v54 }
 0xb5b   : > { %5096 = vmatprep.mubr.f32.mxu1 %v13960_v61 }
 0xb5e   : > { %10803 = vmatmul.mubr.msk.f32.gmra.mrb[38].mxu1 %vm4995_vm11, %v10797_v55 }
 0xb5f   : > { %5185 = vmatprep.mubr.f32.mxu1 %v13960_v61 }
 0xb62   : > { %10806 = vmatmul.mubr.msk.f32.vlgmr.msra.gmra.mrb[32].mxu1 %vm4995_vm11, %v4986_v8 }
 0xb63   : > { %5191 = vmatprep.mubr.f32.mxu1 %v13960_v61 }
 0xb66   : > { %10807 = vmatmul.mubr.msk.f32.gmra.mrb[34].mxu1 %vm4995_vm11, %v4987_v58 }
 0xb67   : > { %5197 = vmatprep.mubr.f32.mxu1 %v13960_v61 }
 0xb68   : > { %v4977_v60 = vpop.f32.mrb[24].mxu0 }
 0xb69   : > { %v4979_v62 = vpop.f32.mrb[25].mxu0 }
 0xb6a   : > { %v4981_v63 = vpop.f32.mrb[26].mxu0  ;;  %10808 = vmatmul.mubr.msk.f32.gmra.mrb[36].mxu1 %vm4995_vm11, %v4988_v59 }
 0xb6b   : > { %v11876_v0 = vpack.c.bf16 %v4981_v63, %v4977_v60  ;;  %v4983_v1 = vpop.f32.mrb[27].mxu0  ;;  %5203 = vmatprep.mubr.f32.mxu1 %v13960_v61 }
 0xb6c   : > { %v11873_v3 = vpack.c.bf16 %v4983_v1, %v4979_v62 }
 0xb6e   : > { %11875 = vmatprep.subr.msk.bf16.mxu1 %vm14873_vm10, %v11873_v3  ;;  %10809 = vmatmul.mubr.msk.f32.gmra.mrb[38].mxu1 %vm4995_vm11, %v4989_v2  ;;  %v5335_v2 = vrot.slane %v5330_v32, %v14729_v4 }
 0xb6f   : > { %11878 = vmatpush1.bf16.msk.msra.mxu1 %vm14873_vm10, %v11876_v0  ;;  %5297 = vmatprep.mubr.f32.mxu1 %v13960_v61 }
 0xb70   : > { %11903 = vmatprep.subr.bf16.mxu1 %v13961_v33 }
 0xb72   : > { %10816 = vmatmul.mubr.msk.f32.vlgmr.msra.gmra.mrb[32].mxu1 %vm4995_vm11, %v10810_v5 }
 0xb73   : > { %5303 = vmatprep.mubr.f32.mxu1 %v13960_v61  ;;  %11905 = vmatpush3.bf16.msra.mxu1 %v11880_v14 }
 0xb74   : > { %11906 = vmatprep.subr.bf16.mxu1 %v13961_v33 }
 0xb76   : > { %10817 = vmatmul.mubr.msk.f32.gmra.mrb[34].mxu1 %vm4995_vm11, %v10811_v6 }
 0xb77   : > { %5309 = vmatprep.mubr.f32.mxu1 %v13960_v61  ;;  %11908 = vmatpush3.bf16.msra.mxu1 %v11883_v16 }
 0xb78   : > { %11909 = vmatprep.subr.bf16.mxu1 %v13961_v33 }
 0xb7a   : > { %10818 = vmatmul.mubr.msk.f32.gmra.mrb[36].mxu1 %vm4995_vm11, %v10812_v10 }
 0xb7b   : > { %5315 = vmatprep.mubr.f32.mxu1 %v13960_v61  ;;  %11911 = vmatpush3.bf16.msra.mxu1 %v11886_v20 }
 0xb7c   : > { %11912 = vmatprep.subr.bf16.mxu1 %v13961_v33 }
 0xb7e   : > { %10819 = vmatmul.mubr.msk.f32.gmra.mrb[38].mxu1 %vm4995_vm11, %v10813_v11 }
 0xb7f   : > { %11592 = vmatprep.mubr.msk.f32.mxu1 %vm13962_vm2, %v13960_v61  ;;  %11914 = vmatpush3.bf16.msra.mxu1 %v11889_v23 }
 0xb80   : > { %11915 = vmatprep.subr.bf16.mxu1 %v13961_v33 }
 0xb83   : > { %11917 = vmatpush3.bf16.msra.mxu1 %v11892_v15 }
 0xb84   : > { %11918 = vmatprep.subr.bf16.mxu1 %v13961_v33 }
 0xb87   : > { %11920 = vmatpush3.bf16.msra.mxu1 %v11895_v26 }
 0xb88   : > { %11921 = vmatprep.subr.bf16.mxu1 %v13961_v33 }
 0xb8b   : > { %11923 = vmatpush3.bf16.msra.mxu1 %v11898_v29 }
 0xb8c   : > { %11924 = vmatprep.subr.bf16.mxu1 %v13961_v33 }
 0xb8f   : > { %11926 = vmatpush3.bf16.msra.mxu1 %v11901_v31 }
 0xc45   : > { %v5299_v35 = vpop.f32.mrb[32].mxu1 }
 0xc46   : > { %v5301_v36 = vpop.f32.mrb[33].mxu1  ;;  %v5342_v6 = vadd.f32 %v5335_v2, %v5299_v35 }
 0xc47   : > { %v5343_v37 = vadd.f32 %v5339_v34, %v5301_v36 }
 0xc49   : > { %v5350_v38 = vsub.f32 0.0, %v5343_v37  ;;  %v5305_v39 = vpop.f32.mrb[34].mxu1 }
 0xc4a   : > { %v5307_v40 = vpop.f32.mrb[35].mxu1  ;;  %v5344_v13 = vadd.f32 %v5335_v2, %v5305_v39 }
 0xc4b   : > { %v5354_v41 = vmul.f32 1.442695, %v5350_v38  ;;  %v5345_v44 = vadd.f32 %v5339_v34, %v5307_v40 }
 0xc4d   : > { %13259 = vpow2.f32 %v5354_v41  ;;  %v5351_v45 = vsub.f32 0.0, %v5345_v44  ;;  %v5311_v46 = vpop.f32.mrb[36].mxu1 }
 0xc4e   : > { %v5313_v48 = vpop.f32.mrb[37].mxu1  ;;  %v5346_v50 = vadd.f32 %v5335_v2, %v5311_v46 }
 0xc4f   : > { %v5356_v49 = vmul.f32 1.442695, %v5351_v45  ;;  %v5347_v51 = vadd.f32 %v5339_v34, %v5313_v48  ;;  %v5558_v45 = vld [vmem:[%s16444_s10] sm:$0xff]  ;;  %s1440_s10 = scalar_lea.vmem %s16445_s22, %s11172_s18  ;;  %s16446_s22 = sld [smem:[#allocation56_spill]] }
 0xc50   : > { %s16447_s18 = sld [smem:[#allocation58_spill]] }
 0xc51   : > { %13261 = vpow2.f32 %v5356_v49  ;;  %v5352_v52 = vsub.f32 0.0, %v5347_v51  ;;  %v5317_v53 = vpop.f32.mrb[38].mxu1 }
 0xc52   : > { %v5319_v54 = vpop.f32.mrb[39].mxu1  ;;  %v5348_v20 = vadd.f32 %v5335_v2, %v5317_v53  ;;  %v13065_v2 = vld [vmem:[#allocation20 + $0x64] ss:$24 sps:$4 sm:$0xff]  }
 0xc53   : > { %v5358_v55 = vmul.f32 1.442695, %v5352_v52  ;;  %v5349_v8 = vadd.f32 %v5339_v34, %v5319_v54 }
 0xc55   : > { %13263 = vpow2.f32 %v5358_v55  ;;  %v5353_v58 = vsub.f32 0.0, %v5349_v8  ;;  %v13053_v8 = vld [vmem:[#allocation20 + $0x4] ss:$24 sps:$4 sm:$0xff]  }
 0xc57   : > { %v13260_v59 = vpop.eup %13259  ;;  %v5360_v60 = vmul.f32 1.442695, %v5353_v58  ;;  %v13051_v58 = vld [vmem:[#allocation20] ss:$24 sps:$4 sm:$0xff]  }
 0xc58   : > { %v5362_v62 = vadd.f32 1.0, %v13260_v59  ;;  %v13056_v59 = vld [vmem:[#allocation20 + $0xc] ss:$24 sps:$4 sm:$0xff]  }
 0xc59   : > { %13265 = vpow2.f32 %v5360_v60  ;;  %v13054_v60 = vld [vmem:[#allocation20 + $0x8] ss:$24 sps:$4 sm:$0xff]   ;;  %6105 = vmatprep.subr.bf16.mxu1 %v13056_v59 }
 0xc5a   : > { %13267 = vrcp.f32 %v5362_v62  ;;  %v13057_v62 = vld [vmem:[#allocation20 + $0x30] ss:$24 sps:$4 sm:$0xff]  }
 0xc5b   : > { %v13262_v63 = vpop.eup %13261 }
 0xc5c   : > { %v5363_v0 = vadd.f32 1.0, %v13262_v63  ;;  %v13059_v63 = vld [vmem:[#allocation20 + $0x34] ss:$24 sps:$4 sm:$0xff]  }
 0xc5e   : > { %13269 = vrcp.f32 %v5363_v0  ;;  %v13060_v0 = vld [vmem:[#allocation20 + $0x38] ss:$24 sps:$4 sm:$0xff]  }
 0xc5f   : > { %v13264_v1 = vpop.eup %13263 }
 0xc60   : > { %v5364_v3 = vadd.f32 1.0, %v13264_v1  ;;  %v13062_v1 = vld [vmem:[#allocation20 + $0x3c] ss:$24 sps:$4 sm:$0xff]  }
 0xc62   : > { %13271 = vrcp.f32 %v5364_v3  ;;  %v13068_v3 = vld [vmem:[#allocation20 + $0x6c] ss:$24 sps:$4 sm:$0xff]  }
 0xc63   : > { %v13266_v5 = vpop.eup %13265 }
 0xc64   : > { %v13268_v10 = vpop.eup %13267  ;;  %v5365_v11 = vadd.f32 1.0, %v13266_v5  ;;  %v13063_v5 = vld [vmem:[#allocation20 + $0x60] ss:$24 sps:$4 sm:$0xff]  }
 0xc65   : > { %v14960_v12 = vmul.f32 %v13268_v10, %v5342_v6  ;;  %v13066_v6 = vld [vmem:[#allocation20 + $0x68] ss:$24 sps:$4 sm:$0xff]   ;;  %v13071_v10 = vld [vmem:[#allocation20 + $0x94] ss:$24 sps:$4 sm:$0xff]  }
 0xc66   : > { %13273 = vrcp.f32 %v5365_v11  ;;  %v13074_v11 = vld [vmem:[#allocation20 + $0x9c] ss:$24 sps:$4 sm:$0xff]  }
 0xc67   : > { %v5384_v22 = vmul.f32 %v14960_v12, %v14960_v12 }
 0xc68   : > { %v13270_v14 = vpop.eup %13269 }
 0xc69   : > { %v14962_v47 = vmul.f32 %v13270_v14, %v5344_v13  ;;  %v13069_v13 = vld [vmem:[#allocation20 + $0x90] ss:$24 sps:$4 sm:$0xff]  }
 0xc6a   : > { %v13072_v14 = vld [vmem:[#allocation20 + $0x98] ss:$24 sps:$4 sm:$0xff]  }
 0xc6b   : > { %v5385_v18 = vmul.f32 %v14962_v47, %v14962_v47  ;;  %v5374_v24 = vadd.f32 %v14962_v47, %v14960_v12 }
 0xc6c   : > { %v13272_v16 = vpop.eup %13271 }
 0xc6d   : > { %v14964_v17 = vmul.f32 %v13272_v16, %v5346_v50  ;;  %v5388_v9 = vadd.f32 %v5385_v18, %v5384_v22  ;;  %v13077_v50 = vld [vmem:[#allocation20 + $0xc4] ss:$24 sps:$4 sm:$0xff]   ;;  %v13075_v16 = vld [vmem:[#allocation20 + $0xc0] ss:$24 sps:$4 sm:$0xff]   ;;  %v13081_v22 = vld [vmem:[#allocation20 + $0xf0] ss:$24 sps:$4 sm:$0xff]  }
 0xc6e   : > { %v13080_v18 = vld [vmem:[#allocation20 + $0xcc] ss:$24 sps:$4 sm:$0xff]  }
 0xc6f   : > { %v5386_v23 = vmul.f32 %v14964_v17, %v14964_v17  ;;  %v5375_v15 = vadd.f32 %v5374_v24, %v14964_v17  ;;  %v13084_v24 = vld [vmem:[#allocation20 + $0xf8] ss:$24 sps:$4 sm:$0xff]  }
 0xc70   : > { %v13274_v21 = vpop.eup %13273 }
 0xc71   : > { %v14974_v25 = vmul.f32 %v13274_v21, %v5348_v20  ;;  %v5389_v28 = vadd.f32 %v5388_v9, %v5386_v23  ;;  %v13078_v20 = vld [vmem:[#allocation20 + $0xc8] ss:$24 sps:$4 sm:$0xff]   ;;  %v13083_v21 = vld [vmem:[#allocation20 + $0xf4] ss:$24 sps:$4 sm:$0xff]  }
 0xc72   : > { %v13086_v23 = vld [vmem:[#allocation20 + $0xfc] ss:$24 sps:$4 sm:$0xff]   ;;  %v13087_v9 = vld [vmem:[#allocation20 + $0x120] ss:$24 sps:$4 sm:$0xff]  }
 0xc73   : > { %v5387_v57 = vmul.f32 %v14974_v25, %v14974_v25  ;;  %v5376_v26 = vsel %vm3130_vm3, %v14974_v25, 0.0 }
 0xc74   : > { %v5377_v27 = vadd.f32 %v5376_v26, %v5375_v15  ;;  %v13089_v15 = vld [vmem:[#allocation20 + $0x124] ss:$24 sps:$4 sm:$0xff]  }
 0xc75   : > { %v5390_v29 = vsel %vm3130_vm3, %v5387_v57, 0.0  ;;  %v13090_v57 = vld [vmem:[#allocation20 + $0x128] ss:$24 sps:$4 sm:$0xff]   ;;  %v13092_v26 = vld [vmem:[#allocation20 + $0x12c] ss:$24 sps:$4 sm:$0xff]  }
 0xc76   : > { %v5378_v56 = vrot.slane %v5377_v27, 4  ;;  %v5391_v30 = vadd.f32 %v5390_v29, %v5389_v28  ;;  %v13093_v28 = vld [vmem:[#allocation20 + $0x150] ss:$24 sps:$4 sm:$0xff]   ;;  %v13098_v29 = vld [vmem:[#allocation20 + $0x15c] ss:$24 sps:$4 sm:$0xff]  }
 0xc78   : > { %v5379_v31 = vadd.f32 %v5378_v56, %v5377_v27  ;;  %v5392_v32 = vrot.slane %v5391_v30, 4  ;;  %v13095_v27 = vld [vmem:[#allocation20 + $0x154] ss:$24 sps:$4 sm:$0xff]   ;;  %v13096_v56 = vld [vmem:[#allocation20 + $0x158] ss:$24 sps:$4 sm:$0xff]  }
 0xc7a   : > { %v5380_v34 = vrot.slane %v5379_v31, 2  ;;  %v5393_v35 = vadd.f32 %v5392_v32, %v5391_v30  ;;  %v13101_v30 = vld [vmem:[#allocation20 + $0x14] ss:$24 sps:$4 sm:$0xff]  }
 0xc7c   : > { %v5381_v36 = vadd.f32 %v5380_v34, %v5379_v31  ;;  %v5394_v37 = vrot.slane %v5393_v35, 2 }
 0xc7e   : > { %v5382_v38 = vrot.slane %v5381_v36, 1  ;;  %v5395_v39 = vadd.f32 %v5394_v37, %v5393_v35  ;;  %v5705_v35 = vld [vmem:[#allocation18] sm:$0x7] }
 0xc80   : > { %v5383_v40 = vadd.f32 %v5382_v38, %v5381_v36  ;;  %v5396_v41 = vrot.slane %v5395_v39, 1  ;;  %v5725_v38 = vrot.slane %v5705_v35, %v14729_v4 }
 0xc82   : > { %11558 = vmatmul.mubr.f32.vlgmr.msra.gmra.mrb[18].mxu0 %v5383_v40  ;;  %v5397_v44 = vadd.f32 %v5396_v41, %v5395_v39 }
 0xc83   : > { %11597 = vmatprep.mubr.msk.f32.mxu0 %vm13962_vm2, %v13960_v61  ;;  %11596 = vmatpush3.msra.mxu0 %v5558_v45 }
 0xc84   : > { %11593 = vmatmul.mubr.f32.vlgmr.msra.gmra.mrb[40].mxu1 %v5397_v44  ;;  %11600 = vmatprep.subr.mxu0 %v13960_v61 }
 0xc85   : > { %6137 = vmatprep.mubr.bf16.mxu1 %v13963_v7  ;;  %6106 = vmatpush1.bf16.msra.mxu1 %v13054_v60 }
 0xc86   : > { %6107 = vmatprep.subr.bf16.mxu1 %v13062_v1 }
 0xc89   : > { %6108 = vmatpush1.bf16.msra.mxu1 %v13060_v0 }
 0xc8a   : > { %6109 = vmatprep.subr.bf16.mxu1 %v13068_v3  ;;  %v5757_v3 = vld [vmem:[%s1440_s10 + $0x18] sm:$0x7f] }
 0xc8d   : > { %6110 = vmatpush1.bf16.msra.mxu1 %v13066_v6 }
 0xc8e   : > { %6111 = vmatprep.subr.bf16.mxu1 %v13074_v11 }
 0xc91   : > { %6112 = vmatpush1.bf16.msra.mxu1 %v13072_v14 }
 0xc92   : > { %6113 = vmatprep.subr.bf16.mxu1 %v13080_v18 }
 0xc95   : > { %6114 = vmatpush1.bf16.msra.mxu1 %v13078_v20 }
 0xc96   : > { %6115 = vmatprep.subr.bf16.mxu1 %v13086_v23  ;;  %v13102_v23 = vld [vmem:[#allocation20 + $0x40] ss:$24 sps:$4 sm:$0xff]  }
 0xc99   : > { %6116 = vmatpush1.bf16.msra.mxu1 %v13084_v24  ;;  %v13107_v24 = vld [vmem:[#allocation20 + $0x74] ss:$24 sps:$4 sm:$0xff]  }
 0xc9a   : > { %6117 = vmatprep.subr.bf16.mxu1 %v13092_v26  ;;  %v13113_v26 = vld [vmem:[#allocation20 + $0xd4] ss:$24 sps:$4 sm:$0xff]  }
 0xc9d   : > { %6118 = vmatpush1.bf16.msra.mxu1 %v13090_v57  ;;  %v13108_v57 = vld [vmem:[#allocation20 + $0xa0] ss:$24 sps:$4 sm:$0xff]  }
 0xc9e   : > { %6119 = vmatprep.subr.bf16.mxu1 %v13098_v29  ;;  %v13114_v29 = vld [vmem:[#allocation20 + $0x100] ss:$24 sps:$4 sm:$0xff]  }
 0xca1   : > { %6120 = vmatpush1.bf16.msra.mxu1 %v13096_v56  ;;  %v13119_v56 = vld [vmem:[#allocation20 + $0x134] ss:$24 sps:$4 sm:$0xff]  }
 0xd55   : > { %v5480_v46 = vpop.f32.mrb[18].mxu0 }
 0xd56   : > { %v5554_v48 = vmul.f32 %v5480_v46, %v5480_v46  ;;  %v11559_v49 = vpop.f32.mrb[19].mxu0  ;;  %11598 = vmatmul.mubr.msk.f32.vlgmr.msra.gmra.mrb[28].mxu0 %vm3307_vm4, %v5480_v46  ;;  %v5733_v46 = vrot.slane %v5705_v35, %v14725_v43 }
 0xd57   : > { %v5550_v51 = vpop.f32.mrb[40].mxu1  ;;  %11601 = vmatpush3.msra.mxu0 %v5558_v45  ;;  %11602 = vmatprep.mubr.msk.f32.mxu0 %vm13962_vm2, %v13960_v61 }
 0xd58   : > { %v5555_v52 = vsub.f32 %v5550_v51, %v5554_v48  ;;  %v11594_v53 = vpop.f32.mrb[41].mxu1  ;;  %6052 = vmatprep.subr.bf16.mxu0 %v13053_v8 }
 0xd5a   : > { %v5556_v54 = vadd.f32 1e-05, %v5555_v52 }
 0xd5c   : > { %13275 = vrsqrt.f32 %v5556_v54 }
 0xd66   : > { %v13276_v55 = vpop.eup %13275 }
 0xd67   : > { %11603 = vmatmul.mubr.msk.f32.vlgmr.msra.gmra.mrb[30].mxu0 %vm3307_vm4, %v13276_v55 }
 0xd68   : > { %6084 = vmatprep.mubr.bf16.mxu0 %v13963_v7  ;;  %6053 = vmatpush1.bf16.msra.mxu0 %v13051_v58 }
 0xd69   : > { %6054 = vmatprep.subr.bf16.mxu0 %v13059_v63  ;;  %v5755_v63 = vld [vmem:[%s1440_s10 + $0x8] sm:$0xff] }
 0xd6c   : > { %6055 = vmatpush1.bf16.msra.mxu0 %v13057_v62  ;;  %v5754_v62 = vld [vmem:[%s1440_s10] sm:$0xff] }
 0xd6d   : > { %6056 = vmatprep.subr.bf16.mxu0 %v13065_v2  ;;  %v5756_v2 = vld [vmem:[%s1440_s10 + $0x10] sm:$0xff]  ;;  %s16448_s10 = smov %s16447_s18 }
 0xd70   : > { %6057 = vmatpush1.bf16.msra.mxu0 %v13063_v5 }
 0xd71   : > { %6058 = vmatprep.subr.bf16.mxu0 %v13071_v10 }
 0xd74   : > { %6059 = vmatpush1.bf16.msra.mxu0 %v13069_v13 }
 0xd75   : > { %6060 = vmatprep.subr.bf16.mxu0 %v13077_v50  ;;  %v13099_v50 = vld [vmem:[#allocation20 + $0x10] ss:$24 sps:$4 sm:$0xff]  }
 0xd78   : > { %6061 = vmatpush1.bf16.msra.mxu0 %v13075_v16 }
 0xd79   : > { %6062 = vmatprep.subr.bf16.mxu0 %v13083_v21  ;;  %v13104_v21 = vld [vmem:[#allocation20 + $0x44] ss:$24 sps:$4 sm:$0xff]  }
 0xd7c   : > { %6063 = vmatpush1.bf16.msra.mxu0 %v13081_v22 }
 0xd7d   : > { %6064 = vmatprep.subr.bf16.mxu0 %v13089_v15  ;;  %v13105_v15 = vld [vmem:[#allocation20 + $0x70] ss:$24 sps:$4 sm:$0xff]  }
 0xd80   : > { %6065 = vmatpush1.bf16.msra.mxu0 %v13087_v9  ;;  %v13110_v9 = vld [vmem:[#allocation20 + $0xa4] ss:$24 sps:$4 sm:$0xff]  }
 0xd81   : > { %6066 = vmatprep.subr.bf16.mxu0 %v13095_v27  ;;  %v13111_v27 = vld [vmem:[#allocation20 + $0xd0] ss:$24 sps:$4 sm:$0xff]  }
 0xd84   : > { %6067 = vmatpush1.bf16.msra.mxu0 %v13093_v28  ;;  %v13116_v28 = vld [vmem:[#allocation20 + $0x104] ss:$24 sps:$4 sm:$0xff]  }
 0xd85   : > { %6158 = vmatprep.subr.bf16.mxu0 %v13101_v30  ;;  %v13117_v30 = vld [vmem:[#allocation20 + $0x130] ss:$24 sps:$4 sm:$0xff]  }
 0xe29   : > { %v5628_v31 = vpop.f32.mrb[28].mxu0 }
 0xe2a   : > { %v11599_v32 = vpop.f32.mrb[29].mxu0  ;;  %v5709_v34 = vrot.slane %v5628_v31, %v14729_v4  ;;  %v13122_v31 = vld [vmem:[#allocation20 + $0x164] ss:$24 sps:$4 sm:$0xff]  }
 0xe2b   : > { %v13120_v32 = vld [vmem:[#allocation20 + $0x160] ss:$24 sps:$4 sm:$0xff]  }
 0xe2c   : > { %v5710_v36 = vsub.f32 %v14960_v12, %v5709_v34  ;;  %v5711_v39 = vsub.f32 %v14962_v47, %v5709_v34  ;;  %v5712_v40 = vsub.f32 %v14964_v17, %v5709_v34  ;;  %v5713_v41 = vsub.f32 %v14974_v25, %v5709_v34 }
 0xe2d   : > { %v5745_v12 = vrot.slane %v5705_v35, %v14768_v19 }
 0xe3a   : > { %v5701_v37 = vpop.f32.mrb[30].mxu0 }
 0xe3b   : > { %v5717_v44 = vrot.slane %v5701_v37, %v14729_v4  ;;  %v11604_v45 = vpop.f32.mrb[31].mxu0 }
 0xe3d   : > { %v5718_v48 = vmul.f32 %v5717_v44, %v5710_v36  ;;  %v5719_v49 = vmul.f32 %v5717_v44, %v5711_v39  ;;  %v5720_v51 = vmul.f32 %v5717_v44, %v5712_v40  ;;  %v5721_v52 = vmul.f32 %v5717_v44, %v5713_v41 }
 0xe3f   : > { %v5726_v53 = vmul.f32 %v5725_v38, %v5718_v48  ;;  %v5727_v54 = vmul.f32 %v5725_v38, %v5719_v49  ;;  %v5728_v47 = vmul.f32 %v5725_v38, %v5720_v51  ;;  %v5729_v55 = vmul.f32 %v5725_v38, %v5721_v52 }
 0xe41   : > { %v5734_v17 = vadd.f32 %v5733_v46, %v5726_v53  ;;  %v5735_v8 = vadd.f32 %v5733_v46, %v5727_v54  ;;  %v5736_v25 = vadd.f32 %v5733_v46, %v5728_v47  ;;  %v5737_v58 = vadd.f32 %v5733_v46, %v5729_v55 }
 0xe43   : > { %vm5738_vm12 = vcmp.gt.f32.partialorder %v5734_v17, 0.0  ;;  %vm5739_vm13 = vcmp.gt.f32.partialorder %v5735_v8, 0.0  ;;  %v5746_v59 = vmul.f32 %v5745_v12, %v5734_v17  ;;  %v5747_v60 = vmul.f32 %v5745_v12, %v5735_v8 }
 0xe44   : > { %vm5740_vm14 = vcmp.gt.f32.partialorder %v5736_v25, 0.0  ;;  %vm5741_vm15 = vcmp.gt.f32.partialorder %v5737_v58, 0.0  ;;  %v5748_v0 = vmul.f32 %v5745_v12, %v5736_v25  ;;  %v5749_v1 = vmul.f32 %v5745_v12, %v5737_v58 }
 0xe45   : > { %v5750_v5 = vsel %vm5738_vm12, %v5734_v17, %v5746_v59  ;;  %v5751_v6 = vsel %vm5739_vm13, %v5735_v8, %v5747_v60  ;;  %v10870_v59 = vld [vmem:[%s16446_s22 + $0x40] sm:$0xff]  ;;  %v10871_v60 = vld [vmem:[%s16446_s22 + $0x48] sm:$0xff]  ;;  %vm8079_vm12 = vcmask 515072  }
 0xe46   : > { %v5758_v10 = vadd.f32 %v5754_v62, %v5750_v5  ;;  %v5759_v11 = vadd.f32 %v5755_v63, %v5751_v6  ;;  %v5752_v13 = vsel %vm5740_vm14, %v5736_v25, %v5748_v0  ;;  %v5753_v14 = vsel %vm5741_vm15, %v5737_v58, %v5749_v1  ;;  %v10872_v62 = vld [vmem:[%s16446_s22 + $0x50] sm:$0xff]  ;;  %v10873_v63 = vld [vmem:[%s16446_s22 + $0x58] sm:$0xff]  ;;  %v10874_v0 = vld [vmem:[%s16446_s22 + $0x60] sm:$0xff] }
 0xe47   : > { %v5760_v16 = vadd.f32 %v5756_v2, %v5752_v13  ;;  %v5761_v18 = vadd.f32 %v5757_v3, %v5753_v14  ;;  %v10876_v13 = vld [vmem:[%s16446_s22 + $0x70] sm:$0xff] }
 0xe48   : > { %v5762_v20 = vpack.c.bf16 %v5759_v11, %v5758_v10  ;;  %v10875_v10 = vld [vmem:[%s16446_s22 + $0x68] sm:$0xff] }
 0xe49   : > { %v5763_v22 = vpack.c.bf16 %v5761_v18, %v5760_v16 }
 0xe4a   : > { %6085 = vmatmul.mubr.bf16.vlgmr.msra.gmra.mrb[32].mxu0 %v5762_v20  ;;  %6138 = vmatmul.mubr.bf16.vlgmr.msra.gmra.mrb[44].mxu1 %v5762_v20 }
 0xe4b   : > { %6159 = vmatpush1.bf16.msra.mxu0 %v13099_v50  ;;  %6094 = vmatprep.mubr.bf16.mxu0 %v13963_v7 }
 0xe4c   : > { %6160 = vmatprep.subr.bf16.mxu0 %v13104_v21  ;;  %6147 = vmatprep.mubr.bf16.mxu1 %v13963_v7  ;;  %v10877_v21 = vld [vmem:[%s16446_s22 + $0x78] sm:$0x7f] }
 0xe4f   : > { %6161 = vmatpush1.bf16.msra.mxu0 %v13102_v23  ;;  %v6211_v23 = vld [vmem:[%s16446_s22] sm:$0xff] }
 0xe50   : > { %6162 = vmatprep.subr.bf16.mxu0 %v13107_v24  ;;  %v6212_v24 = vld [vmem:[%s16446_s22 + $0x8] sm:$0xff] }
 0xe52   : > { %6095 = vmatmul.mubr.bf16.gmra.mrb[36].mxu0 %v5763_v22  ;;  %6148 = vmatmul.mubr.bf16.gmra.mrb[48].mxu1 %v5763_v22 }
 0xe53   : > { %6163 = vmatpush1.bf16.msra.mxu0 %v13105_v15  ;;  %6190 = vmatprep.mubr.bf16.mxu0 %v13963_v7  ;;  %v6213_v15 = vld [vmem:[%s16446_s22 + $0x10] sm:$0xff] }
 0xe54   : > { %6164 = vmatprep.subr.bf16.mxu0 %v13110_v9  ;;  %6323 = vmatprep.mubr.f32.mxu1 %v13960_v61  ;;  %v6214_v9 = vld [vmem:[%s16446_s22 + $0x18] sm:$0xff] }
 0xe57   : > { %6165 = vmatpush1.bf16.msra.mxu0 %v13108_v57  ;;  %v6215_v57 = vld [vmem:[%s16446_s22 + $0x20] sm:$0xff] }
 0xe58   : > { %6166 = vmatprep.subr.bf16.mxu0 %v13113_v26  ;;  %v6216_v26 = vld [vmem:[%s16446_s22 + $0x28] sm:$0xff] }
 0xe5b   : > { %6167 = vmatpush1.bf16.msra.mxu0 %v13111_v27  ;;  %v6217_v27 = vld [vmem:[%s16446_s22 + $0x30] sm:$0xff] }
 0xe5c   : > { %6168 = vmatprep.subr.bf16.mxu0 %v13116_v28  ;;  %v6218_v28 = vld [vmem:[%s16446_s22 + $0x38] sm:$0x7f] }
 0xe5f   : > { %6169 = vmatpush1.bf16.msra.mxu0 %v13114_v29  ;;  %v10898_v29 = vld [vmem:[%s16446_s22 + $0x80] sm:$0xff] }
 0xe60   : > { %6170 = vmatprep.subr.bf16.mxu0 %v13119_v56  ;;  %v10899_v56 = vld [vmem:[%s16446_s22 + $0x88] sm:$0xff] }
 0xe63   : > { %6171 = vmatpush1.bf16.msra.mxu0 %v13117_v30  ;;  %v10900_v30 = vld [vmem:[%s16446_s22 + $0x90] sm:$0xff] }
 0xe64   : > { %6172 = vmatprep.subr.bf16.mxu0 %v13122_v31  ;;  %v10901_v31 = vld [vmem:[%s16446_s22 + $0x98] sm:$0xff] }
 0xe67   : > { %6173 = vmatpush1.bf16.msra.mxu0 %v13120_v32  ;;  %v10902_v32 = vld [vmem:[%s16446_s22 + $0xa0] sm:$0xff] }
 0xe68   : > { %11957 = vmatprep.subr.bf16.mxu0 %v13961_v33 }
 0xe6a   : > { %6191 = vmatmul.mubr.bf16.vlgmr.msra.gmra.mrb[40].mxu0 %v5762_v20 }
 0xe6b   : > { %6200 = vmatprep.mubr.bf16.mxu0 %v13963_v7 }
 0xe72   : > { %6201 = vmatmul.mubr.bf16.gmra.mrb[44].mxu0 %v5763_v22 }
 0xe73   : > { %11637 = vmatprep.mubr.msk.f32.mxu0 %vm13962_vm2, %v13960_v61 }
 0xf1d   : > { %v6086_v34 = vpop.f32.mrb[32].mxu0  ;;  %v6139_v35 = vpop.f32.mrb[44].mxu1 }
 0xf1e   : > { %v6088_v36 = vpop.f32.mrb[33].mxu0  ;;  %v6141_v37 = vpop.f32.mrb[45].mxu1 }
 0xf1f   : > { %v6090_v38 = vpop.f32.mrb[34].mxu0  ;;  %v6143_v39 = vpop.f32.mrb[46].mxu1 }
 0xf20   : > { %v11939_v40 = vpack.c.bf16 %v6090_v38, %v6086_v34  ;;  %v11929_v41 = vpack.c.bf16 %v6143_v39, %v6139_v35  ;;  %v6092_v44 = vpop.f32.mrb[35].mxu0  ;;  %v6145_v45 = vpop.f32.mrb[47].mxu1  ;;  %v10903_v34 = vld [vmem:[%s16446_s22 + $0xa8] sm:$0xff]  ;;  %v10904_v35 = vld [vmem:[%s16446_s22 + $0xb0] sm:$0xff] }
 0xf21   : > { %v11937_v46 = vpack.c.bf16 %v6092_v44, %v6088_v36  ;;  %v11927_v48 = vpack.c.bf16 %v6145_v45, %v6141_v37  ;;  %v10905_v36 = vld [vmem:[%s16446_s22 + $0xb8] sm:$0x7f]  ;;  %v6795_v37 = vld [vmem:[%s16447_s18] sm:$0xff]  ;;  %v6796_v38 = vld [vmem:[%s16448_s10 + $0x8] sm:$0xff]  ;;  %s16449_s18 = sld [smem:[#allocation59_spill]] }
 0xf22   : > { %v15097_v39 = vpack.c.bf16 %v6796_v38, %v6795_v37  ;;  %v6799_v45 = vld [vmem:[%s16448_s10 + $0x20] sm:$0xff] }
 0xf23   : > { %11928 = vmatprep.subr.bf16.mxu1 %v11927_v48 }
 0xf24   : > { %11930 = vmatpush1.bf16.msra.mxu1 %v11929_v41  ;;  %11959 = vmatpush3.bf16.msra.mxu0 %v15097_v39  ;;  %v6798_v41 = vld [vmem:[%s16448_s10 + $0x18] sm:$0xff] }
 0xf25   : > { %v6096_v49 = vpop.f32.mrb[36].mxu0  ;;  %v6149_v51 = vpop.f32.mrb[48].mxu1  ;;  %11960 = vmatprep.subr.bf16.mxu0 %v13961_v33 }
 0xf26   : > { %v6098_v52 = vpop.f32.mrb[37].mxu0  ;;  %v6151_v12 = vpop.f32.mrb[49].mxu1 }
 0xf27   : > { %v6100_v53 = vpop.f32.mrb[38].mxu0  ;;  %v6153_v54 = vpop.f32.mrb[50].mxu1 }
 0xf28   : > { %v11944_v47 = vpack.c.bf16 %v6100_v53, %v6096_v49  ;;  %v11934_v55 = vpack.c.bf16 %v6153_v54, %v6149_v51  ;;  %v6102_v17 = vpop.f32.mrb[39].mxu0  ;;  %v6155_v8 = vpop.f32.mrb[51].mxu1  ;;  %v6801_v49 = vld [vmem:[%s16448_s10 + $0x30] sm:$0xff]  ;;  %v6802_v51 = vld [vmem:[%s16448_s10 + $0x38] sm:$0xff]  ;;  %v6804_v53 = vld [vmem:[%s16448_s10 + $0x48] sm:$0xff] }
 0xf29   : > { %v11941_v25 = vpack.c.bf16 %v6102_v17, %v6098_v52  ;;  %v11931_v58 = vpack.c.bf16 %v6155_v8, %v6151_v12  ;;  %v15115_v52 = vpack.c.bf16 %v6802_v51, %v6801_v49  ;;  %v6803_v12 = vld [vmem:[%s16448_s10 + $0x40] sm:$0xff] }
 0xf2a   : > { %v15121_v54 = vpack.c.bf16 %v6804_v53, %v6803_v12  ;;  %v6807_v8 = vld [vmem:[%s16448_s10 + $0x60] sm:$0xff] }
 0xf2b   : > { %11933 = vmatprep.subr.msk.bf16.mxu1 %vm14873_vm10, %v11931_v58 }
 0xf2c   : > { %11936 = vmatpush1.bf16.msk.msra.mxu1 %vm14873_vm10, %v11934_v55  ;;  %v6806_v55 = vld [vmem:[%s16448_s10 + $0x58] sm:$0xff] }
 0xf2d   : > { %11938 = vmatprep.subr.bf16.mxu1 %v11937_v46  ;;  %v6800_v46 = vld [vmem:[%s16448_s10 + $0x28] sm:$0xff] }
 0xf2e   : > { %v15109_v48 = vpack.c.bf16 %v6800_v46, %v6799_v45 }
 0xf2f   : > { %10880 = vmatmul.mubr.msk.f32.vlgmr.msra.gmra.mrb[42].mxu1 %vm6228_vm0, %v10870_v59  ;;  %v6809_v59 = vld [vmem:[%s16448_s10 + $0x70] sm:$0xff] }
 0xf30   : > { %11940 = vmatpush1.bf16.msra.mxu1 %v11939_v40  ;;  %6329 = vmatprep.mubr.f32.mxu1 %v13960_v61  ;;  %v6797_v40 = vld [vmem:[%s16448_s10 + $0x10] sm:$0xff] }
 0xf31   : > { %11943 = vmatprep.subr.msk.bf16.mxu1 %vm14873_vm10, %v11941_v25  ;;  %v15103_v44 = vpack.c.bf16 %v6798_v41, %v6797_v40  ;;  %v6808_v25 = vld [vmem:[%s16448_s10 + $0x68] sm:$0xff] }
 0xf32   : > { %v15132_v58 = vpack.c.bf16 %v6808_v25, %v6807_v8 }
 0xf33   : > { %10881 = vmatmul.mubr.msk.f32.gmra.mrb[52].mxu1 %vm6228_vm0, %v10871_v60  ;;  %11962 = vmatpush3.bf16.msra.mxu0 %v15103_v44  ;;  %v6810_v60 = vld [vmem:[%s16448_s10 + $0x78] sm:$0xff] }
 0xf34   : > { %11946 = vmatpush1.bf16.msk.msra.mxu1 %vm14873_vm10, %v11944_v47  ;;  %6335 = vmatprep.mubr.f32.mxu1 %v13960_v61  ;;  %v6805_v47 = vld [vmem:[%s16448_s10 + $0x50] sm:$0xff] }
 0xf35   : > { %11963 = vmatprep.subr.bf16.mxu0 %v13961_v33  ;;  %v15126_v17 = vpack.c.bf16 %v6806_v55, %v6805_v47 }
 0xf37   : > { %10882 = vmatmul.mubr.msk.f32.gmra.mrb[54].mxu1 %vm6228_vm0, %v10872_v62  ;;  %11965 = vmatpush3.bf16.msra.mxu0 %v15109_v48  ;;  %v15138_v62 = vpack.c.bf16 %v6810_v60, %v6809_v59 }
 0xf38   : > { %6341 = vmatprep.mubr.f32.mxu1 %v13960_v61  ;;  %11966 = vmatprep.subr.bf16.mxu0 %v13961_v33 }
 0xf3b   : > { %10883 = vmatmul.mubr.msk.f32.gmra.mrb[56].mxu1 %vm6228_vm0, %v10873_v63  ;;  %11968 = vmatpush3.bf16.msra.mxu0 %v15115_v52  ;;  %v6683_v63 = vld [vmem:[#allocation21] sm:$0x3] }
 0xf3c   : > { %6347 = vmatprep.mubr.f32.mxu1 %v13960_v61  ;;  %11969 = vmatprep.subr.bf16.mxu0 %v13961_v33  ;;  %v6688_v46 = vrot.slane %v6683_v63, %v14729_v4 }
 0xf3d   : > { %v6192_v1 = vpop.f32.mrb[40].mxu0 }
 0xf3e   : > { %v6194_v2 = vpop.f32.mrb[41].mxu0 }
 0xf3f   : > { %v6196_v3 = vpop.f32.mrb[42].mxu0  ;;  %10884 = vmatmul.mubr.msk.f32.gmra.mrb[58].mxu1 %vm6228_vm0, %v10874_v0  ;;  %11971 = vmatpush3.bf16.msra.mxu0 %v15121_v54  ;;  %v6692_v0 = vrot.slane %v6683_v63, %v14725_v43 }
 0xf40   : > { %v11949_v5 = vpack.c.bf16 %v6196_v3, %v6192_v1  ;;  %v6198_v6 = vpop.f32.mrb[43].mxu0  ;;  %6353 = vmatprep.mubr.f32.mxu1 %v13960_v61  ;;  %11972 = vmatprep.subr.bf16.mxu0 %v13961_v33 }
 0xf41   : > { %v11947_v11 = vpack.c.bf16 %v6198_v6, %v6194_v2 }
 0xf43   : > { %11948 = vmatprep.subr.bf16.mxu1 %v11947_v11  ;;  %10885 = vmatmul.mubr.msk.f32.gmra.mrb[60].mxu1 %vm6228_vm0, %v10875_v10 }
 0xf44   : > { %6359 = vmatprep.mubr.f32.mxu1 %v13960_v61  ;;  %11974 = vmatpush3.bf16.msra.mxu0 %v15126_v17 }
 0xf45   : > { %v6202_v14 = vpop.f32.mrb[44].mxu0  ;;  %11975 = vmatprep.subr.bf16.mxu0 %v13961_v33 }
 0xf46   : > { %v6204_v50 = vpop.f32.mrb[45].mxu0 }
 0xf47   : > { %v6206_v16 = vpop.f32.mrb[46].mxu0  ;;  %10886 = vmatmul.mubr.msk.f32.gmra.mrb[62].mxu1 %vm6228_vm0, %v10876_v13 }
 0xf48   : > { %v11954_v18 = vpack.c.bf16 %v6206_v16, %v6202_v14  ;;  %v6208_v20 = vpop.f32.mrb[47].mxu0  ;;  %6365 = vmatprep.mubr.f32.mxu1 %v13960_v61  ;;  %11977 = vmatpush3.bf16.msra.mxu0 %v15132_v58 }
 0xf49   : > { %v11951_v22 = vpack.c.bf16 %v6208_v20, %v6204_v50  ;;  %11978 = vmatprep.subr.bf16.mxu0 %v13961_v33 }
 0xf4b   : > { %10887 = vmatmul.mubr.msk.f32.gmra.mrb[64].mxu1 %vm6228_vm0, %v10877_v21 }
 0xf4c   : > { %6466 = vmatprep.mubr.f32.mxu1 %v13960_v61  ;;  %11980 = vmatpush3.bf16.msra.mxu0 %v15138_v62 }
 0xf4d   : > { %11981 = vmatprep.subr.bf16.mxu0 %v13961_v33 }
 0xf4f   : > { %10890 = vmatmul.mubr.msk.f32.vlgmr.msra.gmra.mrb[42].mxu1 %vm6228_vm0, %v6211_v23 }
 0xf50   : > { %11950 = vmatpush1.bf16.msra.mxu1 %v11949_v5  ;;  %6472 = vmatprep.mubr.f32.mxu1 %v13960_v61 }
 0xf51   : > { %11953 = vmatprep.subr.msk.bf16.mxu1 %vm14873_vm10, %v11951_v22 }
 0xf53   : > { %10891 = vmatmul.mubr.msk.f32.gmra.mrb[52].mxu1 %vm6228_vm0, %v6212_v24 }
 0xf54   : > { %11956 = vmatpush1.bf16.msk.msra.mxu1 %vm14873_vm10, %v11954_v18  ;;  %6478 = vmatprep.mubr.f32.mxu1 %v13960_v61 }
 0xf57   : > { %10892 = vmatmul.mubr.msk.f32.gmra.mrb[54].mxu1 %vm6228_vm0, %v6213_v15 }
 0xf58   : > { %6484 = vmatprep.mubr.f32.mxu1 %v13960_v61 }
 0xf5b   : > { %10893 = vmatmul.mubr.msk.f32.gmra.mrb[56].mxu1 %vm6228_vm0, %v6214_v9 }
 0xf5c   : > { %6490 = vmatprep.mubr.f32.mxu1 %v13960_v61 }
 0xf5f   : > { %10894 = vmatmul.mubr.msk.f32.gmra.mrb[58].mxu1 %vm6228_vm0, %v6215_v57 }
 0xf60   : > { %6496 = vmatprep.mubr.f32.mxu1 %v13960_v61 }
 0xf63   : > { %10895 = vmatmul.mubr.msk.f32.gmra.mrb[60].mxu1 %vm6228_vm0, %v6216_v26 }
 0xf64   : > { %6502 = vmatprep.mubr.f32.mxu1 %v13960_v61 }
 0xf67   : > { %10896 = vmatmul.mubr.msk.f32.gmra.mrb[62].mxu1 %vm6228_vm0, %v6217_v27 }
 0xf68   : > { %6508 = vmatprep.mubr.f32.mxu1 %v13960_v61 }
 0xf6b   : > { %10897 = vmatmul.mubr.msk.f32.gmra.mrb[64].mxu1 %vm6228_vm0, %v6218_v28 }
 0xf6c   : > { %6618 = vmatprep.mubr.f32.mxu1 %v13960_v61 }
 0xf6f   : > { %10908 = vmatmul.mubr.msk.f32.vlgmr.msra.gmra.mrb[42].mxu1 %vm6228_vm0, %v10898_v29 }
 0xf70   : > { %6624 = vmatprep.mubr.f32.mxu1 %v13960_v61 }
 0xf73   : > { %10909 = vmatmul.mubr.msk.f32.gmra.mrb[52].mxu1 %vm6228_vm0, %v10899_v56 }
 0xf74   : > { %6630 = vmatprep.mubr.f32.mxu1 %v13960_v61 }
 0xf77   : > { %10910 = vmatmul.mubr.msk.f32.gmra.mrb[54].mxu1 %vm6228_vm0, %v10900_v30 }
 0xf78   : > { %6636 = vmatprep.mubr.f32.mxu1 %v13960_v61 }
 0xf7b   : > { %10911 = vmatmul.mubr.msk.f32.gmra.mrb[56].mxu1 %vm6228_vm0, %v10901_v31 }
 0xf7c   : > { %6642 = vmatprep.mubr.f32.mxu1 %v13960_v61 }
 0xf7f   : > { %10912 = vmatmul.mubr.msk.f32.gmra.mrb[58].mxu1 %vm6228_vm0, %v10902_v32 }
 0xf80   : > { %6648 = vmatprep.mubr.f32.mxu1 %v13960_v61 }
 0xf83   : > { %10913 = vmatmul.mubr.msk.f32.gmra.mrb[60].mxu1 %vm6228_vm0, %v10903_v34 }
 0xf84   : > { %6654 = vmatprep.mubr.f32.mxu1 %v13960_v61 }
 0xf87   : > { %10914 = vmatmul.mubr.msk.f32.gmra.mrb[62].mxu1 %vm6228_vm0, %v10904_v35 }
 0xf88   : > { %6660 = vmatprep.mubr.f32.mxu1 %v13960_v61 }
 0xf8b   : > { %10915 = vmatmul.mubr.msk.f32.gmra.mrb[64].mxu1 %vm6228_vm0, %v10905_v36 }
 0xf8c   : > { %7711 = vmatprep.mubr.bf16.mxu1 %v13963_v7 }
0x1042   : > { %v6620_v1 = vpop.f32.mrb[42].mxu1 }
0x1043   : > { %v6622_v2 = vpop.f32.mrb[43].mxu1  ;;  %v6695_v25 = vadd.f32 %v6688_v46, %v6620_v1 }
0x1044   : > { %v6696_v3 = vadd.f32 %v6692_v0, %v6622_v2 }
0x1046   : > { %v6711_v5 = vsub.f32 0.0, %v6696_v3  ;;  %v6626_v6 = vpop.f32.mrb[52].mxu1 }
0x1047   : > { %v6628_v10 = vpop.f32.mrb[53].mxu1 }
0x1048   : > { %v6719_v11 = vmul.f32 1.442695, %v6711_v5  ;;  %v6698_v13 = vadd.f32 %v6692_v0, %v6628_v10 }
0x104a   : > { %13277 = vpow2.f32 %v6719_v11  ;;  %v6712_v14 = vsub.f32 0.0, %v6698_v13  ;;  %v6632_v50 = vpop.f32.mrb[54].mxu1  ;;  %v6697_v11 = vadd.f32 %v6688_v46, %v6626_v6 }
0x104b   : > { %v6634_v16 = vpop.f32.mrb[55].mxu1  ;;  %v6699_v1 = vadd.f32 %v6688_v46, %v6632_v50 }
0x104c   : > { %v6721_v18 = vmul.f32 1.442695, %v6712_v14  ;;  %v6700_v20 = vadd.f32 %v6692_v0, %v6634_v16 }
0x104e   : > { %13279 = vpow2.f32 %v6721_v18  ;;  %v6713_v21 = vsub.f32 0.0, %v6700_v20  ;;  %v6638_v22 = vpop.f32.mrb[56].mxu1 }
0x104f   : > { %v6640_v23 = vpop.f32.mrb[57].mxu1 }
0x1050   : > { %v6723_v24 = vmul.f32 1.442695, %v6713_v21  ;;  %v6702_v15 = vadd.f32 %v6692_v0, %v6640_v23 }
0x1052   : > { %13281 = vpow2.f32 %v6723_v24  ;;  %v6714_v9 = vsub.f32 0.0, %v6702_v15  ;;  %v6644_v57 = vpop.f32.mrb[58].mxu1  ;;  %v6701_v15 = vadd.f32 %v6688_v46, %v6638_v22 }
0x1053   : > { %v6646_v26 = vpop.f32.mrb[59].mxu1 }
0x1054   : > { %v13278_v27 = vpop.eup %13277  ;;  %v6725_v28 = vmul.f32 1.442695, %v6714_v9  ;;  %v6704_v29 = vadd.f32 %v6692_v0, %v6646_v26 }
0x1055   : > { %v6735_v56 = vadd.f32 1.0, %v13278_v27 }
0x1056   : > { %13283 = vpow2.f32 %v6725_v28  ;;  %v6715_v30 = vsub.f32 0.0, %v6704_v29  ;;  %v6650_v31 = vpop.f32.mrb[60].mxu1  ;;  %v6703_v28 = vadd.f32 %v6688_v46, %v6644_v57 }
0x1057   : > { %13285 = vrcp.f32 %v6735_v56  ;;  %v6652_v32 = vpop.f32.mrb[61].mxu1  ;;  %v6705_v50 = vadd.f32 %v6688_v46, %v6650_v31 }
0x1058   : > { %v13280_v34 = vpop.eup %13279  ;;  %v6727_v35 = vmul.f32 1.442695, %v6715_v30  ;;  %v6706_v36 = vadd.f32 %v6692_v0, %v6652_v32 }
0x1059   : > { %v6736_v37 = vadd.f32 1.0, %v13280_v34 }
0x105a   : > { %13287 = vpow2.f32 %v6727_v35  ;;  %v6716_v38 = vsub.f32 0.0, %v6706_v36  ;;  %v6656_v40 = vpop.f32.mrb[62].mxu1 }
0x105b   : > { %13289 = vrcp.f32 %v6736_v37  ;;  %v6658_v41 = vpop.f32.mrb[63].mxu1  ;;  %v6707_v36 = vadd.f32 %v6688_v46, %v6656_v40 }
0x105c   : > { %v13282_v45 = vpop.eup %13281  ;;  %v6729_v49 = vmul.f32 1.442695, %v6716_v38  ;;  %v6708_v51 = vadd.f32 %v6692_v0, %v6658_v41 }
0x105d   : > { %v6737_v12 = vadd.f32 1.0, %v13282_v45 }
0x105e   : > { %13291 = vpow2.f32 %v6729_v49  ;;  %v6717_v53 = vsub.f32 0.0, %v6708_v51  ;;  %v6662_v47 = vpop.f32.mrb[64].mxu1 }
0x105f   : > { %13293 = vrcp.f32 %v6737_v12  ;;  %v6664_v55 = vpop.f32.mrb[65].mxu1  ;;  %v6709_v45 = vadd.f32 %v6688_v46, %v6662_v47 }
0x1060   : > { %v13284_v8 = vpop.eup %13283  ;;  %v6731_v59 = vmul.f32 1.442695, %v6717_v53  ;;  %v6710_v60 = vadd.f32 %v6692_v0, %v6664_v55 }
0x1061   : > { %v13286_v2 = vpop.eup %13285  ;;  %v6738_v3 = vadd.f32 1.0, %v13284_v8 }
0x1062   : > { %v15145_v5 = vmul.f32 %v13286_v2, %v6695_v25  ;;  %13295 = vpow2.f32 %v6731_v59  ;;  %v6718_v10 = vsub.f32 0.0, %v6710_v60 }
0x1063   : > { %13297 = vrcp.f32 %v6738_v3 }
0x1064   : > { %v13288_v63 = vpop.eup %13287  ;;  %v6733_v13 = vmul.f32 1.442695, %v6718_v10  ;;  %v6773_v59 = vmul.f32 %v15145_v5, %v15145_v5 }
0x1065   : > { %v13290_v14 = vpop.eup %13289  ;;  %v6739_v16 = vadd.f32 1.0, %v13288_v63 }
0x1066   : > { %v15147_v18 = vmul.f32 %v13290_v14, %v6697_v11  ;;  %13299 = vpow2.f32 %v6733_v13 }
0x1067   : > { %13301 = vrcp.f32 %v6739_v16 }
0x1068   : > { %v13292_v20 = vpop.eup %13291  ;;  %v6759_v34 = vadd.f32 %v15147_v18, %v15145_v5  ;;  %v6774_v8 = vmul.f32 %v15147_v18, %v15147_v18 }
0x1069   : > { %v13294_v21 = vpop.eup %13293  ;;  %v6740_v0 = vadd.f32 1.0, %v13292_v20 }
0x106a   : > { %v15149_v23 = vmul.f32 %v13294_v21, %v6699_v1  ;;  %v6781_v60 = vadd.f32 %v6774_v8, %v6773_v59  ;;  %v13146_v8 = vld [vmem:[%s16450_s1 + $0xfc] ss:$40 sps:$4 sm:$0xff]   ;;  %v13144_v59 = vld [vmem:[%s16450_s1 + $0xf8] ss:$40 sps:$4 sm:$0xff]  }
0x106b   : > { %13303 = vrcp.f32 %v6740_v0 }
0x106c   : > { %v13296_v24 = vpop.eup %13295  ;;  %v6760_v22 = vadd.f32 %v6759_v34, %v15149_v23  ;;  %v6775_v46 = vmul.f32 %v15149_v23, %v15149_v23  ;;  %v13123_v34 = vld [vmem:[%s16450_s1] ss:$40 sps:$4 sm:$0xff]  }
0x106d   : > { %v13298_v9 = vpop.eup %13297  ;;  %v6741_v26 = vadd.f32 1.0, %v13296_v24 }
0x106e   : > { %v15151_v27 = vmul.f32 %v13298_v9, %v6701_v15  ;;  %v6782_v10 = vadd.f32 %v6781_v60, %v6775_v46  ;;  %v13149_v46 = vld [vmem:[%s16450_s1 + $0x144] ss:$40 sps:$4 sm:$0xff]   ;;  %v13147_v60 = vld [vmem:[%s16450_s1 + $0x140] ss:$40 sps:$4 sm:$0xff]  }
0x106f   : > { %13305 = vrcp.f32 %v6741_v26 }
0x1070   : > { %v13300_v6 = vpop.eup %13299  ;;  %v6761_v38 = vadd.f32 %v6760_v22, %v15151_v27  ;;  %v6776_v2 = vmul.f32 %v15151_v27, %v15151_v27  ;;  %v13125_v22 = vld [vmem:[%s16450_s1 + $0x4] ss:$40 sps:$4 sm:$0xff]  }
0x1071   : > { %v13302_v29 = vpop.eup %13301  ;;  %v6742_v56 = vadd.f32 1.0, %v13300_v6  ;;  %7679 = vmatprep.subr.bf16.mxu1 %v13125_v22 }
0x1072   : > { %v15153_v30 = vmul.f32 %v13302_v29, %v6703_v28  ;;  %v6783_v16 = vadd.f32 %v6782_v10, %v6776_v2  ;;  %7680 = vmatpush1.bf16.msra.mxu1 %v13123_v34  ;;  %v13150_v2 = vld [vmem:[%s16450_s1 + $0x148] ss:$40 sps:$4 sm:$0xff]   ;;  %v13155_v10 = vld [vmem:[%s16450_s1 + $0x194] ss:$40 sps:$4 sm:$0xff]  }
0x1073   : > { %13307 = vrcp.f32 %v6742_v56 }
0x1074   : > { %v6762_v57 = vadd.f32 %v6761_v38, %v15153_v30  ;;  %v6777_v63 = vmul.f32 %v15153_v30, %v15153_v30  ;;  %v13131_v38 = vld [vmem:[%s16450_s1 + $0x54] ss:$40 sps:$4 sm:$0xff]  }
0x1075   : > { %v13304_v32 = vpop.eup %13303  ;;  %7681 = vmatprep.subr.bf16.mxu1 %v13131_v38 }
0x1076   : > { %v15157_v35 = vmul.f32 %v13304_v32, %v6705_v50  ;;  %v6784_v21 = vadd.f32 %v6783_v16, %v6777_v63  ;;  %v13156_v63 = vld [vmem:[%s16450_s1 + $0x198] ss:$40 sps:$4 sm:$0xff]  }
0x1077   : > { %v13159_v16 = vld [vmem:[%s16450_s1 + $0x1e0] ss:$40 sps:$4 sm:$0xff]  }
0x1078   : > { %v6763_v31 = vadd.f32 %v6762_v57, %v15157_v35  ;;  %v6778_v14 = vmul.f32 %v15157_v35, %v15157_v35  ;;  %v13134_v57 = vld [vmem:[%s16450_s1 + $0x5c] ss:$40 sps:$4 sm:$0xff]  }
0x1079   : > { %v13306_v37 = vpop.eup %13305 }
0x107a   : > { %v15161_v41 = vmul.f32 %v13306_v37, %v6707_v36  ;;  %v6785_v0 = vadd.f32 %v6784_v21, %v6778_v14  ;;  %v13126_v36 = vld [vmem:[%s16450_s1 + $0x8] ss:$40 sps:$4 sm:$0xff]   ;;  %v13128_v37 = vld [vmem:[%s16450_s1 + $0xc] ss:$40 sps:$4 sm:$0xff]   ;;  %v13170_v21 = vld [vmem:[%s16450_s1 + $0x23c] ss:$40 sps:$4 sm:$0xff]  }
0x107b   : > { %v13164_v14 = vld [vmem:[%s16450_s1 + $0x1ec] ss:$40 sps:$4 sm:$0xff]  }
0x107c   : > { %v6764_v12 = vadd.f32 %v6763_v31, %v15161_v41  ;;  %v6779_v1 = vmul.f32 %v15161_v41, %v15161_v41  ;;  %v13137_v31 = vld [vmem:[%s16450_s1 + $0xa4] ss:$40 sps:$4 sm:$0xff]  }
0x107d   : > { %v13308_v49 = vpop.eup %13307 }
0x107e   : > { %v15165_v51 = vmul.f32 %v13308_v49, %v6709_v45  ;;  %v6786_v15 = vadd.f32 %v6785_v0, %v6779_v1  ;;  %v13129_v45 = vld [vmem:[%s16450_s1 + $0x50] ss:$40 sps:$4 sm:$0xff]   ;;  %v13167_v1 = vld [vmem:[%s16450_s1 + $0x234] ss:$40 sps:$4 sm:$0xff]  }
0x107f   : > { %v13132_v49 = vld [vmem:[%s16450_s1 + $0x58] ss:$40 sps:$4 sm:$0xff]   ;;  %7682 = vmatpush1.bf16.msra.mxu1 %v13129_v45 }
0x1080   : > { %v6765_v53 = vsel %vm3130_vm3, %v15165_v51, 0.0  ;;  %v6780_v20 = vmul.f32 %v15165_v51, %v15165_v51  ;;  %7683 = vmatprep.subr.bf16.mxu1 %v13137_v31  ;;  %v13165_v0 = vld [vmem:[%s16450_s1 + $0x230] ss:$40 sps:$4 sm:$0xff]  }
0x1081   : > { %v6766_v55 = vadd.f32 %v6765_v53, %v6764_v12  ;;  %v13140_v12 = vld [vmem:[%s16450_s1 + $0xac] ss:$40 sps:$4 sm:$0xff]   ;;  %v13135_v53 = vld [vmem:[%s16450_s1 + $0xa0] ss:$40 sps:$4 sm:$0xff]  }
0x1082   : > { %v6787_v24 = vsel %vm3130_vm3, %v6780_v20, 0.0  ;;  %v13162_v20 = vld [vmem:[%s16450_s1 + $0x1e8] ss:$40 sps:$4 sm:$0xff]  }
0x1083   : > { %v6767_v40 = vrot.slane %v6766_v55, 4  ;;  %v6788_v9 = vadd.f32 %v6787_v24, %v6786_v15  ;;  %7684 = vmatpush1.bf16.msra.mxu1 %v13135_v53  ;;  %v13168_v24 = vld [vmem:[%s16450_s1 + $0x238] ss:$40 sps:$4 sm:$0xff]   ;;  %v13173_v15 = vld [vmem:[%s16450_s1 + $0x14] ss:$40 sps:$4 sm:$0xff]  }
0x1085   : > { %v6768_v25 = vadd.f32 %v6767_v40, %v6766_v55  ;;  %v6789_v26 = vrot.slane %v6788_v9, 4  ;;  %v13138_v55 = vld [vmem:[%s16450_s1 + $0xa8] ss:$40 sps:$4 sm:$0xff]   ;;  %v13143_v40 = vld [vmem:[%s16450_s1 + $0xf4] ss:$40 sps:$4 sm:$0xff]  }
0x1086   : > { %7685 = vmatprep.subr.bf16.mxu1 %v13143_v40 }
0x1087   : > { %v6769_v47 = vrot.slane %v6768_v25, 2 }
0x1089   : > { %v6770_v3 = vadd.f32 %v6769_v47, %v6768_v25  ;;  %v13141_v25 = vld [vmem:[%s16450_s1 + $0xf0] ss:$40 sps:$4 sm:$0xff]   ;;  %v13152_v47 = vld [vmem:[%s16450_s1 + $0x14c] ss:$40 sps:$4 sm:$0xff]  }
0x108a   : > { %7686 = vmatpush1.bf16.msra.mxu1 %v13141_v25 }
0x108b   : > { %v6771_v11 = vrot.slane %v6770_v3, 1  ;;  %7687 = vmatprep.subr.bf16.mxu1 %v13149_v46 }
0x108d   : > { %v6772_v13 = vadd.f32 %v6771_v11, %v6770_v3  ;;  %v13153_v3 = vld [vmem:[%s16450_s1 + $0x190] ss:$40 sps:$4 sm:$0xff]   ;;  %v13158_v11 = vld [vmem:[%s16450_s1 + $0x19c] ss:$40 sps:$4 sm:$0xff]  }
0x108e   : > { %7688 = vmatpush1.bf16.msra.mxu1 %v13147_v60 }
0x108f   : > { %11638 = vmatmul.mubr.f32.vlgmr.msra.gmra.mrb[48].mxu0 %v6772_v13  ;;  %v13161_v13 = vld [vmem:[%s16450_s1 + $0x1e4] ss:$40 sps:$4 sm:$0xff]   ;;  %7689 = vmatprep.subr.bf16.mxu1 %v13155_v10 }
0x1090   : > { %11983 = vmatpush3.bf16.msra.mxu0 %v15097_v39  ;;  %11672 = vmatprep.mubr.msk.f32.mxu0 %vm13962_vm2, %v13960_v61  ;;  %v6790_v39 = vadd.f32 %v6789_v26, %v6788_v9  ;;  %v13176_v9 = vld [vmem:[%s16450_s1 + $0x1c] ss:$40 sps:$4 sm:$0xff]  }
0x1091   : > { %11984 = vmatprep.subr.bf16.mxu0 %v13961_v33 }
0x1092   : > { %v6791_v6 = vrot.slane %v6790_v39, 2  ;;  %7690 = vmatpush1.bf16.msra.mxu1 %v13153_v3 }
0x1093   : > { %7691 = vmatprep.subr.bf16.mxu1 %v13161_v13 }
0x1094   : > { %11986 = vmatpush3.bf16.msra.mxu0 %v15103_v44  ;;  %v6792_v44 = vadd.f32 %v6791_v6, %v6790_v39 }
0x1095   : > { %11987 = vmatprep.subr.bf16.mxu0 %v13961_v33 }
0x1096   : > { %7692 = vmatpush1.bf16.msra.mxu1 %v13159_v16 }
0x1097   : > { %7693 = vmatprep.subr.bf16.mxu1 %v13167_v1 }
0x1098   : > { %11989 = vmatpush3.bf16.msra.mxu0 %v15109_v48  ;;  %v6793_v48 = vrot.slane %v6792_v44, 1 }
0x1099   : > { %11990 = vmatprep.subr.bf16.mxu0 %v13961_v33 }
0x109a   : > { %7694 = vmatpush1.bf16.msra.mxu1 %v13165_v0 }
0x109b   : > { %7825 = vmatprep.subr.bf16.mxu1 %v13173_v15  ;;  %v13174_v15 = vld [vmem:[%s16450_s1 + $0x18] ss:$40 sps:$4 sm:$0xff]  }
0x109c   : > { %11992 = vmatpush3.bf16.msra.mxu0 %v15115_v52  ;;  %v6794_v52 = vadd.f32 %v6793_v48, %v6792_v44  ;;  %v7102_v44 = vld [vmem:[#allocation23] sm:$0x7] }
0x109d   : > { %11993 = vmatprep.subr.bf16.mxu0 %v13961_v33  ;;  %v7130_v48 = vrot.slane %v7102_v44, %v14729_v4 }
0x10a0   : > { %11995 = vmatpush3.bf16.msra.mxu0 %v15121_v54  ;;  %v6955_v54 = vld [vmem:[%s16449_s18] sm:$0xff]  ;;  %s16451_s18 = sld [smem:[#allocation42_spill]] }
0x10a1   : > { %11996 = vmatprep.subr.bf16.mxu0 %v13961_v33 }
0x10a4   : > { %11998 = vmatpush3.bf16.msra.mxu0 %v15126_v17 }
0x10a5   : > { %11999 = vmatprep.subr.bf16.mxu0 %v13961_v33 }
0x10a6   : > { %s15265_s4 = scalar_lea.vmem %s16451_s18, %s11173_s3  ;;  %s16452_s3 = sld [smem:[#allocation61_spill]] }
0x10a7   : > { %v7179_v10 = vld [vmem:[%s15265_s4] sm:$0xff]  ;;  %v7182_v16 = vld [vmem:[%s15265_s4 + $0x18] sm:$0xff]  ;;  %s10463_s18 = sshll.u32 %s1414_s11, 4 }
0x10a8   : > { %12001 = vmatpush3.bf16.msra.mxu0 %v15132_v58 }
0x10a9   : > { %12002 = vmatprep.subr.bf16.mxu0 %v13961_v33 }
0x10ac   : > { %12004 = vmatpush3.bf16.msra.mxu0 %v15138_v62  ;;  %v11096_v42 = vld [vmem:[%s16452_s3 + $0x1d0] sm:$0xff] }
0x10ad   : > { %11675 = vmatprep.subr.mxu0 %v13960_v61 }
0x10af   : > { %11673 = vmatmul.mubr.f32.vlgmr.msra.gmra.mrb[50].mxu0 %v6794_v52  ;;  %v7142_v52 = vrot.slane %v7102_v44, %v14725_v43 }
0x10b0   : > { %11677 = vmatprep.mubr.msk.f32.mxu0 %vm13962_vm2, %v13960_v61  ;;  %11676 = vmatpush3.msra.mxu0 %v6955_v54 }
0x10b1   : > { %11680 = vmatprep.subr.mxu0 %v13960_v61 }
0x1162   : > { %v6877_v17 = vpop.f32.mrb[48].mxu0 }
0x1163   : > { %v11639_v58 = vpop.f32.mrb[49].mxu0  ;;  %11678 = vmatmul.mubr.msk.f32.vlgmr.msra.gmra.mrb[52].mxu0 %vm3307_vm4, %v6877_v17  ;;  %v6951_v62 = vmul.f32 %v6877_v17, %v6877_v17 }
0x1164   : > { %11681 = vmatpush3.msra.mxu0 %v6955_v54  ;;  %11682 = vmatprep.mubr.msk.f32.mxu0 %vm13962_vm2, %v13960_v61  ;;  %v15252_v54 = vrot.slane %v7102_v44, %v14768_v19 }
0x1165   : > { %7752 = vmatprep.subr.bf16.mxu0 %v13128_v37 }
0x1182   : > { %v6947_v28 = vpop.f32.mrb[50].mxu0 }
0x1183   : > { %v6952_v29 = vsub.f32 %v6947_v28, %v6951_v62  ;;  %v11674_v56 = vpop.f32.mrb[51].mxu0 }
0x1185   : > { %v6953_v50 = vadd.f32 1e-05, %v6952_v29 }
0x1187   : > { %13309 = vrsqrt.f32 %v6953_v50 }
0x1191   : > { %v13310_v32 = vpop.eup %13309 }
0x1192   : > { %11683 = vmatmul.mubr.msk.f32.vlgmr.msra.gmra.mrb[54].mxu0 %vm3307_vm4, %v13310_v32 }
0x1193   : > { %7784 = vmatprep.mubr.bf16.mxu0 %v13963_v7  ;;  %7753 = vmatpush1.bf16.msra.mxu0 %v13126_v36 }
0x1194   : > { %7754 = vmatprep.subr.bf16.mxu0 %v13134_v57 }
0x1197   : > { %7755 = vmatpush1.bf16.msra.mxu0 %v13132_v49 }
0x1198   : > { %7756 = vmatprep.subr.bf16.mxu0 %v13140_v12 }
0x119b   : > { %7757 = vmatpush1.bf16.msra.mxu0 %v13138_v55 }
0x119c   : > { %7758 = vmatprep.subr.bf16.mxu0 %v13146_v8 }
0x119f   : > { %7759 = vmatpush1.bf16.msra.mxu0 %v13144_v59 }
0x11a0   : > { %7760 = vmatprep.subr.bf16.mxu0 %v13152_v47 }
0x11a3   : > { %7761 = vmatpush1.bf16.msra.mxu0 %v13150_v2 }
0x11a4   : > { %7762 = vmatprep.subr.bf16.mxu0 %v13158_v11 }
0x11a7   : > { %7763 = vmatpush1.bf16.msra.mxu0 %v13156_v63  ;;  %v7180_v63 = vld [vmem:[%s15265_s4 + $0x8] sm:$0xff] }
0x11a8   : > { %7764 = vmatprep.subr.bf16.mxu0 %v13164_v14  ;;  %v7181_v14 = vld [vmem:[%s15265_s4 + $0x10] sm:$0xff] }
0x11ab   : > { %7765 = vmatpush1.bf16.msra.mxu0 %v13162_v20 }
0x11ac   : > { %7766 = vmatprep.subr.bf16.mxu0 %v13170_v21 }
0x11af   : > { %7767 = vmatpush1.bf16.msra.mxu0 %v13168_v24  ;;  %v13171_v24 = vld [vmem:[%s16450_s1 + $0x10] ss:$40 sps:$4 sm:$0xff]  }
0x11b0   : > { %7898 = vmatprep.subr.bf16.mxu0 %v13176_v9 }
0x1236   : > { %v7025_v26 = vpop.f32.mrb[52].mxu0 }
0x1237   : > { %v11679_v39 = vpop.f32.mrb[53].mxu0  ;;  %v7106_v6 = vrot.slane %v7025_v26, %v14729_v4 }
0x1238   : > { %v13179_v39 = vld [vmem:[%s16450_s1 + $0x64] ss:$40 sps:$4 sm:$0xff]  }
0x1239   : > { %v7107_v58 = vsub.f32 %v15145_v5, %v7106_v6  ;;  %v7108_v29 = vsub.f32 %v15147_v18, %v7106_v6  ;;  %v7109_v56 = vsub.f32 %v15149_v23, %v7106_v6  ;;  %v7110_v50 = vsub.f32 %v15151_v27, %v7106_v6 }
0x123a   : > { %v7111_v32 = vsub.f32 %v15153_v30, %v7106_v6  ;;  %v7112_v34 = vsub.f32 %v15157_v35, %v7106_v6  ;;  %v7113_v22 = vsub.f32 %v15161_v41, %v7106_v6  ;;  %v7114_v36 = vsub.f32 %v15165_v51, %v7106_v6 }
0x1265   : > { %v7098_v17 = vpop.f32.mrb[54].mxu0 }
0x1266   : > { %v7118_v62 = vrot.slane %v7098_v17, %v14729_v4  ;;  %v11684_v28 = vpop.f32.mrb[55].mxu0  ;;  %v7183_v17 = vld [vmem:[%s15265_s4 + $0x20] sm:$0xff] }
0x1267   : > { %v13182_v28 = vld [vmem:[%s16450_s1 + $0x6c] ss:$40 sps:$4 sm:$0xff]  }
0x1268   : > { %v7119_v5 = vmul.f32 %v7118_v62, %v7107_v58  ;;  %v7120_v37 = vmul.f32 %v7118_v62, %v7108_v29  ;;  %v7121_v38 = vmul.f32 %v7118_v62, %v7109_v56  ;;  %v7122_v57 = vmul.f32 %v7118_v62, %v7110_v50  ;;  %v7184_v58 = vld [vmem:[%s15265_s4 + $0x28] sm:$0xff]  ;;  %v7185_v56 = vld [vmem:[%s15265_s4 + $0x30] sm:$0xff] }
0x1269   : > { %v7123_v45 = vmul.f32 %v7118_v62, %v7111_v32  ;;  %v7124_v18 = vmul.f32 %v7118_v62, %v7112_v34  ;;  %v7125_v49 = vmul.f32 %v7118_v62, %v7113_v22  ;;  %v7126_v23 = vmul.f32 %v7118_v62, %v7114_v36  ;;  %v7186_v36 = vld [vmem:[%s15265_s4 + $0x38] sm:$0x7f]  ;;  %s16453_s4 = sld [smem:[#allocation64_spill]] }
0x126a   : > { %v7131_v31 = vmul.f32 %v7130_v48, %v7119_v5  ;;  %v7132_v27 = vmul.f32 %v7130_v48, %v7120_v37  ;;  %v7133_v12 = vmul.f32 %v7130_v48, %v7121_v38  ;;  %v7134_v30 = vmul.f32 %v7130_v48, %v7122_v57  ;;  %v13177_v57 = vld [vmem:[%s16450_s1 + $0x60] ss:$40 sps:$4 sm:$0xff]  }
0x126b   : > { %v7135_v35 = vmul.f32 %v7130_v48, %v7123_v45  ;;  %v7136_v41 = vmul.f32 %v7130_v48, %v7124_v18  ;;  %v7137_v51 = vmul.f32 %v7130_v48, %v7125_v49  ;;  %v7138_v53 = vmul.f32 %v7130_v48, %v7126_v23  ;;  %v13180_v45 = vld [vmem:[%s16450_s1 + $0x68] ss:$40 sps:$4 sm:$0xff]   ;;  %v13188_v23 = vld [vmem:[%s16450_s1 + $0xbc] ss:$40 sps:$4 sm:$0xff]  }
0x126c   : > { %v7143_v55 = vadd.f32 %v7142_v52, %v7131_v31  ;;  %v7144_v40 = vadd.f32 %v7142_v52, %v7132_v27  ;;  %v7145_v8 = vadd.f32 %v7142_v52, %v7133_v12  ;;  %v7146_v25 = vadd.f32 %v7142_v52, %v7134_v30  ;;  %v13183_v30 = vld [vmem:[%s16450_s1 + $0xb0] ss:$40 sps:$4 sm:$0xff]  }
0x126d   : > { %v7147_v59 = vadd.f32 %v7142_v52, %v7135_v35  ;;  %v7148_v46 = vadd.f32 %v7142_v52, %v7136_v41  ;;  %v7149_v47 = vadd.f32 %v7142_v52, %v7137_v51  ;;  %v7150_v60 = vadd.f32 %v7142_v52, %v7138_v53  ;;  %v13186_v35 = vld [vmem:[%s16450_s1 + $0xb8] ss:$40 sps:$4 sm:$0xff]   ;;  %v13191_v41 = vld [vmem:[%s16450_s1 + $0x104] ss:$40 sps:$4 sm:$0xff]  }
0x126e   : > { %vm7151_vm1 = vcmp.gt.f32.partialorder %v7143_v55, 0.0  ;;  %vm7152_vm3 = vcmp.gt.f32.partialorder %v7144_v40, 0.0  ;;  %v7163_v2 = vmul.f32 %v15252_v54, %v7143_v55  ;;  %v7164_v3 = vmul.f32 %v15252_v54, %v7144_v40  ;;  %v13194_v51 = vld [vmem:[%s16450_s1 + $0x10c] ss:$40 sps:$4 sm:$0xff]   ;;  %v13189_v53 = vld [vmem:[%s16450_s1 + $0x100] ss:$40 sps:$4 sm:$0xff]  }
0x126f   : > { %vm7153_vm5 = vcmp.gt.f32.partialorder %v7145_v8, 0.0  ;;  %vm7154_vm6 = vcmp.gt.f32.partialorder %v7146_v25, 0.0  ;;  %v7165_v11 = vmul.f32 %v15252_v54, %v7145_v8  ;;  %v7166_v13 = vmul.f32 %v15252_v54, %v7146_v25 }
0x1270   : > { %v7171_v20 = vsel %vm7151_vm1, %v7143_v55, %v7163_v2  ;;  %v7172_v1 = vsel %vm7152_vm3, %v7144_v40, %v7164_v3  ;;  %vm7155_vm7 = vcmp.gt.f32.partialorder %v7147_v59, 0.0  ;;  %vm7156_vm8 = vcmp.gt.f32.partialorder %v7148_v46, 0.0  ;;  %v13192_v55 = vld [vmem:[%s16450_s1 + $0x108] ss:$40 sps:$4 sm:$0xff]   ;;  %v13197_v40 = vld [vmem:[%s16450_s1 + $0x154] ss:$40 sps:$4 sm:$0xff]  }
0x1271   : > { %v7187_v21 = vadd.f32 %v7179_v10, %v7171_v20  ;;  %v7188_v0 = vadd.f32 %v7180_v63, %v7172_v1  ;;  %v7173_v9 = vsel %vm7153_vm5, %v7145_v8, %v7165_v11  ;;  %v7174_v26 = vsel %vm7154_vm6, %v7146_v25, %v7166_v13  ;;  %v13200_v8 = vld [vmem:[%s16450_s1 + $0x15c] ss:$40 sps:$4 sm:$0xff]   ;;  %v13195_v25 = vld [vmem:[%s16450_s1 + $0x150] ss:$40 sps:$4 sm:$0xff]  }
0x1272   : > { %v7189_v6 = vadd.f32 %v7181_v14, %v7173_v9  ;;  %v7190_v44 = vadd.f32 %v7182_v16, %v7174_v26  ;;  %v7167_v48 = vmul.f32 %v15252_v54, %v7147_v59  ;;  %v7168_v52 = vmul.f32 %v15252_v54, %v7148_v46  ;;  %v13204_v2 = vld [vmem:[%s16450_s1 + $0x1a8] ss:$40 sps:$4 sm:$0xff]   ;;  %v13209_v3 = vld [vmem:[%s16450_s1 + $0x1f4] ss:$40 sps:$4 sm:$0xff]   ;;  %v13210_v11 = vld [vmem:[%s16450_s1 + $0x1f8] ss:$40 sps:$4 sm:$0xff]  }
0x1273   : > { %v15282_v62 = vpack.c.bf16 %v7188_v0, %v7187_v21  ;;  %vm7157_vm9 = vcmp.gt.f32.partialorder %v7149_v47, 0.0  ;;  %vm7158_vm11 = vcmp.gt.f32.partialorder %v7150_v60, 0.0  ;;  %v7169_v29 = vmul.f32 %v15252_v54, %v7149_v47  ;;  %v13212_v10 = vld [vmem:[%s16450_s1 + $0x1fc] ss:$40 sps:$4 sm:$0xff]   ;;  %v13207_v63 = vld [vmem:[%s16450_s1 + $0x1f0] ss:$40 sps:$4 sm:$0xff]  }
0x1274   : > { %v15287_v50 = vpack.c.bf16 %v7190_v44, %v7189_v6  ;;  %v7175_v32 = vsel %vm7155_vm7, %v7147_v59, %v7167_v48  ;;  %v7176_v34 = vsel %vm7156_vm8, %v7148_v46, %v7168_v52  ;;  %v7170_v22 = vmul.f32 %v15252_v54, %v7150_v60  ;;  %v13185_v54 = vld [vmem:[%s16450_s1 + $0xb4] ss:$40 sps:$4 sm:$0xff]   ;;  %v13198_v59 = vld [vmem:[%s16450_s1 + $0x158] ss:$40 sps:$4 sm:$0xff]   ;;  %v13203_v46 = vld [vmem:[%s16450_s1 + $0x1a4] ss:$40 sps:$4 sm:$0xff]  }
0x1275   : > { %7712 = vmatmul.mubr.bf16.vlgmr.msra.gmra.mrb[68].mxu1 %v15282_v62  ;;  %7785 = vmatmul.mubr.bf16.vlgmr.msra.gmra.mrb[56].mxu0 %v15282_v62  ;;  %v7191_v5 = vadd.f32 %v7183_v17, %v7175_v32  ;;  %v7192_v37 = vadd.f32 %v7184_v58, %v7176_v34  ;;  %v7177_v38 = vsel %vm7157_vm9, %v7149_v47, %v7169_v29  ;;  %v13206_v47 = vld [vmem:[%s16450_s1 + $0x1ac] ss:$40 sps:$4 sm:$0xff]   ;;  %v13213_v16 = vld [vmem:[%s16450_s1 + $0x240] ss:$40 sps:$4 sm:$0xff]   ;;  %v13234_v52 = vld [vmem:[%s16450_s1 + $0x1b0] ss:$40 sps:$4 sm:$0xff]  }
0x1276   : > { %7826 = vmatpush1.bf16.msra.mxu1 %v13171_v24  ;;  %7899 = vmatpush1.bf16.msra.mxu0 %v13174_v15  ;;  %v7178_v18 = vsel %vm7158_vm11, %v7150_v60, %v7170_v22  ;;  %v7193_v49 = vadd.f32 %v7185_v56, %v7177_v38  ;;  %v13201_v60 = vld [vmem:[%s16450_s1 + $0x1a0] ss:$40 sps:$4 sm:$0xff]   ;;  %v13215_v13 = vld [vmem:[%s16450_s1 + $0x244] ss:$40 sps:$4 sm:$0xff]   ;;  %v13224_v0 = vld [vmem:[%s16450_s1 + $0x74] ss:$40 sps:$4 sm:$0xff]  }
0x1277   : > { %7827 = vmatprep.subr.bf16.mxu1 %v13179_v39  ;;  %7900 = vmatprep.subr.bf16.mxu0 %v13182_v28  ;;  %v15300_v31 = vpack.c.bf16 %v7192_v37, %v7191_v5  ;;  %v7194_v27 = vadd.f32 %v7186_v36, %v7178_v18  ;;  %v13218_v14 = vld [vmem:[%s16450_s1 + $0x24c] ss:$40 sps:$4 sm:$0xff]   ;;  %v13216_v20 = vld [vmem:[%s16450_s1 + $0x248] ss:$40 sps:$4 sm:$0xff]  }
0x1278   : > { %7721 = vmatprep.mubr.bf16.mxu1 %v13963_v7  ;;  %7794 = vmatprep.mubr.bf16.mxu0 %v13963_v7  ;;  %v13221_v1 = vld [vmem:[%s16450_s1 + $0x24] ss:$40 sps:$4 sm:$0xff]   ;;  %v13219_v21 = vld [vmem:[%s16450_s1 + $0x20] ss:$40 sps:$4 sm:$0xff]   ;;  %v13222_v24 = vld [vmem:[%s16450_s1 + $0x70] ss:$40 sps:$4 sm:$0xff]  }
0x1279   : > { %v15304_v12 = vpack.c.bf16 %v7194_v27, %v7193_v49  ;;  %v13227_v15 = vld [vmem:[%s16450_s1 + $0xc4] ss:$40 sps:$4 sm:$0xff]   ;;  %v13225_v9 = vld [vmem:[%s16450_s1 + $0xc0] ss:$40 sps:$4 sm:$0xff]   ;;  %v13230_v26 = vld [vmem:[%s16450_s1 + $0x114] ss:$40 sps:$4 sm:$0xff]  }
0x127a   : > { %7828 = vmatpush1.bf16.msra.mxu1 %v13177_v57  ;;  %7901 = vmatpush1.bf16.msra.mxu0 %v13180_v45  ;;  %v13228_v39 = vld [vmem:[%s16450_s1 + $0x110] ss:$40 sps:$4 sm:$0xff]   ;;  %v13233_v6 = vld [vmem:[%s16450_s1 + $0x164] ss:$40 sps:$4 sm:$0xff]   ;;  %v13231_v44 = vld [vmem:[%s16450_s1 + $0x160] ss:$40 sps:$4 sm:$0xff]  }
0x127b   : > { %7829 = vmatprep.subr.bf16.mxu1 %v13185_v54  ;;  %7902 = vmatprep.subr.bf16.mxu0 %v13188_v23  ;;  %v13236_v48 = vld [vmem:[%s16450_s1 + $0x1b4] ss:$40 sps:$4 sm:$0xff]   ;;  %v13239_v17 = vld [vmem:[%s16450_s1 + $0x204] ss:$40 sps:$4 sm:$0xff]   ;;  %v13237_v58 = vld [vmem:[%s16450_s1 + $0x200] ss:$40 sps:$4 sm:$0xff]  }
0x127c   : > { %v13242_v28 = vld [vmem:[%s16450_s1 + $0x254] ss:$40 sps:$4 sm:$0xff]   ;;  %v13240_v29 = vld [vmem:[%s16450_s1 + $0x250] ss:$40 sps:$4 sm:$0xff]   ;;  %s11174_s1 = sshll.u32 %s14185_s19, 8  ;;  %s13965_s19 = smov [#allocation27]  }
0x127d   : > { %7722 = vmatmul.mubr.bf16.gmra.mrb[72].mxu1 %v15287_v50  ;;  %7795 = vmatmul.mubr.bf16.gmra.mrb[60].mxu0 %v15287_v50 }
0x127e   : > { %7830 = vmatpush1.bf16.msra.mxu1 %v13183_v30  ;;  %7903 = vmatpush1.bf16.msra.mxu0 %v13186_v35 }
0x127f   : > { %7831 = vmatprep.subr.bf16.mxu1 %v13191_v41  ;;  %7904 = vmatprep.subr.bf16.mxu0 %v13194_v51 }
0x1280   : > { %7731 = vmatprep.mubr.bf16.mxu1 %v13963_v7  ;;  %7804 = vmatprep.mubr.bf16.mxu0 %v13963_v7 }
0x1282   : > { %7832 = vmatpush1.bf16.msra.mxu1 %v13189_v53  ;;  %7905 = vmatpush1.bf16.msra.mxu0 %v13192_v55 }
0x1283   : > { %7833 = vmatprep.subr.bf16.mxu1 %v13197_v40  ;;  %7906 = vmatprep.subr.bf16.mxu0 %v13200_v8 }
0x1285   : > { %7732 = vmatmul.mubr.bf16.gmra.mrb[76].mxu1 %v15300_v31  ;;  %7805 = vmatmul.mubr.bf16.gmra.mrb[64].mxu0 %v15300_v31 }
0x1286   : > { %7834 = vmatpush1.bf16.msra.mxu1 %v13195_v25  ;;  %7907 = vmatpush1.bf16.msra.mxu0 %v13198_v59 }
0x1287   : > { %7835 = vmatprep.subr.bf16.mxu1 %v13203_v46  ;;  %7908 = vmatprep.subr.bf16.mxu0 %v13206_v47 }
0x1288   : > { %7741 = vmatprep.mubr.bf16.mxu1 %v13963_v7  ;;  %7814 = vmatprep.mubr.bf16.mxu0 %v13963_v7 }
0x128a   : > { %7836 = vmatpush1.bf16.msra.mxu1 %v13201_v60  ;;  %7909 = vmatpush1.bf16.msra.mxu0 %v13204_v2 }
0x128b   : > { %7837 = vmatprep.subr.bf16.mxu1 %v13209_v3  ;;  %7910 = vmatprep.subr.bf16.mxu0 %v13212_v10 }
0x128d   : > { %7742 = vmatmul.mubr.bf16.gmra.mrb[80].mxu1 %v15304_v12  ;;  %7815 = vmatmul.mubr.bf16.gmra.mrb[68].mxu0 %v15304_v12 }
0x128e   : > { %7838 = vmatpush1.bf16.msra.mxu1 %v13207_v63  ;;  %7911 = vmatpush1.bf16.msra.mxu0 %v13210_v11 }
0x128f   : > { %7839 = vmatprep.subr.bf16.mxu1 %v13215_v13  ;;  %7912 = vmatprep.subr.bf16.mxu0 %v13218_v14 }
0x1290   : > { %7857 = vmatprep.mubr.bf16.mxu1 %v13963_v7  ;;  %7930 = vmatprep.mubr.bf16.mxu0 %v13963_v7 }
0x1292   : > { %7840 = vmatpush1.bf16.msra.mxu1 %v13213_v16  ;;  %7913 = vmatpush1.bf16.msra.mxu0 %v13216_v20 }
0x1293   : > { %7971 = vmatprep.subr.bf16.mxu1 %v13221_v1 }
0x1295   : > { %7858 = vmatmul.mubr.bf16.vlgmr.msra.gmra.mrb[84].mxu1 %v15282_v62  ;;  %7931 = vmatmul.mubr.bf16.vlgmr.msra.gmra.mrb[72].mxu0 %v15282_v62 }
0x1296   : > { %7972 = vmatpush1.bf16.msra.mxu1 %v13219_v21  ;;  %7867 = vmatprep.mubr.bf16.mxu1 %v13963_v7 }
0x1297   : > { %7973 = vmatprep.subr.bf16.mxu1 %v13224_v0  ;;  %7940 = vmatprep.mubr.bf16.mxu0 %v13963_v7 }
0x129a   : > { %7974 = vmatpush1.bf16.msra.mxu1 %v13222_v24 }
0x129b   : > { %7975 = vmatprep.subr.bf16.mxu1 %v13227_v15 }
0x129d   : > { %7868 = vmatmul.mubr.bf16.gmra.mrb[88].mxu1 %v15287_v50  ;;  %7941 = vmatmul.mubr.bf16.gmra.mrb[76].mxu0 %v15287_v50 }
0x129e   : > { %7976 = vmatpush1.bf16.msra.mxu1 %v13225_v9  ;;  %7877 = vmatprep.mubr.bf16.mxu1 %v13963_v7 }
0x129f   : > { %7977 = vmatprep.subr.bf16.mxu1 %v13230_v26  ;;  %7950 = vmatprep.mubr.bf16.mxu0 %v13963_v7  ;;  %v8044_v26 = vld [vmem:[%s16452_s3] sm:$0xff] }
0x12a2   : > { %7978 = vmatpush1.bf16.msra.mxu1 %v13228_v39  ;;  %v10998_v39 = vld [vmem:[%s16452_s3 + $0x88] sm:$0xff] }
0x12a3   : > { %7979 = vmatprep.subr.bf16.mxu1 %v13233_v6 }
0x12a5   : > { %7878 = vmatmul.mubr.bf16.gmra.mrb[92].mxu1 %v15300_v31  ;;  %7951 = vmatmul.mubr.bf16.gmra.mrb[80].mxu0 %v15300_v31 }
0x12a6   : > { %7980 = vmatpush1.bf16.msra.mxu1 %v13231_v44  ;;  %7887 = vmatprep.mubr.bf16.mxu1 %v13963_v7 }
0x12a7   : > { %7981 = vmatprep.subr.bf16.mxu1 %v13236_v48  ;;  %7960 = vmatprep.mubr.bf16.mxu0 %v13963_v7 }
0x12aa   : > { %7982 = vmatpush1.bf16.msra.mxu1 %v13234_v52 }
0x12ab   : > { %7983 = vmatprep.subr.bf16.mxu1 %v13239_v17 }
0x12ad   : > { %7888 = vmatmul.mubr.bf16.gmra.mrb[96].mxu1 %v15304_v12  ;;  %7961 = vmatmul.mubr.bf16.gmra.mrb[84].mxu0 %v15304_v12 }
0x12ae   : > { %7984 = vmatpush1.bf16.msra.mxu1 %v13237_v58  ;;  %8003 = vmatprep.mubr.bf16.mxu1 %v13963_v7 }
0x12af   : > { %7985 = vmatprep.subr.bf16.mxu1 %v13242_v28  ;;  %8425 = vmatprep.mubr.f32.mxu0 %v13960_v61 }
0x12b2   : > { %7986 = vmatpush1.bf16.msra.mxu1 %v13240_v29 }
0x12b5   : > { %8004 = vmatmul.mubr.bf16.vlgmr.msra.gmra.mrb[100].mxu1 %v15282_v62 }
0x12b6   : > { %8013 = vmatprep.mubr.bf16.mxu1 %v13963_v7 }
0x12bd   : > { %8014 = vmatmul.mubr.bf16.gmra.mrb[104].mxu1 %v15287_v50 }
0x12be   : > { %8023 = vmatprep.mubr.bf16.mxu1 %v13963_v7 }
0x12c5   : > { %8024 = vmatmul.mubr.bf16.gmra.mrb[108].mxu1 %v15300_v31 }
0x12c6   : > { %8033 = vmatprep.mubr.bf16.mxu1 %v13963_v7 }
0x12cd   : > { %8034 = vmatmul.mubr.bf16.gmra.mrb[112].mxu1 %v15304_v12 }
0x12ce   : > { %8201 = vmatprep.mubr.f32.mxu1 %v13960_v61 }
0x1348   : > { %v7713_v56 = vpop.f32.mrb[68].mxu1  ;;  %v7786_v32 = vpop.f32.mrb[56].mxu0 }
0x1349   : > { %v7715_v34 = vpop.f32.mrb[69].mxu1  ;;  %v7788_v22 = vpop.f32.mrb[57].mxu0 }
0x134a   : > { %v7717_v36 = vpop.f32.mrb[70].mxu1  ;;  %v7790_v62 = vpop.f32.mrb[58].mxu0 }
0x134b   : > { %v15380_v5 = vpack.c.bf16 %v7717_v36, %v7713_v56  ;;  %v12007_v37 = vpack.c.bf16 %v7790_v62, %v7786_v32  ;;  %v7719_v50 = vpop.f32.mrb[71].mxu1  ;;  %v7792_v38 = vpop.f32.mrb[59].mxu0  ;;  %v10999_v62 = vld [vmem:[%s16452_s3 + $0x90] sm:$0xff] }
0x134c   : > { %v12023_v57 = vpack.c.bf16 %v7719_v50, %v7715_v34  ;;  %v12005_v45 = vpack.c.bf16 %v7792_v38, %v7788_v22  ;;  %v8045_v34 = vld [vmem:[%s16452_s3 + $0x8] sm:$0xff] }
0x134e   : > { %12006 = vmatprep.subr.bf16.mxu1 %v12005_v45  ;;  %12024 = vmatprep.subr.bf16.mxu0 %v12023_v57 }
0x134f   : > { %12008 = vmatpush1.bf16.msra.mxu1 %v12007_v37  ;;  %12026 = vmatpush1.bf16.msra.mxu0 %v15380_v5  ;;  %v8046_v37 = vld [vmem:[%s16452_s3 + $0x10] sm:$0xff] }
0x1350   : > { %v7723_v7 = vpop.f32.mrb[72].mxu1  ;;  %v7796_v18 = vpop.f32.mrb[60].mxu0 }
0x1351   : > { %v7725_v49 = vpop.f32.mrb[73].mxu1  ;;  %v7798_v54 = vpop.f32.mrb[61].mxu0 }
0x1352   : > { %v7727_v23 = vpop.f32.mrb[74].mxu1  ;;  %v7800_v31 = vpop.f32.mrb[62].mxu0 }
0x1353   : > { %v15383_v27 = vpack.c.bf16 %v7727_v23, %v7723_v7  ;;  %v12011_v12 = vpack.c.bf16 %v7800_v31, %v7796_v18  ;;  %v7729_v30 = vpop.f32.mrb[75].mxu1  ;;  %v7802_v35 = vpop.f32.mrb[63].mxu0  ;;  %v11000_v18 = vld [vmem:[%s16452_s3 + $0x98] sm:$0xff] }
0x1354   : > { %v12027_v41 = vpack.c.bf16 %v7729_v30, %v7725_v49  ;;  %v12009_v51 = vpack.c.bf16 %v7802_v35, %v7798_v54  ;;  %v11001_v35 = vld [vmem:[%s16452_s3 + $0xa0] sm:$0xff] }
0x1356   : > { %12010 = vmatprep.subr.bf16.mxu1 %v12009_v51  ;;  %12028 = vmatprep.subr.bf16.mxu0 %v12027_v41 }
0x1357   : > { %12012 = vmatpush1.bf16.msra.mxu1 %v12011_v12  ;;  %12030 = vmatpush1.bf16.msra.mxu0 %v15383_v27 }
0x1358   : > { %v7733_v53 = vpop.f32.mrb[76].mxu1  ;;  %v7806_v55 = vpop.f32.mrb[64].mxu0 }
0x1359   : > { %v7735_v40 = vpop.f32.mrb[77].mxu1  ;;  %v7808_v8 = vpop.f32.mrb[65].mxu0 }
0x135a   : > { %v7737_v25 = vpop.f32.mrb[78].mxu1  ;;  %v7810_v59 = vpop.f32.mrb[66].mxu0 }
0x135b   : > { %v15386_v46 = vpack.c.bf16 %v7737_v25, %v7733_v53  ;;  %v12015_v47 = vpack.c.bf16 %v7810_v59, %v7806_v55  ;;  %v7739_v60 = vpop.f32.mrb[79].mxu1  ;;  %v7812_v2 = vpop.f32.mrb[67].mxu0  ;;  %v11002_v59 = vld [vmem:[%s16452_s3 + $0xa8] sm:$0xff] }
0x135c   : > { %v12031_v3 = vpack.c.bf16 %v7739_v60, %v7735_v40  ;;  %v12013_v10 = vpack.c.bf16 %v7812_v2, %v7808_v8 }
0x135e   : > { %12014 = vmatprep.subr.bf16.mxu1 %v12013_v10  ;;  %12032 = vmatprep.subr.bf16.mxu0 %v12031_v3 }
0x135f   : > { %12016 = vmatpush1.bf16.msra.mxu1 %v12015_v47  ;;  %12034 = vmatpush1.bf16.msra.mxu0 %v15386_v46 }
0x1360   : > { %v7743_v63 = vpop.f32.mrb[80].mxu1  ;;  %v7816_v11 = vpop.f32.mrb[68].mxu0 }
0x1361   : > { %v7745_v13 = vpop.f32.mrb[81].mxu1  ;;  %v7818_v14 = vpop.f32.mrb[69].mxu0 }
0x1362   : > { %v7747_v16 = vpop.f32.mrb[82].mxu1  ;;  %v7820_v20 = vpop.f32.mrb[70].mxu0 }
0x1363   : > { %v15389_v1 = vpack.c.bf16 %v7747_v16, %v7743_v63  ;;  %v12020_v21 = vpack.c.bf16 %v7820_v20, %v7816_v11  ;;  %v7749_v0 = vpop.f32.mrb[83].mxu1  ;;  %v7822_v24 = vpop.f32.mrb[71].mxu0  ;;  %v11003_v11 = vld [vmem:[%s16452_s3 + $0xb0] sm:$0xff] }
0x1364   : > { %v12035_v15 = vpack.c.bf16 %v7749_v0, %v7745_v13  ;;  %v12017_v9 = vpack.c.bf16 %v7822_v24, %v7818_v14  ;;  %v8050_v13 = vld [vmem:[%s16452_s3 + $0x30] sm:$0xff]  ;;  %v11004_v24 = vld [vmem:[%s16452_s3 + $0xb8] sm:$0xff] }
0x1366   : > { %12019 = vmatprep.subr.msk.bf16.mxu1 %vm14873_vm10, %v12017_v9  ;;  %12037 = vmatprep.subr.msk.bf16.mxu0 %vm14873_vm10, %v12035_v15 }
0x1367   : > { %12022 = vmatpush1.bf16.msk.msra.mxu1 %vm14873_vm10, %v12020_v21  ;;  %12040 = vmatpush1.bf16.msk.msra.mxu0 %vm14873_vm10, %v15389_v1 }
0x1368   : > { %v7859_v6 = vpop.f32.mrb[84].mxu1  ;;  %v15402_v44 = vpop.f32.mrb[72].mxu0  ;;  %12167 = vmatprep.subr.bf16.mxu1 %v12023_v57 }
0x1369   : > { %v7861_v48 = vpop.f32.mrb[85].mxu1  ;;  %v15404_v52 = vpop.f32.mrb[73].mxu0 }
0x136a   : > { %v7863_v17 = vpop.f32.mrb[86].mxu1  ;;  %v15406_v58 = vpop.f32.mrb[74].mxu0  ;;  %11036 = vmatmul.mubr.msk.f32.vlgmr.msra.gmra.mrb[88].mxu0 %vm8079_vm12, %v8044_v26  ;;  %11017 = vmatmul.mubr.msk.f32.vlgmr.msra.gmra.mrb[66].mxu1 %vm8079_vm12, %v10998_v39 }
0x136b   : > { %v12043_v28 = vpack.c.bf16 %v7863_v17, %v7859_v6  ;;  %v12061_v29 = vpack.c.bf16 %v15406_v58, %v15402_v44  ;;  %v7865_v56 = vpop.f32.mrb[87].mxu1  ;;  %v15412_v32 = vpop.f32.mrb[75].mxu0  ;;  %12171 = vmatpush1.bf16.msra.mxu1 %v15380_v5  ;;  %8431 = vmatprep.mubr.f32.mxu0 %v13960_v61  ;;  %v8051_v6 = vld [vmem:[%s16452_s3 + $0x38] sm:$0xff]  ;;  %v11055_v44 = vld [vmem:[%s16452_s3 + $0x120] sm:$0xff] }
0x136c   : > { %v12041_v22 = vpack.c.bf16 %v7865_v56, %v7861_v48  ;;  %v12059_v36 = vpack.c.bf16 %v15412_v32, %v15404_v52  ;;  %12168 = vmatprep.subr.bf16.mxu1 %v12027_v41  ;;  %8207 = vmatprep.mubr.f32.mxu1 %v13960_v61  ;;  %v8048_v41 = vld [vmem:[%s16452_s3 + $0x20] sm:$0xff]  ;;  %v11053_v56 = vld [vmem:[%s16452_s3 + $0x110] sm:$0xff]  ;;  %v11054_v52 = vld [vmem:[%s16452_s3 + $0x118] sm:$0xff] }
0x136e   : > { %11037 = vmatmul.mubr.msk.f32.gmra.mrb[90].mxu0 %vm8079_vm12, %v8045_v34  ;;  %12042 = vmatprep.subr.bf16.mxu0 %v12041_v22 }
0x136f   : > { %12172 = vmatpush1.bf16.msra.mxu1 %v15383_v27  ;;  %12044 = vmatpush1.bf16.msra.mxu0 %v12043_v28  ;;  %v8047_v27 = vld [vmem:[%s16452_s3 + $0x18] sm:$0xff]  ;;  %v11005_v28 = vld [vmem:[%s16452_s3 + $0xc0] sm:$0xff] }
0x1370   : > { %v7869_v5 = vpop.f32.mrb[88].mxu1  ;;  %v15424_v50 = vpop.f32.mrb[76].mxu0  ;;  %12169 = vmatprep.subr.bf16.mxu1 %v12031_v3  ;;  %8437 = vmatprep.mubr.f32.mxu0 %v13960_v61  ;;  %v8049_v3 = vld [vmem:[%s16452_s3 + $0x28] sm:$0xff] }
0x1371   : > { %v7871_v38 = vpop.f32.mrb[89].mxu1  ;;  %v15427_v57 = vpop.f32.mrb[77].mxu0  ;;  %11018 = vmatmul.mubr.msk.f32.gmra.mrb[116].mxu1 %vm8079_vm12, %v10999_v62 }
0x1372   : > { %v7873_v45 = vpop.f32.mrb[90].mxu1  ;;  %v15430_v7 = vpop.f32.mrb[78].mxu0  ;;  %11038 = vmatmul.mubr.msk.f32.gmra.mrb[92].mxu0 %vm8079_vm12, %v8046_v37  ;;  %8213 = vmatprep.mubr.f32.mxu1 %v13960_v61  ;;  %v11006_v37 = vld [vmem:[%s16452_s3 + $0xc8] sm:$0xff] }
0x1373   : > { %v12047_v49 = vpack.c.bf16 %v7873_v45, %v7869_v5  ;;  %v12065_v54 = vpack.c.bf16 %v15430_v7, %v15424_v50  ;;  %v7875_v23 = vpop.f32.mrb[91].mxu1  ;;  %v15437_v31 = vpop.f32.mrb[79].mxu0  ;;  %12173 = vmatpush1.bf16.msra.mxu1 %v15386_v46  ;;  %8443 = vmatprep.mubr.f32.mxu0 %v13960_v61  ;;  %v11008_v50 = vld [vmem:[%s16452_s3 + $0xd8] sm:$0xff] }
0x1374   : > { %v12045_v12 = vpack.c.bf16 %v7875_v23, %v7871_v38  ;;  %v12063_v30 = vpack.c.bf16 %v15437_v31, %v15427_v57  ;;  %12170 = vmatprep.subr.msk.bf16.mxu1 %vm14873_vm10, %v12035_v15  ;;  %v11057_v23 = vld [vmem:[%s16452_s3 + $0x130] sm:$0xff] }
0x1375   : > { %11019 = vmatmul.mubr.msk.f32.gmra.mrb[118].mxu1 %vm8079_vm12, %v11000_v18  ;;  %v11056_v18 = vld [vmem:[%s16452_s3 + $0x128] sm:$0xff] }
0x1376   : > { %11039 = vmatmul.mubr.msk.f32.gmra.mrb[94].mxu0 %vm8079_vm12, %v8047_v27  ;;  %12046 = vmatprep.subr.bf16.mxu0 %v12045_v12 }
0x1377   : > { %12174 = vmatpush1.bf16.msk.msra.mxu1 %vm14873_vm10, %v15389_v1  ;;  %12048 = vmatpush1.bf16.msra.mxu0 %v12047_v49 }
0x1378   : > { %v7879_v51 = vpop.f32.mrb[92].mxu1  ;;  %v15453_v53 = vpop.f32.mrb[80].mxu0  ;;  %8449 = vmatprep.mubr.f32.mxu0 %v13960_v61  ;;  %8219 = vmatprep.mubr.f32.mxu1 %v13960_v61 }
0x1379   : > { %v7881_v55 = vpop.f32.mrb[93].mxu1  ;;  %v15457_v40 = vpop.f32.mrb[81].mxu0  ;;  %11020 = vmatmul.mubr.msk.f32.gmra.mrb[120].mxu1 %vm8079_vm12, %v11001_v35  ;;  %12095 = vmatprep.subr.bf16.mxu1 %v13961_v33 }
0x137a   : > { %v7883_v8 = vpop.f32.mrb[94].mxu1  ;;  %v15461_v25 = vpop.f32.mrb[82].mxu0  ;;  %11040 = vmatmul.mubr.msk.f32.gmra.mrb[96].mxu0 %vm8079_vm12, %v8048_v41  ;;  %8225 = vmatprep.mubr.f32.mxu1 %v13960_v61 }
0x137b   : > { %v12051_v46 = vpack.c.bf16 %v7883_v8, %v7879_v51  ;;  %v12069_v47 = vpack.c.bf16 %v15461_v25, %v15453_v53  ;;  %v7885_v60 = vpop.f32.mrb[95].mxu1  ;;  %v7958_v2 = vpop.f32.mrb[83].mxu0  ;;  %8455 = vmatprep.mubr.f32.mxu0 %v13960_v61  ;;  %v11058_v51 = vld [vmem:[%s16452_s3 + $0x138] sm:$0xff] }
0x137c   : > { %v12049_v10 = vpack.c.bf16 %v7885_v60, %v7881_v55  ;;  %v12067_v63 = vpack.c.bf16 %v7958_v2, %v15457_v40  ;;  %v11011_v55 = vld [vmem:[%s16452_s3 + $0xf0] sm:$0xff]  ;;  %v11059_v40 = vld [vmem:[%s16452_s3 + $0x140] sm:$0xff]  ;;  %v11060_v2 = vld [vmem:[%s16452_s3 + $0x148] sm:$0xff] }
0x137d   : > { %11021 = vmatmul.mubr.msk.f32.gmra.mrb[122].mxu1 %vm8079_vm12, %v11002_v59 }
0x137e   : > { %11041 = vmatmul.mubr.msk.f32.gmra.mrb[98].mxu0 %vm8079_vm12, %v8049_v3  ;;  %12050 = vmatprep.subr.bf16.mxu0 %v12049_v10  ;;  %v11013_v10 = vld [vmem:[%s16452_s3 + $0x100] sm:$0xff] }
0x137f   : > { %12052 = vmatpush1.bf16.msra.mxu0 %v12051_v46  ;;  %8461 = vmatprep.mubr.f32.mxu0 %v13960_v61  ;;  %v11012_v46 = vld [vmem:[%s16452_s3 + $0xf8] sm:$0xff] }
0x1380   : > { %v7889_v14 = vpop.f32.mrb[96].mxu1  ;;  %v15476_v16 = vpop.f32.mrb[84].mxu0  ;;  %8231 = vmatprep.mubr.f32.mxu1 %v13960_v61 }
0x1381   : > { %v7891_v20 = vpop.f32.mrb[97].mxu1  ;;  %v7964_v1 = vpop.f32.mrb[85].mxu0  ;;  %11022 = vmatmul.mubr.msk.f32.gmra.mrb[124].mxu1 %vm8079_vm12, %v11003_v11  ;;  %v11014_v11 = vld [vmem:[%s16452_s3 + $0x108] sm:$0x1] }
0x1382   : > { %v7893_v21 = vpop.f32.mrb[98].mxu1  ;;  %v7966_v0 = vpop.f32.mrb[86].mxu0  ;;  %11042 = vmatmul.mubr.msk.f32.gmra.mrb[100].mxu0 %vm8079_vm12, %v8050_v13  ;;  %8237 = vmatprep.mubr.f32.mxu1 %v13960_v61  ;;  %v11062_v13 = vld [vmem:[%s16452_s3 + $0x158] sm:$0xff] }
0x1383   : > { %v12056_v15 = vpack.c.bf16 %v7893_v21, %v7889_v14  ;;  %v12074_v9 = vpack.c.bf16 %v7966_v0, %v15476_v16  ;;  %v7895_v26 = vpop.f32.mrb[99].mxu1  ;;  %v7968_v39 = vpop.f32.mrb[87].mxu0  ;;  %8467 = vmatprep.mubr.f32.mxu0 %v13960_v61  ;;  %v8052_v14 = vld [vmem:[%s16452_s3 + $0x40] sm:$0xff]  ;;  %v8054_v21 = vld [vmem:[%s16452_s3 + $0x50] sm:$0xff] }
0x1384   : > { %v12053_v48 = vpack.c.bf16 %v7895_v26, %v7891_v20  ;;  %v12071_v17 = vpack.c.bf16 %v7968_v39, %v7964_v1  ;;  %v11063_v16 = vld [vmem:[%s16452_s3 + $0x160] sm:$0xff]  ;;  %v8053_v20 = vld [vmem:[%s16452_s3 + $0x48] sm:$0xff]  ;;  %v11065_v0 = vld [vmem:[%s16452_s3 + $0x170] sm:$0xff] }
0x1385   : > { %11023 = vmatmul.mubr.msk.f32.gmra.mrb[126].mxu1 %vm8079_vm12, %v11004_v24  ;;  %v11064_v1 = vld [vmem:[%s16452_s3 + $0x168] sm:$0xff]  ;;  %v8055_v24 = vld [vmem:[%s16452_s3 + $0x58] sm:$0xff]  ;;  %v11067_v26 = vld [vmem:[%s16452_s3 + $0x180] sm:$0xff] }
0x1386   : > { %11043 = vmatmul.mubr.msk.f32.gmra.mrb[102].mxu0 %vm8079_vm12, %v8051_v6  ;;  %12055 = vmatprep.subr.msk.bf16.mxu0 %vm14873_vm10, %v12053_v48  ;;  %v8057_v39 = vld [vmem:[%s16452_s3 + $0x68] sm:$0xff]  ;;  %v8058_v48 = vld [vmem:[%s16452_s3 + $0x70] sm:$0xff] }
0x1387   : > { %12058 = vmatpush1.bf16.msk.msra.mxu0 %vm14873_vm10, %v12056_v15  ;;  %8667 = vmatprep.mubr.f32.mxu0 %v13960_v61  ;;  %v11066_v15 = vld [vmem:[%s16452_s3 + $0x178] sm:$0xff]  ;;  %v11068_v6 = vld [vmem:[%s16452_s3 + $0x188] sm:$0xff] }
0x1388   : > { %v15495_v34 = vpop.f32.mrb[100].mxu1  ;;  %12060 = vmatprep.subr.bf16.mxu0 %v12059_v36  ;;  %8243 = vmatprep.mubr.f32.mxu1 %v13960_v61  ;;  %v11007_v36 = vld [vmem:[%s16452_s3 + $0xd0] sm:$0xff] }
0x1389   : > { %v8007_v22 = vpop.f32.mrb[101].mxu1  ;;  %11024 = vmatmul.mubr.msk.f32.gmra.mrb[128].mxu1 %vm8079_vm12, %v11005_v28  ;;  %v8059_v28 = vld [vmem:[%s16452_s3 + $0x78] sm:$0xff] }
0x138a   : > { %v15502_v62 = vpop.f32.mrb[102].mxu1  ;;  %11072 = vmatmul.mubr.msk.f32.vlgmr.msra.gmra.mrb[88].mxu0 %vm8079_vm12, %v11053_v56  ;;  %8249 = vmatprep.mubr.f32.mxu1 %v13960_v61  ;;  %v11089_v56 = vld [vmem:[%s16452_s3 + $0x198] sm:$0xff] }
0x138b   : > { %v12079_v5 = vpack.c.bf16 %v15502_v62, %v15495_v34  ;;  %v8011_v38 = vpop.f32.mrb[103].mxu1  ;;  %12062 = vmatpush1.bf16.msra.mxu0 %v12061_v29  ;;  %8673 = vmatprep.mubr.f32.mxu0 %v13960_v61  ;;  %v11091_v34 = vld [vmem:[%s16452_s3 + $0x1a8] sm:$0xff]  ;;  %v11092_v62 = vld [vmem:[%s16452_s3 + $0x1b0] sm:$0xff] }
0x138c   : > { %v12077_v32 = vpack.c.bf16 %v8011_v38, %v8007_v22  ;;  %12064 = vmatprep.subr.bf16.mxu0 %v12063_v30  ;;  %v11010_v30 = vld [vmem:[%s16452_s3 + $0xe8] sm:$0xff]  ;;  %v8060_v22 = vld [vmem:[%s16452_s3 + $0x80] sm:$0x1] }
0x138d   : > { %11025 = vmatmul.mubr.msk.f32.gmra.mrb[130].mxu1 %vm8079_vm12, %v11006_v37  ;;  %v11090_v37 = vld [vmem:[%s16452_s3 + $0x1a0] sm:$0xff] }
0x138e   : > { %11073 = vmatmul.mubr.msk.f32.gmra.mrb[90].mxu0 %vm8079_vm12, %v11054_v52  ;;  %8255 = vmatprep.mubr.f32.mxu1 %v13960_v61  ;;  %v11094_v38 = vld [vmem:[%s16452_s3 + $0x1c0] sm:$0xff]  ;;  %v11095_v52 = vld [vmem:[%s16452_s3 + $0x1c8] sm:$0xff] }
0x138f   : > { %12066 = vmatpush1.bf16.msra.mxu0 %v12065_v54  ;;  %8679 = vmatprep.mubr.f32.mxu0 %v13960_v61  ;;  %v11009_v54 = vld [vmem:[%s16452_s3 + $0xe0] sm:$0xff] }
0x1390   : > { %v15526_v58 = vpop.f32.mrb[104].mxu1  ;;  %12068 = vmatprep.subr.bf16.mxu0 %v12067_v63  ;;  %v11061_v63 = vld [vmem:[%s16452_s3 + $0x150] sm:$0xff] }
0x1391   : > { %v15528_v29 = vpop.f32.mrb[105].mxu1  ;;  %11026 = vmatmul.mubr.msk.f32.gmra.mrb[132].mxu1 %vm8079_vm12, %v11007_v36  ;;  %v11098_v36 = vld [vmem:[%s16452_s3 + $0x1e0] sm:$0xff] }
0x1392   : > { %v15531_v57 = vpop.f32.mrb[106].mxu1  ;;  %11074 = vmatmul.mubr.msk.f32.gmra.mrb[92].mxu0 %vm8079_vm12, %v11055_v44  ;;  %8261 = vmatprep.mubr.f32.mxu1 %v13960_v61  ;;  %v11099_v44 = vld [vmem:[%s16452_s3 + $0x1e8] sm:$0xff] }
0x1393   : > { %v12083_v45 = vpack.c.bf16 %v15531_v57, %v15526_v58  ;;  %v15538_v7 = vpop.f32.mrb[107].mxu1  ;;  %12070 = vmatpush1.bf16.msra.mxu0 %v12069_v47  ;;  %8685 = vmatprep.mubr.f32.mxu0 %v13960_v61  ;;  %v11100_v58 = vld [vmem:[%s16452_s3 + $0x1f0] sm:$0xff]  ;;  %v11102_v57 = vld [vmem:[%s16452_s3 + $0x200] sm:$0xff] }
0x1394   : > { %v12081_v49 = vpack.c.bf16 %v15538_v7, %v15528_v29  ;;  %12073 = vmatprep.subr.msk.bf16.mxu0 %vm14873_vm10, %v12071_v17  ;;  %v11069_v17 = vld [vmem:[%s16452_s3 + $0x190] sm:$0x1]  ;;  %v11101_v29 = vld [vmem:[%s16452_s3 + $0x1f8] sm:$0xff] }
0x1395   : > { %11027 = vmatmul.mubr.msk.f32.gmra.mrb[134].mxu1 %vm8079_vm12, %v11008_v50  ;;  %v11103_v50 = vld [vmem:[%s16452_s3 + $0x208] sm:$0xff]  ;;  %v11105_v7 = vld [vmem:[%s16452_s3 + $0x218] sm:$0x1] }
0x1396   : > { %11075 = vmatmul.mubr.msk.f32.gmra.mrb[94].mxu0 %vm8079_vm12, %v11056_v18  ;;  %8267 = vmatprep.mubr.f32.mxu1 %v13960_v61  ;;  %v11125_v18 = vld [vmem:[%s16452_s3 + $0x220] sm:$0xff] }
0x1397   : > { %12076 = vmatpush1.bf16.msk.msra.mxu0 %vm14873_vm10, %v12074_v9  ;;  %8691 = vmatprep.mubr.f32.mxu0 %v13960_v61  ;;  %v8056_v9 = vld [vmem:[%s16452_s3 + $0x60] sm:$0xff] }
0x1398   : > { %v15557_v31 = vpop.f32.mrb[108].mxu1  ;;  %12078 = vmatprep.subr.bf16.mxu0 %v12077_v32  ;;  %v11097_v32 = vld [vmem:[%s16452_s3 + $0x1d8] sm:$0xff] }
0x1399   : > { %v15559_v27 = vpop.f32.mrb[109].mxu1  ;;  %11028 = vmatmul.mubr.msk.f32.gmra.mrb[136].mxu1 %vm8079_vm12, %v11009_v54  ;;  %v11127_v54 = vld [vmem:[%s16452_s3 + $0x230] sm:$0xff] }
0x139a   : > { %v15562_v12 = vpop.f32.mrb[110].mxu1  ;;  %11076 = vmatmul.mubr.msk.f32.gmra.mrb[96].mxu0 %vm8079_vm12, %v11057_v23  ;;  %8273 = vmatprep.mubr.f32.mxu1 %v13960_v61  ;;  %v11128_v23 = vld [vmem:[%s16452_s3 + $0x238] sm:$0xff] }
0x139b   : > { %v12087_v35 = vpack.c.bf16 %v15562_v12, %v15557_v31  ;;  %v15569_v41 = vpop.f32.mrb[111].mxu1  ;;  %8697 = vmatprep.mubr.f32.mxu0 %v13960_v61  ;;  %v11129_v31 = vld [vmem:[%s16452_s3 + $0x240] sm:$0xff]  ;;  %v11131_v12 = vld [vmem:[%s16452_s3 + $0x250] sm:$0xff] }
0x139c   : > { %v12085_v53 = vpack.c.bf16 %v15569_v41, %v15559_v27  ;;  %v11130_v27 = vld [vmem:[%s16452_s3 + $0x248] sm:$0xff] }
0x139d   : > { %11029 = vmatmul.mubr.msk.f32.gmra.mrb[138].mxu1 %vm8079_vm12, %v11010_v30  ;;  %v11132_v30 = vld [vmem:[%s16452_s3 + $0x258] sm:$0xff]  ;;  %v11134_v41 = vld [vmem:[%s16452_s3 + $0x268] sm:$0xff] }
0x139e   : > { %11077 = vmatmul.mubr.msk.f32.gmra.mrb[98].mxu0 %vm8079_vm12, %v11058_v51  ;;  %8279 = vmatprep.mubr.f32.mxu1 %v13960_v61  ;;  %v11135_v51 = vld [vmem:[%s16452_s3 + $0x270] sm:$0xff] }
0x139f   : > { %8703 = vmatprep.mubr.f32.mxu0 %v13960_v61 }
0x13a0   : > { %v15581_v8 = vpop.f32.mrb[112].mxu1 }
0x13a1   : > { %v15583_v25 = vpop.f32.mrb[113].mxu1  ;;  %11030 = vmatmul.mubr.msk.f32.gmra.mrb[140].mxu1 %vm8079_vm12, %v11011_v55 }
0x13a2   : > { %v15586_v59 = vpop.f32.mrb[114].mxu1  ;;  %11078 = vmatmul.mubr.msk.f32.gmra.mrb[100].mxu0 %vm8079_vm12, %v11059_v40  ;;  %8285 = vmatprep.mubr.f32.mxu1 %v13960_v61 }
0x13a3   : > { %v12092_v47 = vpack.c.bf16 %v15586_v59, %v15581_v8  ;;  %v15593_v60 = vpop.f32.mrb[115].mxu1  ;;  %8709 = vmatprep.mubr.f32.mxu0 %v13960_v61  ;;  %v11137_v8 = vld [vmem:[%s16452_s3 + $0x280] sm:$0xff] }
0x13a4   : > { %v12089_v3 = vpack.c.bf16 %v15593_v60, %v15583_v25  ;;  %v11138_v25 = vld [vmem:[%s16452_s3 + $0x288] sm:$0xff] }
0x13a5   : > { %11031 = vmatmul.mubr.msk.f32.gmra.mrb[142].mxu1 %vm8079_vm12, %v11012_v46 }
0x13a6   : > { %11079 = vmatmul.mubr.msk.f32.gmra.mrb[102].mxu0 %vm8079_vm12, %v11060_v2  ;;  %8291 = vmatprep.mubr.f32.mxu1 %v13960_v61 }
0x13a7   : > { %8715 = vmatprep.mubr.f32.mxu0 %v13960_v61 }
0x13a9   : > { %11032 = vmatmul.mubr.msk.f32.gmra.mrb[144].mxu1 %vm8079_vm12, %v11013_v10 }
0x13aa   : > { %11080 = vmatmul.mubr.msk.f32.gmra.mrb[104].mxu0 %vm8079_vm12, %v11061_v63  ;;  %8297 = vmatprep.mubr.f32.mxu1 %v13960_v61 }
0x13ab   : > { %8721 = vmatprep.mubr.f32.mxu0 %v13960_v61 }
0x13ad   : > { %11033 = vmatmul.mubr.msk.f32.gmra.mrb[146].mxu1 %vm8079_vm12, %v11014_v11  ;;  %v11141_v11 = vld [vmem:[%s16452_s3 + $0x2a0] sm:$0x1] }
0x13ae   : > { %11081 = vmatmul.mubr.msk.f32.gmra.mrb[106].mxu0 %vm8079_vm12, %v11062_v13  ;;  %8473 = vmatprep.mubr.f32.mxu1 %v13960_v61 }
0x13af   : > { %8727 = vmatprep.mubr.f32.mxu0 %v13960_v61 }
0x13b1   : > { %11044 = vmatmul.mubr.msk.f32.vlgmr.msra.gmra.mrb[130].mxu1 %vm8079_vm12, %v8052_v14 }
0x13b2   : > { %11082 = vmatmul.mubr.msk.f32.gmra.mrb[108].mxu0 %vm8079_vm12, %v11063_v16  ;;  %8479 = vmatprep.mubr.f32.mxu1 %v13960_v61 }
0x13b3   : > { %8733 = vmatprep.mubr.f32.mxu0 %v13960_v61 }
0x13b5   : > { %11045 = vmatmul.mubr.msk.f32.gmra.mrb[132].mxu1 %vm8079_vm12, %v8053_v20 }
0x13b6   : > { %11083 = vmatmul.mubr.msk.f32.gmra.mrb[110].mxu0 %vm8079_vm12, %v11064_v1  ;;  %8485 = vmatprep.mubr.f32.mxu1 %v13960_v61 }
0x13b7   : > { %8739 = vmatprep.mubr.f32.mxu0 %v13960_v61 }
0x13b9   : > { %11046 = vmatmul.mubr.msk.f32.gmra.mrb[134].mxu1 %vm8079_vm12, %v8054_v21 }
0x13ba   : > { %11084 = vmatmul.mubr.msk.f32.gmra.mrb[112].mxu0 %vm8079_vm12, %v11065_v0  ;;  %8491 = vmatprep.mubr.f32.mxu1 %v13960_v61 }
0x13bb   : > { %8745 = vmatprep.mubr.f32.mxu0 %v13960_v61 }
0x13bd   : > { %11047 = vmatmul.mubr.msk.f32.gmra.mrb[136].mxu1 %vm8079_vm12, %v8055_v24 }
0x13be   : > { %11085 = vmatmul.mubr.msk.f32.gmra.mrb[114].mxu0 %vm8079_vm12, %v11066_v15  ;;  %8497 = vmatprep.mubr.f32.mxu1 %v13960_v61 }
0x13bf   : > { %8751 = vmatprep.mubr.f32.mxu0 %v13960_v61 }
0x13c1   : > { %11048 = vmatmul.mubr.msk.f32.gmra.mrb[138].mxu1 %vm8079_vm12, %v8056_v9 }
0x13c2   : > { %11086 = vmatmul.mubr.msk.f32.gmra.mrb[116].mxu0 %vm8079_vm12, %v11067_v26  ;;  %8503 = vmatprep.mubr.f32.mxu1 %v13960_v61 }
0x13c3   : > { %8757 = vmatprep.mubr.f32.mxu0 %v13960_v61 }
0x13c5   : > { %11049 = vmatmul.mubr.msk.f32.gmra.mrb[140].mxu1 %vm8079_vm12, %v8057_v39 }
0x13c6   : > { %11087 = vmatmul.mubr.msk.f32.gmra.mrb[118].mxu0 %vm8079_vm12, %v11068_v6  ;;  %8509 = vmatprep.mubr.f32.mxu1 %v13960_v61 }
0x13c7   : > { %8763 = vmatprep.mubr.f32.mxu0 %v13960_v61 }
0x13c9   : > { %11050 = vmatmul.mubr.msk.f32.gmra.mrb[142].mxu1 %vm8079_vm12, %v8058_v48 }
0x13ca   : > { %11088 = vmatmul.mubr.msk.f32.gmra.mrb[120].mxu0 %vm8079_vm12, %v11069_v17  ;;  %8515 = vmatprep.mubr.f32.mxu1 %v13960_v61 }
0x13cb   : > { %8943 = vmatprep.mubr.f32.mxu0 %v13960_v61 }
0x13cd   : > { %11051 = vmatmul.mubr.msk.f32.gmra.mrb[144].mxu1 %vm8079_vm12, %v8059_v28 }
0x13ce   : > { %11108 = vmatmul.mubr.msk.f32.vlgmr.msra.gmra.mrb[88].mxu0 %vm8079_vm12, %v11089_v56  ;;  %8521 = vmatprep.mubr.f32.mxu1 %v13960_v61 }
0x13cf   : > { %12080 = vmatpush1.bf16.msra.mxu0 %v12079_v5  ;;  %8949 = vmatprep.mubr.f32.mxu0 %v13960_v61  ;;  %v11093_v5 = vld [vmem:[%s16452_s3 + $0x1b8] sm:$0xff] }
0x13d0   : > { %12082 = vmatprep.subr.bf16.mxu0 %v12081_v49  ;;  %v11126_v49 = vld [vmem:[%s16452_s3 + $0x228] sm:$0xff] }
0x13d1   : > { %11052 = vmatmul.mubr.msk.f32.gmra.mrb[146].mxu1 %vm8079_vm12, %v8060_v22 }
0x13d2   : > { %11109 = vmatmul.mubr.msk.f32.gmra.mrb[90].mxu0 %vm8079_vm12, %v11090_v37  ;;  %11717 = vmatprep.mubr.msk.f32.mxu1 %vm13962_vm2, %v13960_v61 }
0x13d3   : > { %12084 = vmatpush1.bf16.msra.mxu0 %v12083_v45  ;;  %8955 = vmatprep.mubr.f32.mxu0 %v13960_v61  ;;  %v11104_v45 = vld [vmem:[%s16452_s3 + $0x210] sm:$0xff] }
0x13d4   : > { %12086 = vmatprep.subr.bf16.mxu0 %v12085_v53  ;;  %v11136_v53 = vld [vmem:[%s16452_s3 + $0x278] sm:$0xff] }
0x13d6   : > { %11110 = vmatmul.mubr.msk.f32.gmra.mrb[92].mxu0 %vm8079_vm12, %v11091_v34 }
0x13d7   : > { %12088 = vmatpush1.bf16.msra.mxu0 %v12087_v35  ;;  %8961 = vmatprep.mubr.f32.mxu0 %v13960_v61  ;;  %v11133_v35 = vld [vmem:[%s16452_s3 + $0x260] sm:$0xff] }
0x13d8   : > { %12091 = vmatprep.subr.msk.bf16.mxu0 %vm14873_vm10, %v12089_v3  ;;  %v11140_v3 = vld [vmem:[%s16452_s3 + $0x298] sm:$0xff] }
0x13da   : > { %11111 = vmatmul.mubr.msk.f32.gmra.mrb[94].mxu0 %vm8079_vm12, %v11092_v62 }
0x13db   : > { %12094 = vmatpush1.bf16.msk.msra.mxu0 %vm14873_vm10, %v12092_v47  ;;  %8967 = vmatprep.mubr.f32.mxu0 %v13960_v61  ;;  %v11139_v47 = vld [vmem:[%s16452_s3 + $0x290] sm:$0xff]  ;;  %vm9519_vm10 = vcmask 1040384   ;;  %s1416_s3 = scalar_lea.vmem [#allocation27], %s10463_s18  ;;  %s13813_s18 = sshll.u32 %s13965_s19, 4  ;;  %s13814_s18 = int_to_ptr.vmem [resolvable:$false] %s13813_s18 }
0x13dc   : > { %s13815_s8 = scalar_lea.vmem %s13814_s18, 512 }
0x13de   : > { %11112 = vmatmul.mubr.msk.f32.gmra.mrb[96].mxu0 %vm8079_vm12, %v11093_v5 }
0x13df   : > { %8973 = vmatprep.mubr.f32.mxu0 %v13960_v61 }
0x13e2   : > { %11113 = vmatmul.mubr.msk.f32.gmra.mrb[98].mxu0 %vm8079_vm12, %v11094_v38 }
0x13e3   : > { %8979 = vmatprep.mubr.f32.mxu0 %v13960_v61 }
0x13e6   : > { %11114 = vmatmul.mubr.msk.f32.gmra.mrb[100].mxu0 %vm8079_vm12, %v11095_v52 }
0x13e7   : > { %8985 = vmatprep.mubr.f32.mxu0 %v13960_v61 }
0x13ea   : > { %11115 = vmatmul.mubr.msk.f32.gmra.mrb[102].mxu0 %vm8079_vm12, %v11096_v42 }
0x13eb   : > { %8991 = vmatprep.mubr.f32.mxu0 %v13960_v61 }
0x13ee   : > { %11116 = vmatmul.mubr.msk.f32.gmra.mrb[104].mxu0 %vm8079_vm12, %v11097_v32 }
0x13ef   : > { %8997 = vmatprep.mubr.f32.mxu0 %v13960_v61 }
0x13f2   : > { %11117 = vmatmul.mubr.msk.f32.gmra.mrb[106].mxu0 %vm8079_vm12, %v11098_v36  ;;  %v9568_v36 = vld [vmem:[%s16453_s4] sm:$0xff] }
0x13f3   : > { %9003 = vmatprep.mubr.f32.mxu0 %v13960_v61 }
0x13f6   : > { %11118 = vmatmul.mubr.msk.f32.gmra.mrb[108].mxu0 %vm8079_vm12, %v11099_v44  ;;  %v9569_v44 = vld [vmem:[%s16453_s4 + $0x8] sm:$0xff] }
0x13f7   : > { %9009 = vmatprep.mubr.f32.mxu0 %v13960_v61 }
0x13fa   : > { %11119 = vmatmul.mubr.msk.f32.gmra.mrb[110].mxu0 %vm8079_vm12, %v11100_v58  ;;  %v15860_v58 = vpack.c.bf16 %v9569_v44, %v9568_v36 }
0x13fb   : > { %9015 = vmatprep.mubr.f32.mxu0 %v13960_v61 }
0x13fc   : > { %12097 = vmatpush3.bf16.msra.mxu1 %v15860_v58 }
0x13fd   : > { %12098 = vmatprep.subr.bf16.mxu1 %v13961_v33 }
0x13fe   : > { %11120 = vmatmul.mubr.msk.f32.gmra.mrb[112].mxu0 %vm8079_vm12, %v11101_v29  ;;  %v9570_v29 = vld [vmem:[%s16453_s4 + $0x10] sm:$0xff] }
0x13ff   : > { %9021 = vmatprep.mubr.f32.mxu0 %v13960_v61 }
0x1402   : > { %11121 = vmatmul.mubr.msk.f32.gmra.mrb[114].mxu0 %vm8079_vm12, %v11102_v57  ;;  %v9571_v57 = vld [vmem:[%s16453_s4 + $0x18] sm:$0xff] }
0x1403   : > { %9027 = vmatprep.mubr.f32.mxu0 %v13960_v61 }
0x1406   : > { %11122 = vmatmul.mubr.msk.f32.gmra.mrb[116].mxu0 %vm8079_vm12, %v11103_v50  ;;  %v15866_v50 = vpack.c.bf16 %v9571_v57, %v9570_v29 }
0x1407   : > { %9033 = vmatprep.mubr.f32.mxu0 %v13960_v61 }
0x1408   : > { %12100 = vmatpush3.bf16.msra.mxu1 %v15866_v50 }
0x1409   : > { %12101 = vmatprep.subr.bf16.mxu1 %v13961_v33 }
0x140a   : > { %11123 = vmatmul.mubr.msk.f32.gmra.mrb[118].mxu0 %vm8079_vm12, %v11104_v45  ;;  %v9572_v45 = vld [vmem:[%s16453_s4 + $0x20] sm:$0xff] }
0x140b   : > { %9039 = vmatprep.mubr.f32.mxu0 %v13960_v61 }
0x140e   : > { %11124 = vmatmul.mubr.msk.f32.gmra.mrb[120].mxu0 %vm8079_vm12, %v11105_v7  ;;  %v9573_v7 = vld [vmem:[%s16453_s4 + $0x28] sm:$0xff] }
0x140f   : > { %9219 = vmatprep.mubr.f32.mxu0 %v13960_v61 }
0x1412   : > { %11144 = vmatmul.mubr.msk.f32.vlgmr.msra.gmra.mrb[88].mxu0 %vm8079_vm12, %v11125_v18  ;;  %v15872_v18 = vpack.c.bf16 %v9573_v7, %v9572_v45 }
0x1413   : > { %9225 = vmatprep.mubr.f32.mxu0 %v13960_v61 }
0x1414   : > { %12103 = vmatpush3.bf16.msra.mxu1 %v15872_v18 }
0x1415   : > { %12104 = vmatprep.subr.bf16.mxu1 %v13961_v33 }
0x1416   : > { %11145 = vmatmul.mubr.msk.f32.gmra.mrb[90].mxu0 %vm8079_vm12, %v11126_v49  ;;  %v9574_v49 = vld [vmem:[%s16453_s4 + $0x30] sm:$0xff] }
0x1417   : > { %9231 = vmatprep.mubr.f32.mxu0 %v13960_v61 }
0x141a   : > { %11146 = vmatmul.mubr.msk.f32.gmra.mrb[92].mxu0 %vm8079_vm12, %v11127_v54  ;;  %v9575_v54 = vld [vmem:[%s16453_s4 + $0x38] sm:$0xff] }
0x141b   : > { %9237 = vmatprep.mubr.f32.mxu0 %v13960_v61 }
0x141e   : > { %11147 = vmatmul.mubr.msk.f32.gmra.mrb[94].mxu0 %vm8079_vm12, %v11128_v23  ;;  %v15878_v23 = vpack.c.bf16 %v9575_v54, %v9574_v49 }
0x141f   : > { %9243 = vmatprep.mubr.f32.mxu0 %v13960_v61 }
0x1420   : > { %12106 = vmatpush3.bf16.msra.mxu1 %v15878_v23 }
0x1421   : > { %12107 = vmatprep.subr.bf16.mxu1 %v13961_v33 }
0x1422   : > { %11148 = vmatmul.mubr.msk.f32.gmra.mrb[96].mxu0 %vm8079_vm12, %v11129_v31  ;;  %v9576_v31 = vld [vmem:[%s16453_s4 + $0x40] sm:$0xff] }
0x1423   : > { %9249 = vmatprep.mubr.f32.mxu0 %v13960_v61 }
0x1426   : > { %11149 = vmatmul.mubr.msk.f32.gmra.mrb[98].mxu0 %vm8079_vm12, %v11130_v27  ;;  %v9577_v27 = vld [vmem:[%s16453_s4 + $0x48] sm:$0xff] }
0x1427   : > { %9255 = vmatprep.mubr.f32.mxu0 %v13960_v61 }
0x142a   : > { %11150 = vmatmul.mubr.msk.f32.gmra.mrb[100].mxu0 %vm8079_vm12, %v11131_v12  ;;  %v15883_v12 = vpack.c.bf16 %v9577_v27, %v9576_v31 }
0x142b   : > { %9261 = vmatprep.mubr.f32.mxu0 %v13960_v61 }
0x142c   : > { %12109 = vmatpush3.bf16.msra.mxu1 %v15883_v12 }
0x142d   : > { %12110 = vmatprep.subr.bf16.mxu1 %v13961_v33 }
0x142e   : > { %11151 = vmatmul.mubr.msk.f32.gmra.mrb[102].mxu0 %vm8079_vm12, %v11132_v30  ;;  %v9578_v30 = vld [vmem:[%s16453_s4 + $0x50] sm:$0xff] }
0x142f   : > { %9267 = vmatprep.mubr.f32.mxu0 %v13960_v61 }
0x1432   : > { %11152 = vmatmul.mubr.msk.f32.gmra.mrb[104].mxu0 %vm8079_vm12, %v11133_v35  ;;  %v9579_v35 = vld [vmem:[%s16453_s4 + $0x58] sm:$0xff] }
0x1433   : > { %9273 = vmatprep.mubr.f32.mxu0 %v13960_v61 }
0x1436   : > { %11153 = vmatmul.mubr.msk.f32.gmra.mrb[106].mxu0 %vm8079_vm12, %v11134_v41  ;;  %v15889_v41 = vpack.c.bf16 %v9579_v35, %v9578_v30 }
0x1437   : > { %9279 = vmatprep.mubr.f32.mxu0 %v13960_v61 }
0x1438   : > { %12112 = vmatpush3.bf16.msra.mxu1 %v15889_v41 }
0x1439   : > { %12113 = vmatprep.subr.bf16.mxu1 %v13961_v33 }
0x143a   : > { %11154 = vmatmul.mubr.msk.f32.gmra.mrb[108].mxu0 %vm8079_vm12, %v11135_v51  ;;  %v9580_v51 = vld [vmem:[%s16453_s4 + $0x60] sm:$0xff] }
0x143b   : > { %9285 = vmatprep.mubr.f32.mxu0 %v13960_v61 }
0x143d   : > { %v15774_v55 = vpop.f32.mrb[66].mxu1 }
0x143e   : > { %11155 = vmatmul.mubr.msk.f32.gmra.mrb[110].mxu0 %vm8079_vm12, %v11136_v53  ;;  %v15777_v40 = vpop.f32.mrb[67].mxu1  ;;  %v9581_v53 = vld [vmem:[%s16453_s4 + $0x68] sm:$0xff] }
0x143f   : > { %9291 = vmatprep.mubr.f32.mxu0 %v13960_v61 }
0x1442   : > { %11156 = vmatmul.mubr.msk.f32.gmra.mrb[112].mxu0 %vm8079_vm12, %v11137_v8  ;;  %v15895_v8 = vpack.c.bf16 %v9581_v53, %v9580_v51 }
0x1443   : > { %9297 = vmatprep.mubr.f32.mxu0 %v13960_v61 }
0x1444   : > { %v15784_v59 = vpop.f32.mrb[116].mxu1  ;;  %12115 = vmatpush3.bf16.msra.mxu1 %v15895_v8 }
0x1445   : > { %v15786_v46 = vpop.f32.mrb[117].mxu1  ;;  %12116 = vmatprep.subr.bf16.mxu1 %v13961_v33 }
0x1446   : > { %11157 = vmatmul.mubr.msk.f32.gmra.mrb[114].mxu0 %vm8079_vm12, %v11138_v25  ;;  %v9582_v25 = vld [vmem:[%s16453_s4 + $0x70] sm:$0xff] }
0x1447   : > { %9303 = vmatprep.mubr.f32.mxu0 %v13960_v61 }
0x1448   : > { %v15791_v60 = vpop.f32.mrb[118].mxu1 }
0x1449   : > { %v15793_v2 = vpop.f32.mrb[119].mxu1 }
0x144a   : > { %11158 = vmatmul.mubr.msk.f32.gmra.mrb[116].mxu0 %vm8079_vm12, %v11139_v47  ;;  %v9583_v47 = vld [vmem:[%s16453_s4 + $0x78] sm:$0xff]  ;;  %s10127_s4 = sshll.u32 %s1416_s3, 4  ;;  %s16292_s4 = int_to_ptr.vmem [resolvable:$true] %s10127_s4 }
0x144b   : > { %9309 = vmatprep.mubr.f32.mxu0 %v13960_v61  ;;  %s13809_s7 = scalar_lea.vmem %s16292_s4, 256  ;;  %p13816_p6 = scmp.lt.s32.totalorder %s16292_s4, %s13814_s18 }
0x144c   : > { %v15798_v10 = vpop.f32.mrb[120].mxu1  ;;  %p13810_p3 = scmp.ne.s32.totalorder %s16292_s4, %s13809_s7  ;;  %p13817_p9 = scmp.lt.s32.totalorder %s13815_s8, %s13809_s7 }
0x144d   : > { %v15800_v63 = vpop.f32.mrb[121].mxu1 }
0x144e   : > { %11159 = vmatmul.mubr.msk.f32.gmra.mrb[118].mxu0 %vm8079_vm12, %v11140_v3  ;;  %v15901_v3 = vpack.c.bf16 %v9583_v47, %v9582_v25  ;;  %p13811_p12 = pnand %p13810_p3, %p16455_p4  ;;  %p13818_p10 = por %p13817_p9, %p13816_p6 }
0x144f   : > { %9315 = vmatprep.mubr.f32.mxu0 %v13960_v61 }
0x1450   : > { %v15805_v13 = vpop.f32.mrb[122].mxu1  ;;  %12118 = vmatpush3.bf16.msra.mxu1 %v15901_v3  ;;  %p13812_p5 = pneg %p13811_p12 }
0x1451   : > { %v15807_v14 = vpop.f32.mrb[123].mxu1  ;;  %12119 = vmatprep.subr.bf16.mxu1 %v13961_v33 }
0x1452   : > { %11160 = vmatmul.mubr.msk.f32.gmra.mrb[120].mxu0 %vm8079_vm12, %v11141_v11  ;;  %v9356_v11 = vld [vmem:[#allocation24] sm:$0x3]  ;;  %p13819_p7 = pnand %p13818_p10, %p13812_p5 }
0x1453   : > { %v15907_v44 = vrot.slane %v9356_v11, %v14725_v43 }
0x1454   : > { %v15810_v16 = vpop.f32.mrb[124].mxu1 }
0x1455   : > { %v15812_v20 = vpop.f32.mrb[125].mxu1 }
0x1458   : > { %v15814_v1 = vpop.f32.mrb[126].mxu1 }
0x1459   : > { %v15816_v21 = vpop.f32.mrb[127].mxu1 }
0x145c   : > { %v15818_v0 = vpop.f32.mrb[128].mxu1 }
0x145d   : > { %v15820_v24 = vpop.f32.mrb[129].mxu1 }
0x1484   : > { %v15822_v15 = vpop.f32.mrb[130].mxu1 }
0x1485   : > { %v15824_v9 = vpop.f32.mrb[131].mxu1 }
0x1488   : > { %v15826_v26 = vpop.f32.mrb[132].mxu1 }
0x1489   : > { %v15828_v39 = vpop.f32.mrb[133].mxu1 }
0x148c   : > { %v15830_v6 = vpop.f32.mrb[134].mxu1 }
0x148d   : > { %v15832_v48 = vpop.f32.mrb[135].mxu1 }
0x1490   : > { %v15834_v17 = vpop.f32.mrb[136].mxu1 }
0x1491   : > { %v15836_v28 = vpop.f32.mrb[137].mxu1 }
0x1494   : > { %v15838_v56 = vpop.f32.mrb[138].mxu1 }
0x1495   : > { %v15840_v22 = vpop.f32.mrb[139].mxu1 }
0x1498   : > { %v15842_v37 = vpop.f32.mrb[140].mxu1 }
0x1499   : > { %v15844_v34 = vpop.f32.mrb[141].mxu1 }
0x149c   : > { %v15846_v62 = vpop.f32.mrb[142].mxu1 }
0x149d   : > { %v15848_v5 = vpop.f32.mrb[143].mxu1 }
0x14a0   : > { %v15850_v38 = vpop.f32.mrb[144].mxu1 }
0x14a1   : > { %v15852_v52 = vpop.f32.mrb[145].mxu1 }
0x14a4   : > { %v15854_v42 = vpop.f32.mrb[146].mxu1 }
0x14a5   : > { %v15856_v32 = vpop.f32.mrb[147].mxu1 }
0x14e5   : > { %v9221_v36 = vpop.f32.mrb[88].mxu0 }
0x14e6   : > { %v15910_v29 = vadd.f32 %v9221_v36, %v15774_v55  ;;  %v9223_v57 = vpop.f32.mrb[89].mxu0 }
0x14e7   : > { %v12176_v45 = vadd.f32 %v9223_v57, %v15777_v40 }
0x14e9   : > { %v9369_v7 = vadd.f32 %v12176_v45, %v15907_v44  ;;  %v9227_v49 = vpop.f32.mrb[90].mxu0 }
0x14ea   : > { %v15915_v54 = vadd.f32 %v9227_v49, %v15784_v59  ;;  %v9229_v31 = vpop.f32.mrb[91].mxu0 }
0x14eb   : > { %v9402_v27 = vsub.f32 0.0, %v9369_v7  ;;  %v12178_v30 = vadd.f32 %v9229_v31, %v15786_v46 }
0x14ed   : > { %v9419_v35 = vmul.f32 1.442695, %v9402_v27  ;;  %v9371_v51 = vadd.f32 %v12178_v30, %v15907_v44  ;;  %v9233_v53 = vpop.f32.mrb[92].mxu0 }
0x14ee   : > { %v15920_v55 = vadd.f32 %v9233_v53, %v15791_v60  ;;  %v9235_v25 = vpop.f32.mrb[93].mxu0 }
0x14ef   : > { %13311 = vpow2.f32 %v9419_v35  ;;  %v9403_v40 = vsub.f32 0.0, %v9371_v51  ;;  %v12180_v47 = vadd.f32 %v9235_v25, %v15793_v2 }
0x14f1   : > { %v9421_v36 = vmul.f32 1.442695, %v9403_v40  ;;  %v9373_v59 = vadd.f32 %v12180_v47, %v15907_v44  ;;  %v9239_v57 = vpop.f32.mrb[94].mxu0 }
0x14f2   : > { %v15925_v45 = vadd.f32 %v9239_v57, %v15798_v10  ;;  %v9241_v46 = vpop.f32.mrb[95].mxu0 }
0x14f3   : > { %13313 = vpow2.f32 %v9421_v36  ;;  %v9404_v7 = vsub.f32 0.0, %v9373_v59  ;;  %v12182_v49 = vadd.f32 %v9241_v46, %v15800_v63 }
0x14f5   : > { %v9423_v31 = vmul.f32 1.442695, %v9404_v7  ;;  %v9375_v60 = vadd.f32 %v12182_v49, %v15907_v44  ;;  %v9245_v27 = vpop.f32.mrb[96].mxu0 }
0x14f6   : > { %v15930_v30 = vadd.f32 %v9245_v27, %v15805_v13  ;;  %v9247_v2 = vpop.f32.mrb[97].mxu0 }
0x14f7   : > { %13315 = vpow2.f32 %v9423_v31  ;;  %v9405_v35 = vsub.f32 0.0, %v9375_v60  ;;  %v12184_v51 = vadd.f32 %v9247_v2, %v15807_v14 }
0x14f9   : > { %v13312_v53 = vpop.eup %13311  ;;  %v9425_v10 = vmul.f32 1.442695, %v9405_v35  ;;  %v9377_v25 = vadd.f32 %v12184_v51, %v15907_v44  ;;  %v9251_v40 = vpop.f32.mrb[98].mxu0  ;;  %v15944_v35 = vrot.slane %v9356_v11, %v14729_v4 }
0x14fa   : > { %v9453_v47 = vadd.f32 1.0, %v13312_v53  ;;  %v15935_v63 = vadd.f32 %v9251_v40, %v15810_v16  ;;  %v9253_v36 = vpop.f32.mrb[99].mxu0 }
0x14fb   : > { %13317 = vpow2.f32 %v9425_v10  ;;  %v9406_v59 = vsub.f32 0.0, %v9377_v25  ;;  %v12186_v13 = vadd.f32 %v9253_v36, %v15812_v20  ;;  %v9368_v36 = vadd.f32 %v15910_v29, %v15944_v35 }
0x14fc   : > { %13319 = vrcp.f32 %v9453_v47  ;;  %v9370_v29 = vadd.f32 %v15915_v54, %v15944_v35  ;;  %v9372_v54 = vadd.f32 %v15920_v55, %v15944_v35  ;;  %v9374_v55 = vadd.f32 %v15925_v45, %v15944_v35 }
0x14fd   : > { %v13314_v57 = vpop.eup %13313  ;;  %v9427_v46 = vmul.f32 1.442695, %v9406_v59  ;;  %v9379_v7 = vadd.f32 %v12186_v13, %v15907_v44  ;;  %v9257_v14 = vpop.f32.mrb[100].mxu0  ;;  %v9376_v45 = vadd.f32 %v15930_v30, %v15944_v35  ;;  %v9378_v30 = vadd.f32 %v15935_v63, %v15944_v35 }
0x14fe   : > { %v9454_v49 = vadd.f32 1.0, %v13314_v57  ;;  %v15940_v31 = vadd.f32 %v9257_v14, %v15814_v1  ;;  %v9259_v60 = vpop.f32.mrb[101].mxu0 }
0x14ff   : > { %13321 = vpow2.f32 %v9427_v46  ;;  %v9407_v27 = vsub.f32 0.0, %v9379_v7  ;;  %v12188_v16 = vadd.f32 %v9259_v60, %v15816_v21 }
0x1500   : > { %13323 = vrcp.f32 %v9454_v49  ;;  %v9380_v63 = vadd.f32 %v15940_v31, %v15944_v35 }
0x1501   : > { %v13316_v2 = vpop.eup %13315  ;;  %v9429_v20 = vmul.f32 1.442695, %v9407_v27  ;;  %v9381_v51 = vadd.f32 %v12188_v16, %v15907_v44  ;;  %v9263_v53 = vpop.f32.mrb[102].mxu0 }
0x1502   : > { %v9455_v10 = vadd.f32 1.0, %v13316_v2  ;;  %v15948_v25 = vadd.f32 %v9263_v53, %v15818_v0  ;;  %v9265_v1 = vpop.f32.mrb[103].mxu0 }
0x1503   : > { %13325 = vpow2.f32 %v9429_v20  ;;  %v9408_v40 = vsub.f32 0.0, %v9381_v51  ;;  %v12190_v47 = vadd.f32 %v9265_v1, %v15820_v24 }
0x1504   : > { %13327 = vrcp.f32 %v9455_v10 }
0x1505   : > { %v13318_v21 = vpop.eup %13317  ;;  %v9431_v11 = vmul.f32 1.442695, %v9408_v40  ;;  %v9383_v59 = vadd.f32 %v12190_v47, %v15907_v44  ;;  %v9269_v13 = vpop.f32.mrb[104].mxu0 }
0x1506   : > { %v13320_v57 = vpop.eup %13319  ;;  %v9456_v46 = vadd.f32 1.0, %v13318_v21  ;;  %v15955_v7 = vadd.f32 %v9269_v13, %v15822_v15  ;;  %v9271_v0 = vpop.f32.mrb[105].mxu0 }
0x1507   : > { %v15957_v14 = vmul.f32 %v13320_v57, %v9368_v36  ;;  %13329 = vpow2.f32 %v9431_v11  ;;  %v9409_v49 = vsub.f32 0.0, %v9383_v59  ;;  %v12192_v24 = vadd.f32 %v9271_v0, %v15824_v9 }
0x1508   : > { %13331 = vrcp.f32 %v9456_v46 }
0x1509   : > { %v13322_v60 = vpop.eup %13321  ;;  %v9433_v27 = vmul.f32 1.442695, %v9409_v49  ;;  %v9385_v16 = vadd.f32 %v12192_v24, %v15907_v44  ;;  %v9275_v2 = vpop.f32.mrb[106].mxu0 }
0x150a   : > { %v13324_v20 = vpop.eup %13323  ;;  %v9457_v51 = vadd.f32 1.0, %v13322_v60  ;;  %v15964_v15 = vadd.f32 %v9275_v2, %v15826_v26  ;;  %v9277_v53 = vpop.f32.mrb[107].mxu0 }
0x150b   : > { %v15966_v10 = vmul.f32 %v13324_v20, %v9370_v29  ;;  %13333 = vpow2.f32 %v9433_v27  ;;  %v9410_v1 = vsub.f32 0.0, %v9385_v16  ;;  %v12194_v9 = vadd.f32 %v9277_v53, %v15828_v39 }
0x150c   : > { %13335 = vrcp.f32 %v9457_v51 }
0x150d   : > { %v13326_v40 = vpop.eup %13325  ;;  %v9435_v47 = vmul.f32 1.442695, %v9410_v1  ;;  %v9387_v21 = vadd.f32 %v12194_v9, %v15907_v44  ;;  %v9281_v36 = vpop.f32.mrb[108].mxu0 }
0x150e   : > { %v13328_v11 = vpop.eup %13327  ;;  %v9458_v59 = vadd.f32 1.0, %v13326_v40  ;;  %v15973_v26 = vadd.f32 %v9281_v36, %v15830_v6  ;;  %v9283_v13 = vpop.f32.mrb[109].mxu0 }
0x150f   : > { %v15975_v57 = vmul.f32 %v13328_v11, %v9372_v54  ;;  %13337 = vpow2.f32 %v9435_v47  ;;  %v9411_v46 = vsub.f32 0.0, %v9387_v21  ;;  %v12196_v39 = vadd.f32 %v9283_v13, %v15832_v48 }
0x1510   : > { %13339 = vrcp.f32 %v9458_v59 }
0x1511   : > { %v13330_v0 = vpop.eup %13329  ;;  %v9437_v49 = vmul.f32 1.442695, %v9411_v46  ;;  %v9287_v24 = vpop.f32.mrb[110].mxu0  ;;  %v9389_v27 = vadd.f32 %v12196_v39, %v15907_v44 }
0x1512   : > { %v13332_v60 = vpop.eup %13331  ;;  %v9459_v29 = vadd.f32 1.0, %v13330_v0  ;;  %v15982_v6 = vadd.f32 %v9287_v24, %v15834_v17  ;;  %v9289_v16 = vpop.f32.mrb[111].mxu0 }
0x1513   : > { %v15984_v2 = vmul.f32 %v13332_v60, %v9374_v55  ;;  %13341 = vpow2.f32 %v9437_v49  ;;  %v12198_v20 = vadd.f32 %v9289_v16, %v15836_v28  ;;  %v9412_v48 = vsub.f32 0.0, %v9389_v27 }
0x1514   : > { %13343 = vrcp.f32 %v9459_v29 }
0x1515   : > { %v13334_v51 = vpop.eup %13333  ;;  %v9391_v53 = vadd.f32 %v12198_v20, %v15907_v44  ;;  %v9293_v1 = vpop.f32.mrb[112].mxu0  ;;  %v9439_v54 = vmul.f32 1.442695, %v9412_v48 }
0x1516   : > { %v13336_v9 = vpop.eup %13335  ;;  %v9460_v40 = vadd.f32 1.0, %v13334_v51  ;;  %v15991_v17 = vadd.f32 %v9293_v1, %v15838_v56  ;;  %v9295_v47 = vpop.f32.mrb[113].mxu0  ;;  %v9382_v1 = vadd.f32 %v15948_v25, %v15944_v35  ;;  %v9384_v25 = vadd.f32 %v15955_v7, %v15944_v35 }
0x1517   : > { %v15993_v21 = vmul.f32 %v13336_v9, %v9376_v45  ;;  %v9413_v36 = vsub.f32 0.0, %v9391_v53  ;;  %v12200_v28 = vadd.f32 %v9295_v47, %v15840_v22  ;;  %v9386_v7 = vadd.f32 %v15964_v15, %v15944_v35 }
0x1518   : > { %13345 = vrcp.f32 %v9460_v40  ;;  %v9388_v15 = vadd.f32 %v15973_v26, %v15944_v35 }
0x1519   : > { %v13338_v11 = vpop.eup %13337  ;;  %13347 = vpow2.f32 %v9439_v54  ;;  %v9441_v59 = vmul.f32 1.442695, %v9413_v36  ;;  %v9299_v13 = vpop.f32.mrb[114].mxu0  ;;  %v9393_v0 = vadd.f32 %v12200_v28, %v15907_v44 }
0x151a   : > { %v13340_v46 = vpop.eup %13339  ;;  %v9461_v39 = vadd.f32 1.0, %v13338_v11  ;;  %v16000_v56 = vadd.f32 %v9299_v13, %v15842_v37  ;;  %v9301_v55 = vpop.f32.mrb[115].mxu0 }
0x151b   : > { %v16002_v49 = vmul.f32 %v13340_v46, %v9378_v30  ;;  %13349 = vpow2.f32 %v9441_v59  ;;  %v12202_v22 = vadd.f32 %v9301_v55, %v15844_v34  ;;  %v9414_v24 = vsub.f32 0.0, %v9393_v0 }
0x151c   : > { %13351 = vrcp.f32 %v9461_v39 }
0x151d   : > { %v13342_v60 = vpop.eup %13341  ;;  %v9395_v29 = vadd.f32 %v12202_v22, %v15907_v44  ;;  %v9305_v27 = vpop.f32.mrb[116].mxu0  ;;  %v9443_v48 = vmul.f32 1.442695, %v9414_v24 }
0x151e   : > { %v13344_v16 = vpop.eup %13343  ;;  %v9462_v20 = vadd.f32 1.0, %v13342_v60  ;;  %v16009_v37 = vadd.f32 %v9305_v27, %v15846_v62  ;;  %v9307_v51 = vpop.f32.mrb[117].mxu0 }
0x151f   : > { %v16011_v45 = vmul.f32 %v13344_v16, %v9380_v63  ;;  %v9415_v53 = vsub.f32 0.0, %v9395_v29  ;;  %v12204_v34 = vadd.f32 %v9307_v51, %v15848_v5 }
0x1520   : > { %13353 = vrcp.f32 %v9462_v20 }
0x1521   : > { %13355 = vpow2.f32 %v9443_v48  ;;  %v9445_v31 = vmul.f32 1.442695, %v9415_v53  ;;  %v9311_v9 = vpop.f32.mrb[118].mxu0  ;;  %v9397_v54 = vadd.f32 %v12204_v34, %v15907_v44  ;;  %v9504_v53 = vadd.f32 %v15966_v10, %v15957_v14 }
0x1522   : > { %v13346_v40 = vpop.eup %13345  ;;  %v16018_v47 = vadd.f32 %v9311_v9, %v15850_v38  ;;  %v9313_v62 = vpop.f32.mrb[119].mxu0  ;;  %v9390_v9 = vadd.f32 %v15982_v6, %v15944_v35 }
0x1523   : > { %v13348_v36 = vpop.eup %13347  ;;  %v16020_v28 = vmul.f32 %v13346_v40, %v9382_v1  ;;  %13357 = vpow2.f32 %v9445_v31  ;;  %v12206_v5 = vadd.f32 %v9313_v62, %v15852_v52  ;;  %v9416_v30 = vsub.f32 0.0, %v9397_v54 }
0x1524   : > { %v9463_v11 = vadd.f32 1.0, %v13348_v36  ;;  %v9505_v31 = vadd.f32 %v9504_v53, %v15975_v57 }
0x1525   : > { %v13350_v59 = vpop.eup %13349  ;;  %v9399_v13 = vadd.f32 %v12206_v5, %v15907_v44  ;;  %v9317_v46 = vpop.f32.mrb[120].mxu0  ;;  %v9447_v0 = vmul.f32 1.442695, %v9416_v30 }
0x1526   : > { %v13352_v39 = vpop.eup %13351  ;;  %13359 = vrcp.f32 %v9463_v11  ;;  %v9464_v38 = vadd.f32 1.0, %v13350_v59  ;;  %v16027_v55 = vadd.f32 %v9317_v46, %v15854_v42  ;;  %v9319_v22 = vpop.f32.mrb[121].mxu0  ;;  %v9506_v54 = vadd.f32 %v9505_v31, %v15984_v2 }
0x1527   : > { %v16029_v24 = vmul.f32 %v13352_v39, %v9384_v25  ;;  %v9417_v52 = vsub.f32 0.0, %v9399_v13  ;;  %v12208_v60 = vadd.f32 %v9319_v22, %v15856_v32  ;;  %v9392_v25 = vadd.f32 %v15991_v17, %v15944_v35 }
0x1528   : > { %13361 = vrcp.f32 %v9464_v38  ;;  %v9507_v5 = vadd.f32 %v9506_v54, %v15993_v21  ;;  %v9394_v39 = vadd.f32 %v16000_v56, %v15944_v35  ;;  %v9529_v17 = vmul.f32 %v15966_v10, %v15966_v10 }
0x1529   : > { %13363 = vpow2.f32 %v9447_v0  ;;  %v9449_v63 = vmul.f32 1.442695, %v9417_v52  ;;  %v9401_v27 = vadd.f32 %v12208_v60, %v15907_v44  ;;  %v9528_v56 = vmul.f32 %v15957_v14, %v15957_v14 }
0x152a   : > { %v13354_v29 = vpop.eup %13353  ;;  %v9508_v30 = vadd.f32 %v9507_v5, %v16002_v49  ;;  %v9532_v31 = vmul.f32 %v15993_v21, %v15993_v21  ;;  %v9533_v54 = vmul.f32 %v16002_v49, %v16002_v49 }
0x152b   : > { %v13356_v16 = vpop.eup %13355  ;;  %v16035_v20 = vmul.f32 %v13354_v29, %v9386_v7  ;;  %13365 = vpow2.f32 %v9449_v63  ;;  %v9418_v48 = vsub.f32 0.0, %v9401_v27  ;;  %v9396_v29 = vadd.f32 %v16009_v37, %v15944_v35 }
0x152c   : > { %v9465_v42 = vadd.f32 1.0, %v13356_v16  ;;  %v9509_v6 = vadd.f32 %v9508_v30, %v16011_v45  ;;  %v9530_v16 = vmul.f32 %v15975_v57, %v15975_v57 }
0x152d   : > { %v13358_v51 = vpop.eup %13357  ;;  %v9451_v34 = vmul.f32 1.442695, %v9418_v48 }
0x152e   : > { %13367 = vrcp.f32 %v9465_v42  ;;  %v9466_v32 = vadd.f32 1.0, %v13358_v51  ;;  %v9510_v0 = vadd.f32 %v9509_v6, %v16020_v28  ;;  %v9398_v51 = vadd.f32 %v16018_v47, %v15944_v35 }
0x1530   : > { %v13360_v1 = vpop.eup %13359  ;;  %13369 = vrcp.f32 %v9466_v32  ;;  %v9511_v60 = vadd.f32 %v9510_v0, %v16029_v24  ;;  %v9545_v32 = vadd.f32 %v9529_v17, %v9528_v56 }
0x1531   : > { %v16042_v44 = vmul.f32 %v13360_v1, %v9388_v15  ;;  %13371 = vpow2.f32 %v9451_v34  ;;  %v9531_v34 = vmul.f32 %v15984_v2, %v15984_v2 }
0x1532   : > { %v13362_v40 = vpop.eup %13361  ;;  %v9512_v63 = vadd.f32 %v9511_v60, %v16035_v20  ;;  %v9546_v1 = vadd.f32 %v9545_v32, %v9530_v16 }
0x1533   : > { %v13364_v62 = vpop.eup %13363  ;;  %v16047_v36 = vmul.f32 %v13362_v40, %v9390_v9  ;;  %v9538_v17 = vmul.f32 %v16042_v44, %v16042_v44 }
0x1534   : > { %v9467_v11 = vadd.f32 1.0, %v13364_v62  ;;  %v9513_v42 = vadd.f32 %v9512_v63, %v16042_v44  ;;  %v9547_v40 = vadd.f32 %v9546_v1, %v9531_v34  ;;  %v9400_v62 = vadd.f32 %v16027_v55, %v15944_v35 }
0x1535   : > { %v13366_v26 = vpop.eup %13365  ;;  %v9536_v55 = vmul.f32 %v16029_v24, %v16029_v24 }
0x1536   : > { %13373 = vrcp.f32 %v9467_v11  ;;  %v9468_v59 = vadd.f32 1.0, %v13366_v26  ;;  %v9514_v37 = vadd.f32 %v9513_v42, %v16047_v36  ;;  %v9548_v11 = vadd.f32 %v9547_v40, %v9532_v31 }
0x1537   : > { %v9534_v26 = vmul.f32 %v16011_v45, %v16011_v45 }
0x1538   : > { %v13368_v13 = vpop.eup %13367  ;;  %13375 = vrcp.f32 %v9468_v59 }
0x1539   : > { %v16054_v46 = vmul.f32 %v13368_v13, %v9392_v25  ;;  %v9549_v25 = vadd.f32 %v9548_v11, %v9533_v54  ;;  %v9535_v13 = vmul.f32 %v16020_v28, %v16020_v28 }
0x153a   : > { %v13370_v38 = vpop.eup %13369 }
0x153b   : > { %v13372_v22 = vpop.eup %13371  ;;  %v16059_v52 = vmul.f32 %v13370_v38, %v9394_v39  ;;  %v9515_v9 = vadd.f32 %v9514_v37, %v16054_v46  ;;  %v9550_v35 = vadd.f32 %v9549_v25, %v9534_v26  ;;  %v9540_v42 = vmul.f32 %v16054_v46, %v16054_v46 }
0x153c   : > { %v9469_v7 = vadd.f32 1.0, %v13372_v22  ;;  %v9537_v22 = vmul.f32 %v16035_v20, %v16035_v20 }
0x153d   : > { %v9516_v47 = vadd.f32 %v9515_v9, %v16059_v52  ;;  %v9551_v0 = vadd.f32 %v9550_v35, %v9535_v13  ;;  %v9541_v32 = vmul.f32 %v16059_v52, %v16059_v52 }
0x153e   : > { %13377 = vrcp.f32 %v9469_v7 }
0x153f   : > { %v9552_v7 = vadd.f32 %v9551_v0, %v9536_v55 }
0x1540   : > { %v13374_v27 = vpop.eup %13373 }
0x1541   : > { %v16072_v48 = vmul.f32 %v13374_v27, %v9396_v29  ;;  %v9553_v29 = vadd.f32 %v9552_v7, %v9537_v22  ;;  %v9539_v27 = vmul.f32 %v16047_v36, %v16047_v36  ;;  %v9875_v22 = vld [vmem:[#allocation26] sm:$0x7] }
0x1542   : > { %v13376_v53 = vpop.eup %13375  ;;  %v16150_v7 = vrot.slane %v9875_v22, %v14729_v4 }
0x1543   : > { %v16079_v15 = vmul.f32 %v13376_v53, %v9398_v51  ;;  %v9517_v30 = vadd.f32 %v9516_v47, %v16072_v48  ;;  %v9554_v16 = vadd.f32 %v9553_v29, %v9538_v17  ;;  %v9542_v1 = vmul.f32 %v16072_v48, %v16072_v48 }
0x1544   : > { %v16153_v17 = vrot.slane %v9875_v22, %v14725_v43 }
0x1545   : > { %v9518_v6 = vadd.f32 %v9517_v30, %v16079_v15  ;;  %v9555_v34 = vadd.f32 %v9554_v16, %v9539_v27  ;;  %v9543_v40 = vmul.f32 %v16079_v15, %v16079_v15 }
0x1547   : > { %v9556_v31 = vadd.f32 %v9555_v34, %v9540_v42 }
0x1548   : > { %v13378_v5 = vpop.eup %13377 }
0x1549   : > { %v16092_v59 = vmul.f32 %v13378_v5, %v9400_v62  ;;  %v9557_v54 = vadd.f32 %v9556_v31, %v9541_v32 }
0x154b   : > { %v9520_v39 = vsel %vm9519_vm10, %v16092_v59, 0.0  ;;  %v9544_v9 = vmul.f32 %v16092_v59, %v16092_v59  ;;  %v9558_v47 = vadd.f32 %v9557_v54, %v9542_v1 }
0x154c   : > { %v9521_v38 = vadd.f32 %v9520_v39, %v9518_v6 }
0x154d   : > { %v9560_v62 = vsel %vm9519_vm10, %v9544_v9, 0.0  ;;  %v9559_v5 = vadd.f32 %v9558_v47, %v9543_v40 }
0x154e   : > { %v9522_v60 = vrot.slane %v9521_v38, 4 }
0x154f   : > { %v9561_v11 = vadd.f32 %v9560_v62, %v9559_v5 }
0x1550   : > { %v9523_v63 = vadd.f32 %v9522_v60, %v9521_v38  ;;  %v11163_v38 = vld [vmem:[#allocation2] ss:$0 sm:$0xff] }
0x1551   : > { %v9562_v26 = vrot.slane %v9561_v11, 4  ;;  %10023 = vperm.xlu0 %12618, %v11163_v38  }
0x1552   : > { %v9524_v56 = vrot.slane %v9523_v63, 2 }
0x1554   : > { %v9525_v51 = vadd.f32 %v9524_v56, %v9523_v63  ;;  %v16156_v63 = vrot.slane %v9875_v22, %v14768_v19 }
0x1556   : > { %v9526_v53 = vrot.slane %v9525_v51, 1 }
0x1558   : > { %v9527_v37 = vadd.f32 %v9526_v53, %v9525_v51 }
0x155a   : > { %11718 = vmatmul.mubr.f32.vlgmr.msra.gmra.mrb[148].mxu1 %v9527_v37 }
0x155b   : > { %12121 = vmatpush3.bf16.msra.mxu1 %v15860_v58  ;;  %11752 = vmatprep.mubr.msk.f32.mxu1 %vm13962_vm2, %v13960_v61  ;;  %v9563_v58 = vadd.f32 %v9562_v26, %v9561_v11 }
0x155c   : > { %12122 = vmatprep.subr.bf16.mxu1 %v13961_v33 }
0x155d   : > { %v9564_v30 = vrot.slane %v9563_v58, 2 }
0x155f   : > { %12124 = vmatpush3.bf16.msra.mxu1 %v15866_v50  ;;  %v9565_v50 = vadd.f32 %v9564_v30, %v9563_v58 }
0x1560   : > { %12125 = vmatprep.subr.bf16.mxu1 %v13961_v33 }
0x1563   : > { %12127 = vmatpush3.bf16.msra.mxu1 %v15872_v18  ;;  %v9566_v18 = vrot.slane %v9565_v50, 1 }
0x1564   : > { %12128 = vmatprep.subr.bf16.mxu1 %v13961_v33 }
0x1567   : > { %12130 = vmatpush3.bf16.msra.mxu1 %v15878_v23  ;;  %v9567_v23 = vadd.f32 %v9566_v18, %v9565_v50 }
0x1568   : > { %12131 = vmatprep.subr.bf16.mxu1 %v13961_v33 }
0x156b   : > { %12133 = vmatpush3.bf16.msra.mxu1 %v15883_v12  ;;  %v9728_v12 = vld [vmem:[%s16454_s5] sm:$0xff]  ;;  %s16290_s5 = scalar_lea.hbm %s14162_s9, %s11174_s1 }
0x156c   : > { %12134 = vmatprep.subr.bf16.mxu1 %v13961_v33 }
0x156f   : > { %12136 = vmatpush3.bf16.msra.mxu1 %v15889_v41 }
0x1570   : > { %12137 = vmatprep.subr.bf16.mxu1 %v13961_v33 }
0x1573   : > { %12139 = vmatpush3.bf16.msra.mxu1 %v15895_v8 }
0x1574   : > { %12140 = vmatprep.subr.bf16.mxu1 %v13961_v33 }
0x1577   : > { %12142 = vmatpush3.bf16.msra.mxu1 %v15901_v3 }
0x1578   : > { %11755 = vmatprep.subr.mxu1 %v13960_v61 }
0x157a   : > { %11753 = vmatmul.mubr.f32.vlgmr.msra.gmra.mrb[150].mxu1 %v9567_v23 }
0x157b   : > { %11757 = vmatprep.mubr.msk.f32.mxu1 %vm13962_vm2, %v13960_v61  ;;  %11756 = vmatpush3.msra.mxu1 %v9728_v12 }
0x157c   : > { %11760 = vmatprep.subr.mxu1 %v13960_v61 }
0x162d   : > { %v9650_v41 = vpop.f32.mrb[148].mxu1 }
0x162e   : > { %v11719_v25 = vpop.f32.mrb[149].mxu1  ;;  %11758 = vmatmul.mubr.msk.f32.vlgmr.msra.gmra.mrb[152].mxu1 %vm3307_vm4, %v9650_v41  ;;  %v9724_v8 = vmul.f32 %v9650_v41, %v9650_v41 }
0x162f   : > { %11761 = vmatpush3.msra.mxu1 %v9728_v12  ;;  %11762 = vmatprep.mubr.msk.f32.mxu1 %vm13962_vm2, %v13960_v61 }
0x1630   : > { %12143 = vmatprep.subr.bf16.mxu1 %v13961_v33 }
0x164d   : > { %v9720_v3 = vpop.f32.mrb[150].mxu1 }
0x164e   : > { %v9725_v13 = vsub.f32 %v9720_v3, %v9724_v8  ;;  %v11754_v6 = vpop.f32.mrb[151].mxu1 }
0x1650   : > { %v9726_v39 = vadd.f32 1e-05, %v9725_v13 }
0x1652   : > { %13379 = vrsqrt.f32 %v9726_v39 }
0x165c   : > { %v13380_v35 = vpop.eup %13379 }
0x165d   : > { %11763 = vmatmul.mubr.msk.f32.vlgmr.msra.gmra.mrb[154].mxu1 %vm3307_vm4, %v13380_v35 }
0x165e   : > { %10090 = vmatprep.mubr.f32.mxu1 %v13960_v61 }
0x1701   : > { %v9798_v55 = vpop.f32.mrb[152].mxu1 }
0x1702   : > { %v11759_v0 = vpop.f32.mrb[153].mxu1  ;;  %v16147_v60 = vrot.slane %v9798_v55, %v14729_v4 }
0x1704   : > { %v9880_v29 = vsub.f32 %v15957_v14, %v16147_v60  ;;  %v9881_v27 = vsub.f32 %v15966_v10, %v16147_v60  ;;  %v9882_v56 = vsub.f32 %v15975_v57, %v16147_v60  ;;  %v9883_v16 = vsub.f32 %v15984_v2, %v16147_v60 }
0x1705   : > { %v9884_v42 = vsub.f32 %v15993_v21, %v16147_v60  ;;  %v9885_v43 = vsub.f32 %v16002_v49, %v16147_v60  ;;  %v9886_v51 = vsub.f32 %v16011_v45, %v16147_v60  ;;  %v9887_v14 = vsub.f32 %v16020_v28, %v16147_v60 }
0x1706   : > { %v9888_v10 = vsub.f32 %v16029_v24, %v16147_v60  ;;  %v9889_v57 = vsub.f32 %v16035_v20, %v16147_v60  ;;  %v9890_v49 = vsub.f32 %v16042_v44, %v16147_v60  ;;  %v9891_v53 = vsub.f32 %v16047_v36, %v16147_v60 }
0x1707   : > { %v9892_v45 = vsub.f32 %v16054_v46, %v16147_v60  ;;  %v9893_v28 = vsub.f32 %v16059_v52, %v16147_v60  ;;  %v9894_v24 = vsub.f32 %v16072_v48, %v16147_v60  ;;  %v9896_v20 = vsub.f32 %v16092_v59, %v16147_v60 }
0x1730   : > { %v9871_v19 = vpop.f32.mrb[154].mxu1 }
0x1731   : > { %v16179_v2 = vrot.slane %v9871_v19, %v14729_v4  ;;  %v11764_v21 = vpop.f32.mrb[155].mxu1  ;;  %v9895_v4 = vsub.f32 %v16079_v15, %v16147_v60 }
0x1733   : > { %v9901_v44 = vmul.f32 %v16179_v2, %v9880_v29  ;;  %v9902_v32 = vmul.f32 %v16179_v2, %v9881_v27  ;;  %v9903_v36 = vmul.f32 %v16179_v2, %v9882_v56  ;;  %v9904_v34 = vmul.f32 %v16179_v2, %v9883_v16 }
0x1734   : > { %v9905_v37 = vmul.f32 %v16179_v2, %v9884_v42  ;;  %v9906_v1 = vmul.f32 %v16179_v2, %v9885_v43  ;;  %v9907_v31 = vmul.f32 %v16179_v2, %v9886_v51  ;;  %v9908_v9 = vmul.f32 %v16179_v2, %v9887_v14 }
0x1735   : > { %v9922_v40 = vmul.f32 %v16150_v7, %v9901_v44  ;;  %v9923_v54 = vmul.f32 %v16150_v7, %v9902_v32  ;;  %v9924_v47 = vmul.f32 %v16150_v7, %v9903_v36  ;;  %v9925_v62 = vmul.f32 %v16150_v7, %v9904_v34 }
0x1736   : > { %v9926_v5 = vmul.f32 %v16150_v7, %v9905_v37  ;;  %v9927_v11 = vmul.f32 %v16150_v7, %v9906_v1  ;;  %v9928_v26 = vmul.f32 %v16150_v7, %v9907_v31  ;;  %v9929_v58 = vmul.f32 %v16150_v7, %v9908_v9 }
0x1737   : > { %v9943_v30 = vadd.f32 %v16153_v17, %v9922_v40  ;;  %v9944_v50 = vadd.f32 %v16153_v17, %v9923_v54  ;;  %v9945_v18 = vadd.f32 %v16153_v17, %v9924_v47  ;;  %v9946_v23 = vadd.f32 %v16153_v17, %v9925_v62 }
0x1738   : > { %v9947_v12 = vadd.f32 %v16153_v17, %v9926_v5  ;;  %v9948_v41 = vadd.f32 %v16153_v17, %v9927_v11  ;;  %v9949_v25 = vadd.f32 %v16153_v17, %v9928_v26  ;;  %v9950_v8 = vadd.f32 %v16153_v17, %v9929_v58 }
0x1739   : > { %vm9960_vm2 = vcmp.gt.f32.partialorder %v9943_v30, 0.0  ;;  %vm9961_vm4 = vcmp.gt.f32.partialorder %v9944_v50, 0.0  ;;  %v9981_v3 = vmul.f32 %v16156_v63, %v9943_v30  ;;  %v9982_v13 = vmul.f32 %v16156_v63, %v9944_v50 }
0x173a   : > { %vm9962_vm13 = vcmp.gt.f32.partialorder %v9945_v18, 0.0  ;;  %vm9963_vm14 = vcmp.gt.f32.partialorder %v9946_v23, 0.0  ;;  %v9983_v6 = vmul.f32 %v16156_v63, %v9945_v18  ;;  %v9984_v39 = vmul.f32 %v16156_v63, %v9946_v23 }
0x173b   : > { %v9998_v35 = vsel %vm9960_vm2, %v9943_v30, %v9981_v3  ;;  %v9999_v55 = vsel %vm9961_vm4, %v9944_v50, %v9982_v13  ;;  %vm9964_vm15 = vcmp.gt.f32.partialorder %v9947_v12, 0.0  ;;  %vm9965_vm0 = vcmp.gt.f32.partialorder %v9948_v41, 0.0 }
0x173c   : > { %v12144_v38 = vpack.c.bf16 %v9999_v55, %v9998_v35  ;;  %v10000_v0 = vsel %vm9962_vm13, %v9945_v18, %v9983_v6  ;;  %v10001_v22 = vsel %vm9963_vm14, %v9946_v23, %v9984_v39  ;;  %v9985_v29 = vmul.f32 %v16156_v63, %v9947_v12 }
0x173d   : > { %v12147_v27 = vpack.c.bf16 %v10001_v22, %v10000_v0  ;;  %v9986_v56 = vmul.f32 %v16156_v63, %v9948_v41  ;;  %vm9966_vm1 = vcmp.gt.f32.partialorder %v9949_v25, 0.0  ;;  %vm9967_vm3 = vcmp.gt.f32.partialorder %v9950_v8, 0.0 }
0x173e   : > { %12145 = vmatpush1.bf16.xpose.msra.mxu1 %v12144_v38  ;;  %v10002_v16 = vsel %vm9964_vm15, %v9947_v12, %v9985_v29  ;;  %v9987_v42 = vmul.f32 %v16156_v63, %v9949_v25  ;;  %v9988_v43 = vmul.f32 %v16156_v63, %v9950_v8  ;;  %v9909_v19 = vmul.f32 %v16179_v2, %v9888_v10 }
0x173f   : > { %12146 = vmatprep.subr.bf16.mxu1 %v13961_v33  ;;  %v10003_v51 = vsel %vm9965_vm0, %v9948_v41, %v9986_v56  ;;  %v9910_v14 = vmul.f32 %v16179_v2, %v9889_v57  ;;  %v9911_v21 = vmul.f32 %v16179_v2, %v9890_v49  ;;  %v9912_v44 = vmul.f32 %v16179_v2, %v9891_v53 }
0x1740   : > { %v12150_v32 = vpack.c.bf16 %v10003_v51, %v10002_v16  ;;  %v10004_v36 = vsel %vm9966_vm1, %v9949_v25, %v9987_v42  ;;  %v10005_v34 = vsel %vm9967_vm3, %v9950_v8, %v9988_v43  ;;  %v9930_v37 = vmul.f32 %v16150_v7, %v9909_v19 }
0x1741   : > { %v12153_v1 = vpack.c.bf16 %v10005_v34, %v10004_v36  ;;  %v9931_v31 = vmul.f32 %v16150_v7, %v9910_v14  ;;  %v9932_v9 = vmul.f32 %v16150_v7, %v9911_v21  ;;  %v9933_v10 = vmul.f32 %v16150_v7, %v9912_v44 }
0x1742   : > { %v9951_v40 = vadd.f32 %v16153_v17, %v9930_v37  ;;  %v9913_v57 = vmul.f32 %v16179_v2, %v9892_v45  ;;  %v9914_v49 = vmul.f32 %v16179_v2, %v9893_v28  ;;  %v9915_v53 = vmul.f32 %v16179_v2, %v9894_v24 }
0x1743   : > { %v9952_v54 = vadd.f32 %v16153_v17, %v9931_v31  ;;  %v9953_v47 = vadd.f32 %v16153_v17, %v9932_v9  ;;  %v9954_v62 = vadd.f32 %v16153_v17, %v9933_v10  ;;  %v9916_v46 = vmul.f32 %v16179_v2, %v9895_v4 }
0x1744   : > { %vm9968_vm5 = vcmp.gt.f32.partialorder %v9951_v40, 0.0  ;;  %v9989_v52 = vmul.f32 %v16156_v63, %v9951_v40  ;;  %v9934_v45 = vmul.f32 %v16150_v7, %v9913_v57  ;;  %v9935_v48 = vmul.f32 %v16150_v7, %v9914_v49 }
0x1745   : > { %vm9969_vm6 = vcmp.gt.f32.partialorder %v9952_v54, 0.0  ;;  %v9990_v28 = vmul.f32 %v16156_v63, %v9952_v54  ;;  %vm9970_vm7 = vcmp.gt.f32.partialorder %v9953_v47, 0.0  ;;  %vm9971_vm8 = vcmp.gt.f32.partialorder %v9954_v62, 0.0 }
0x1746   : > { %12148 = vmatpush1.bf16.xpose.msra.mxu1 %v12147_v27  ;;  %v10006_v24 = vsel %vm9968_vm5, %v9951_v40, %v9989_v52  ;;  %v9991_v5 = vmul.f32 %v16156_v63, %v9953_v47  ;;  %v9992_v15 = vmul.f32 %v16156_v63, %v9954_v62  ;;  %v9955_v4 = vadd.f32 %v16153_v17, %v9934_v45 }
0x1747   : > { %12149 = vmatprep.subr.bf16.mxu1 %v13961_v33  ;;  %v10007_v11 = vsel %vm9969_vm6, %v9952_v54, %v9990_v28  ;;  %v9956_v26 = vadd.f32 %v16153_v17, %v9935_v48  ;;  %v9936_v58 = vmul.f32 %v16150_v7, %v9915_v53  ;;  %v9937_v30 = vmul.f32 %v16150_v7, %v9916_v46 }
0x1748   : > { %v12156_v50 = vpack.c.bf16 %v10007_v11, %v10006_v24  ;;  %v10008_v18 = vsel %vm9970_vm7, %v9953_v47, %v9991_v5  ;;  %v10009_v23 = vsel %vm9971_vm8, %v9954_v62, %v9992_v15  ;;  %vm9972_vm9 = vcmp.gt.f32.partialorder %v9955_v4, 0.0 }
0x1749   : > { %v12159_v12 = vpack.c.bf16 %v10009_v23, %v10008_v18  ;;  %vm9973_vm11 = vcmp.gt.f32.partialorder %v9956_v26, 0.0  ;;  %v9993_v41 = vmul.f32 %v16156_v63, %v9955_v4  ;;  %v9994_v25 = vmul.f32 %v16156_v63, %v9956_v26 }
0x174a   : > { %v9957_v8 = vadd.f32 %v16153_v17, %v9936_v58  ;;  %v9958_v3 = vadd.f32 %v16153_v17, %v9937_v30  ;;  %v9917_v13 = vmul.f32 %v16179_v2, %v9896_v20  ;;  %vm10110_vm4 = vcmask 7168  }
0x174b   : > { %v10010_v6 = vsel %vm9972_vm9, %v9955_v4, %v9993_v41  ;;  %v10011_v39 = vsel %vm9973_vm11, %v9956_v26, %v9994_v25 }
0x174c   : > { %v12162_v35 = vpack.c.bf16 %v10011_v39, %v10010_v6  ;;  %vm9974_vm12 = vcmp.gt.f32.partialorder %v9957_v8, 0.0  ;;  %vm9975_vm10 = vcmp.gt.f32.partialorder %v9958_v3, 0.0  ;;  %v9995_v55 = vmul.f32 %v16156_v63, %v9957_v8 }
0x174d   : > { %v9996_v38 = vmul.f32 %v16156_v63, %v9958_v3  ;;  %v9938_v0 = vmul.f32 %v16150_v7, %v9917_v13  ;;  %v10015_v7 = vld [vmem:[%s14154_s29] sm:$0xff] }
0x174e   : > { %12151 = vmatpush1.bf16.xpose.msra.mxu1 %v12150_v32  ;;  %v10012_v22 = vsel %vm9974_vm12, %v9957_v8, %v9995_v55 }
0x174f   : > { %12152 = vmatprep.subr.bf16.mxu1 %v13961_v33  ;;  %v10013_v29 = vsel %vm9975_vm10, %v9958_v3, %v9996_v38  ;;  %v9959_v59 = vadd.f32 %v16153_v17, %v9938_v0  ;;  %v10024_v17 = vpop.permute.xlu0 %10023 }
0x1750   : > { %v12165_v60 = vpack.c.bf16 %v10013_v29, %v10012_v22 }
0x1751   : > { %vm9976_vm2 = vcmp.gt.f32.partialorder %v9959_v59, 0.0  ;;  %v9997_v2 = vmul.f32 %v16156_v63, %v9959_v59 }
0x1753   : > { %v10014_v20 = vsel %vm9976_vm2, %v9959_v59, %v9997_v2 }
0x1756   : > { %12154 = vmatpush1.bf16.xpose.msra.mxu1 %v12153_v1 }
0x1757   : > { %12155 = vmatprep.subr.bf16.mxu1 %v13961_v33 }
0x175e   : > { %12157 = vmatpush1.bf16.xpose.msra.mxu1 %v12156_v50 }
0x175f   : > { %12158 = vmatprep.subr.bf16.mxu1 %v13961_v33 }
0x1766   : > { %12160 = vmatpush1.bf16.xpose.msra.mxu1 %v12159_v12 }
0x1767   : > { %12161 = vmatprep.subr.bf16.mxu1 %v13961_v33 }
0x176e   : > { %12163 = vmatpush1.bf16.xpose.msra.mxu1 %v12162_v35 }
0x176f   : > { %12164 = vmatprep.subr.bf16.mxu1 %v13961_v33 }
0x1776   : > { %12166 = vmatpush1.bf16.xpose.msra.mxu1 %v12165_v60 }
0x1777   : > { %10058 = vmatprep.subr.mxu1 %v13960_v61 }
0x177e   : > { %10059 = vmatpush1.xpose.msra.mxu1 %v10014_v20 }
0x1781   : > { %10091 = vmatmul.mubr.f32.vlgmr.msra.gmra.mrb[156].mxu1 %v10015_v7 }
0x1854   : > { %v10092_v63 = vpop.f32.mrb[156].mxu1 }
0x1855   : > { %v10093_v27 = vadd.f32 %v10092_v63, %v10024_v17  ;;  %v10094_v56 = vpop.f32.mrb[157].mxu1 }
0x1856   : > { %v10095_v16 = vadd.f32 %v10094_v56, %v10024_v17 }
0x1857   : > { %v10097_v42 = vsub.f32 0.0, %v10093_v27 }
0x1858   : > { %v10098_v43 = vsub.f32 0.0, %v10095_v16 }
0x1859   : > { %v10099_v19 = vmul.f32 1.442695, %v10097_v42 }
0x185a   : > { %v10101_v51 = vmul.f32 1.442695, %v10098_v43 }
0x185b   : > { %13381 = vpow2.f32 %v10099_v19 }
0x185c   : > { %13383 = vpow2.f32 %v10101_v51 }
0x1865   : > { %v13382_v33 = vpop.eup %13381 }
0x1866   : > { %v13384_v14 = vpop.eup %13383  ;;  %v10103_v61 = vadd.f32 1.0, %v13382_v33 }
0x1867   : > { %v10104_v21 = vadd.f32 1.0, %v13384_v14 }
0x1868   : > { %13385 = vrcp.f32 %v10103_v61 }
0x1869   : > { %13387 = vrcp.f32 %v10104_v21 }
0x1872   : > { %v13386_v44 = vpop.eup %13385 }
0x1873   : > { %v13388_v32 = vpop.eup %13387  ;;  %10109 = vst [vmem:[%s1416_s3] sm:$0xff] %v13386_v44 }
0x1874   : > { %10111 = vst.msk [vmem:[%s1416_s3 + $0x8] sm:$0xff] %vm10110_vm4, %v13388_v32 }
0x1875   : > { %13822 = shalt.err (!%p13819_p7)
}
0x1876   : > { %s13823_s1 = scalar_lea.hbm %s16290_s5, 256  ;;  %s13827_s3 = scalar_lea.hbm %s14162_s9, 512 }
0x1877   : > { %p13824_p8 = scmp.ne.s32.totalorder %s16290_s5, %s13823_s1  ;;  %p13828_p1 = scmp.lt.u32.totalorder %s16290_s5, %s14162_s9 }
0x1878   : > { %p13829_p2 = scmp.lt.u32.totalorder %s13827_s3, %s13823_s1  ;;  %p13831_p3 = scmp.lt.u32.totalorder %s13823_s1, %s16290_s5 }
0x1879   : > { %p13825_p11 = pnand %p13824_p8, %p16455_p4 }
0x187a   : > { %p13830_p0 = por %p13829_p2, %p13828_p1 }
0x187b   : > { %p13826_p13 = pneg %p13825_p11 }
0x187c   : > { %p13832_p12 = por %p13831_p3, %p13830_p0 }
0x187e   : > { %p13833_p5 = pnand %p13832_p12, %p13826_p13 }
0x1880   : > { %13836 = shalt.err (!%p13833_p5)
}
0x1881   : > { %12443 = dma.vmem_to_hbm [thread:$0]  (%p16455_p4), %s16292_s4, 256, %s16290_s5, %s10113_s6  }
0x1882 PF: > { %s16456_s8 = sld [smem:[#allocation69_spill]]  ;;  %p12525_p6 = scmp.ge.s32.totalorder %s13903_s0, 2 }
0x1883   : > { %s10139_s7 = sand.u32 1, %s13891_s15  }
0x1884   : > { %s10140_s11 = scalar_lea.sflag [#allocation5], %s10139_s7 }
0x1888   : > { %p16457_p9 = scmp.ne.s32.totalorder %s16456_s8, 0 }
0x188a   : > { %p12492_p10 = pnand %p12525_p6, %p16457_p9 }
0x188c   : > { %13886 = dma.done.wait (!%p12492_p10), %s10140_s11, 256  }
0x188d   : > { %13888 = vsyncadd (!%p12492_p10), %s10140_s11, 4294967040  ;;  %s16458_s0 = sld [smem:[#allocation67_spill]]  ;;  %s16459_s19 = sld [smem:[#allocation66_spill]] }
0x188e   : > { %s16460_s18 = sld [smem:[#allocation68_spill]]  ;;  %s16461_s15 = smov %s13895_s16 }
0x1893   : > { %p97_p7 = scmp.ge.s32.totalorder %s16458_s0, 4   ;;  %s16462_s16 = smov %s16459_s19 }
0x1895   :  { %99 = sbr.rel (!%p97_p7) target bundleno = 86 (0x56), region = 333 }
0x189c   :  { %10145 = vsyncpa [#allocation4], 1 }
0x189d   :  { %10147 = vsyncpa [#allocation4 + $0x1], 1 }
0x189e   :  { %10148 = vsyncpa [#allocation7], 1 }
0x189f   :  { %10149 = vsyncpa [#allocation10], 1 }
0x18a0   :  { %10150 = vsyncpa [#allocation13], 1 }
0x18a1   :  { %10151 = vsyncpa [#allocation16], 1 }
0x18a2   :  { %10152 = vsyncpa [#allocation19], 1 }
0x18a3   :  { %10153 = vsyncpa [#allocation22], 1 }
0x18a4   :  { %10154 = vsyncpa [#allocation25], 1 }
0x18a5   :  { %10155 = vsyncpa [#allocation5], 1 }
0x18a6   :  { %10157 = vsyncpa [#allocation5 + $0x1], 1 }

</bundles_post_ra>
